<compile_context>
chip_gen: v6e
topology: v6e:2x2x1
jax: 0.10.0
libtpu: 0.0.40
codegen_flags: <defaults>
</compile_context>

<pallas_src>
import functools

import jax
import jax.numpy as jnp
from jax import lax
from jax.experimental import pallas as pl
from jax.experimental.pallas import tpu as pltpu

_LANE = 128      # vreg lane width
_SUBLANE = 8     # vreg sublane count (f32)


def _round_up(x, m):
    return (x + m - 1) // m * m


def _pad2(a, shape):
    return jnp.pad(a, [(0, s - d) for d, s in zip(a.shape, shape)])


# --------------------------- fused kernel factory ----------------------------
def _make_fused_kernel(num_layers, seq_len):
    """Builds a kernel with arg order:
       x, (10 refs per layer) * num_layers, fc_w, fc_b, out,
       act_scratch, gi_r_scratch, gi_z_scratch, gi_n_scratch
    """
    T = seq_len
    n_w = 10 * num_layers

    def kernel(*args):
        x_ref = args[0]
        w_refs = args[1:1 + n_w]
        fcw_ref = args[1 + n_w]
        fcb_ref = args[2 + n_w]
        out_ref = args[3 + n_w]
        act_s, gir_s, giz_s, gin_s = args[4 + n_w:8 + n_w]

        bt, hp = act_s.shape[1], act_s.shape[2]
        h_last = jnp.zeros((bt, hp), jnp.float32)

        for layer in range(num_layers):
            (wir, wiz, win, whr, whz, whn,
             b_r, b_z, b_in, b_hn) = w_refs[10 * layer:10 * (layer + 1)]

            # ---- Phase 1: hoisted input->hidden matmuls for ALL timesteps.
            # One (T*bt, Din) x (Din, Hp) MXU matmul per gate instead of T tiny
            # per-step matmuls.  Gate-major slabs => no sub-vreg gate slicing.
            xin = x_ref[...] if layer == 0 else act_s[...]
            din = xin.shape[-1]
            x2d = xin.reshape(T * bt, din)
            gir_s[...] = (jnp.dot(x2d, wir[...],
                                  preferred_element_type=jnp.float32)
                          + b_r[...]).reshape(T, bt, hp)
            giz_s[...] = (jnp.dot(x2d, wiz[...],
                                  preferred_element_type=jnp.float32)
                          + b_z[...]).reshape(T, bt, hp)
            gin_s[...] = (jnp.dot(x2d, win[...],
                                  preferred_element_type=jnp.float32)
                          + b_in[...]).reshape(T, bt, hp)

            bhn_v = b_hn[...]
            is_last_layer = layer == num_layers - 1

            # ---- Phase 2: sequential recurrence. Only the h-dependent matmuls
            # remain; h is carried in vregs (no per-step grid overhead, no h
            # VMEM round-trip).  sigmoid/tanh run on the EUP slot and overlap
            # the next step's MXU pushes once unrolled.
            def step(t, h):
                gh_r = jnp.dot(h, whr[...], preferred_element_type=jnp.float32)
                gh_z = jnp.dot(h, whz[...], preferred_element_type=jnp.float32)
                gh_n = jnp.dot(h, whn[...], preferred_element_type=jnp.float32)
                r = jax.nn.sigmoid(gir_s[t] + gh_r)
                z = jax.nn.sigmoid(giz_s[t] + gh_z)
                n = jnp.tanh(gin_s[t] + r * (gh_n + bhn_v))
                h_new = (1.0 - z) * n + z * h
                if not is_last_layer:
                    act_s[t] = h_new        # feed the next layer (stays in VMEM)
                return h_new

            h_last = lax.fori_loop(0, T, step,
                                   jnp.zeros((bt, hp), jnp.float32),
                                   unroll=True)

        # ---- Final Linear on the last timestep of the last layer (fused).
        out_ref[...] = (jnp.dot(h_last, fcw_ref[...],
                                preferred_element_type=jnp.float32)
                        + fcb_ref[...])

    return kernel


# ------------------------- parameter re-layout (host) ------------------------
def prepare_kernel_params(params):
    """PyTorch-style interleaved params -> padded, gate-major slabs.

    Per layer returns:
      w_ih_r/z/n: (Dp, Hp), w_hh_r/z/n: (Hp, Hp),
      b_r = b_ir+b_hr, b_z = b_iz+b_hz : (1, Hp),
      b_in, b_hn (kept separate: b_hn sits inside r*(W_hn h + b_hn)) : (1, Hp)
    Zero padding keeps padded hidden positions exactly zero through the
    recurrence, so results are unchanged after slicing.
    """
    H = params["layers"][0][1].shape[0]
    Hp = _round_up(H, _LANE)
    layers_k = []
    for (w_ih_t, w_hh_t, b_ih, b_hh) in params["layers"]:
        din = w_ih_t.shape[0]
        dp = _round_up(din, _LANE)
        wir, wiz, win = (w_ih_t[:, 0:H], w_ih_t[:, H:2 * H], w_ih_t[:, 2 * H:])
        whr, whz, whn = (w_hh_t[:, 0:H], w_hh_t[:, H:2 * H], w_hh_t[:, 2 * H:])
        bir, biz, bin_ = (b_ih[:, 0:H], b_ih[:, H:2 * H], b_ih[:, 2 * H:])
        bhr, bhz, bhn = (b_hh[:, 0:H], b_hh[:, H:2 * H], b_hh[:, 2 * H:])
        layers_k.append((
            _pad2(wir, (dp, Hp)), _pad2(wiz, (dp, Hp)), _pad2(win, (dp, Hp)),
            _pad2(whr, (Hp, Hp)), _pad2(whz, (Hp, Hp)), _pad2(whn, (Hp, Hp)),
            _pad2(bir + bhr, (1, Hp)),
            _pad2(biz + bhz, (1, Hp)),
            _pad2(bin_, (1, Hp)),
            _pad2(bhn, (1, Hp)),
        ))
    C = params["fc_w_t"].shape[1]
    Cp = _round_up(C, _LANE)
    fc_w = _pad2(params["fc_w_t"], (Hp, Cp))
    fc_b = _pad2(params["fc_b"], (1, Cp))
    return layers_k, fc_w, fc_b, Hp, Cp


# ------------------------------ full forward ---------------------------------
def gru_model_forward(x_btd, params):
    """Equivalent of GRU.forward: all GRU layers + Linear on the last step."""
    B, T, Din = x_btd.shape
    C = params["fc_w_t"].shape[1]
    layers_k, fc_w, fc_b, Hp, Cp = prepare_kernel_params(params)
    num_layers = len(layers_k)

    Bp = _round_up(B, _SUBLANE)
    Dp = _round_up(Din, _LANE)
    bt = _SUBLANE                 # batch tile = one sublane group per grid step
    nb = Bp // bt

    # time-major, padded so every tile is (8, 128)-dense.
    x_p = jnp.pad(jnp.transpose(x_btd, (1, 0, 2)),
                  ((0, 0), (0, Bp - B), (0, Dp - Din)))

    flat_w = [w for layer in layers_k for w in layer]

    in_specs = [pl.BlockSpec((T, bt, Dp), lambda b: (0, b, 0))]
    # Weights/biases are loop-invariant: constant index_map => DMA'd once,
    # never re-fetched per grid step.  (At production sizes, cast these to
    # bf16 to halve VMEM/DMA and feed the v6e/v7x MXU at full rate.)
    for w in flat_w + [fc_w, fc_b]:
        in_specs.append(pl.BlockSpec(w.shape, lambda b: (0, 0)))

    kernel = _make_fused_kernel(num_layers, T)

    out_p = pl.pallas_call(
        kernel,
        out_shape=jax.ShapeDtypeStruct((Bp, Cp), jnp.float32),
        grid_spec=pltpu.PrefetchScalarGridSpec(
            num_scalar_prefetch=0,
            grid=(nb,),
            in_specs=in_specs,
            out_specs=pl.BlockSpec((bt, Cp), lambda b: (b, 0)),
            scratch_shapes=[
                pltpu.VMEM((T, bt, Hp), jnp.float32),   # inter-layer activations
                pltpu.VMEM((T, bt, Hp), jnp.float32),   # gi_r (all timesteps)
                pltpu.VMEM((T, bt, Hp), jnp.float32),   # gi_z
                pltpu.VMEM((T, bt, Hp), jnp.float32),   # gi_n
            ]),
        compiler_params=pltpu.CompilerParams(
            # batch tiles are independent -> split across the 2 TCs on v7x.
            dimension_semantics=("parallel",)),
    )(x_p, *flat_w, fc_w, fc_b)
    return out_p[:B, :C]


# ------------------------ pure-JAX reference (check) -------------------------
def gru_reference(x_btd, params):
    x = jnp.transpose(x_btd, (1, 0, 2))
    for (w_ih_t, w_hh_t, b_ih, b_hh) in params["layers"]:
        T, B, _ = x.shape
        H = w_hh_t.shape[0]
        h = jnp.zeros((B, H), jnp.float32)
        outs = []
        for t in range(T):
            gi = x[t] @ w_ih_t + b_ih
            gh = h @ w_hh_t + b_hh
            r = jax.nn.sigmoid(gi[:, :H] + gh[:, :H])
            z = jax.nn.sigmoid(gi[:, H:2 * H] + gh[:, H:2 * H])
            n = jnp.tanh(gi[:, 2 * H:] + r * gh[:, 2 * H:])
            h = (1.0 - z) * n + z * h
            outs.append(h)
        x = jnp.stack(outs, axis=0)
    return x[-1] @ params["fc_w_t"] + params["fc_b"]


# -------------------------------- param init ---------------------------------
def init_params(key, input_size, hidden_size, num_layers, num_classes):
    k = 1.0 / jnp.sqrt(hidden_size)
    layers = []
    for layer in range(num_layers):
        din = input_size if layer == 0 else hidden_size
        key, k1, k2, k3, k4 = jax.random.split(key, 5)
        w_ih_t = jax.random.uniform(k1, (din, 3 * hidden_size), jnp.float32, -k, k)
        w_hh_t = jax.random.uniform(k2, (hidden_size, 3 * hidden_size), jnp.float32, -k, k)
        b_ih = jax.random.uniform(k3, (1, 3 * hidden_size), jnp.float32, -k, k)
        b_hh = jax.random.uniform(k4, (1, 3 * hidden_size), jnp.float32, -k, k)
        layers.append((w_ih_t, w_hh_t, b_ih, b_hh))
    key, k5, k6 = jax.random.split(key, 3)
    fc_w_t = jax.random.uniform(k5, (hidden_size, num_classes), jnp.float32, -k, k)
    fc_b = jax.random.uniform(k6, (1, num_classes), jnp.float32, -k, k)
    return {"layers": layers, "fc_w_t": fc_w_t, "fc_b": fc_b}


# ----------------------------------- main ------------------------------------
if __name__ == "__main__":
    batch, seq, input_size = 4, 8, 16
    hidden_size, num_layers, num_classes = 32, 2, 10

    key = jax.random.PRNGKey(0)
    key, kx = jax.random.split(key)
    x = jax.random.normal(kx, (batch, seq, input_size), jnp.float32)

    params = init_params(key, input_size, hidden_size, num_layers, num_classes)

    out = jax.jit(functools.partial(gru_model_forward, params=params))(x)
    out = jax.block_until_ready(out)

    ref = gru_reference(x, params)
    assert out.shape == (batch, num_classes)
    assert jnp.allclose(out, ref, atol=1e-4, rtol=1e-4), "mismatch vs reference"

    print("KERNEL_OK")
</pallas_src>

<mosaic_0001>
module attributes {stable_mosaic.version = 11 : i64} {
  func.func @kernel(%arg0: i32, %arg1: memref<8x8x128xf32, #tpu.memory_space<vmem>>, %arg2: memref<128x128xf32, #tpu.memory_space<vmem>>, %arg3: memref<128x128xf32, #tpu.memory_space<vmem>>, %arg4: memref<128x128xf32, #tpu.memory_space<vmem>>, %arg5: memref<128x128xf32, #tpu.memory_space<vmem>>, %arg6: memref<128x128xf32, #tpu.memory_space<vmem>>, %arg7: memref<128x128xf32, #tpu.memory_space<vmem>>, %arg8: memref<1x128xf32, #tpu.memory_space<vmem>>, %arg9: memref<1x128xf32, #tpu.memory_space<vmem>>, %arg10: memref<1x128xf32, #tpu.memory_space<vmem>>, %arg11: memref<1x128xf32, #tpu.memory_space<vmem>>, %arg12: memref<128x128xf32, #tpu.memory_space<vmem>>, %arg13: memref<128x128xf32, #tpu.memory_space<vmem>>, %arg14: memref<128x128xf32, #tpu.memory_space<vmem>>, %arg15: memref<128x128xf32, #tpu.memory_space<vmem>>, %arg16: memref<128x128xf32, #tpu.memory_space<vmem>>, %arg17: memref<128x128xf32, #tpu.memory_space<vmem>>, %arg18: memref<1x128xf32, #tpu.memory_space<vmem>>, %arg19: memref<1x128xf32, #tpu.memory_space<vmem>>, %arg20: memref<1x128xf32, #tpu.memory_space<vmem>>, %arg21: memref<1x128xf32, #tpu.memory_space<vmem>>, %arg22: memref<128x128xf32, #tpu.memory_space<vmem>>, %arg23: memref<1x128xf32, #tpu.memory_space<vmem>>, %arg24: memref<8x128xf32, #tpu.memory_space<vmem>>, %arg25: memref<8x8x128xf32, #tpu.memory_space<vmem>>, %arg26: memref<8x8x128xf32, #tpu.memory_space<vmem>>, %arg27: memref<8x8x128xf32, #tpu.memory_space<vmem>>, %arg28: memref<8x8x128xf32, #tpu.memory_space<vmem>>) attributes {dimension_semantics = [#tpu.dimension_semantics<parallel>], iteration_bounds = array<i64: 1>, scalar_prefetch = 0 : i64, scratch_operands = 4 : i64, tpu.core_type = #tpu.core_type<tc>, window_params = [{transform_indices = @transform_0, window_bounds = array<i64: 8, 8, 128>}, {pipeline_mode = #tpu.pipeline_mode<synchronous>, transform_indices = @transform_1, window_bounds = array<i64: 128, 128>}, {pipeline_mode = #tpu.pipeline_mode<synchronous>, transform_indices = @transform_2, window_bounds = array<i64: 128, 128>}, {pipeline_mode = #tpu.pipeline_mode<synchronous>, transform_indices = @transform_3, window_bounds = array<i64: 128, 128>}, {pipeline_mode = #tpu.pipeline_mode<synchronous>, transform_indices = @transform_4, window_bounds = array<i64: 128, 128>}, {pipeline_mode = #tpu.pipeline_mode<synchronous>, transform_indices = @transform_5, window_bounds = array<i64: 128, 128>}, {pipeline_mode = #tpu.pipeline_mode<synchronous>, transform_indices = @transform_6, window_bounds = array<i64: 128, 128>}, {pipeline_mode = #tpu.pipeline_mode<synchronous>, transform_indices = @transform_7, window_bounds = array<i64: 1, 128>}, {pipeline_mode = #tpu.pipeline_mode<synchronous>, transform_indices = @transform_8, window_bounds = array<i64: 1, 128>}, {pipeline_mode = #tpu.pipeline_mode<synchronous>, transform_indices = @transform_9, window_bounds = array<i64: 1, 128>}, {pipeline_mode = #tpu.pipeline_mode<synchronous>, transform_indices = @transform_10, window_bounds = array<i64: 1, 128>}, {pipeline_mode = #tpu.pipeline_mode<synchronous>, transform_indices = @transform_11, window_bounds = array<i64: 128, 128>}, {pipeline_mode = #tpu.pipeline_mode<synchronous>, transform_indices = @transform_12, window_bounds = array<i64: 128, 128>}, {pipeline_mode = #tpu.pipeline_mode<synchronous>, transform_indices = @transform_13, window_bounds = array<i64: 128, 128>}, {pipeline_mode = #tpu.pipeline_mode<synchronous>, transform_indices = @transform_14, window_bounds = array<i64: 128, 128>}, {pipeline_mode = #tpu.pipeline_mode<synchronous>, transform_indices = @transform_15, window_bounds = array<i64: 128, 128>}, {pipeline_mode = #tpu.pipeline_mode<synchronous>, transform_indices = @transform_16, window_bounds = array<i64: 128, 128>}, {pipeline_mode = #tpu.pipeline_mode<synchronous>, transform_indices = @transform_17, window_bounds = array<i64: 1, 128>}, {pipeline_mode = #tpu.pipeline_mode<synchronous>, transform_indices = @transform_18, window_bounds = array<i64: 1, 128>}, {pipeline_mode = #tpu.pipeline_mode<synchronous>, transform_indices = @transform_19, window_bounds = array<i64: 1, 128>}, {pipeline_mode = #tpu.pipeline_mode<synchronous>, transform_indices = @transform_20, window_bounds = array<i64: 1, 128>}, {pipeline_mode = #tpu.pipeline_mode<synchronous>, transform_indices = @transform_21, window_bounds = array<i64: 128, 128>}, {pipeline_mode = #tpu.pipeline_mode<synchronous>, transform_indices = @transform_22, window_bounds = array<i64: 1, 128>}, {transform_indices = @transform_23, window_bounds = array<i64: 8, 128>}]} {
    %c0 = arith.constant 0 : index
    %c0_0 = arith.constant 0 : index
    %c0_1 = arith.constant 0 : index
    %0 = vector.load %arg1[%c0, %c0_0, %c0_1] : memref<8x8x128xf32, #tpu.memory_space<vmem>>, vector<8x8x128xf32>
    %1 = vector.shape_cast %0 : vector<8x8x128xf32> to vector<64x128xf32>
    %c0_2 = arith.constant 0 : index
    %c0_3 = arith.constant 0 : index
    %2 = vector.load %arg2[%c0_2, %c0_3] : memref<128x128xf32, #tpu.memory_space<vmem>>, vector<128x128xf32>
    %cst = arith.constant dense<0.000000e+00> : vector<64x128xf32>
    %3 = tpu.matmul %1, %2, %cst {dimension_numbers = #tpu.dot_dimension_numbers<[1], [0], [0], [1], [0, 0, 1, 1], [], []>} : vector<64x128xf32>, vector<128x128xf32>, vector<64x128xf32> -> vector<64x128xf32>
    %c0_4 = arith.constant 0 : index
    %c0_5 = arith.constant 0 : index
    %4 = vector.load %arg8[%c0_4, %c0_5] : memref<1x128xf32, #tpu.memory_space<vmem>>, vector<1x128xf32>
    %5 = vector.broadcast %4 : vector<1x128xf32> to vector<64x128xf32>
    %6 = arith.addf %3, %5 : vector<64x128xf32>
    %7 = vector.shape_cast %6 : vector<64x128xf32> to vector<8x8x128xf32>
    %c0_6 = arith.constant 0 : index
    %c0_7 = arith.constant 0 : index
    %c0_8 = arith.constant 0 : index
    %8 = vector.load %arg26[%c0_6, %c0_7, %c0_8] : memref<8x8x128xf32, #tpu.memory_space<vmem>>, vector<8x8x128xf32>
    tpu.vector_store %arg26[%c0_6, %c0_7, %c0_8], %7 {strides = array<i32>} : memref<8x8x128xf32, #tpu.memory_space<vmem>>, vector<8x8x128xf32>,
    %c0_9 = arith.constant 0 : index
    %c0_10 = arith.constant 0 : index
    %9 = vector.load %arg3[%c0_9, %c0_10] : memref<128x128xf32, #tpu.memory_space<vmem>>, vector<128x128xf32>
    %cst_11 = arith.constant dense<0.000000e+00> : vector<64x128xf32>
    %10 = tpu.matmul %1, %9, %cst_11 {dimension_numbers = #tpu.dot_dimension_numbers<[1], [0], [0], [1], [0, 0, 1, 1], [], []>} : vector<64x128xf32>, vector<128x128xf32>, vector<64x128xf32> -> vector<64x128xf32>
    %c0_12 = arith.constant 0 : index
    %c0_13 = arith.constant 0 : index
    %11 = vector.load %arg9[%c0_12, %c0_13] : memref<1x128xf32, #tpu.memory_space<vmem>>, vector<1x128xf32>
    %12 = vector.broadcast %11 : vector<1x128xf32> to vector<64x128xf32>
    %13 = arith.addf %10, %12 : vector<64x128xf32>
    %14 = vector.shape_cast %13 : vector<64x128xf32> to vector<8x8x128xf32>
    %c0_14 = arith.constant 0 : index
    %c0_15 = arith.constant 0 : index
    %c0_16 = arith.constant 0 : index
    %15 = vector.load %arg27[%c0_14, %c0_15, %c0_16] : memref<8x8x128xf32, #tpu.memory_space<vmem>>, vector<8x8x128xf32>
    tpu.vector_store %arg27[%c0_14, %c0_15, %c0_16], %14 {strides = array<i32>} : memref<8x8x128xf32, #tpu.memory_space<vmem>>, vector<8x8x128xf32>,
    %c0_17 = arith.constant 0 : index
    %c0_18 = arith.constant 0 : index
    %16 = vector.load %arg4[%c0_17, %c0_18] : memref<128x128xf32, #tpu.memory_space<vmem>>, vector<128x128xf32>
    %cst_19 = arith.constant dense<0.000000e+00> : vector<64x128xf32>
    %17 = tpu.matmul %1, %16, %cst_19 {dimension_numbers = #tpu.dot_dimension_numbers<[1], [0], [0], [1], [0, 0, 1, 1], [], []>} : vector<64x128xf32>, vector<128x128xf32>, vector<64x128xf32> -> vector<64x128xf32>
    %c0_20 = arith.constant 0 : index
    %c0_21 = arith.constant 0 : index
    %18 = vector.load %arg10[%c0_20, %c0_21] : memref<1x128xf32, #tpu.memory_space<vmem>>, vector<1x128xf32>
    %19 = vector.broadcast %18 : vector<1x128xf32> to vector<64x128xf32>
    %20 = arith.addf %17, %19 : vector<64x128xf32>
    %21 = vector.shape_cast %20 : vector<64x128xf32> to vector<8x8x128xf32>
    %c0_22 = arith.constant 0 : index
    %c0_23 = arith.constant 0 : index
    %c0_24 = arith.constant 0 : index
    %22 = vector.load %arg28[%c0_22, %c0_23, %c0_24] : memref<8x8x128xf32, #tpu.memory_space<vmem>>, vector<8x8x128xf32>
    tpu.vector_store %arg28[%c0_22, %c0_23, %c0_24], %21 {strides = array<i32>} : memref<8x8x128xf32, #tpu.memory_space<vmem>>, vector<8x8x128xf32>,
    %c0_25 = arith.constant 0 : index
    %c0_26 = arith.constant 0 : index
    %23 = vector.load %arg11[%c0_25, %c0_26] : memref<1x128xf32, #tpu.memory_space<vmem>>, vector<1x128xf32>
    %cst_27 = arith.constant 0.000000e+00 : f32
    %24 = vector.broadcast %cst_27 : f32 to vector<8x128xf32>
    %c0_i32 = arith.constant 0 : i32
    %c0_28 = arith.constant 0 : index
    %c0_29 = arith.constant 0 : index
    %25 = vector.load %arg5[%c0_28, %c0_29] : memref<128x128xf32, #tpu.memory_space<vmem>>, vector<128x128xf32>
    %cst_30 = arith.constant dense<0.000000e+00> : vector<8x128xf32>
    %26 = tpu.matmul %24, %25, %cst_30 {dimension_numbers = #tpu.dot_dimension_numbers<[1], [0], [0], [1], [0, 0, 1, 1], [], []>} : vector<8x128xf32>, vector<128x128xf32>, vector<8x128xf32> -> vector<8x128xf32>
    %c0_31 = arith.constant 0 : index
    %c0_32 = arith.constant 0 : index
    %27 = vector.load %arg6[%c0_31, %c0_32] : memref<128x128xf32, #tpu.memory_space<vmem>>, vector<128x128xf32>
    %cst_33 = arith.constant dense<0.000000e+00> : vector<8x128xf32>
    %28 = tpu.matmul %24, %27, %cst_33 {dimension_numbers = #tpu.dot_dimension_numbers<[1], [0], [0], [1], [0, 0, 1, 1], [], []>} : vector<8x128xf32>, vector<128x128xf32>, vector<8x128xf32> -> vector<8x128xf32>
    %c0_34 = arith.constant 0 : index
    %c0_35 = arith.constant 0 : index
    %29 = vector.load %arg7[%c0_34, %c0_35] : memref<128x128xf32, #tpu.memory_space<vmem>>, vector<128x128xf32>
    %cst_36 = arith.constant dense<0.000000e+00> : vector<8x128xf32>
    %30 = tpu.matmul %24, %29, %cst_36 {dimension_numbers = #tpu.dot_dimension_numbers<[1], [0], [0], [1], [0, 0, 1, 1], [], []>} : vector<8x128xf32>, vector<128x128xf32>, vector<8x128xf32> -> vector<8x128xf32>
    %31 = arith.index_cast %c0_i32 : i32 to index
    %c0_37 = arith.constant 0 : index
    %c0_38 = arith.constant 0 : index
    %32 = vector.load %arg26[%31, %c0_37, %c0_38] : memref<8x8x128xf32, #tpu.memory_space<vmem>>, vector<1x8x128xf32>
    %33 = vector.shape_cast %32 : vector<1x8x128xf32> to vector<8x128xf32>
    %34 = arith.addf %33, %26 : vector<8x128xf32>
    %35 = arith.negf %34 : vector<8x128xf32>
    %36 = math.exp %35 : vector<8x128xf32>
    %cst_39 = arith.constant 1.000000e+00 : f32
    %37 = vector.broadcast %cst_39 : f32 to vector<8x128xf32>
    %38 = arith.addf %37, %36 : vector<8x128xf32>
    %39 = arith.divf %37, %38 : vector<8x128xf32>
    %40 = arith.index_cast %c0_i32 : i32 to index
    %c0_40 = arith.constant 0 : index
    %c0_41 = arith.constant 0 : index
    %41 = vector.load %arg27[%40, %c0_40, %c0_41] : memref<8x8x128xf32, #tpu.memory_space<vmem>>, vector<1x8x128xf32>
    %42 = vector.shape_cast %41 : vector<1x8x128xf32> to vector<8x128xf32>
    %43 = arith.addf %42, %28 : vector<8x128xf32>
    %44 = arith.negf %43 : vector<8x128xf32>
    %45 = math.exp %44 : vector<8x128xf32>
    %cst_42 = arith.constant 1.000000e+00 : f32
    %46 = vector.broadcast %cst_42 : f32 to vector<8x128xf32>
    %47 = arith.addf %46, %45 : vector<8x128xf32>
    %48 = arith.divf %46, %47 : vector<8x128xf32>
    %49 = arith.index_cast %c0_i32 : i32 to index
    %c0_43 = arith.constant 0 : index
    %c0_44 = arith.constant 0 : index
    %50 = vector.load %arg28[%49, %c0_43, %c0_44] : memref<8x8x128xf32, #tpu.memory_space<vmem>>, vector<1x8x128xf32>
    %51 = vector.shape_cast %50 : vector<1x8x128xf32> to vector<8x128xf32>
    %52 = vector.broadcast %23 : vector<1x128xf32> to vector<8x128xf32>
    %53 = arith.addf %30, %52 : vector<8x128xf32>
    %54 = arith.mulf %39, %53 : vector<8x128xf32>
    %55 = arith.addf %51, %54 : vector<8x128xf32>
    %56 = math.tanh %55 : vector<8x128xf32>
    %cst_45 = arith.constant 1.000000e+00 : f32
    %57 = vector.broadcast %cst_45 : f32 to vector<8x128xf32>
    %58 = arith.subf %57, %48 : vector<8x128xf32>
    %59 = arith.mulf %58, %56 : vector<8x128xf32>
    %60 = arith.mulf %48, %24 : vector<8x128xf32>
    %61 = arith.addf %59, %60 : vector<8x128xf32>
    %62 = arith.index_cast %c0_i32 : i32 to index
    %c0_46 = arith.constant 0 : index
    %c0_47 = arith.constant 0 : index
    %63 = vector.load %arg25[%62, %c0_46, %c0_47] : memref<8x8x128xf32, #tpu.memory_space<vmem>>, vector<1x8x128xf32>
    %64 = vector.shape_cast %63 : vector<1x8x128xf32> to vector<8x128xf32>
    %65 = vector.shape_cast %61 : vector<8x128xf32> to vector<1x8x128xf32>
    tpu.vector_store %arg25[%62, %c0_46, %c0_47], %65 {strides = array<i32>} : memref<8x8x128xf32, #tpu.memory_space<vmem>>, vector<1x8x128xf32>,
    %c1_i32 = arith.constant 1 : i32
    %c0_48 = arith.constant 0 : index
    %c0_49 = arith.constant 0 : index
    %66 = vector.load %arg5[%c0_48, %c0_49] : memref<128x128xf32, #tpu.memory_space<vmem>>, vector<128x128xf32>
    %cst_50 = arith.constant dense<0.000000e+00> : vector<8x128xf32>
    %67 = tpu.matmul %61, %66, %cst_50 {dimension_numbers = #tpu.dot_dimension_numbers<[1], [0], [0], [1], [0, 0, 1, 1], [], []>} : vector<8x128xf32>, vector<128x128xf32>, vector<8x128xf32> -> vector<8x128xf32>
    %c0_51 = arith.constant 0 : index
    %c0_52 = arith.constant 0 : index
    %68 = vector.load %arg6[%c0_51, %c0_52] : memref<128x128xf32, #tpu.memory_space<vmem>>, vector<128x128xf32>
    %cst_53 = arith.constant dense<0.000000e+00> : vector<8x128xf32>
    %69 = tpu.matmul %61, %68, %cst_53 {dimension_numbers = #tpu.dot_dimension_numbers<[1], [0], [0], [1], [0, 0, 1, 1], [], []>} : vector<8x128xf32>, vector<128x128xf32>, vector<8x128xf32> -> vector<8x128xf32>
    %c0_54 = arith.constant 0 : index
    %c0_55 = arith.constant 0 : index
    %70 = vector.load %arg7[%c0_54, %c0_55] : memref<128x128xf32, #tpu.memory_space<vmem>>, vector<128x128xf32>
    %cst_56 = arith.constant dense<0.000000e+00> : vector<8x128xf32>
    %71 = tpu.matmul %61, %70, %cst_56 {dimension_numbers = #tpu.dot_dimension_numbers<[1], [0], [0], [1], [0, 0, 1, 1], [], []>} : vector<8x128xf32>, vector<128x128xf32>, vector<8x128xf32> -> vector<8x128xf32>
    %72 = arith.index_cast %c1_i32 : i32 to index
    %c0_57 = arith.constant 0 : index
    %c0_58 = arith.constant 0 : index
    %73 = vector.load %arg26[%72, %c0_57, %c0_58] : memref<8x8x128xf32, #tpu.memory_space<vmem>>, vector<1x8x128xf32>
    %74 = vector.shape_cast %73 : vector<1x8x128xf32> to vector<8x128xf32>
    %75 = arith.addf %74, %67 : vector<8x128xf32>
    %76 = arith.negf %75 : vector<8x128xf32>
    %77 = math.exp %76 : vector<8x128xf32>
    %cst_59 = arith.constant 1.000000e+00 : f32
    %78 = vector.broadcast %cst_59 : f32 to vector<8x128xf32>
    %79 = arith.addf %78, %77 : vector<8x128xf32>
    %80 = arith.divf %78, %79 : vector<8x128xf32>
    %81 = arith.index_cast %c1_i32 : i32 to index
    %c0_60 = arith.constant 0 : index
    %c0_61 = arith.constant 0 : index
    %82 = vector.load %arg27[%81, %c0_60, %c0_61] : memref<8x8x128xf32, #tpu.memory_space<vmem>>, vector<1x8x128xf32>
    %83 = vector.shape_cast %82 : vector<1x8x128xf32> to vector<8x128xf32>
    %84 = arith.addf %83, %69 : vector<8x128xf32>
    %85 = arith.negf %84 : vector<8x128xf32>
    %86 = math.exp %85 : vector<8x128xf32>
    %cst_62 = arith.constant 1.000000e+00 : f32
    %87 = vector.broadcast %cst_62 : f32 to vector<8x128xf32>
    %88 = arith.addf %87, %86 : vector<8x128xf32>
    %89 = arith.divf %87, %88 : vector<8x128xf32>
    %90 = arith.index_cast %c1_i32 : i32 to index
    %c0_63 = arith.constant 0 : index
    %c0_64 = arith.constant 0 : index
    %91 = vector.load %arg28[%90, %c0_63, %c0_64] : memref<8x8x128xf32, #tpu.memory_space<vmem>>, vector<1x8x128xf32>
    %92 = vector.shape_cast %91 : vector<1x8x128xf32> to vector<8x128xf32>
    %93 = vector.broadcast %23 : vector<1x128xf32> to vector<8x128xf32>
    %94 = arith.addf %71, %93 : vector<8x128xf32>
    %95 = arith.mulf %80, %94 : vector<8x128xf32>
    %96 = arith.addf %92, %95 : vector<8x128xf32>
    %97 = math.tanh %96 : vector<8x128xf32>
    %cst_65 = arith.constant 1.000000e+00 : f32
    %98 = vector.broadcast %cst_65 : f32 to vector<8x128xf32>
    %99 = arith.subf %98, %89 : vector<8x128xf32>
    %100 = arith.mulf %99, %97 : vector<8x128xf32>
    %101 = arith.mulf %89, %61 : vector<8x128xf32>
    %102 = arith.addf %100, %101 : vector<8x128xf32>
    %103 = arith.index_cast %c1_i32 : i32 to index
    %c0_66 = arith.constant 0 : index
    %c0_67 = arith.constant 0 : index
    %104 = vector.load %arg25[%103, %c0_66, %c0_67] : memref<8x8x128xf32, #tpu.memory_space<vmem>>, vector<1x8x128xf32>
    %105 = vector.shape_cast %104 : vector<1x8x128xf32> to vector<8x128xf32>
    %106 = vector.shape_cast %102 : vector<8x128xf32> to vector<1x8x128xf32>
    tpu.vector_store %arg25[%103, %c0_66, %c0_67], %106 {strides = array<i32>} : memref<8x8x128xf32, #tpu.memory_space<vmem>>, vector<1x8x128xf32>,
    %c2_i32 = arith.constant 2 : i32
    %c0_68 = arith.constant 0 : index
    %c0_69 = arith.constant 0 : index
    %107 = vector.load %arg5[%c0_68, %c0_69] : memref<128x128xf32, #tpu.memory_space<vmem>>, vector<128x128xf32>
    %cst_70 = arith.constant dense<0.000000e+00> : vector<8x128xf32>
    %108 = tpu.matmul %102, %107, %cst_70 {dimension_numbers = #tpu.dot_dimension_numbers<[1], [0], [0], [1], [0, 0, 1, 1], [], []>} : vector<8x128xf32>, vector<128x128xf32>, vector<8x128xf32> -> vector<8x128xf32>
    %c0_71 = arith.constant 0 : index
    %c0_72 = arith.constant 0 : index
    %109 = vector.load %arg6[%c0_71, %c0_72] : memref<128x128xf32, #tpu.memory_space<vmem>>, vector<128x128xf32>
    %cst_73 = arith.constant dense<0.000000e+00> : vector<8x128xf32>
    %110 = tpu.matmul %102, %109, %cst_73 {dimension_numbers = #tpu.dot_dimension_numbers<[1], [0], [0], [1], [0, 0, 1, 1], [], []>} : vector<8x128xf32>, vector<128x128xf32>, vector<8x128xf32> -> vector<8x128xf32>
    %c0_74 = arith.constant 0 : index
    %c0_75 = arith.constant 0 : index
    %111 = vector.load %arg7[%c0_74, %c0_75] : memref<128x128xf32, #tpu.memory_space<vmem>>, vector<128x128xf32>
    %cst_76 = arith.constant dense<0.000000e+00> : vector<8x128xf32>
    %112 = tpu.matmul %102, %111, %cst_76 {dimension_numbers = #tpu.dot_dimension_numbers<[1], [0], [0], [1], [0, 0, 1, 1], [], []>} : vector<8x128xf32>, vector<128x128xf32>, vector<8x128xf32> -> vector<8x128xf32>
    %113 = arith.index_cast %c2_i32 : i32 to index
    %c0_77 = arith.constant 0 : index
    %c0_78 = arith.constant 0 : index
    %114 = vector.load %arg26[%113, %c0_77, %c0_78] : memref<8x8x128xf32, #tpu.memory_space<vmem>>, vector<1x8x128xf32>
    %115 = vector.shape_cast %114 : vector<1x8x128xf32> to vector<8x128xf32>
    %116 = arith.addf %115, %108 : vector<8x128xf32>
    %117 = arith.negf %116 : vector<8x128xf32>
    %118 = math.exp %117 : vector<8x128xf32>
    %cst_79 = arith.constant 1.000000e+00 : f32
    %119 = vector.broadcast %cst_79 : f32 to vector<8x128xf32>
    %120 = arith.addf %119, %118 : vector<8x128xf32>
    %121 = arith.divf %119, %120 : vector<8x128xf32>
    %122 = arith.index_cast %c2_i32 : i32 to index
    %c0_80 = arith.constant 0 : index
    %c0_81 = arith.constant 0 : index
    %123 = vector.load %arg27[%122, %c0_80, %c0_81] : memref<8x8x128xf32, #tpu.memory_space<vmem>>, vector<1x8x128xf32>
    %124 = vector.shape_cast %123 : vector<1x8x128xf32> to vector<8x128xf32>
    %125 = arith.addf %124, %110 : vector<8x128xf32>
    %126 = arith.negf %125 : vector<8x128xf32>
    %127 = math.exp %126 : vector<8x128xf32>
    %cst_82 = arith.constant 1.000000e+00 : f32
    %128 = vector.broadcast %cst_82 : f32 to vector<8x128xf32>
    %129 = arith.addf %128, %127 : vector<8x128xf32>
    %130 = arith.divf %128, %129 : vector<8x128xf32>
    %131 = arith.index_cast %c2_i32 : i32 to index
    %c0_83 = arith.constant 0 : index
    %c0_84 = arith.constant 0 : index
    %132 = vector.load %arg28[%131, %c0_83, %c0_84] : memref<8x8x128xf32, #tpu.memory_space<vmem>>, vector<1x8x128xf32>
    %133 = vector.shape_cast %132 : vector<1x8x128xf32> to vector<8x128xf32>
    %134 = vector.broadcast %23 : vector<1x128xf32> to vector<8x128xf32>
    %135 = arith.addf %112, %134 : vector<8x128xf32>
    %136 = arith.mulf %121, %135 : vector<8x128xf32>
    %137 = arith.addf %133, %136 : vector<8x128xf32>
    %138 = math.tanh %137 : vector<8x128xf32>
    %cst_85 = arith.constant 1.000000e+00 : f32
    %139 = vector.broadcast %cst_85 : f32 to vector<8x128xf32>
    %140 = arith.subf %139, %130 : vector<8x128xf32>
    %141 = arith.mulf %140, %138 : vector<8x128xf32>
    %142 = arith.mulf %130, %102 : vector<8x128xf32>
    %143 = arith.addf %141, %142 : vector<8x128xf32>
    %144 = arith.index_cast %c2_i32 : i32 to index
    %c0_86 = arith.constant 0 : index
    %c0_87 = arith.constant 0 : index
    %145 = vector.load %arg25[%144, %c0_86, %c0_87] : memref<8x8x128xf32, #tpu.memory_space<vmem>>, vector<1x8x128xf32>
    %146 = vector.shape_cast %145 : vector<1x8x128xf32> to vector<8x128xf32>
    %147 = vector.shape_cast %143 : vector<8x128xf32> to vector<1x8x128xf32>
    tpu.vector_store %arg25[%144, %c0_86, %c0_87], %147 {strides = array<i32>} : memref<8x8x128xf32, #tpu.memory_space<vmem>>, vector<1x8x128xf32>,
    %c3_i32 = arith.constant 3 : i32
    %c0_88 = arith.constant 0 : index
    %c0_89 = arith.constant 0 : index
    %148 = vector.load %arg5[%c0_88, %c0_89] : memref<128x128xf32, #tpu.memory_space<vmem>>, vector<128x128xf32>
    %cst_90 = arith.constant dense<0.000000e+00> : vector<8x128xf32>
    %149 = tpu.matmul %143, %148, %cst_90 {dimension_numbers = #tpu.dot_dimension_numbers<[1], [0], [0], [1], [0, 0, 1, 1], [], []>} : vector<8x128xf32>, vector<128x128xf32>, vector<8x128xf32> -> vector<8x128xf32>
    %c0_91 = arith.constant 0 : index
    %c0_92 = arith.constant 0 : index
    %150 = vector.load %arg6[%c0_91, %c0_92] : memref<128x128xf32, #tpu.memory_space<vmem>>, vector<128x128xf32>
    %cst_93 = arith.constant dense<0.000000e+00> : vector<8x128xf32>
    %151 = tpu.matmul %143, %150, %cst_93 {dimension_numbers = #tpu.dot_dimension_numbers<[1], [0], [0], [1], [0, 0, 1, 1], [], []>} : vector<8x128xf32>, vector<128x128xf32>, vector<8x128xf32> -> vector<8x128xf32>
    %c0_94 = arith.constant 0 : index
    %c0_95 = arith.constant 0 : index
    %152 = vector.load %arg7[%c0_94, %c0_95] : memref<128x128xf32, #tpu.memory_space<vmem>>, vector<128x128xf32>
    %cst_96 = arith.constant dense<0.000000e+00> : vector<8x128xf32>
    %153 = tpu.matmul %143, %152, %cst_96 {dimension_numbers = #tpu.dot_dimension_numbers<[1], [0], [0], [1], [0, 0, 1, 1], [], []>} : vector<8x128xf32>, vector<128x128xf32>, vector<8x128xf32> -> vector<8x128xf32>
    %154 = arith.index_cast %c3_i32 : i32 to index
    %c0_97 = arith.constant 0 : index
    %c0_98 = arith.constant 0 : index
    %155 = vector.load %arg26[%154, %c0_97, %c0_98] : memref<8x8x128xf32, #tpu.memory_space<vmem>>, vector<1x8x128xf32>
    %156 = vector.shape_cast %155 : vector<1x8x128xf32> to vector<8x128xf32>
    %157 = arith.addf %156, %149 : vector<8x128xf32>
    %158 = arith.negf %157 : vector<8x128xf32>
    %159 = math.exp %158 : vector<8x128xf32>
    %cst_99 = arith.constant 1.000000e+00 : f32
    %160 = vector.broadcast %cst_99 : f32 to vector<8x128xf32>
    %161 = arith.addf %160, %159 : vector<8x128xf32>
    %162 = arith.divf %160, %161 : vector<8x128xf32>
    %163 = arith.index_cast %c3_i32 : i32 to index
    %c0_100 = arith.constant 0 : index
    %c0_101 = arith.constant 0 : index
    %164 = vector.load %arg27[%163, %c0_100, %c0_101] : memref<8x8x128xf32, #tpu.memory_space<vmem>>, vector<1x8x128xf32>
    %165 = vector.shape_cast %164 : vector<1x8x128xf32> to vector<8x128xf32>
    %166 = arith.addf %165, %151 : vector<8x128xf32>
    %167 = arith.negf %166 : vector<8x128xf32>
    %168 = math.exp %167 : vector<8x128xf32>
    %cst_102 = arith.constant 1.000000e+00 : f32
    %169 = vector.broadcast %cst_102 : f32 to vector<8x128xf32>
    %170 = arith.addf %169, %168 : vector<8x128xf32>
    %171 = arith.divf %169, %170 : vector<8x128xf32>
    %172 = arith.index_cast %c3_i32 : i32 to index
    %c0_103 = arith.constant 0 : index
    %c0_104 = arith.constant 0 : index
    %173 = vector.load %arg28[%172, %c0_103, %c0_104] : memref<8x8x128xf32, #tpu.memory_space<vmem>>, vector<1x8x128xf32>
    %174 = vector.shape_cast %173 : vector<1x8x128xf32> to vector<8x128xf32>
    %175 = vector.broadcast %23 : vector<1x128xf32> to vector<8x128xf32>
    %176 = arith.addf %153, %175 : vector<8x128xf32>
    %177 = arith.mulf %162, %176 : vector<8x128xf32>
    %178 = arith.addf %174, %177 : vector<8x128xf32>
    %179 = math.tanh %178 : vector<8x128xf32>
    %cst_105 = arith.constant 1.000000e+00 : f32
    %180 = vector.broadcast %cst_105 : f32 to vector<8x128xf32>
    %181 = arith.subf %180, %171 : vector<8x128xf32>
    %182 = arith.mulf %181, %179 : vector<8x128xf32>
    %183 = arith.mulf %171, %143 : vector<8x128xf32>
    %184 = arith.addf %182, %183 : vector<8x128xf32>
    %185 = arith.index_cast %c3_i32 : i32 to index
    %c0_106 = arith.constant 0 : index
    %c0_107 = arith.constant 0 : index
    %186 = vector.load %arg25[%185, %c0_106, %c0_107] : memref<8x8x128xf32, #tpu.memory_space<vmem>>, vector<1x8x128xf32>
    %187 = vector.shape_cast %186 : vector<1x8x128xf32> to vector<8x128xf32>
    %188 = vector.shape_cast %184 : vector<8x128xf32> to vector<1x8x128xf32>
    tpu.vector_store %arg25[%185, %c0_106, %c0_107], %188 {strides = array<i32>} : memref<8x8x128xf32, #tpu.memory_space<vmem>>, vector<1x8x128xf32>,
    %c4_i32 = arith.constant 4 : i32
    %c0_108 = arith.constant 0 : index
    %c0_109 = arith.constant 0 : index
    %189 = vector.load %arg5[%c0_108, %c0_109] : memref<128x128xf32, #tpu.memory_space<vmem>>, vector<128x128xf32>
    %cst_110 = arith.constant dense<0.000000e+00> : vector<8x128xf32>
    %190 = tpu.matmul %184, %189, %cst_110 {dimension_numbers = #tpu.dot_dimension_numbers<[1], [0], [0], [1], [0, 0, 1, 1], [], []>} : vector<8x128xf32>, vector<128x128xf32>, vector<8x128xf32> -> vector<8x128xf32>
    %c0_111 = arith.constant 0 : index
    %c0_112 = arith.constant 0 : index
    %191 = vector.load %arg6[%c0_111, %c0_112] : memref<128x128xf32, #tpu.memory_space<vmem>>, vector<128x128xf32>
    %cst_113 = arith.constant dense<0.000000e+00> : vector<8x128xf32>
    %192 = tpu.matmul %184, %191, %cst_113 {dimension_numbers = #tpu.dot_dimension_numbers<[1], [0], [0], [1], [0, 0, 1, 1], [], []>} : vector<8x128xf32>, vector<128x128xf32>, vector<8x128xf32> -> vector<8x128xf32>
    %c0_114 = arith.constant 0 : index
    %c0_115 = arith.constant 0 : index
    %193 = vector.load %arg7[%c0_114, %c0_115] : memref<128x128xf32, #tpu.memory_space<vmem>>, vector<128x128xf32>
    %cst_116 = arith.constant dense<0.000000e+00> : vector<8x128xf32>
    %194 = tpu.matmul %184, %193, %cst_116 {dimension_numbers = #tpu.dot_dimension_numbers<[1], [0], [0], [1], [0, 0, 1, 1], [], []>} : vector<8x128xf32>, vector<128x128xf32>, vector<8x128xf32> -> vector<8x128xf32>
    %195 = arith.index_cast %c4_i32 : i32 to index
    %c0_117 = arith.constant 0 : index
    %c0_118 = arith.constant 0 : index
    %196 = vector.load %arg26[%195, %c0_117, %c0_118] : memref<8x8x128xf32, #tpu.memory_space<vmem>>, vector<1x8x128xf32>
    %197 = vector.shape_cast %196 : vector<1x8x128xf32> to vector<8x128xf32>
    %198 = arith.addf %197, %190 : vector<8x128xf32>
    %199 = arith.negf %198 : vector<8x128xf32>
    %200 = math.exp %199 : vector<8x128xf32>
    %cst_119 = arith.constant 1.000000e+00 : f32
    %201 = vector.broadcast %cst_119 : f32 to vector<8x128xf32>
    %202 = arith.addf %201, %200 : vector<8x128xf32>
    %203 = arith.divf %201, %202 : vector<8x128xf32>
    %204 = arith.index_cast %c4_i32 : i32 to index
    %c0_120 = arith.constant 0 : index
    %c0_121 = arith.constant 0 : index
    %205 = vector.load %arg27[%204, %c0_120, %c0_121] : memref<8x8x128xf32, #tpu.memory_space<vmem>>, vector<1x8x128xf32>
    %206 = vector.shape_cast %205 : vector<1x8x128xf32> to vector<8x128xf32>
    %207 = arith.addf %206, %192 : vector<8x128xf32>
    %208 = arith.negf %207 : vector<8x128xf32>
    %209 = math.exp %208 : vector<8x128xf32>
    %cst_122 = arith.constant 1.000000e+00 : f32
    %210 = vector.broadcast %cst_122 : f32 to vector<8x128xf32>
    %211 = arith.addf %210, %209 : vector<8x128xf32>
    %212 = arith.divf %210, %211 : vector<8x128xf32>
    %213 = arith.index_cast %c4_i32 : i32 to index
    %c0_123 = arith.constant 0 : index
    %c0_124 = arith.constant 0 : index
    %214 = vector.load %arg28[%213, %c0_123, %c0_124] : memref<8x8x128xf32, #tpu.memory_space<vmem>>, vector<1x8x128xf32>
    %215 = vector.shape_cast %214 : vector<1x8x128xf32> to vector<8x128xf32>
    %216 = vector.broadcast %23 : vector<1x128xf32> to vector<8x128xf32>
    %217 = arith.addf %194, %216 : vector<8x128xf32>
    %218 = arith.mulf %203, %217 : vector<8x128xf32>
    %219 = arith.addf %215, %218 : vector<8x128xf32>
    %220 = math.tanh %219 : vector<8x128xf32>
    %cst_125 = arith.constant 1.000000e+00 : f32
    %221 = vector.broadcast %cst_125 : f32 to vector<8x128xf32>
    %222 = arith.subf %221, %212 : vector<8x128xf32>
    %223 = arith.mulf %222, %220 : vector<8x128xf32>
    %224 = arith.mulf %212, %184 : vector<8x128xf32>
    %225 = arith.addf %223, %224 : vector<8x128xf32>
    %226 = arith.index_cast %c4_i32 : i32 to index
    %c0_126 = arith.constant 0 : index
    %c0_127 = arith.constant 0 : index
    %227 = vector.load %arg25[%226, %c0_126, %c0_127] : memref<8x8x128xf32, #tpu.memory_space<vmem>>, vector<1x8x128xf32>
    %228 = vector.shape_cast %227 : vector<1x8x128xf32> to vector<8x128xf32>
    %229 = vector.shape_cast %225 : vector<8x128xf32> to vector<1x8x128xf32>
    tpu.vector_store %arg25[%226, %c0_126, %c0_127], %229 {strides = array<i32>} : memref<8x8x128xf32, #tpu.memory_space<vmem>>, vector<1x8x128xf32>,
    %c5_i32 = arith.constant 5 : i32
    %c0_128 = arith.constant 0 : index
    %c0_129 = arith.constant 0 : index
    %230 = vector.load %arg5[%c0_128, %c0_129] : memref<128x128xf32, #tpu.memory_space<vmem>>, vector<128x128xf32>
    %cst_130 = arith.constant dense<0.000000e+00> : vector<8x128xf32>
    %231 = tpu.matmul %225, %230, %cst_130 {dimension_numbers = #tpu.dot_dimension_numbers<[1], [0], [0], [1], [0, 0, 1, 1], [], []>} : vector<8x128xf32>, vector<128x128xf32>, vector<8x128xf32> -> vector<8x128xf32>
    %c0_131 = arith.constant 0 : index
    %c0_132 = arith.constant 0 : index
    %232 = vector.load %arg6[%c0_131, %c0_132] : memref<128x128xf32, #tpu.memory_space<vmem>>, vector<128x128xf32>
    %cst_133 = arith.constant dense<0.000000e+00> : vector<8x128xf32>
    %233 = tpu.matmul %225, %232, %cst_133 {dimension_numbers = #tpu.dot_dimension_numbers<[1], [0], [0], [1], [0, 0, 1, 1], [], []>} : vector<8x128xf32>, vector<128x128xf32>, vector<8x128xf32> -> vector<8x128xf32>
    %c0_134 = arith.constant 0 : index
    %c0_135 = arith.constant 0 : index
    %234 = vector.load %arg7[%c0_134, %c0_135] : memref<128x128xf32, #tpu.memory_space<vmem>>, vector<128x128xf32>
    %cst_136 = arith.constant dense<0.000000e+00> : vector<8x128xf32>
    %235 = tpu.matmul %225, %234, %cst_136 {dimension_numbers = #tpu.dot_dimension_numbers<[1], [0], [0], [1], [0, 0, 1, 1], [], []>} : vector<8x128xf32>, vector<128x128xf32>, vector<8x128xf32> -> vector<8x128xf32>
    %236 = arith.index_cast %c5_i32 : i32 to index
    %c0_137 = arith.constant 0 : index
    %c0_138 = arith.constant 0 : index
    %237 = vector.load %arg26[%236, %c0_137, %c0_138] : memref<8x8x128xf32, #tpu.memory_space<vmem>>, vector<1x8x128xf32>
    %238 = vector.shape_cast %237 : vector<1x8x128xf32> to vector<8x128xf32>
    %239 = arith.addf %238, %231 : vector<8x128xf32>
    %240 = arith.negf %239 : vector<8x128xf32>
    %241 = math.exp %240 : vector<8x128xf32>
    %cst_139 = arith.constant 1.000000e+00 : f32
    %242 = vector.broadcast %cst_139 : f32 to vector<8x128xf32>
    %243 = arith.addf %242, %241 : vector<8x128xf32>
    %244 = arith.divf %242, %243 : vector<8x128xf32>
    %245 = arith.index_cast %c5_i32 : i32 to index
    %c0_140 = arith.constant 0 : index
    %c0_141 = arith.constant 0 : index
    %246 = vector.load %arg27[%245, %c0_140, %c0_141] : memref<8x8x128xf32, #tpu.memory_space<vmem>>, vector<1x8x128xf32>
    %247 = vector.shape_cast %246 : vector<1x8x128xf32> to vector<8x128xf32>
    %248 = arith.addf %247, %233 : vector<8x128xf32>
    %249 = arith.negf %248 : vector<8x128xf32>
    %250 = math.exp %249 : vector<8x128xf32>
    %cst_142 = arith.constant 1.000000e+00 : f32
    %251 = vector.broadcast %cst_142 : f32 to vector<8x128xf32>
    %252 = arith.addf %251, %250 : vector<8x128xf32>
    %253 = arith.divf %251, %252 : vector<8x128xf32>
    %254 = arith.index_cast %c5_i32 : i32 to index
    %c0_143 = arith.constant 0 : index
    %c0_144 = arith.constant 0 : index
    %255 = vector.load %arg28[%254, %c0_143, %c0_144] : memref<8x8x128xf32, #tpu.memory_space<vmem>>, vector<1x8x128xf32>
    %256 = vector.shape_cast %255 : vector<1x8x128xf32> to vector<8x128xf32>
    %257 = vector.broadcast %23 : vector<1x128xf32> to vector<8x128xf32>
    %258 = arith.addf %235, %257 : vector<8x128xf32>
    %259 = arith.mulf %244, %258 : vector<8x128xf32>
    %260 = arith.addf %256, %259 : vector<8x128xf32>
    %261 = math.tanh %260 : vector<8x128xf32>
    %cst_145 = arith.constant 1.000000e+00 : f32
    %262 = vector.broadcast %cst_145 : f32 to vector<8x128xf32>
    %263 = arith.subf %262, %253 : vector<8x128xf32>
    %264 = arith.mulf %263, %261 : vector<8x128xf32>
    %265 = arith.mulf %253, %225 : vector<8x128xf32>
    %266 = arith.addf %264, %265 : vector<8x128xf32>
    %267 = arith.index_cast %c5_i32 : i32 to index
    %c0_146 = arith.constant 0 : index
    %c0_147 = arith.constant 0 : index
    %268 = vector.load %arg25[%267, %c0_146, %c0_147] : memref<8x8x128xf32, #tpu.memory_space<vmem>>, vector<1x8x128xf32>
    %269 = vector.shape_cast %268 : vector<1x8x128xf32> to vector<8x128xf32>
    %270 = vector.shape_cast %266 : vector<8x128xf32> to vector<1x8x128xf32>
    tpu.vector_store %arg25[%267, %c0_146, %c0_147], %270 {strides = array<i32>} : memref<8x8x128xf32, #tpu.memory_space<vmem>>, vector<1x8x128xf32>,
    %c6_i32 = arith.constant 6 : i32
    %c0_148 = arith.constant 0 : index
    %c0_149 = arith.constant 0 : index
    %271 = vector.load %arg5[%c0_148, %c0_149] : memref<128x128xf32, #tpu.memory_space<vmem>>, vector<128x128xf32>
    %cst_150 = arith.constant dense<0.000000e+00> : vector<8x128xf32>
    %272 = tpu.matmul %266, %271, %cst_150 {dimension_numbers = #tpu.dot_dimension_numbers<[1], [0], [0], [1], [0, 0, 1, 1], [], []>} : vector<8x128xf32>, vector<128x128xf32>, vector<8x128xf32> -> vector<8x128xf32>
    %c0_151 = arith.constant 0 : index
    %c0_152 = arith.constant 0 : index
    %273 = vector.load %arg6[%c0_151, %c0_152] : memref<128x128xf32, #tpu.memory_space<vmem>>, vector<128x128xf32>
    %cst_153 = arith.constant dense<0.000000e+00> : vector<8x128xf32>
    %274 = tpu.matmul %266, %273, %cst_153 {dimension_numbers = #tpu.dot_dimension_numbers<[1], [0], [0], [1], [0, 0, 1, 1], [], []>} : vector<8x128xf32>, vector<128x128xf32>, vector<8x128xf32> -> vector<8x128xf32>
    %c0_154 = arith.constant 0 : index
    %c0_155 = arith.constant 0 : index
    %275 = vector.load %arg7[%c0_154, %c0_155] : memref<128x128xf32, #tpu.memory_space<vmem>>, vector<128x128xf32>
    %cst_156 = arith.constant dense<0.000000e+00> : vector<8x128xf32>
    %276 = tpu.matmul %266, %275, %cst_156 {dimension_numbers = #tpu.dot_dimension_numbers<[1], [0], [0], [1], [0, 0, 1, 1], [], []>} : vector<8x128xf32>, vector<128x128xf32>, vector<8x128xf32> -> vector<8x128xf32>
    %277 = arith.index_cast %c6_i32 : i32 to index
    %c0_157 = arith.constant 0 : index
    %c0_158 = arith.constant 0 : index
    %278 = vector.load %arg26[%277, %c0_157, %c0_158] : memref<8x8x128xf32, #tpu.memory_space<vmem>>, vector<1x8x128xf32>
    %279 = vector.shape_cast %278 : vector<1x8x128xf32> to vector<8x128xf32>
    %280 = arith.addf %279, %272 : vector<8x128xf32>
    %281 = arith.negf %280 : vector<8x128xf32>
    %282 = math.exp %281 : vector<8x128xf32>
    %cst_159 = arith.constant 1.000000e+00 : f32
    %283 = vector.broadcast %cst_159 : f32 to vector<8x128xf32>
    %284 = arith.addf %283, %282 : vector<8x128xf32>
    %285 = arith.divf %283, %284 : vector<8x128xf32>
    %286 = arith.index_cast %c6_i32 : i32 to index
    %c0_160 = arith.constant 0 : index
    %c0_161 = arith.constant 0 : index
    %287 = vector.load %arg27[%286, %c0_160, %c0_161] : memref<8x8x128xf32, #tpu.memory_space<vmem>>, vector<1x8x128xf32>
    %288 = vector.shape_cast %287 : vector<1x8x128xf32> to vector<8x128xf32>
    %289 = arith.addf %288, %274 : vector<8x128xf32>
    %290 = arith.negf %289 : vector<8x128xf32>
    %291 = math.exp %290 : vector<8x128xf32>
    %cst_162 = arith.constant 1.000000e+00 : f32
    %292 = vector.broadcast %cst_162 : f32 to vector<8x128xf32>
    %293 = arith.addf %292, %291 : vector<8x128xf32>
    %294 = arith.divf %292, %293 : vector<8x128xf32>
    %295 = arith.index_cast %c6_i32 : i32 to index
    %c0_163 = arith.constant 0 : index
    %c0_164 = arith.constant 0 : index
    %296 = vector.load %arg28[%295, %c0_163, %c0_164] : memref<8x8x128xf32, #tpu.memory_space<vmem>>, vector<1x8x128xf32>
    %297 = vector.shape_cast %296 : vector<1x8x128xf32> to vector<8x128xf32>
    %298 = vector.broadcast %23 : vector<1x128xf32> to vector<8x128xf32>
    %299 = arith.addf %276, %298 : vector<8x128xf32>
    %300 = arith.mulf %285, %299 : vector<8x128xf32>
    %301 = arith.addf %297, %300 : vector<8x128xf32>
    %302 = math.tanh %301 : vector<8x128xf32>
    %cst_165 = arith.constant 1.000000e+00 : f32
    %303 = vector.broadcast %cst_165 : f32 to vector<8x128xf32>
    %304 = arith.subf %303, %294 : vector<8x128xf32>
    %305 = arith.mulf %304, %302 : vector<8x128xf32>
    %306 = arith.mulf %294, %266 : vector<8x128xf32>
    %307 = arith.addf %305, %306 : vector<8x128xf32>
    %308 = arith.index_cast %c6_i32 : i32 to index
    %c0_166 = arith.constant 0 : index
    %c0_167 = arith.constant 0 : index
    %309 = vector.load %arg25[%308, %c0_166, %c0_167] : memref<8x8x128xf32, #tpu.memory_space<vmem>>, vector<1x8x128xf32>
    %310 = vector.shape_cast %309 : vector<1x8x128xf32> to vector<8x128xf32>
    %311 = vector.shape_cast %307 : vector<8x128xf32> to vector<1x8x128xf32>
    tpu.vector_store %arg25[%308, %c0_166, %c0_167], %311 {strides = array<i32>} : memref<8x8x128xf32, #tpu.memory_space<vmem>>, vector<1x8x128xf32>,
    %c7_i32 = arith.constant 7 : i32
    %c0_168 = arith.constant 0 : index
    %c0_169 = arith.constant 0 : index
    %312 = vector.load %arg5[%c0_168, %c0_169] : memref<128x128xf32, #tpu.memory_space<vmem>>, vector<128x128xf32>
    %cst_170 = arith.constant dense<0.000000e+00> : vector<8x128xf32>
    %313 = tpu.matmul %307, %312, %cst_170 {dimension_numbers = #tpu.dot_dimension_numbers<[1], [0], [0], [1], [0, 0, 1, 1], [], []>} : vector<8x128xf32>, vector<128x128xf32>, vector<8x128xf32> -> vector<8x128xf32>
    %c0_171 = arith.constant 0 : index
    %c0_172 = arith.constant 0 : index
    %314 = vector.load %arg6[%c0_171, %c0_172] : memref<128x128xf32, #tpu.memory_space<vmem>>, vector<128x128xf32>
    %cst_173 = arith.constant dense<0.000000e+00> : vector<8x128xf32>
    %315 = tpu.matmul %307, %314, %cst_173 {dimension_numbers = #tpu.dot_dimension_numbers<[1], [0], [0], [1], [0, 0, 1, 1], [], []>} : vector<8x128xf32>, vector<128x128xf32>, vector<8x128xf32> -> vector<8x128xf32>
    %c0_174 = arith.constant 0 : index
    %c0_175 = arith.constant 0 : index
    %316 = vector.load %arg7[%c0_174, %c0_175] : memref<128x128xf32, #tpu.memory_space<vmem>>, vector<128x128xf32>
    %cst_176 = arith.constant dense<0.000000e+00> : vector<8x128xf32>
    %317 = tpu.matmul %307, %316, %cst_176 {dimension_numbers = #tpu.dot_dimension_numbers<[1], [0], [0], [1], [0, 0, 1, 1], [], []>} : vector<8x128xf32>, vector<128x128xf32>, vector<8x128xf32> -> vector<8x128xf32>
    %318 = arith.index_cast %c7_i32 : i32 to index
    %c0_177 = arith.constant 0 : index
    %c0_178 = arith.constant 0 : index
    %319 = vector.load %arg26[%318, %c0_177, %c0_178] : memref<8x8x128xf32, #tpu.memory_space<vmem>>, vector<1x8x128xf32>
    %320 = vector.shape_cast %319 : vector<1x8x128xf32> to vector<8x128xf32>
    %321 = arith.addf %320, %313 : vector<8x128xf32>
    %322 = arith.negf %321 : vector<8x128xf32>
    %323 = math.exp %322 : vector<8x128xf32>
    %cst_179 = arith.constant 1.000000e+00 : f32
    %324 = vector.broadcast %cst_179 : f32 to vector<8x128xf32>
    %325 = arith.addf %324, %323 : vector<8x128xf32>
    %326 = arith.divf %324, %325 : vector<8x128xf32>
    %327 = arith.index_cast %c7_i32 : i32 to index
    %c0_180 = arith.constant 0 : index
    %c0_181 = arith.constant 0 : index
    %328 = vector.load %arg27[%327, %c0_180, %c0_181] : memref<8x8x128xf32, #tpu.memory_space<vmem>>, vector<1x8x128xf32>
    %329 = vector.shape_cast %328 : vector<1x8x128xf32> to vector<8x128xf32>
    %330 = arith.addf %329, %315 : vector<8x128xf32>
    %331 = arith.negf %330 : vector<8x128xf32>
    %332 = math.exp %331 : vector<8x128xf32>
    %cst_182 = arith.constant 1.000000e+00 : f32
    %333 = vector.broadcast %cst_182 : f32 to vector<8x128xf32>
    %334 = arith.addf %333, %332 : vector<8x128xf32>
    %335 = arith.divf %333, %334 : vector<8x128xf32>
    %336 = arith.index_cast %c7_i32 : i32 to index
    %c0_183 = arith.constant 0 : index
    %c0_184 = arith.constant 0 : index
    %337 = vector.load %arg28[%336, %c0_183, %c0_184] : memref<8x8x128xf32, #tpu.memory_space<vmem>>, vector<1x8x128xf32>
    %338 = vector.shape_cast %337 : vector<1x8x128xf32> to vector<8x128xf32>
    %339 = vector.broadcast %23 : vector<1x128xf32> to vector<8x128xf32>
    %340 = arith.addf %317, %339 : vector<8x128xf32>
    %341 = arith.mulf %326, %340 : vector<8x128xf32>
    %342 = arith.addf %338, %341 : vector<8x128xf32>
    %343 = math.tanh %342 : vector<8x128xf32>
    %cst_185 = arith.constant 1.000000e+00 : f32
    %344 = vector.broadcast %cst_185 : f32 to vector<8x128xf32>
    %345 = arith.subf %344, %335 : vector<8x128xf32>
    %346 = arith.mulf %345, %343 : vector<8x128xf32>
    %347 = arith.mulf %335, %307 : vector<8x128xf32>
    %348 = arith.addf %346, %347 : vector<8x128xf32>
    %349 = arith.index_cast %c7_i32 : i32 to index
    %c0_186 = arith.constant 0 : index
    %c0_187 = arith.constant 0 : index
    %350 = vector.load %arg25[%349, %c0_186, %c0_187] : memref<8x8x128xf32, #tpu.memory_space<vmem>>, vector<1x8x128xf32>
    %351 = vector.shape_cast %350 : vector<1x8x128xf32> to vector<8x128xf32>
    %352 = vector.shape_cast %348 : vector<8x128xf32> to vector<1x8x128xf32>
    tpu.vector_store %arg25[%349, %c0_186, %c0_187], %352 {strides = array<i32>} : memref<8x8x128xf32, #tpu.memory_space<vmem>>, vector<1x8x128xf32>,
    %c8_i32 = arith.constant 8 : i32
    %c0_188 = arith.constant 0 : index
    %c0_189 = arith.constant 0 : index
    %c0_190 = arith.constant 0 : index
    %353 = vector.load %arg25[%c0_188, %c0_189, %c0_190] : memref<8x8x128xf32, #tpu.memory_space<vmem>>, vector<8x8x128xf32>
    %354 = vector.shape_cast %353 : vector<8x8x128xf32> to vector<64x128xf32>
    %c0_191 = arith.constant 0 : index
    %c0_192 = arith.constant 0 : index
    %355 = vector.load %arg12[%c0_191, %c0_192] : memref<128x128xf32, #tpu.memory_space<vmem>>, vector<128x128xf32>
    %cst_193 = arith.constant dense<0.000000e+00> : vector<64x128xf32>
    %356 = tpu.matmul %354, %355, %cst_193 {dimension_numbers = #tpu.dot_dimension_numbers<[1], [0], [0], [1], [0, 0, 1, 1], [], []>} : vector<64x128xf32>, vector<128x128xf32>, vector<64x128xf32> -> vector<64x128xf32>
    %c0_194 = arith.constant 0 : index
    %c0_195 = arith.constant 0 : index
    %357 = vector.load %arg18[%c0_194, %c0_195] : memref<1x128xf32, #tpu.memory_space<vmem>>, vector<1x128xf32>
    %358 = vector.broadcast %357 : vector<1x128xf32> to vector<64x128xf32>
    %359 = arith.addf %356, %358 : vector<64x128xf32>
    %360 = vector.shape_cast %359 : vector<64x128xf32> to vector<8x8x128xf32>
    %c0_196 = arith.constant 0 : index
    %c0_197 = arith.constant 0 : index
    %c0_198 = arith.constant 0 : index
    %361 = vector.load %arg26[%c0_196, %c0_197, %c0_198] : memref<8x8x128xf32, #tpu.memory_space<vmem>>, vector<8x8x128xf32>
    tpu.vector_store %arg26[%c0_196, %c0_197, %c0_198], %360 {strides = array<i32>} : memref<8x8x128xf32, #tpu.memory_space<vmem>>, vector<8x8x128xf32>,
    %c0_199 = arith.constant 0 : index
    %c0_200 = arith.constant 0 : index
    %362 = vector.load %arg13[%c0_199, %c0_200] : memref<128x128xf32, #tpu.memory_space<vmem>>, vector<128x128xf32>
    %cst_201 = arith.constant dense<0.000000e+00> : vector<64x128xf32>
    %363 = tpu.matmul %354, %362, %cst_201 {dimension_numbers = #tpu.dot_dimension_numbers<[1], [0], [0], [1], [0, 0, 1, 1], [], []>} : vector<64x128xf32>, vector<128x128xf32>, vector<64x128xf32> -> vector<64x128xf32>
    %c0_202 = arith.constant 0 : index
    %c0_203 = arith.constant 0 : index
    %364 = vector.load %arg19[%c0_202, %c0_203] : memref<1x128xf32, #tpu.memory_space<vmem>>, vector<1x128xf32>
    %365 = vector.broadcast %364 : vector<1x128xf32> to vector<64x128xf32>
    %366 = arith.addf %363, %365 : vector<64x128xf32>
    %367 = vector.shape_cast %366 : vector<64x128xf32> to vector<8x8x128xf32>
    %c0_204 = arith.constant 0 : index
    %c0_205 = arith.constant 0 : index
    %c0_206 = arith.constant 0 : index
    %368 = vector.load %arg27[%c0_204, %c0_205, %c0_206] : memref<8x8x128xf32, #tpu.memory_space<vmem>>, vector<8x8x128xf32>
    tpu.vector_store %arg27[%c0_204, %c0_205, %c0_206], %367 {strides = array<i32>} : memref<8x8x128xf32, #tpu.memory_space<vmem>>, vector<8x8x128xf32>,
    %c0_207 = arith.constant 0 : index
    %c0_208 = arith.constant 0 : index
    %369 = vector.load %arg14[%c0_207, %c0_208] : memref<128x128xf32, #tpu.memory_space<vmem>>, vector<128x128xf32>
    %cst_209 = arith.constant dense<0.000000e+00> : vector<64x128xf32>
    %370 = tpu.matmul %354, %369, %cst_209 {dimension_numbers = #tpu.dot_dimension_numbers<[1], [0], [0], [1], [0, 0, 1, 1], [], []>} : vector<64x128xf32>, vector<128x128xf32>, vector<64x128xf32> -> vector<64x128xf32>
    %c0_210 = arith.constant 0 : index
    %c0_211 = arith.constant 0 : index
    %371 = vector.load %arg20[%c0_210, %c0_211] : memref<1x128xf32, #tpu.memory_space<vmem>>, vector<1x128xf32>
    %372 = vector.broadcast %371 : vector<1x128xf32> to vector<64x128xf32>
    %373 = arith.addf %370, %372 : vector<64x128xf32>
    %374 = vector.shape_cast %373 : vector<64x128xf32> to vector<8x8x128xf32>
    %c0_212 = arith.constant 0 : index
    %c0_213 = arith.constant 0 : index
    %c0_214 = arith.constant 0 : index
    %375 = vector.load %arg28[%c0_212, %c0_213, %c0_214] : memref<8x8x128xf32, #tpu.memory_space<vmem>>, vector<8x8x128xf32>
    tpu.vector_store %arg28[%c0_212, %c0_213, %c0_214], %374 {strides = array<i32>} : memref<8x8x128xf32, #tpu.memory_space<vmem>>, vector<8x8x128xf32>,
    %c0_215 = arith.constant 0 : index
    %c0_216 = arith.constant 0 : index
    %376 = vector.load %arg21[%c0_215, %c0_216] : memref<1x128xf32, #tpu.memory_space<vmem>>, vector<1x128xf32>
    %cst_217 = arith.constant 0.000000e+00 : f32
    %377 = vector.broadcast %cst_217 : f32 to vector<8x128xf32>
    %c0_i32_218 = arith.constant 0 : i32
    %c0_219 = arith.constant 0 : index
    %c0_220 = arith.constant 0 : index
    %378 = vector.load %arg15[%c0_219, %c0_220] : memref<128x128xf32, #tpu.memory_space<vmem>>, vector<128x128xf32>
    %cst_221 = arith.constant dense<0.000000e+00> : vector<8x128xf32>
    %379 = tpu.matmul %377, %378, %cst_221 {dimension_numbers = #tpu.dot_dimension_numbers<[1], [0], [0], [1], [0, 0, 1, 1], [], []>} : vector<8x128xf32>, vector<128x128xf32>, vector<8x128xf32> -> vector<8x128xf32>
    %c0_222 = arith.constant 0 : index
    %c0_223 = arith.constant 0 : index
    %380 = vector.load %arg16[%c0_222, %c0_223] : memref<128x128xf32, #tpu.memory_space<vmem>>, vector<128x128xf32>
    %cst_224 = arith.constant dense<0.000000e+00> : vector<8x128xf32>
    %381 = tpu.matmul %377, %380, %cst_224 {dimension_numbers = #tpu.dot_dimension_numbers<[1], [0], [0], [1], [0, 0, 1, 1], [], []>} : vector<8x128xf32>, vector<128x128xf32>, vector<8x128xf32> -> vector<8x128xf32>
    %c0_225 = arith.constant 0 : index
    %c0_226 = arith.constant 0 : index
    %382 = vector.load %arg17[%c0_225, %c0_226] : memref<128x128xf32, #tpu.memory_space<vmem>>, vector<128x128xf32>
    %cst_227 = arith.constant dense<0.000000e+00> : vector<8x128xf32>
    %383 = tpu.matmul %377, %382, %cst_227 {dimension_numbers = #tpu.dot_dimension_numbers<[1], [0], [0], [1], [0, 0, 1, 1], [], []>} : vector<8x128xf32>, vector<128x128xf32>, vector<8x128xf32> -> vector<8x128xf32>
    %384 = arith.index_cast %c0_i32_218 : i32 to index
    %c0_228 = arith.constant 0 : index
    %c0_229 = arith.constant 0 : index
    %385 = vector.load %arg26[%384, %c0_228, %c0_229] : memref<8x8x128xf32, #tpu.memory_space<vmem>>, vector<1x8x128xf32>
    %386 = vector.shape_cast %385 : vector<1x8x128xf32> to vector<8x128xf32>
    %387 = arith.addf %386, %379 : vector<8x128xf32>
    %388 = arith.negf %387 : vector<8x128xf32>
    %389 = math.exp %388 : vector<8x128xf32>
    %cst_230 = arith.constant 1.000000e+00 : f32
    %390 = vector.broadcast %cst_230 : f32 to vector<8x128xf32>
    %391 = arith.addf %390, %389 : vector<8x128xf32>
    %392 = arith.divf %390, %391 : vector<8x128xf32>
    %393 = arith.index_cast %c0_i32_218 : i32 to index
    %c0_231 = arith.constant 0 : index
    %c0_232 = arith.constant 0 : index
    %394 = vector.load %arg27[%393, %c0_231, %c0_232] : memref<8x8x128xf32, #tpu.memory_space<vmem>>, vector<1x8x128xf32>
    %395 = vector.shape_cast %394 : vector<1x8x128xf32> to vector<8x128xf32>
    %396 = arith.addf %395, %381 : vector<8x128xf32>
    %397 = arith.negf %396 : vector<8x128xf32>
    %398 = math.exp %397 : vector<8x128xf32>
    %cst_233 = arith.constant 1.000000e+00 : f32
    %399 = vector.broadcast %cst_233 : f32 to vector<8x128xf32>
    %400 = arith.addf %399, %398 : vector<8x128xf32>
    %401 = arith.divf %399, %400 : vector<8x128xf32>
    %402 = arith.index_cast %c0_i32_218 : i32 to index
    %c0_234 = arith.constant 0 : index
    %c0_235 = arith.constant 0 : index
    %403 = vector.load %arg28[%402, %c0_234, %c0_235] : memref<8x8x128xf32, #tpu.memory_space<vmem>>, vector<1x8x128xf32>
    %404 = vector.shape_cast %403 : vector<1x8x128xf32> to vector<8x128xf32>
    %405 = vector.broadcast %376 : vector<1x128xf32> to vector<8x128xf32>
    %406 = arith.addf %383, %405 : vector<8x128xf32>
    %407 = arith.mulf %392, %406 : vector<8x128xf32>
    %408 = arith.addf %404, %407 : vector<8x128xf32>
    %409 = math.tanh %408 : vector<8x128xf32>
    %cst_236 = arith.constant 1.000000e+00 : f32
    %410 = vector.broadcast %cst_236 : f32 to vector<8x128xf32>
    %411 = arith.subf %410, %401 : vector<8x128xf32>
    %412 = arith.mulf %411, %409 : vector<8x128xf32>
    %413 = arith.mulf %401, %377 : vector<8x128xf32>
    %414 = arith.addf %412, %413 : vector<8x128xf32>
    %c1_i32_237 = arith.constant 1 : i32
    %c0_238 = arith.constant 0 : index
    %c0_239 = arith.constant 0 : index
    %415 = vector.load %arg15[%c0_238, %c0_239] : memref<128x128xf32, #tpu.memory_space<vmem>>, vector<128x128xf32>
    %cst_240 = arith.constant dense<0.000000e+00> : vector<8x128xf32>
    %416 = tpu.matmul %414, %415, %cst_240 {dimension_numbers = #tpu.dot_dimension_numbers<[1], [0], [0], [1], [0, 0, 1, 1], [], []>} : vector<8x128xf32>, vector<128x128xf32>, vector<8x128xf32> -> vector<8x128xf32>
    %c0_241 = arith.constant 0 : index
    %c0_242 = arith.constant 0 : index
    %417 = vector.load %arg16[%c0_241, %c0_242] : memref<128x128xf32, #tpu.memory_space<vmem>>, vector<128x128xf32>
    %cst_243 = arith.constant dense<0.000000e+00> : vector<8x128xf32>
    %418 = tpu.matmul %414, %417, %cst_243 {dimension_numbers = #tpu.dot_dimension_numbers<[1], [0], [0], [1], [0, 0, 1, 1], [], []>} : vector<8x128xf32>, vector<128x128xf32>, vector<8x128xf32> -> vector<8x128xf32>
    %c0_244 = arith.constant 0 : index
    %c0_245 = arith.constant 0 : index
    %419 = vector.load %arg17[%c0_244, %c0_245] : memref<128x128xf32, #tpu.memory_space<vmem>>, vector<128x128xf32>
    %cst_246 = arith.constant dense<0.000000e+00> : vector<8x128xf32>
    %420 = tpu.matmul %414, %419, %cst_246 {dimension_numbers = #tpu.dot_dimension_numbers<[1], [0], [0], [1], [0, 0, 1, 1], [], []>} : vector<8x128xf32>, vector<128x128xf32>, vector<8x128xf32> -> vector<8x128xf32>
    %421 = arith.index_cast %c1_i32_237 : i32 to index
    %c0_247 = arith.constant 0 : index
    %c0_248 = arith.constant 0 : index
    %422 = vector.load %arg26[%421, %c0_247, %c0_248] : memref<8x8x128xf32, #tpu.memory_space<vmem>>, vector<1x8x128xf32>
    %423 = vector.shape_cast %422 : vector<1x8x128xf32> to vector<8x128xf32>
    %424 = arith.addf %423, %416 : vector<8x128xf32>
    %425 = arith.negf %424 : vector<8x128xf32>
    %426 = math.exp %425 : vector<8x128xf32>
    %cst_249 = arith.constant 1.000000e+00 : f32
    %427 = vector.broadcast %cst_249 : f32 to vector<8x128xf32>
    %428 = arith.addf %427, %426 : vector<8x128xf32>
    %429 = arith.divf %427, %428 : vector<8x128xf32>
    %430 = arith.index_cast %c1_i32_237 : i32 to index
    %c0_250 = arith.constant 0 : index
    %c0_251 = arith.constant 0 : index
    %431 = vector.load %arg27[%430, %c0_250, %c0_251] : memref<8x8x128xf32, #tpu.memory_space<vmem>>, vector<1x8x128xf32>
    %432 = vector.shape_cast %431 : vector<1x8x128xf32> to vector<8x128xf32>
    %433 = arith.addf %432, %418 : vector<8x128xf32>
    %434 = arith.negf %433 : vector<8x128xf32>
    %435 = math.exp %434 : vector<8x128xf32>
    %cst_252 = arith.constant 1.000000e+00 : f32
    %436 = vector.broadcast %cst_252 : f32 to vector<8x128xf32>
    %437 = arith.addf %436, %435 : vector<8x128xf32>
    %438 = arith.divf %436, %437 : vector<8x128xf32>
    %439 = arith.index_cast %c1_i32_237 : i32 to index
    %c0_253 = arith.constant 0 : index
    %c0_254 = arith.constant 0 : index
    %440 = vector.load %arg28[%439, %c0_253, %c0_254] : memref<8x8x128xf32, #tpu.memory_space<vmem>>, vector<1x8x128xf32>
    %441 = vector.shape_cast %440 : vector<1x8x128xf32> to vector<8x128xf32>
    %442 = vector.broadcast %376 : vector<1x128xf32> to vector<8x128xf32>
    %443 = arith.addf %420, %442 : vector<8x128xf32>
    %444 = arith.mulf %429, %443 : vector<8x128xf32>
    %445 = arith.addf %441, %444 : vector<8x128xf32>
    %446 = math.tanh %445 : vector<8x128xf32>
    %cst_255 = arith.constant 1.000000e+00 : f32
    %447 = vector.broadcast %cst_255 : f32 to vector<8x128xf32>
    %448 = arith.subf %447, %438 : vector<8x128xf32>
    %449 = arith.mulf %448, %446 : vector<8x128xf32>
    %450 = arith.mulf %438, %414 : vector<8x128xf32>
    %451 = arith.addf %449, %450 : vector<8x128xf32>
    %c2_i32_256 = arith.constant 2 : i32
    %c0_257 = arith.constant 0 : index
    %c0_258 = arith.constant 0 : index
    %452 = vector.load %arg15[%c0_257, %c0_258] : memref<128x128xf32, #tpu.memory_space<vmem>>, vector<128x128xf32>
    %cst_259 = arith.constant dense<0.000000e+00> : vector<8x128xf32>
    %453 = tpu.matmul %451, %452, %cst_259 {dimension_numbers = #tpu.dot_dimension_numbers<[1], [0], [0], [1], [0, 0, 1, 1], [], []>} : vector<8x128xf32>, vector<128x128xf32>, vector<8x128xf32> -> vector<8x128xf32>
    %c0_260 = arith.constant 0 : index
    %c0_261 = arith.constant 0 : index
    %454 = vector.load %arg16[%c0_260, %c0_261] : memref<128x128xf32, #tpu.memory_space<vmem>>, vector<128x128xf32>
    %cst_262 = arith.constant dense<0.000000e+00> : vector<8x128xf32>
    %455 = tpu.matmul %451, %454, %cst_262 {dimension_numbers = #tpu.dot_dimension_numbers<[1], [0], [0], [1], [0, 0, 1, 1], [], []>} : vector<8x128xf32>, vector<128x128xf32>, vector<8x128xf32> -> vector<8x128xf32>
    %c0_263 = arith.constant 0 : index
    %c0_264 = arith.constant 0 : index
    %456 = vector.load %arg17[%c0_263, %c0_264] : memref<128x128xf32, #tpu.memory_space<vmem>>, vector<128x128xf32>
    %cst_265 = arith.constant dense<0.000000e+00> : vector<8x128xf32>
    %457 = tpu.matmul %451, %456, %cst_265 {dimension_numbers = #tpu.dot_dimension_numbers<[1], [0], [0], [1], [0, 0, 1, 1], [], []>} : vector<8x128xf32>, vector<128x128xf32>, vector<8x128xf32> -> vector<8x128xf32>
    %458 = arith.index_cast %c2_i32_256 : i32 to index
    %c0_266 = arith.constant 0 : index
    %c0_267 = arith.constant 0 : index
    %459 = vector.load %arg26[%458, %c0_266, %c0_267] : memref<8x8x128xf32, #tpu.memory_space<vmem>>, vector<1x8x128xf32>
    %460 = vector.shape_cast %459 : vector<1x8x128xf32> to vector<8x128xf32>
    %461 = arith.addf %460, %453 : vector<8x128xf32>
    %462 = arith.negf %461 : vector<8x128xf32>
    %463 = math.exp %462 : vector<8x128xf32>
    %cst_268 = arith.constant 1.000000e+00 : f32
    %464 = vector.broadcast %cst_268 : f32 to vector<8x128xf32>
    %465 = arith.addf %464, %463 : vector<8x128xf32>
    %466 = arith.divf %464, %465 : vector<8x128xf32>
    %467 = arith.index_cast %c2_i32_256 : i32 to index
    %c0_269 = arith.constant 0 : index
    %c0_270 = arith.constant 0 : index
    %468 = vector.load %arg27[%467, %c0_269, %c0_270] : memref<8x8x128xf32, #tpu.memory_space<vmem>>, vector<1x8x128xf32>
    %469 = vector.shape_cast %468 : vector<1x8x128xf32> to vector<8x128xf32>
    %470 = arith.addf %469, %455 : vector<8x128xf32>
    %471 = arith.negf %470 : vector<8x128xf32>
    %472 = math.exp %471 : vector<8x128xf32>
    %cst_271 = arith.constant 1.000000e+00 : f32
    %473 = vector.broadcast %cst_271 : f32 to vector<8x128xf32>
    %474 = arith.addf %473, %472 : vector<8x128xf32>
    %475 = arith.divf %473, %474 : vector<8x128xf32>
    %476 = arith.index_cast %c2_i32_256 : i32 to index
    %c0_272 = arith.constant 0 : index
    %c0_273 = arith.constant 0 : index
    %477 = vector.load %arg28[%476, %c0_272, %c0_273] : memref<8x8x128xf32, #tpu.memory_space<vmem>>, vector<1x8x128xf32>
    %478 = vector.shape_cast %477 : vector<1x8x128xf32> to vector<8x128xf32>
    %479 = vector.broadcast %376 : vector<1x128xf32> to vector<8x128xf32>
    %480 = arith.addf %457, %479 : vector<8x128xf32>
    %481 = arith.mulf %466, %480 : vector<8x128xf32>
    %482 = arith.addf %478, %481 : vector<8x128xf32>
    %483 = math.tanh %482 : vector<8x128xf32>
    %cst_274 = arith.constant 1.000000e+00 : f32
    %484 = vector.broadcast %cst_274 : f32 to vector<8x128xf32>
    %485 = arith.subf %484, %475 : vector<8x128xf32>
    %486 = arith.mulf %485, %483 : vector<8x128xf32>
    %487 = arith.mulf %475, %451 : vector<8x128xf32>
    %488 = arith.addf %486, %487 : vector<8x128xf32>
    %c3_i32_275 = arith.constant 3 : i32
    %c0_276 = arith.constant 0 : index
    %c0_277 = arith.constant 0 : index
    %489 = vector.load %arg15[%c0_276, %c0_277] : memref<128x128xf32, #tpu.memory_space<vmem>>, vector<128x128xf32>
    %cst_278 = arith.constant dense<0.000000e+00> : vector<8x128xf32>
    %490 = tpu.matmul %488, %489, %cst_278 {dimension_numbers = #tpu.dot_dimension_numbers<[1], [0], [0], [1], [0, 0, 1, 1], [], []>} : vector<8x128xf32>, vector<128x128xf32>, vector<8x128xf32> -> vector<8x128xf32>
    %c0_279 = arith.constant 0 : index
    %c0_280 = arith.constant 0 : index
    %491 = vector.load %arg16[%c0_279, %c0_280] : memref<128x128xf32, #tpu.memory_space<vmem>>, vector<128x128xf32>
    %cst_281 = arith.constant dense<0.000000e+00> : vector<8x128xf32>
    %492 = tpu.matmul %488, %491, %cst_281 {dimension_numbers = #tpu.dot_dimension_numbers<[1], [0], [0], [1], [0, 0, 1, 1], [], []>} : vector<8x128xf32>, vector<128x128xf32>, vector<8x128xf32> -> vector<8x128xf32>
    %c0_282 = arith.constant 0 : index
    %c0_283 = arith.constant 0 : index
    %493 = vector.load %arg17[%c0_282, %c0_283] : memref<128x128xf32, #tpu.memory_space<vmem>>, vector<128x128xf32>
    %cst_284 = arith.constant dense<0.000000e+00> : vector<8x128xf32>
    %494 = tpu.matmul %488, %493, %cst_284 {dimension_numbers = #tpu.dot_dimension_numbers<[1], [0], [0], [1], [0, 0, 1, 1], [], []>} : vector<8x128xf32>, vector<128x128xf32>, vector<8x128xf32> -> vector<8x128xf32>
    %495 = arith.index_cast %c3_i32_275 : i32 to index
    %c0_285 = arith.constant 0 : index
    %c0_286 = arith.constant 0 : index
    %496 = vector.load %arg26[%495, %c0_285, %c0_286] : memref<8x8x128xf32, #tpu.memory_space<vmem>>, vector<1x8x128xf32>
    %497 = vector.shape_cast %496 : vector<1x8x128xf32> to vector<8x128xf32>
    %498 = arith.addf %497, %490 : vector<8x128xf32>
    %499 = arith.negf %498 : vector<8x128xf32>
    %500 = math.exp %499 : vector<8x128xf32>
    %cst_287 = arith.constant 1.000000e+00 : f32
    %501 = vector.broadcast %cst_287 : f32 to vector<8x128xf32>
    %502 = arith.addf %501, %500 : vector<8x128xf32>
    %503 = arith.divf %501, %502 : vector<8x128xf32>
    %504 = arith.index_cast %c3_i32_275 : i32 to index
    %c0_288 = arith.constant 0 : index
    %c0_289 = arith.constant 0 : index
    %505 = vector.load %arg27[%504, %c0_288, %c0_289] : memref<8x8x128xf32, #tpu.memory_space<vmem>>, vector<1x8x128xf32>
    %506 = vector.shape_cast %505 : vector<1x8x128xf32> to vector<8x128xf32>
    %507 = arith.addf %506, %492 : vector<8x128xf32>
    %508 = arith.negf %507 : vector<8x128xf32>
    %509 = math.exp %508 : vector<8x128xf32>
    %cst_290 = arith.constant 1.000000e+00 : f32
    %510 = vector.broadcast %cst_290 : f32 to vector<8x128xf32>
    %511 = arith.addf %510, %509 : vector<8x128xf32>
    %512 = arith.divf %510, %511 : vector<8x128xf32>
    %513 = arith.index_cast %c3_i32_275 : i32 to index
    %c0_291 = arith.constant 0 : index
    %c0_292 = arith.constant 0 : index
    %514 = vector.load %arg28[%513, %c0_291, %c0_292] : memref<8x8x128xf32, #tpu.memory_space<vmem>>, vector<1x8x128xf32>
    %515 = vector.shape_cast %514 : vector<1x8x128xf32> to vector<8x128xf32>
    %516 = vector.broadcast %376 : vector<1x128xf32> to vector<8x128xf32>
    %517 = arith.addf %494, %516 : vector<8x128xf32>
    %518 = arith.mulf %503, %517 : vector<8x128xf32>
    %519 = arith.addf %515, %518 : vector<8x128xf32>
    %520 = math.tanh %519 : vector<8x128xf32>
    %cst_293 = arith.constant 1.000000e+00 : f32
    %521 = vector.broadcast %cst_293 : f32 to vector<8x128xf32>
    %522 = arith.subf %521, %512 : vector<8x128xf32>
    %523 = arith.mulf %522, %520 : vector<8x128xf32>
    %524 = arith.mulf %512, %488 : vector<8x128xf32>
    %525 = arith.addf %523, %524 : vector<8x128xf32>
    %c4_i32_294 = arith.constant 4 : i32
    %c0_295 = arith.constant 0 : index
    %c0_296 = arith.constant 0 : index
    %526 = vector.load %arg15[%c0_295, %c0_296] : memref<128x128xf32, #tpu.memory_space<vmem>>, vector<128x128xf32>
    %cst_297 = arith.constant dense<0.000000e+00> : vector<8x128xf32>
    %527 = tpu.matmul %525, %526, %cst_297 {dimension_numbers = #tpu.dot_dimension_numbers<[1], [0], [0], [1], [0, 0, 1, 1], [], []>} : vector<8x128xf32>, vector<128x128xf32>, vector<8x128xf32> -> vector<8x128xf32>
    %c0_298 = arith.constant 0 : index
    %c0_299 = arith.constant 0 : index
    %528 = vector.load %arg16[%c0_298, %c0_299] : memref<128x128xf32, #tpu.memory_space<vmem>>, vector<128x128xf32>
    %cst_300 = arith.constant dense<0.000000e+00> : vector<8x128xf32>
    %529 = tpu.matmul %525, %528, %cst_300 {dimension_numbers = #tpu.dot_dimension_numbers<[1], [0], [0], [1], [0, 0, 1, 1], [], []>} : vector<8x128xf32>, vector<128x128xf32>, vector<8x128xf32> -> vector<8x128xf32>
    %c0_301 = arith.constant 0 : index
    %c0_302 = arith.constant 0 : index
    %530 = vector.load %arg17[%c0_301, %c0_302] : memref<128x128xf32, #tpu.memory_space<vmem>>, vector<128x128xf32>
    %cst_303 = arith.constant dense<0.000000e+00> : vector<8x128xf32>
    %531 = tpu.matmul %525, %530, %cst_303 {dimension_numbers = #tpu.dot_dimension_numbers<[1], [0], [0], [1], [0, 0, 1, 1], [], []>} : vector<8x128xf32>, vector<128x128xf32>, vector<8x128xf32> -> vector<8x128xf32>
    %532 = arith.index_cast %c4_i32_294 : i32 to index
    %c0_304 = arith.constant 0 : index
    %c0_305 = arith.constant 0 : index
    %533 = vector.load %arg26[%532, %c0_304, %c0_305] : memref<8x8x128xf32, #tpu.memory_space<vmem>>, vector<1x8x128xf32>
    %534 = vector.shape_cast %533 : vector<1x8x128xf32> to vector<8x128xf32>
    %535 = arith.addf %534, %527 : vector<8x128xf32>
    %536 = arith.negf %535 : vector<8x128xf32>
    %537 = math.exp %536 : vector<8x128xf32>
    %cst_306 = arith.constant 1.000000e+00 : f32
    %538 = vector.broadcast %cst_306 : f32 to vector<8x128xf32>
    %539 = arith.addf %538, %537 : vector<8x128xf32>
    %540 = arith.divf %538, %539 : vector<8x128xf32>
    %541 = arith.index_cast %c4_i32_294 : i32 to index
    %c0_307 = arith.constant 0 : index
    %c0_308 = arith.constant 0 : index
    %542 = vector.load %arg27[%541, %c0_307, %c0_308] : memref<8x8x128xf32, #tpu.memory_space<vmem>>, vector<1x8x128xf32>
    %543 = vector.shape_cast %542 : vector<1x8x128xf32> to vector<8x128xf32>
    %544 = arith.addf %543, %529 : vector<8x128xf32>
    %545 = arith.negf %544 : vector<8x128xf32>
    %546 = math.exp %545 : vector<8x128xf32>
    %cst_309 = arith.constant 1.000000e+00 : f32
    %547 = vector.broadcast %cst_309 : f32 to vector<8x128xf32>
    %548 = arith.addf %547, %546 : vector<8x128xf32>
    %549 = arith.divf %547, %548 : vector<8x128xf32>
    %550 = arith.index_cast %c4_i32_294 : i32 to index
    %c0_310 = arith.constant 0 : index
    %c0_311 = arith.constant 0 : index
    %551 = vector.load %arg28[%550, %c0_310, %c0_311] : memref<8x8x128xf32, #tpu.memory_space<vmem>>, vector<1x8x128xf32>
    %552 = vector.shape_cast %551 : vector<1x8x128xf32> to vector<8x128xf32>
    %553 = vector.broadcast %376 : vector<1x128xf32> to vector<8x128xf32>
    %554 = arith.addf %531, %553 : vector<8x128xf32>
    %555 = arith.mulf %540, %554 : vector<8x128xf32>
    %556 = arith.addf %552, %555 : vector<8x128xf32>
    %557 = math.tanh %556 : vector<8x128xf32>
    %cst_312 = arith.constant 1.000000e+00 : f32
    %558 = vector.broadcast %cst_312 : f32 to vector<8x128xf32>
    %559 = arith.subf %558, %549 : vector<8x128xf32>
    %560 = arith.mulf %559, %557 : vector<8x128xf32>
    %561 = arith.mulf %549, %525 : vector<8x128xf32>
    %562 = arith.addf %560, %561 : vector<8x128xf32>
    %c5_i32_313 = arith.constant 5 : i32
    %c0_314 = arith.constant 0 : index
    %c0_315 = arith.constant 0 : index
    %563 = vector.load %arg15[%c0_314, %c0_315] : memref<128x128xf32, #tpu.memory_space<vmem>>, vector<128x128xf32>
    %cst_316 = arith.constant dense<0.000000e+00> : vector<8x128xf32>
    %564 = tpu.matmul %562, %563, %cst_316 {dimension_numbers = #tpu.dot_dimension_numbers<[1], [0], [0], [1], [0, 0, 1, 1], [], []>} : vector<8x128xf32>, vector<128x128xf32>, vector<8x128xf32> -> vector<8x128xf32>
    %c0_317 = arith.constant 0 : index
    %c0_318 = arith.constant 0 : index
    %565 = vector.load %arg16[%c0_317, %c0_318] : memref<128x128xf32, #tpu.memory_space<vmem>>, vector<128x128xf32>
    %cst_319 = arith.constant dense<0.000000e+00> : vector<8x128xf32>
    %566 = tpu.matmul %562, %565, %cst_319 {dimension_numbers = #tpu.dot_dimension_numbers<[1], [0], [0], [1], [0, 0, 1, 1], [], []>} : vector<8x128xf32>, vector<128x128xf32>, vector<8x128xf32> -> vector<8x128xf32>
    %c0_320 = arith.constant 0 : index
    %c0_321 = arith.constant 0 : index
    %567 = vector.load %arg17[%c0_320, %c0_321] : memref<128x128xf32, #tpu.memory_space<vmem>>, vector<128x128xf32>
    %cst_322 = arith.constant dense<0.000000e+00> : vector<8x128xf32>
    %568 = tpu.matmul %562, %567, %cst_322 {dimension_numbers = #tpu.dot_dimension_numbers<[1], [0], [0], [1], [0, 0, 1, 1], [], []>} : vector<8x128xf32>, vector<128x128xf32>, vector<8x128xf32> -> vector<8x128xf32>
    %569 = arith.index_cast %c5_i32_313 : i32 to index
    %c0_323 = arith.constant 0 : index
    %c0_324 = arith.constant 0 : index
    %570 = vector.load %arg26[%569, %c0_323, %c0_324] : memref<8x8x128xf32, #tpu.memory_space<vmem>>, vector<1x8x128xf32>
    %571 = vector.shape_cast %570 : vector<1x8x128xf32> to vector<8x128xf32>
    %572 = arith.addf %571, %564 : vector<8x128xf32>
    %573 = arith.negf %572 : vector<8x128xf32>
    %574 = math.exp %573 : vector<8x128xf32>
    %cst_325 = arith.constant 1.000000e+00 : f32
    %575 = vector.broadcast %cst_325 : f32 to vector<8x128xf32>
    %576 = arith.addf %575, %574 : vector<8x128xf32>
    %577 = arith.divf %575, %576 : vector<8x128xf32>
    %578 = arith.index_cast %c5_i32_313 : i32 to index
    %c0_326 = arith.constant 0 : index
    %c0_327 = arith.constant 0 : index
    %579 = vector.load %arg27[%578, %c0_326, %c0_327] : memref<8x8x128xf32, #tpu.memory_space<vmem>>, vector<1x8x128xf32>
    %580 = vector.shape_cast %579 : vector<1x8x128xf32> to vector<8x128xf32>
    %581 = arith.addf %580, %566 : vector<8x128xf32>
    %582 = arith.negf %581 : vector<8x128xf32>
    %583 = math.exp %582 : vector<8x128xf32>
    %cst_328 = arith.constant 1.000000e+00 : f32
    %584 = vector.broadcast %cst_328 : f32 to vector<8x128xf32>
    %585 = arith.addf %584, %583 : vector<8x128xf32>
    %586 = arith.divf %584, %585 : vector<8x128xf32>
    %587 = arith.index_cast %c5_i32_313 : i32 to index
    %c0_329 = arith.constant 0 : index
    %c0_330 = arith.constant 0 : index
    %588 = vector.load %arg28[%587, %c0_329, %c0_330] : memref<8x8x128xf32, #tpu.memory_space<vmem>>, vector<1x8x128xf32>
    %589 = vector.shape_cast %588 : vector<1x8x128xf32> to vector<8x128xf32>
    %590 = vector.broadcast %376 : vector<1x128xf32> to vector<8x128xf32>
    %591 = arith.addf %568, %590 : vector<8x128xf32>
    %592 = arith.mulf %577, %591 : vector<8x128xf32>
    %593 = arith.addf %589, %592 : vector<8x128xf32>
    %594 = math.tanh %593 : vector<8x128xf32>
    %cst_331 = arith.constant 1.000000e+00 : f32
    %595 = vector.broadcast %cst_331 : f32 to vector<8x128xf32>
    %596 = arith.subf %595, %586 : vector<8x128xf32>
    %597 = arith.mulf %596, %594 : vector<8x128xf32>
    %598 = arith.mulf %586, %562 : vector<8x128xf32>
    %599 = arith.addf %597, %598 : vector<8x128xf32>
    %c6_i32_332 = arith.constant 6 : i32
    %c0_333 = arith.constant 0 : index
    %c0_334 = arith.constant 0 : index
    %600 = vector.load %arg15[%c0_333, %c0_334] : memref<128x128xf32, #tpu.memory_space<vmem>>, vector<128x128xf32>
    %cst_335 = arith.constant dense<0.000000e+00> : vector<8x128xf32>
    %601 = tpu.matmul %599, %600, %cst_335 {dimension_numbers = #tpu.dot_dimension_numbers<[1], [0], [0], [1], [0, 0, 1, 1], [], []>} : vector<8x128xf32>, vector<128x128xf32>, vector<8x128xf32> -> vector<8x128xf32>
    %c0_336 = arith.constant 0 : index
    %c0_337 = arith.constant 0 : index
    %602 = vector.load %arg16[%c0_336, %c0_337] : memref<128x128xf32, #tpu.memory_space<vmem>>, vector<128x128xf32>
    %cst_338 = arith.constant dense<0.000000e+00> : vector<8x128xf32>
    %603 = tpu.matmul %599, %602, %cst_338 {dimension_numbers = #tpu.dot_dimension_numbers<[1], [0], [0], [1], [0, 0, 1, 1], [], []>} : vector<8x128xf32>, vector<128x128xf32>, vector<8x128xf32> -> vector<8x128xf32>
    %c0_339 = arith.constant 0 : index
    %c0_340 = arith.constant 0 : index
    %604 = vector.load %arg17[%c0_339, %c0_340] : memref<128x128xf32, #tpu.memory_space<vmem>>, vector<128x128xf32>
    %cst_341 = arith.constant dense<0.000000e+00> : vector<8x128xf32>
    %605 = tpu.matmul %599, %604, %cst_341 {dimension_numbers = #tpu.dot_dimension_numbers<[1], [0], [0], [1], [0, 0, 1, 1], [], []>} : vector<8x128xf32>, vector<128x128xf32>, vector<8x128xf32> -> vector<8x128xf32>
    %606 = arith.index_cast %c6_i32_332 : i32 to index
    %c0_342 = arith.constant 0 : index
    %c0_343 = arith.constant 0 : index
    %607 = vector.load %arg26[%606, %c0_342, %c0_343] : memref<8x8x128xf32, #tpu.memory_space<vmem>>, vector<1x8x128xf32>
    %608 = vector.shape_cast %607 : vector<1x8x128xf32> to vector<8x128xf32>
    %609 = arith.addf %608, %601 : vector<8x128xf32>
    %610 = arith.negf %609 : vector<8x128xf32>
    %611 = math.exp %610 : vector<8x128xf32>
    %cst_344 = arith.constant 1.000000e+00 : f32
    %612 = vector.broadcast %cst_344 : f32 to vector<8x128xf32>
    %613 = arith.addf %612, %611 : vector<8x128xf32>
    %614 = arith.divf %612, %613 : vector<8x128xf32>
    %615 = arith.index_cast %c6_i32_332 : i32 to index
    %c0_345 = arith.constant 0 : index
    %c0_346 = arith.constant 0 : index
    %616 = vector.load %arg27[%615, %c0_345, %c0_346] : memref<8x8x128xf32, #tpu.memory_space<vmem>>, vector<1x8x128xf32>
    %617 = vector.shape_cast %616 : vector<1x8x128xf32> to vector<8x128xf32>
    %618 = arith.addf %617, %603 : vector<8x128xf32>
    %619 = arith.negf %618 : vector<8x128xf32>
    %620 = math.exp %619 : vector<8x128xf32>
    %cst_347 = arith.constant 1.000000e+00 : f32
    %621 = vector.broadcast %cst_347 : f32 to vector<8x128xf32>
    %622 = arith.addf %621, %620 : vector<8x128xf32>
    %623 = arith.divf %621, %622 : vector<8x128xf32>
    %624 = arith.index_cast %c6_i32_332 : i32 to index
    %c0_348 = arith.constant 0 : index
    %c0_349 = arith.constant 0 : index
    %625 = vector.load %arg28[%624, %c0_348, %c0_349] : memref<8x8x128xf32, #tpu.memory_space<vmem>>, vector<1x8x128xf32>
    %626 = vector.shape_cast %625 : vector<1x8x128xf32> to vector<8x128xf32>
    %627 = vector.broadcast %376 : vector<1x128xf32> to vector<8x128xf32>
    %628 = arith.addf %605, %627 : vector<8x128xf32>
    %629 = arith.mulf %614, %628 : vector<8x128xf32>
    %630 = arith.addf %626, %629 : vector<8x128xf32>
    %631 = math.tanh %630 : vector<8x128xf32>
    %cst_350 = arith.constant 1.000000e+00 : f32
    %632 = vector.broadcast %cst_350 : f32 to vector<8x128xf32>
    %633 = arith.subf %632, %623 : vector<8x128xf32>
    %634 = arith.mulf %633, %631 : vector<8x128xf32>
    %635 = arith.mulf %623, %599 : vector<8x128xf32>
    %636 = arith.addf %634, %635 : vector<8x128xf32>
    %c7_i32_351 = arith.constant 7 : i32
    %c0_352 = arith.constant 0 : index
    %c0_353 = arith.constant 0 : index
    %637 = vector.load %arg15[%c0_352, %c0_353] : memref<128x128xf32, #tpu.memory_space<vmem>>, vector<128x128xf32>
    %cst_354 = arith.constant dense<0.000000e+00> : vector<8x128xf32>
    %638 = tpu.matmul %636, %637, %cst_354 {dimension_numbers = #tpu.dot_dimension_numbers<[1], [0], [0], [1], [0, 0, 1, 1], [], []>} : vector<8x128xf32>, vector<128x128xf32>, vector<8x128xf32> -> vector<8x128xf32>
    %c0_355 = arith.constant 0 : index
    %c0_356 = arith.constant 0 : index
    %639 = vector.load %arg16[%c0_355, %c0_356] : memref<128x128xf32, #tpu.memory_space<vmem>>, vector<128x128xf32>
    %cst_357 = arith.constant dense<0.000000e+00> : vector<8x128xf32>
    %640 = tpu.matmul %636, %639, %cst_357 {dimension_numbers = #tpu.dot_dimension_numbers<[1], [0], [0], [1], [0, 0, 1, 1], [], []>} : vector<8x128xf32>, vector<128x128xf32>, vector<8x128xf32> -> vector<8x128xf32>
    %c0_358 = arith.constant 0 : index
    %c0_359 = arith.constant 0 : index
    %641 = vector.load %arg17[%c0_358, %c0_359] : memref<128x128xf32, #tpu.memory_space<vmem>>, vector<128x128xf32>
    %cst_360 = arith.constant dense<0.000000e+00> : vector<8x128xf32>
    %642 = tpu.matmul %636, %641, %cst_360 {dimension_numbers = #tpu.dot_dimension_numbers<[1], [0], [0], [1], [0, 0, 1, 1], [], []>} : vector<8x128xf32>, vector<128x128xf32>, vector<8x128xf32> -> vector<8x128xf32>
    %643 = arith.index_cast %c7_i32_351 : i32 to index
    %c0_361 = arith.constant 0 : index
    %c0_362 = arith.constant 0 : index
    %644 = vector.load %arg26[%643, %c0_361, %c0_362] : memref<8x8x128xf32, #tpu.memory_space<vmem>>, vector<1x8x128xf32>
    %645 = vector.shape_cast %644 : vector<1x8x128xf32> to vector<8x128xf32>
    %646 = arith.addf %645, %638 : vector<8x128xf32>
    %647 = arith.negf %646 : vector<8x128xf32>
    %648 = math.exp %647 : vector<8x128xf32>
    %cst_363 = arith.constant 1.000000e+00 : f32
    %649 = vector.broadcast %cst_363 : f32 to vector<8x128xf32>
    %650 = arith.addf %649, %648 : vector<8x128xf32>
    %651 = arith.divf %649, %650 : vector<8x128xf32>
    %652 = arith.index_cast %c7_i32_351 : i32 to index
    %c0_364 = arith.constant 0 : index
    %c0_365 = arith.constant 0 : index
    %653 = vector.load %arg27[%652, %c0_364, %c0_365] : memref<8x8x128xf32, #tpu.memory_space<vmem>>, vector<1x8x128xf32>
    %654 = vector.shape_cast %653 : vector<1x8x128xf32> to vector<8x128xf32>
    %655 = arith.addf %654, %640 : vector<8x128xf32>
    %656 = arith.negf %655 : vector<8x128xf32>
    %657 = math.exp %656 : vector<8x128xf32>
    %cst_366 = arith.constant 1.000000e+00 : f32
    %658 = vector.broadcast %cst_366 : f32 to vector<8x128xf32>
    %659 = arith.addf %658, %657 : vector<8x128xf32>
    %660 = arith.divf %658, %659 : vector<8x128xf32>
    %661 = arith.index_cast %c7_i32_351 : i32 to index
    %c0_367 = arith.constant 0 : index
    %c0_368 = arith.constant 0 : index
    %662 = vector.load %arg28[%661, %c0_367, %c0_368] : memref<8x8x128xf32, #tpu.memory_space<vmem>>, vector<1x8x128xf32>
    %663 = vector.shape_cast %662 : vector<1x8x128xf32> to vector<8x128xf32>
    %664 = vector.broadcast %376 : vector<1x128xf32> to vector<8x128xf32>
    %665 = arith.addf %642, %664 : vector<8x128xf32>
    %666 = arith.mulf %651, %665 : vector<8x128xf32>
    %667 = arith.addf %663, %666 : vector<8x128xf32>
    %668 = math.tanh %667 : vector<8x128xf32>
    %cst_369 = arith.constant 1.000000e+00 : f32
    %669 = vector.broadcast %cst_369 : f32 to vector<8x128xf32>
    %670 = arith.subf %669, %660 : vector<8x128xf32>
    %671 = arith.mulf %670, %668 : vector<8x128xf32>
    %672 = arith.mulf %660, %636 : vector<8x128xf32>
    %673 = arith.addf %671, %672 : vector<8x128xf32>
    %c8_i32_370 = arith.constant 8 : i32
    %c0_371 = arith.constant 0 : index
    %c0_372 = arith.constant 0 : index
    %674 = vector.load %arg22[%c0_371, %c0_372] : memref<128x128xf32, #tpu.memory_space<vmem>>, vector<128x128xf32>
    %cst_373 = arith.constant dense<0.000000e+00> : vector<8x128xf32>
    %675 = tpu.matmul %673, %674, %cst_373 {dimension_numbers = #tpu.dot_dimension_numbers<[1], [0], [0], [1], [0, 0, 1, 1], [], []>} : vector<8x128xf32>, vector<128x128xf32>, vector<8x128xf32> -> vector<8x128xf32>
    %c0_374 = arith.constant 0 : index
    %c0_375 = arith.constant 0 : index
    %676 = vector.load %arg23[%c0_374, %c0_375] : memref<1x128xf32, #tpu.memory_space<vmem>>, vector<1x128xf32>
    %677 = vector.broadcast %676 : vector<1x128xf32> to vector<8x128xf32>
    %678 = arith.addf %675, %677 : vector<8x128xf32>
    %c0_376 = arith.constant 0 : index
    %c0_377 = arith.constant 0 : index
    %679 = vector.load %arg24[%c0_376, %c0_377] : memref<8x128xf32, #tpu.memory_space<vmem>>, vector<8x128xf32>
    tpu.vector_store %arg24[%c0_376, %c0_377], %678 {strides = array<i32>} : memref<8x128xf32, #tpu.memory_space<vmem>>, vector<8x128xf32>,
    return
  }
  func.func @transform_0(%arg0: i32) -> (i32, i32, i32) {
    %c0_i32 = arith.constant 0 : i32
    %c0_i32_0 = arith.constant 0 : i32
    %c0_i32_1 = arith.constant 0 : i32
    return %c0_i32, %arg0, %c0_i32_0 : i32, i32, i32
  }
  func.func @transform_1(%arg0: i32) -> (i32, i32) {
    %c0_i32 = arith.constant 0 : i32
    %c0_i32_0 = arith.constant 0 : i32
    %c0_i32_1 = arith.constant 0 : i32
    return %c0_i32, %c0_i32_0 : i32, i32
  }
  func.func @transform_2(%arg0: i32) -> (i32, i32) {
    %c0_i32 = arith.constant 0 : i32
    %c0_i32_0 = arith.constant 0 : i32
    %c0_i32_1 = arith.constant 0 : i32
    return %c0_i32, %c0_i32_0 : i32, i32
  }
  func.func @transform_3(%arg0: i32) -> (i32, i32) {
    %c0_i32 = arith.constant 0 : i32
    %c0_i32_0 = arith.constant 0 : i32
    %c0_i32_1 = arith.constant 0 : i32
    return %c0_i32, %c0_i32_0 : i32, i32
  }
  func.func @transform_4(%arg0: i32) -> (i32, i32) {
    %c0_i32 = arith.constant 0 : i32
    %c0_i32_0 = arith.constant 0 : i32
    %c0_i32_1 = arith.constant 0 : i32
    return %c0_i32, %c0_i32_0 : i32, i32
  }
  func.func @transform_5(%arg0: i32) -> (i32, i32) {
    %c0_i32 = arith.constant 0 : i32
    %c0_i32_0 = arith.constant 0 : i32
    %c0_i32_1 = arith.constant 0 : i32
    return %c0_i32, %c0_i32_0 : i32, i32
  }
  func.func @transform_6(%arg0: i32) -> (i32, i32) {
    %c0_i32 = arith.constant 0 : i32
    %c0_i32_0 = arith.constant 0 : i32
    %c0_i32_1 = arith.constant 0 : i32
    return %c0_i32, %c0_i32_0 : i32, i32
  }
  func.func @transform_7(%arg0: i32) -> (i32, i32) {
    %c0_i32 = arith.constant 0 : i32
    %c0_i32_0 = arith.constant 0 : i32
    %c0_i32_1 = arith.constant 0 : i32
    return %c0_i32, %c0_i32_0 : i32, i32
  }
  func.func @transform_8(%arg0: i32) -> (i32, i32) {
    %c0_i32 = arith.constant 0 : i32
    %c0_i32_0 = arith.constant 0 : i32
    %c0_i32_1 = arith.constant 0 : i32
    return %c0_i32, %c0_i32_0 : i32, i32
  }
  func.func @transform_9(%arg0: i32) -> (i32, i32) {
    %c0_i32 = arith.constant 0 : i32
    %c0_i32_0 = arith.constant 0 : i32
    %c0_i32_1 = arith.constant 0 : i32
    return %c0_i32, %c0_i32_0 : i32, i32
  }
  func.func @transform_10(%arg0: i32) -> (i32, i32) {
    %c0_i32 = arith.constant 0 : i32
    %c0_i32_0 = arith.constant 0 : i32
    %c0_i32_1 = arith.constant 0 : i32
    return %c0_i32, %c0_i32_0 : i32, i32
  }
  func.func @transform_11(%arg0: i32) -> (i32, i32) {
    %c0_i32 = arith.constant 0 : i32
    %c0_i32_0 = arith.constant 0 : i32
    %c0_i32_1 = arith.constant 0 : i32
    return %c0_i32, %c0_i32_0 : i32, i32
  }
  func.func @transform_12(%arg0: i32) -> (i32, i32) {
    %c0_i32 = arith.constant 0 : i32
    %c0_i32_0 = arith.constant 0 : i32
    %c0_i32_1 = arith.constant 0 : i32
    return %c0_i32, %c0_i32_0 : i32, i32
  }
  func.func @transform_13(%arg0: i32) -> (i32, i32) {
    %c0_i32 = arith.constant 0 : i32
    %c0_i32_0 = arith.constant 0 : i32
    %c0_i32_1 = arith.constant 0 : i32
    return %c0_i32, %c0_i32_0 : i32, i32
  }
  func.func @transform_14(%arg0: i32) -> (i32, i32) {
    %c0_i32 = arith.constant 0 : i32
    %c0_i32_0 = arith.constant 0 : i32
    %c0_i32_1 = arith.constant 0 : i32
    return %c0_i32, %c0_i32_0 : i32, i32
  }
  func.func @transform_15(%arg0: i32) -> (i32, i32) {
    %c0_i32 = arith.constant 0 : i32
    %c0_i32_0 = arith.constant 0 : i32
    %c0_i32_1 = arith.constant 0 : i32
    return %c0_i32, %c0_i32_0 : i32, i32
  }
  func.func @transform_16(%arg0: i32) -> (i32, i32) {
    %c0_i32 = arith.constant 0 : i32
    %c0_i32_0 = arith.constant 0 : i32
    %c0_i32_1 = arith.constant 0 : i32
    return %c0_i32, %c0_i32_0 : i32, i32
  }
  func.func @transform_17(%arg0: i32) -> (i32, i32) {
    %c0_i32 = arith.constant 0 : i32
    %c0_i32_0 = arith.constant 0 : i32
    %c0_i32_1 = arith.constant 0 : i32
    return %c0_i32, %c0_i32_0 : i32, i32
  }
  func.func @transform_18(%arg0: i32) -> (i32, i32) {
    %c0_i32 = arith.constant 0 : i32
    %c0_i32_0 = arith.constant 0 : i32
    %c0_i32_1 = arith.constant 0 : i32
    return %c0_i32, %c0_i32_0 : i32, i32
  }
  func.func @transform_19(%arg0: i32) -> (i32, i32) {
    %c0_i32 = arith.constant 0 : i32
    %c0_i32_0 = arith.constant 0 : i32
    %c0_i32_1 = arith.constant 0 : i32
    return %c0_i32, %c0_i32_0 : i32, i32
  }
  func.func @transform_20(%arg0: i32) -> (i32, i32) {
    %c0_i32 = arith.constant 0 : i32
    %c0_i32_0 = arith.constant 0 : i32
    %c0_i32_1 = arith.constant 0 : i32
    return %c0_i32, %c0_i32_0 : i32, i32
  }
  func.func @transform_21(%arg0: i32) -> (i32, i32) {
    %c0_i32 = arith.constant 0 : i32
    %c0_i32_0 = arith.constant 0 : i32
    %c0_i32_1 = arith.constant 0 : i32
    return %c0_i32, %c0_i32_0 : i32, i32
  }
  func.func @transform_22(%arg0: i32) -> (i32, i32) {
    %c0_i32 = arith.constant 0 : i32
    %c0_i32_0 = arith.constant 0 : i32
    %c0_i32_1 = arith.constant 0 : i32
    return %c0_i32, %c0_i32_0 : i32, i32
  }
  func.func @transform_23(%arg0: i32) -> (i32, i32) {
    %c0_i32 = arith.constant 0 : i32
    %c0_i32_0 = arith.constant 0 : i32
    return %arg0, %c0_i32 : i32, i32
  }
}

</mosaic_0001>

<bundles_post_ra>
// kernel: gru_model_forward.1
= control target key start
LH: loop header
LB: loop body
LE: loop exit
PB: predicated region body
PF: predicated region fallthrough
CT: control target
= control target key end

     0   :  { %s11659_s0 = inlined_call_operand.vmem [shape: f32[8,8,128], index: 0, kind: input, shape index: {}]   ;;  %s11660_s1 = inlined_call_operand.hbm [shape: f32[128,128], index: 1, kind: input, shape index: {}]   ;;  %s11661_s2 = inlined_call_operand.hbm [shape: f32[128,128], index: 2, kind: input, shape index: {}]   ;;  %s11662_s3 = inlined_call_operand.hbm [shape: f32[128,128], index: 3, kind: input, shape index: {}]   ;;  %s11663_s4 = inlined_call_operand.hbm [shape: f32[128,128], index: 4, kind: input, shape index: {}]   ;;  %s11664_s5 = inlined_call_operand.hbm [shape: f32[128,128], index: 5, kind: input, shape index: {}]   ;;  %s11665_s6 = inlined_call_operand.hbm [shape: f32[128,128], index: 6, kind: input, shape index: {}]   ;;  %s11666_s7 = inlined_call_operand.vmem [shape: f32[1,128], index: 7, kind: input, shape index: {}]   ;;  %s11667_s8 = inlined_call_operand.vmem [shape: f32[1,128], index: 8, kind: input, shape index: {}]   ;;  %s11668_s9 = inlined_call_operand.vmem [shape: f32[1,128], index: 9, kind: input, shape index: {}]   ;;  %s11669_s10 = inlined_call_operand.vmem [shape: f32[1,128], index: 10, kind: input, shape index: {}]   ;;  %s11670_s11 = inlined_call_operand.hbm [shape: f32[128,128], index: 11, kind: input, shape index: {}]   ;;  %s11671_s12 = inlined_call_operand.hbm [shape: f32[128,128], index: 12, kind: input, shape index: {}]   ;;  %s11672_s13 = inlined_call_operand.hbm [shape: f32[128,128], index: 13, kind: input, shape index: {}]   ;;  %s11673_s14 = inlined_call_operand.hbm [shape: f32[128,128], index: 14, kind: input, shape index: {}]   ;;  %s11674_s15 = inlined_call_operand.hbm [shape: f32[128,128], index: 15, kind: input, shape index: {}]   ;;  %s11675_s16 = inlined_call_operand.hbm [shape: f32[128,128], index: 16, kind: input, shape index: {}]   ;;  %s11676_s17 = inlined_call_operand.vmem [shape: f32[1,128], index: 17, kind: input, shape index: {}]   ;;  %s11677_s18 = inlined_call_operand.vmem [shape: f32[1,128], index: 18, kind: input, shape index: {}]   ;;  %s11678_s19 = inlined_call_operand.vmem [shape: f32[1,128], index: 19, kind: input, shape index: {}]   ;;  %s11679_s20 = inlined_call_operand.vmem [shape: f32[1,128], index: 20, kind: input, shape index: {}]   ;;  %s11680_s21 = inlined_call_operand.vmem [shape: f32[128,128], index: 21, kind: input, shape index: {}]   ;;  %s11681_s22 = inlined_call_operand.vmem [shape: f32[1,128], index: 22, kind: input, shape index: {}]   ;;  %s11682_s23 = inlined_call_operand.vmem [shape: f32[8,128], index: 23, kind: output, shape index: {}]  }
   0x1   :  { %11723 = sst [smem:[#allocation60_spill]] %s11659_s0 }
   0x2   :  { %11724 = sst [smem:[#allocation61_spill]] %s11660_s1 }
   0x3   :  { %11725 = sst [smem:[#allocation62_spill]] %s11661_s2 }
   0x4   :  { %11726 = sst [smem:[#allocation63_spill]] %s11662_s3 }
   0x5   :  { %11727 = sst [smem:[#allocation64_spill]] %s11663_s4 }
   0x6   :  { %11728 = sst [smem:[#allocation65_spill]] %s11664_s5 }
   0x7   :  { %11729 = sst [smem:[#allocation66_spill]] %s11665_s6 }
   0x8   :  { %11730 = sst [smem:[#allocation67_spill]] %s11666_s7 }
   0x9   :  { %28 = vsyncpa [#allocation7], 0 }
   0xa   :  { %29 = vsyncpa [#allocation9], 0 }
   0xb   :  { %30 = vsyncpa [#allocation12], 0 }
   0xc   :  { %31 = vsyncpa [#allocation15], 0 }
   0xd   :  { %32 = vsyncpa [#allocation18], 0 }
   0xe   :  { %33 = vsyncpa [#allocation21], 0 }
   0xf   :  { %34 = vsyncpa [#allocation24], 0  ;;  %s8880_s4 = smov [#allocation8]   ;;  %s8881_s24 = smov [#allocation11]  }
  0x10   :  { %s54_s30 = sshll.u32 %s8880_s4, 4  ;;  %s78_s25 = sshll.u32 %s8881_s24, 4  ;;  %s55_s30 = int_to_ptr.vmem [resolvable:$true] %s54_s30  ;;  %s79_s25 = int_to_ptr.vmem [resolvable:$true] %s78_s25 }
  0x11   :  { %s8634_s5 = scalar_lea.vmem %s55_s30, 2048  ;;  %p8639_p1 = scmp.lt.s32.totalorder %s55_s30, %s55_s30 }
  0x12   :  { %p8635_p0 = scmp.ne.s32.totalorder %s55_s30, %s8634_s5  ;;  %p8640_p2 = scmp.lt.s32.totalorder %s8634_s5, %s8634_s5 }
  0x14   :  { %p8641_p3 = por %p8640_p2, %p8639_p1 }
  0x16   :  { %p8642_p4 = pnand %p8641_p3, %p8635_p0 }
  0x18   :  { %8645 = shalt.err (!%p8642_p4)
}
  0x19   :  { %s8882_s1 = smov 128   ;;  %s8883_s26 = smov 8  }
  0x1a   :  { %s11731_s27 = sld [smem:[#allocation62_spill]]  ;;  %s8654_s7 = scalar_lea.vmem %s79_s25, 2048 }
  0x1b   :  { %p8655_p5 = scmp.ne.s32.totalorder %s79_s25, %s8654_s7  ;;  %p8659_p6 = scmp.lt.s32.totalorder %s79_s25, %s79_s25 }
  0x1c   :  { %p8660_p7 = scmp.lt.s32.totalorder %s8654_s7, %s8654_s7 }
  0x1e   :  { %p8661_p8 = por %p8660_p7, %p8659_p6 }
  0x20   :  { %60 = dma.hbm_to_vmem [thread:$0]  %s11731_s27, 2048, %s55_s30, [#allocation9], %s8882_s1, %s8882_s1, %s8883_s26  }
  0x21   :  { %p8662_p9 = pnand %p8661_p8, %p8655_p5 }
  0x23   :  { %8665 = shalt.err (!%p8662_p9)
}
  0x24   :  { %s11732_s3 = sld [smem:[#allocation64_spill]]  ;;  %s8884_s0 = smov [#allocation14]  }
  0x25   :  { %s102_s4 = sshll.u32 %s8884_s0, 4  ;;  %s8885_s24 = smov [#allocation17]   ;;  %s103_s4 = int_to_ptr.vmem [resolvable:$true] %s102_s4 }
  0x26   :  { %s134_s5 = sshll.u32 %s8885_s24, 4  ;;  %s8674_s30 = scalar_lea.vmem %s103_s4, 2048  ;;  %s135_s5 = int_to_ptr.vmem [resolvable:$true] %s134_s5 }
  0x27   :  { %p8675_p10 = scmp.ne.s32.totalorder %s103_s4, %s8674_s30  ;;  %p8679_p11 = scmp.lt.s32.totalorder %s103_s4, %s103_s4 }
  0x28   :  { %p8680_p12 = scmp.lt.s32.totalorder %s8674_s30, %s8674_s30 }
  0x2a   :  { %84 = dma.hbm_to_vmem [thread:$0]  %s11732_s3, 2048, %s79_s25, [#allocation12], %s8882_s1, %s8882_s1, %s8883_s26  }
  0x2b   :  { %p8681_p13 = por %p8680_p12, %p8679_p11 }
  0x2d   :  { %p8682_p0 = pnand %p8681_p13, %p8675_p10 }
  0x2f   :  { %8685 = shalt.err (!%p8682_p0)
}
  0x30   :  { %s11733_s27 = sld [smem:[#allocation66_spill]]  ;;  %s8694_s25 = scalar_lea.vmem %s135_s5, 2048 }
  0x31   :  { %p8695_p1 = scmp.ne.s32.totalorder %s135_s5, %s8694_s25  ;;  %p8699_p2 = scmp.lt.s32.totalorder %s135_s5, %s135_s5 }
  0x32   :  { %p8700_p3 = scmp.lt.s32.totalorder %s8694_s25, %s8694_s25 }
  0x34   :  { %p8701_p4 = por %p8700_p3, %p8699_p2 }
  0x36   :  { %108 = dma.hbm_to_vmem [thread:$0]  %s11733_s27, 2048, %s103_s4, [#allocation15], %s8882_s1, %s8882_s1, %s8883_s26  }
  0x37   :  { %p8702_p5 = pnand %p8701_p4, %p8695_p1 }
  0x39   :  { %8705 = shalt.err (!%p8702_p5)
}
  0x3a   :  { %140 = dma.hbm_to_vmem [thread:$0]  %s11671_s12, 2048, %s135_s5, [#allocation18], %s8882_s1, %s8882_s1, %s8883_s26  }
  0x3b   :  { %s8886_s29 = smov [#allocation20]   ;;  %s8887_s0 = smov [#allocation6]  }
  0x3c   :  { %s158_s3 = sshll.u32 %s8886_s29, 4  ;;  %s42_s24 = sshll.u32 %s8887_s0, 4  ;;  %s159_s3 = int_to_ptr.vmem [resolvable:$true] %s158_s3  ;;  %s43_s24 = int_to_ptr.vmem [resolvable:$true] %s42_s24 }
  0x3d   :  { %s8714_s4 = scalar_lea.vmem %s159_s3, 2048  ;;  %p8719_p7 = scmp.lt.s32.totalorder %s159_s3, %s159_s3 }
  0x3e   :  { %p8715_p6 = scmp.ne.s32.totalorder %s159_s3, %s8714_s4  ;;  %p8720_p8 = scmp.lt.s32.totalorder %s8714_s4, %s8714_s4 }
  0x40   :  { %p8721_p9 = por %p8720_p8, %p8719_p7 }
  0x42   :  { %p8722_p10 = pnand %p8721_p9, %p8715_p6 }
  0x44   :  { %8725 = shalt.err (!%p8722_p10)
}
  0x45   :  { %164 = dma.hbm_to_vmem [thread:$0]  %s11673_s14, 2048, %s159_s3, [#allocation21], %s8882_s1, %s8882_s1, %s8883_s26  }
  0x46   :  { %s8734_s12 = scalar_lea.vmem %s43_s24, 2048  ;;  %p8739_p12 = scmp.lt.s32.totalorder %s43_s24, %s43_s24 }
  0x47   :  { %p8735_p11 = scmp.ne.s32.totalorder %s43_s24, %s8734_s12  ;;  %p8740_p13 = scmp.lt.s32.totalorder %s8734_s12, %s8734_s12 }
  0x49   :  { %p8741_p0 = por %p8740_p13, %p8739_p12 }
  0x4b   :  { %p8742_p1 = pnand %p8741_p0, %p8735_p11 }
  0x4d   :  { %8745 = shalt.err (!%p8742_p1)
}
  0x4e   :  { %s11734_s27 = sld [smem:[#allocation61_spill]]  ;;  %s8888_s25 = smov [#allocation10]  }
  0x4f   :  { %s66_s7 = sshll.u32 %s8888_s25, 4  ;;  %s8889_s28 = smov [#allocation13]   ;;  %s67_s7 = int_to_ptr.vmem [resolvable:$true] %s66_s7 }
  0x50   :  { %s90_s29 = sshll.u32 %s8889_s28, 4  ;;  %s8754_s14 = scalar_lea.vmem %s67_s7, 2048  ;;  %s91_s29 = int_to_ptr.vmem [resolvable:$true] %s90_s29 }
  0x51   :  { %p8755_p2 = scmp.ne.s32.totalorder %s67_s7, %s8754_s14  ;;  %p8759_p3 = scmp.lt.s32.totalorder %s67_s7, %s67_s7 }
  0x52   :  { %p8760_p4 = scmp.lt.s32.totalorder %s8754_s14, %s8754_s14 }
  0x54   :  { %48 = dma.hbm_to_vmem [thread:$0]  %s11734_s27, 2048, %s43_s24, [#allocation7], %s8882_s1, %s8882_s1, %s8883_s26  }
  0x55   :  { %p8761_p5 = por %p8760_p4, %p8759_p3 }
  0x57   :  { %p8762_p6 = pnand %p8761_p5, %p8755_p2 }
  0x59   :  { %8765 = shalt.err (!%p8762_p6)
}
  0x5a   :  { %s11735_s4 = sld [smem:[#allocation63_spill]]  ;;  %s8774_s24 = scalar_lea.vmem %s91_s29, 2048 }
  0x5b   :  { %p8775_p7 = scmp.ne.s32.totalorder %s91_s29, %s8774_s24  ;;  %p8779_p8 = scmp.lt.s32.totalorder %s91_s29, %s91_s29 }
  0x5c   :  { %p8780_p9 = scmp.lt.s32.totalorder %s8774_s24, %s8774_s24 }
  0x5e   :  { %p8781_p10 = por %p8780_p9, %p8779_p8 }
  0x60   :  { %72 = dma.hbm_to_vmem [thread:$0]  %s11735_s4, 2048, %s67_s7, [#allocation9], %s8882_s1, %s8882_s1, %s8883_s26  }
  0x61   :  { %p8782_p11 = pnand %p8781_p10, %p8775_p7 }
  0x63   :  { %8785 = shalt.err (!%p8782_p11)
}
  0x64   :  { %s11736_s12 = sld [smem:[#allocation65_spill]]  ;;  %s8890_s5 = smov [#allocation16]  }
  0x65   :  { %s122_s6 = sshll.u32 %s8890_s5, 4  ;;  %s8891_s27 = smov [#allocation19]   ;;  %s123_s6 = int_to_ptr.vmem [resolvable:$true] %s122_s6 }
  0x66   :  { %s146_s25 = sshll.u32 %s8891_s27, 4  ;;  %s8794_s7 = scalar_lea.vmem %s123_s6, 2048  ;;  %s147_s25 = int_to_ptr.vmem [resolvable:$true] %s146_s25 }
  0x67   :  { %p8795_p12 = scmp.ne.s32.totalorder %s123_s6, %s8794_s7  ;;  %p8799_p13 = scmp.lt.s32.totalorder %s123_s6, %s123_s6 }
  0x68   :  { %p8800_p0 = scmp.lt.s32.totalorder %s8794_s7, %s8794_s7 }
  0x6a   :  { %96 = dma.hbm_to_vmem [thread:$0]  %s11736_s12, 2048, %s91_s29, [#allocation12], %s8882_s1, %s8882_s1, %s8883_s26  }
  0x6b   :  { %p8801_p1 = por %p8800_p0, %p8799_p13 }
  0x6d   :  { %p8802_p2 = pnand %p8801_p1, %p8795_p12 }
  0x6f   :  { %8805 = shalt.err (!%p8802_p2)
}
  0x70   :  { %128 = dma.hbm_to_vmem [thread:$0]  %s11670_s11, 2048, %s123_s6, [#allocation15], %s8882_s1, %s8882_s1, %s8883_s26  }
  0x71   :  { %s8814_s29 = scalar_lea.vmem %s147_s25, 2048  ;;  %p8819_p4 = scmp.lt.s32.totalorder %s147_s25, %s147_s25 }
  0x72   :  { %p8815_p3 = scmp.ne.s32.totalorder %s147_s25, %s8814_s29  ;;  %p8820_p5 = scmp.lt.s32.totalorder %s8814_s29, %s8814_s29 }
  0x74   :  { %p8821_p6 = por %p8820_p5, %p8819_p4 }
  0x76   :  { %p8822_p7 = pnand %p8821_p6, %p8815_p3 }
  0x78   :  { %8825 = shalt.err (!%p8822_p7)
}
  0x79   :  { %152 = dma.hbm_to_vmem [thread:$0]  %s11672_s13, 2048, %s147_s25, [#allocation18], %s8882_s1, %s8882_s1, %s8883_s26  }
  0x7a   :  { %s8892_s4 = smov [#allocation22]   ;;  %s8893_s30 = smov [#allocation23]  }
  0x7b   :  { %s170_s24 = sshll.u32 %s8892_s4, 4  ;;  %s182_s2 = sshll.u32 %s8893_s30, 4  ;;  %s171_s24 = int_to_ptr.vmem [resolvable:$true] %s170_s24  ;;  %s183_s2 = int_to_ptr.vmem [resolvable:$true] %s182_s2 }
  0x7c   :  { %s8834_s11 = scalar_lea.vmem %s171_s24, 2048  ;;  %p8839_p9 = scmp.lt.s32.totalorder %s171_s24, %s171_s24 }
  0x7d   :  { %p8835_p8 = scmp.ne.s32.totalorder %s171_s24, %s8834_s11  ;;  %p8840_p10 = scmp.lt.s32.totalorder %s8834_s11, %s8834_s11 }
  0x7f   :  { %p8841_p11 = por %p8840_p10, %p8839_p9 }
  0x81   :  { %p8842_p12 = pnand %p8841_p11, %p8835_p8 }
  0x83   :  { %8845 = shalt.err (!%p8842_p12)
}
  0x84   :  { %176 = dma.hbm_to_vmem [thread:$0]  %s11674_s15, 2048, %s171_s24, [#allocation21], %s8882_s1, %s8882_s1, %s8883_s26  }
  0x85   :  { %s8854_s13 = scalar_lea.vmem %s183_s2, 2048  ;;  %p8859_p0 = scmp.lt.s32.totalorder %s183_s2, %s183_s2 }
  0x86   :  { %p8855_p13 = scmp.ne.s32.totalorder %s183_s2, %s8854_s13  ;;  %p8860_p1 = scmp.lt.s32.totalorder %s8854_s13, %s8854_s13 }
  0x88   :  { %p8861_p2 = por %p8860_p1, %p8859_p0 }
  0x8a   :  { %p8862_p3 = pnand %p8861_p2, %p8855_p13 }
  0x8c   :  { %8865 = shalt.err (!%p8862_p3)
}
  0x8d   :  { %188 = dma.hbm_to_vmem [thread:$0]  %s11675_s16, 2048, %s183_s2, [#allocation24], %s8882_s1, %s8882_s1, %s8883_s26  }
  0x8e   :  { %8866 = dma.done.wait [#allocation7], 2048  }
  0x8f   :  { %8867 = vsyncadd [#allocation7], 4294965248 }
  0x90   :  { %8868 = dma.done.wait [#allocation9], 4096  }
  0x91   :  { %8869 = vsyncadd [#allocation9], 4294963200 }
  0x92   :  { %8870 = dma.done.wait [#allocation12], 4096  }
  0x93   :  { %8871 = vsyncadd [#allocation12], 4294963200 }
  0x94   :  { %8872 = dma.done.wait [#allocation15], 4096  }
  0x95   :  { %8873 = vsyncadd [#allocation15], 4294963200 }
  0x96   :  { %8874 = dma.done.wait [#allocation18], 4096  }
  0x97   :  { %8875 = vsyncadd [#allocation18], 4294963200 }
  0x98   :  { %8876 = dma.done.wait [#allocation21], 4096  }
  0x99   :  { %8877 = vsyncadd [#allocation21], 4294963200 }
  0x9a   :  { %8878 = dma.done.wait [#allocation24], 2048  }
  0x9b   :  { %8879 = vsyncadd [#allocation24], 4294965248  ;;  %v260_v0 = vld [vmem:[#allocation6 + $0x78] sm:$0xff]  ;;  %v259_v2 = vld [vmem:[#allocation6 + $0x70] sm:$0xff]  ;;  %s11737_s1 = sld [smem:[#allocation60_spill]]  ;;  %v11684_v37 = vmov 0.0  }
  0x9c   :  { %v396_v1 = vld [vmem:[#allocation8 + $0x78] sm:$0xff]  ;;  %6418 = vmatprep.subr.mxu0 %v260_v0  ;;  %v395_v3 = vld [vmem:[#allocation8 + $0x70] sm:$0xff]  ;;  %v258_v4 = vld [vmem:[#allocation6 + $0x68] sm:$0xff]  ;;  %vm8895_vm0 = vmmov 0   ;;  %s11743_s6 = sld [smem:[#allocation67_spill]] }
  0x9d   :  { %6462 = vmatprep.subr.mxu1 %v396_v1  ;;  %6419 = vmatpush3.msra.mxu0 %v260_v0  ;;  %v394_v5 = vld [vmem:[#allocation8 + $0x68] sm:$0xff]  ;;  %v257_v6 = vld [vmem:[#allocation6 + $0x60] sm:$0xff]  ;;  %v256_v8 = vld [vmem:[#allocation6 + $0x58] sm:$0xff] }
  0x9e   :  { %6463 = vmatpush3.msra.mxu1 %v396_v1  ;;  %6420 = vmatprep.subr.mxu0 %v259_v2  ;;  %v393_v7 = vld [vmem:[#allocation8 + $0x60] sm:$0xff]  ;;  %v392_v9 = vld [vmem:[#allocation8 + $0x58] sm:$0xff]  ;;  %v255_v10 = vld [vmem:[#allocation6 + $0x50] sm:$0xff] }
  0x9f   :  { %6464 = vmatprep.subr.mxu1 %v395_v3  ;;  %6421 = vmatpush3.msra.mxu0 %v259_v2  ;;  %v391_v11 = vld [vmem:[#allocation8 + $0x50] sm:$0xff]  ;;  %v254_v12 = vld [vmem:[#allocation6 + $0x48] sm:$0xff]  ;;  %v253_v14 = vld [vmem:[#allocation6 + $0x40] sm:$0xff] }
  0xa0   :  { %6465 = vmatpush3.msra.mxu1 %v395_v3  ;;  %6422 = vmatprep.subr.mxu0 %v258_v4  ;;  %v390_v13 = vld [vmem:[#allocation8 + $0x48] sm:$0xff]  ;;  %v389_v15 = vld [vmem:[#allocation8 + $0x40] sm:$0xff]  ;;  %v252_v16 = vld [vmem:[#allocation6 + $0x38] sm:$0xff] }
  0xa1   :  { %6466 = vmatprep.subr.mxu1 %v394_v5  ;;  %6423 = vmatpush3.msra.mxu0 %v258_v4  ;;  %v388_v17 = vld [vmem:[#allocation8 + $0x38] sm:$0xff]  ;;  %v251_v18 = vld [vmem:[#allocation6 + $0x30] sm:$0xff]  ;;  %v250_v20 = vld [vmem:[#allocation6 + $0x28] sm:$0xff] }
  0xa2   :  { %6467 = vmatpush3.msra.mxu1 %v394_v5  ;;  %6424 = vmatprep.subr.mxu0 %v257_v6  ;;  %v387_v19 = vld [vmem:[#allocation8 + $0x30] sm:$0xff]  ;;  %v386_v21 = vld [vmem:[#allocation8 + $0x28] sm:$0xff]  ;;  %v249_v22 = vld [vmem:[#allocation6 + $0x20] sm:$0xff] }
  0xa3   :  { %6468 = vmatprep.subr.mxu1 %v393_v7  ;;  %6425 = vmatpush3.msra.mxu0 %v257_v6  ;;  %v385_v23 = vld [vmem:[#allocation8 + $0x20] sm:$0xff]  ;;  %v248_v24 = vld [vmem:[#allocation6 + $0x18] sm:$0xff]  ;;  %v247_v26 = vld [vmem:[#allocation6 + $0x10] sm:$0xff] }
  0xa4   :  { %6469 = vmatpush3.msra.mxu1 %v393_v7  ;;  %6426 = vmatprep.subr.mxu0 %v256_v8  ;;  %v384_v25 = vld [vmem:[#allocation8 + $0x18] sm:$0xff]  ;;  %v383_v27 = vld [vmem:[#allocation8 + $0x10] sm:$0xff]  ;;  %v246_v28 = vld [vmem:[#allocation6 + $0x8] sm:$0xff] }
  0xa5   :  { %6470 = vmatprep.subr.mxu1 %v392_v9  ;;  %6427 = vmatpush3.msra.mxu0 %v256_v8  ;;  %v382_v29 = vld [vmem:[#allocation8 + $0x8] sm:$0xff]  ;;  %v245_v30 = vld [vmem:[#allocation6] sm:$0xff]  ;;  %v532_v34 = vld [vmem:[#allocation10 + $0x78] sm:$0xff] }
  0xa6   :  { %6471 = vmatpush3.msra.mxu1 %v392_v9  ;;  %6428 = vmatprep.subr.mxu0 %v255_v10  ;;  %v381_v31 = vld [vmem:[#allocation8] sm:$0xff]  ;;  %v9096_v33 = vld [vmem:[%s11737_s1 + $0x8] sm:$0xff]  ;;  %v9100_v35 = vld [vmem:[#allocation11 + $0x78] sm:$0xff] }
  0xa7   :  { %6472 = vmatprep.subr.mxu1 %v391_v11  ;;  %6429 = vmatpush3.msra.mxu0 %v255_v10  ;;  %v9091_v32 = vld [vmem:[%s11737_s1] sm:$0xff]  ;;  %v531_v36 = vld [vmem:[#allocation10 + $0x70] sm:$0xff]  ;;  %v530_v39 = vld [vmem:[#allocation10 + $0x68] sm:$0xff] }
  0xa8   :  { %6473 = vmatpush3.msra.mxu1 %v391_v11  ;;  %6430 = vmatprep.subr.mxu0 %v254_v12  ;;  %v9105_v38 = vld [vmem:[#allocation11 + $0x70] sm:$0xff]  ;;  %v9109_v40 = vld [vmem:[#allocation11 + $0x68] sm:$0xff]  ;;  %v529_v41 = vld [vmem:[#allocation10 + $0x60] sm:$0xff] }
  0xa9   :  { %6474 = vmatprep.subr.mxu1 %v390_v13  ;;  %6431 = vmatpush3.msra.mxu0 %v254_v12  ;;  %v9113_v42 = vld [vmem:[#allocation11 + $0x60] sm:$0xff]  ;;  %v528_v43 = vld [vmem:[#allocation10 + $0x58] sm:$0xff]  ;;  %v527_v45 = vld [vmem:[#allocation10 + $0x50] sm:$0xff] }
  0xaa   :  { %6475 = vmatpush3.msra.mxu1 %v390_v13  ;;  %6432 = vmatprep.subr.mxu0 %v253_v14  ;;  %v9117_v44 = vld [vmem:[#allocation11 + $0x58] sm:$0xff]  ;;  %v9121_v46 = vld [vmem:[#allocation11 + $0x50] sm:$0xff]  ;;  %v526_v47 = vld [vmem:[#allocation10 + $0x48] sm:$0xff] }
  0xab   :  { %6476 = vmatprep.subr.mxu1 %v389_v15  ;;  %6433 = vmatpush3.msra.mxu0 %v253_v14  ;;  %v9125_v48 = vld [vmem:[#allocation11 + $0x48] sm:$0xff]  ;;  %v525_v49 = vld [vmem:[#allocation10 + $0x40] sm:$0xff]  ;;  %v524_v51 = vld [vmem:[#allocation10 + $0x38] sm:$0xff] }
  0xac   :  { %6477 = vmatpush3.msra.mxu1 %v389_v15  ;;  %6434 = vmatprep.subr.mxu0 %v252_v16  ;;  %v9129_v50 = vld [vmem:[#allocation11 + $0x40] sm:$0xff]  ;;  %v9133_v52 = vld [vmem:[#allocation11 + $0x38] sm:$0xff]  ;;  %v9139_v53 = vld [vmem:[%s11737_s1 + $0x10] sm:$0xff] }
  0xad   :  { %6478 = vmatprep.subr.mxu1 %v388_v17  ;;  %6435 = vmatpush3.msra.mxu0 %v252_v16  ;;  %v523_v54 = vld [vmem:[#allocation10 + $0x30] sm:$0xff]  ;;  %v9145_v55 = vld [vmem:[%s11737_s1 + $0x18] sm:$0xff]  ;;  %v522_v57 = vld [vmem:[#allocation10 + $0x28] sm:$0xff] }
  0xae   :  { %6479 = vmatpush3.msra.mxu1 %v388_v17  ;;  %6436 = vmatprep.subr.mxu0 %v251_v18  ;;  %v9149_v56 = vld [vmem:[#allocation11 + $0x30] sm:$0xff]  ;;  %v9154_v58 = vld [vmem:[#allocation11 + $0x28] sm:$0xff]  ;;  %v9160_v59 = vld [vmem:[%s11737_s1 + $0x20] sm:$0xff] }
  0xaf   :  { %6480 = vmatprep.subr.mxu1 %v387_v19  ;;  %6437 = vmatpush3.msra.mxu0 %v251_v18  ;;  %v521_v60 = vld [vmem:[#allocation10 + $0x20] sm:$0xff]  ;;  %v9167_v61 = vld [vmem:[%s11737_s1 + $0x28] sm:$0xff]  ;;  %v520_v63 = vld [vmem:[#allocation10 + $0x18] sm:$0xff] }
  0xb0   :  { %6481 = vmatpush3.msra.mxu1 %v387_v19  ;;  %6438 = vmatprep.subr.mxu0 %v250_v20  ;;  %v9171_v62 = vld [vmem:[#allocation11 + $0x20] sm:$0xff]  ;;  %v9176_v0 = vld [vmem:[#allocation11 + $0x18] sm:$0xff]  ;;  %v9182_v1 = vld [vmem:[%s11737_s1 + $0x30] sm:$0xff] }
  0xb1   :  { %6482 = vmatprep.subr.mxu1 %v386_v21  ;;  %6439 = vmatpush3.msra.mxu0 %v250_v20  ;;  %v519_v2 = vld [vmem:[#allocation10 + $0x10] sm:$0xff]  ;;  %v9189_v3 = vld [vmem:[%s11737_s1 + $0x38] sm:$0xff]  ;;  %v518_v5 = vld [vmem:[#allocation10 + $0x8] sm:$0xff] }
  0xb2   :  { %6483 = vmatpush3.msra.mxu1 %v386_v21  ;;  %6440 = vmatprep.subr.mxu0 %v249_v22  ;;  %v9193_v4 = vld [vmem:[#allocation11 + $0x10] sm:$0xff]  ;;  %v9198_v6 = vld [vmem:[#allocation11 + $0x8] sm:$0xff]  ;;  %v517_v7 = vld [vmem:[#allocation10] sm:$0xff] }
  0xb3   :  { %6484 = vmatprep.subr.mxu1 %v385_v23  ;;  %6441 = vmatpush3.msra.mxu0 %v249_v22  ;;  %v9204_v8 = vld [vmem:[#allocation11] sm:$0xff]  ;;  %v9211_v9 = vld [vmem:[#allocation13 + $0x78] sm:$0xff]  ;;  %v9219_v11 = vld [vmem:[#allocation13 + $0x70] sm:$0xff] }
  0xb4   :  { %6485 = vmatpush3.msra.mxu1 %v385_v23  ;;  %6442 = vmatprep.subr.mxu0 %v248_v24  ;;  %v9213_v10 = vld [vmem:[#allocation14 + $0x78] sm:$0xff]  ;;  %v9221_v12 = vld [vmem:[#allocation14 + $0x70] sm:$0xff]  ;;  %v9227_v13 = vld [vmem:[#allocation13 + $0x68] sm:$0xff] }
  0xb5   :  { %6486 = vmatprep.subr.mxu1 %v384_v25  ;;  %6443 = vmatpush3.msra.mxu0 %v248_v24  ;;  %v9229_v14 = vld [vmem:[#allocation14 + $0x68] sm:$0xff]  ;;  %v9235_v15 = vld [vmem:[#allocation13 + $0x60] sm:$0xff]  ;;  %v9243_v17 = vld [vmem:[#allocation13 + $0x58] sm:$0xff] }
  0xb6   :  { %6487 = vmatpush3.msra.mxu1 %v384_v25  ;;  %6444 = vmatprep.subr.mxu0 %v247_v26  ;;  %v9237_v16 = vld [vmem:[#allocation14 + $0x60] sm:$0xff]  ;;  %v9245_v18 = vld [vmem:[#allocation14 + $0x58] sm:$0xff]  ;;  %v9251_v19 = vld [vmem:[#allocation13 + $0x50] sm:$0xff] }
  0xb7   :  { %6488 = vmatprep.subr.mxu1 %v383_v27  ;;  %6445 = vmatpush3.msra.mxu0 %v247_v26  ;;  %v9253_v20 = vld [vmem:[#allocation14 + $0x50] sm:$0xff]  ;;  %v9259_v21 = vld [vmem:[#allocation13 + $0x48] sm:$0xff]  ;;  %v9267_v23 = vld [vmem:[#allocation13 + $0x40] sm:$0xff] }
  0xb8   :  { %6489 = vmatpush3.msra.mxu1 %v383_v27  ;;  %6446 = vmatprep.subr.mxu0 %v246_v28  ;;  %v9261_v22 = vld [vmem:[#allocation14 + $0x48] sm:$0xff]  ;;  %v9269_v24 = vld [vmem:[#allocation14 + $0x40] sm:$0xff]  ;;  %v9275_v25 = vld [vmem:[#allocation13 + $0x38] sm:$0xff] }
  0xb9   :  { %6490 = vmatprep.subr.mxu1 %v382_v29  ;;  %6447 = vmatpush3.msra.mxu0 %v246_v28  ;;  %v9279_v26 = vld [vmem:[#allocation14 + $0x38] sm:$0xff]  ;;  %v9285_v27 = vld [vmem:[#allocation13 + $0x30] sm:$0xff] }
  0xba   :  { %6491 = vmatpush3.msra.mxu1 %v382_v29  ;;  %6448 = vmatprep.subr.mxu0 %v245_v30  ;;  %v9287_v28 = vld [vmem:[#allocation14 + $0x30] sm:$0xff]  ;;  %v9293_v29 = vld [vmem:[#allocation13 + $0x28] sm:$0xff] }
  0xbb   :  { %6492 = vmatprep.subr.mxu1 %v381_v31  ;;  %6449 = vmatpush3.msra.mxu0 %v245_v30  ;;  %v9297_v30 = vld [vmem:[#allocation14 + $0x28] sm:$0xff] }
  0xbc   :  { %6450 = vmatprep.mubr.f32.mxu0 %v9091_v32  ;;  %6493 = vmatpush3.msra.mxu1 %v381_v31  ;;  %v9303_v31 = vld [vmem:[#allocation13 + $0x20] sm:$0xff] }
  0xbd   :  { %6451 = vmatmul.mubr.f32.vlgmr.msra.gmra.mxu0 %v9096_v33  ;;  %6494 = vmatprep.mubr.f32.mxu1 %v9091_v32  ;;  %11738 = vst [vmem:[#allocation32_spill] sm:$0xff] %v9303_v31 }
  0xbe   :  { %6506 = vmatprep.subr.mxu0 %v532_v34  ;;  %6550 = vmatprep.subr.mxu1 %v11684_v37 }
  0xbf   :  { %6495 = vmatmul.mubr.f32.vlgmr.msra.gmra.mxu1 %v9096_v33  ;;  %6507 = vmatpush3.msra.mxu0 %v532_v34  ;;  %v9315_v34 = vld [vmem:[#allocation14 + $0x18] sm:$0xff] }
  0xc0   :  { %6551 = vmatpush3.msra.mxu1 %v9100_v35  ;;  %6508 = vmatprep.subr.mxu0 %v531_v36 }
  0xc1   :  { %6552 = vmatprep.subr.mxu1 %v11684_v37  ;;  %6509 = vmatpush3.msra.mxu0 %v531_v36  ;;  %v9321_v36 = vld [vmem:[#allocation13 + $0x10] sm:$0xff] }
  0xc2   :  { %6553 = vmatpush3.msra.mxu1 %v9105_v38  ;;  %6510 = vmatprep.subr.mxu0 %v530_v39  ;;  %11740 = vst [vmem:[#allocation34_spill] sm:$0xff] %v9321_v36 }
  0xc3   :  { %6554 = vmatprep.subr.mxu1 %v11684_v37  ;;  %6511 = vmatpush3.msra.mxu0 %v530_v39  ;;  %v9323_v39 = vld [vmem:[#allocation14 + $0x10] sm:$0xff] }
  0xc4   :  { %6555 = vmatpush3.msra.mxu1 %v9109_v40  ;;  %6512 = vmatprep.subr.mxu0 %v529_v41 }
  0xc5   :  { %6556 = vmatprep.subr.mxu1 %v11684_v37  ;;  %6513 = vmatpush3.msra.mxu0 %v529_v41  ;;  %v9329_v41 = vld [vmem:[#allocation13 + $0x8] sm:$0xff] }
  0xc6   :  { %6557 = vmatpush3.msra.mxu1 %v9113_v42  ;;  %6514 = vmatprep.subr.mxu0 %v528_v43  ;;  %11741 = vst [vmem:[#allocation35_spill] sm:$0xff] %v9329_v41 }
  0xc7   :  { %6558 = vmatprep.subr.mxu1 %v11684_v37  ;;  %6515 = vmatpush3.msra.mxu0 %v528_v43  ;;  %v9331_v43 = vld [vmem:[#allocation14 + $0x8] sm:$0xff] }
  0xc8   :  { %6559 = vmatpush3.msra.mxu1 %v9117_v44  ;;  %6516 = vmatprep.subr.mxu0 %v527_v45 }
  0xc9   :  { %6560 = vmatprep.subr.mxu1 %v11684_v37  ;;  %6517 = vmatpush3.msra.mxu0 %v527_v45  ;;  %v9337_v45 = vld [vmem:[#allocation13] sm:$0xff] }
  0xca   :  { %6561 = vmatpush3.msra.mxu1 %v9121_v46  ;;  %6518 = vmatprep.subr.mxu0 %v526_v47  ;;  %11742 = vst [vmem:[#allocation36_spill] sm:$0xff] %v9337_v45 }
  0xcb   :  { %6562 = vmatprep.subr.mxu1 %v11684_v37  ;;  %6519 = vmatpush3.msra.mxu0 %v526_v47  ;;  %v9341_v47 = vld [vmem:[#allocation14] sm:$0xff] }
  0xcc   :  { %6563 = vmatpush3.msra.mxu1 %v9125_v48  ;;  %6520 = vmatprep.subr.mxu0 %v525_v49 }
  0xcd   :  { %6564 = vmatprep.subr.mxu1 %v11684_v37  ;;  %6521 = vmatpush3.msra.mxu0 %v525_v49  ;;  %v5400_v49 = vld [vmem:[%s11743_s6] ss:$0 sm:$0xff] }
  0xce   :  { %6565 = vmatpush3.msra.mxu1 %v9129_v50  ;;  %6522 = vmatprep.subr.mxu0 %v524_v51 }
  0xcf   :  { %6566 = vmatprep.subr.mxu1 %v11684_v37  ;;  %6523 = vmatpush3.msra.mxu0 %v524_v51 }
  0xd0   :  { %6567 = vmatpush3.msra.mxu1 %v9133_v52  ;;  %6453 = vmatprep.mubr.f32.mxu0 %v9139_v53 }
  0xd1   :  { %6524 = vmatprep.subr.mxu0 %v523_v54  ;;  %6568 = vmatprep.subr.mxu1 %v11684_v37 }
  0xd2   :  { %6454 = vmatmul.mubr.f32.gmra.mxu0 %v9145_v55  ;;  %6497 = vmatprep.mubr.f32.mxu1 %v9139_v53 }
  0xd3   :  { %6525 = vmatpush3.msra.mxu0 %v523_v54  ;;  %6569 = vmatpush3.msra.mxu1 %v9149_v56 }
  0xd4   :  { %6526 = vmatprep.subr.mxu0 %v522_v57  ;;  %6498 = vmatmul.mubr.f32.gmra.mxu1 %v9145_v55 }
  0xd5   :  { %6570 = vmatprep.subr.mxu1 %v11684_v37  ;;  %6527 = vmatpush3.msra.mxu0 %v522_v57 }
  0xd6   :  { %6571 = vmatpush3.msra.mxu1 %v9154_v58  ;;  %6456 = vmatprep.mubr.f32.mxu0 %v9160_v59 }
  0xd7   :  { %6528 = vmatprep.subr.mxu0 %v521_v60  ;;  %6572 = vmatprep.subr.mxu1 %v11684_v37 }
  0xd8   :  { %6457 = vmatmul.mubr.f32.gmra.mxu0 %v9167_v61  ;;  %6500 = vmatprep.mubr.f32.mxu1 %v9160_v59 }
  0xd9   :  { %6529 = vmatpush3.msra.mxu0 %v521_v60  ;;  %6573 = vmatpush3.msra.mxu1 %v9171_v62 }
  0xda   :  { %6530 = vmatprep.subr.mxu0 %v520_v63  ;;  %6501 = vmatmul.mubr.f32.gmra.mxu1 %v9167_v61 }
  0xdb   :  { %6574 = vmatprep.subr.mxu1 %v11684_v37  ;;  %6531 = vmatpush3.msra.mxu0 %v520_v63 }
  0xdc   :  { %6575 = vmatpush3.msra.mxu1 %v9176_v0  ;;  %6459 = vmatprep.mubr.f32.mxu0 %v9182_v1 }
  0xdd   :  { %6532 = vmatprep.subr.mxu0 %v519_v2  ;;  %6576 = vmatprep.subr.mxu1 %v11684_v37 }
  0xde   :  { %6460 = vmatmul.mubr.f32.gmra.mxu0 %v9189_v3  ;;  %6503 = vmatprep.mubr.f32.mxu1 %v9182_v1 }
  0xdf   :  { %6533 = vmatpush3.msra.mxu0 %v519_v2  ;;  %6577 = vmatpush3.msra.mxu1 %v9193_v4 }
  0xe0   :  { %6534 = vmatprep.subr.mxu0 %v518_v5  ;;  %6504 = vmatmul.mubr.f32.gmra.mxu1 %v9189_v3 }
  0xe1   :  { %6578 = vmatprep.subr.mxu1 %v11684_v37  ;;  %6535 = vmatpush3.msra.mxu0 %v518_v5 }
  0xe2   :  { %6579 = vmatpush3.msra.mxu1 %v9198_v6  ;;  %6536 = vmatprep.subr.mxu0 %v517_v7 }
  0xe3   :  { %6580 = vmatprep.subr.mxu1 %v11684_v37  ;;  %6537 = vmatpush3.msra.mxu0 %v517_v7 }
  0xe4   :  { %6538 = vmatprep.mubr.f32.mxu0 %v9091_v32  ;;  %6581 = vmatpush3.msra.mxu1 %v9204_v8  ;;  %v9305_v32 = vld [vmem:[#allocation14 + $0x20] sm:$0xff] }
  0xe5   :  { %6582 = vmatprep.mubr.msk.f32.mxu1 %vm8895_vm0, %v11684_v37  ;;  %6539 = vmatmul.mubr.f32.vlgmr.msra.gmra.mxu0 %v9096_v33  ;;  %v9311_v33 = vld [vmem:[#allocation13 + $0x18] sm:$0xff] }
  0xe6   :  { %6583 = vmatmul.mubr.f32.vlgmr.msra.gmra.mxu1 %v11684_v37  ;;  %6585 = vmatprep.subr.mxu0 %v11684_v37  ;;  %11739 = vst [vmem:[#allocation33_spill] sm:$0xff] %v9311_v33 }
  0xe7   :  { %6620 = vmatprep.subr.mxu1 %v11684_v37  ;;  %6586 = vmatpush3.msra.mxu0 %v9211_v9 }
  0xe8   :  { %6621 = vmatpush3.msra.mxu1 %v9213_v10  ;;  %6587 = vmatprep.subr.mxu0 %v11684_v37 }
  0xe9   :  { %6622 = vmatprep.subr.mxu1 %v11684_v37  ;;  %6588 = vmatpush3.msra.mxu0 %v9219_v11 }
  0xea   :  { %6623 = vmatpush3.msra.mxu1 %v9221_v12  ;;  %6589 = vmatprep.subr.mxu0 %v11684_v37 }
  0xeb   :  { %6624 = vmatprep.subr.mxu1 %v11684_v37  ;;  %6590 = vmatpush3.msra.mxu0 %v9227_v13 }
  0xec   :  { %6625 = vmatpush3.msra.mxu1 %v9229_v14  ;;  %6591 = vmatprep.subr.mxu0 %v11684_v37 }
  0xed   :  { %6626 = vmatprep.subr.mxu1 %v11684_v37  ;;  %6592 = vmatpush3.msra.mxu0 %v9235_v15 }
  0xee   :  { %6627 = vmatpush3.msra.mxu1 %v9237_v16  ;;  %6593 = vmatprep.subr.mxu0 %v11684_v37 }
  0xef   :  { %6628 = vmatprep.subr.mxu1 %v11684_v37  ;;  %6594 = vmatpush3.msra.mxu0 %v9243_v17 }
  0xf0   :  { %6629 = vmatpush3.msra.mxu1 %v9245_v18  ;;  %6595 = vmatprep.subr.mxu0 %v11684_v37 }
  0xf1   :  { %6630 = vmatprep.subr.mxu1 %v11684_v37  ;;  %6596 = vmatpush3.msra.mxu0 %v9251_v19 }
  0xf2   :  { %6631 = vmatpush3.msra.mxu1 %v9253_v20  ;;  %6597 = vmatprep.subr.mxu0 %v11684_v37 }
  0xf3   :  { %6632 = vmatprep.subr.mxu1 %v11684_v37  ;;  %6598 = vmatpush3.msra.mxu0 %v9259_v21 }
  0xf4   :  { %6633 = vmatpush3.msra.mxu1 %v9261_v22  ;;  %6599 = vmatprep.subr.mxu0 %v11684_v37 }
  0xf5   :  { %6634 = vmatprep.subr.mxu1 %v11684_v37  ;;  %6600 = vmatpush3.msra.mxu0 %v9267_v23 }
  0xf6   :  { %6635 = vmatpush3.msra.mxu1 %v9269_v24  ;;  %6601 = vmatprep.subr.mxu0 %v11684_v37 }
  0xf7   :  { %6636 = vmatprep.subr.mxu1 %v11684_v37  ;;  %6541 = vmatprep.mubr.f32.mxu0 %v9139_v53  ;;  %v5401_v53 = vld [vmem:[%s11667_s8] ss:$0 sm:$0xff] }
  0xf8   :  { %6602 = vmatpush3.msra.mxu0 %v9275_v25  ;;  %6637 = vmatpush3.msra.mxu1 %v9279_v26 }
  0xf9   :  { %6542 = vmatmul.mubr.f32.gmra.mxu0 %v9145_v55  ;;  %6603 = vmatprep.subr.mxu0 %v11684_v37 }
  0xfa   :  { %6638 = vmatprep.subr.mxu1 %v11684_v37  ;;  %6604 = vmatpush3.msra.mxu0 %v9285_v27 }
  0xfb   :  { %6639 = vmatpush3.msra.mxu1 %v9287_v28  ;;  %6605 = vmatprep.subr.mxu0 %v11684_v37 }
  0xfc   :  { %6640 = vmatprep.subr.mxu1 %v11684_v37  ;;  %6544 = vmatprep.mubr.f32.mxu0 %v9160_v59 }
  0xfd   :  { %6606 = vmatpush3.msra.mxu0 %v9293_v29  ;;  %6641 = vmatpush3.msra.mxu1 %v9297_v30 }
  0xfe   :  { %6545 = vmatmul.mubr.f32.gmra.mxu0 %v9167_v61  ;;  %6607 = vmatprep.subr.mxu0 %v11684_v37 }
  0xff   :  { %6642 = vmatprep.subr.mxu1 %v11684_v37  ;;  %6608 = vmatpush3.msra.mxu0 %v9303_v31 }
 0x100   :  { %6643 = vmatpush3.msra.mxu1 %v9305_v32  ;;  %6609 = vmatprep.subr.mxu0 %v11684_v37 }
 0x101   :  { %6644 = vmatprep.subr.mxu1 %v11684_v37  ;;  %6547 = vmatprep.mubr.f32.mxu0 %v9182_v1 }
 0x102   :  { %6610 = vmatpush3.msra.mxu0 %v9311_v33  ;;  %6645 = vmatpush3.msra.mxu1 %v9315_v34 }
 0x103   :  { %6548 = vmatmul.mubr.f32.gmra.mxu0 %v9189_v3  ;;  %6611 = vmatprep.subr.mxu0 %v11684_v37 }
 0x104   :  { %6646 = vmatprep.subr.mxu1 %v11684_v37  ;;  %6612 = vmatpush3.msra.mxu0 %v9321_v36 }
 0x105   :  { %6647 = vmatpush3.msra.mxu1 %v9323_v39  ;;  %6613 = vmatprep.subr.mxu0 %v11684_v37 }
 0x106   :  { %6648 = vmatprep.subr.mxu1 %v11684_v37  ;;  %6614 = vmatpush3.msra.mxu0 %v9329_v41 }
 0x107   :  { %6649 = vmatpush3.msra.mxu1 %v9331_v43  ;;  %6615 = vmatprep.subr.mxu0 %v11684_v37 }
 0x108   :  { %6650 = vmatprep.subr.mxu1 %v11684_v37  ;;  %6616 = vmatpush3.msra.mxu0 %v9337_v45 }
 0x109   :  { %6617 = vmatprep.mubr.msk.f32.mxu0 %vm8895_vm0, %v11684_v37  ;;  %6651 = vmatpush3.msra.mxu1 %v9341_v47 }
 0x10a   :  { %6652 = vmatprep.mubr.msk.f32.mxu1 %vm8895_vm0, %v11684_v37  ;;  %6618 = vmatmul.mubr.f32.vlgmr.msra.gmra.mxu0 %v11684_v37 }
 0x10b   :  { %6653 = vmatmul.mubr.f32.vlgmr.msra.gmra.mxu1 %v11684_v37  ;;  %6655 = vmatprep.subr.mxu0 %v11684_v37 }
 0x10c   :  { %6690 = vmatprep.subr.mxu1 %v11684_v37  ;;  %6656 = vmatpush3.msra.mxu0 %v9100_v35 }
 0x10d   :  { %6691 = vmatpush3.msra.mxu1 %v9211_v9  ;;  %6657 = vmatprep.subr.mxu0 %v11684_v37 }
 0x10e   :  { %6692 = vmatprep.subr.mxu1 %v11684_v37  ;;  %6658 = vmatpush3.msra.mxu0 %v9105_v38 }
 0x10f   :  { %6693 = vmatpush3.msra.mxu1 %v9219_v11  ;;  %6659 = vmatprep.subr.mxu0 %v11684_v37 }
 0x110   :  { %6694 = vmatprep.subr.mxu1 %v11684_v37  ;;  %6660 = vmatpush3.msra.mxu0 %v9109_v40 }
 0x111   :  { %6695 = vmatpush3.msra.mxu1 %v9227_v13  ;;  %6661 = vmatprep.subr.mxu0 %v11684_v37 }
 0x112   :  { %6696 = vmatprep.subr.mxu1 %v11684_v37  ;;  %6662 = vmatpush3.msra.mxu0 %v9113_v42 }
 0x113   :  { %6697 = vmatpush3.msra.mxu1 %v9235_v15  ;;  %6663 = vmatprep.subr.mxu0 %v11684_v37 }
 0x114   :  { %6698 = vmatprep.subr.mxu1 %v11684_v37  ;;  %6664 = vmatpush3.msra.mxu0 %v9117_v44 }
 0x115   :  { %6699 = vmatpush3.msra.mxu1 %v9243_v17  ;;  %6665 = vmatprep.subr.mxu0 %v11684_v37 }
 0x116   :  { %6700 = vmatprep.subr.mxu1 %v11684_v37  ;;  %6666 = vmatpush3.msra.mxu0 %v9121_v46 }
 0x117   :  { %6701 = vmatpush3.msra.mxu1 %v9251_v19  ;;  %6667 = vmatprep.subr.mxu0 %v11684_v37 }
 0x118   :  { %6702 = vmatprep.subr.mxu1 %v11684_v37  ;;  %6668 = vmatpush3.msra.mxu0 %v9125_v48 }
 0x119   :  { %6703 = vmatpush3.msra.mxu1 %v9259_v21  ;;  %6669 = vmatprep.subr.mxu0 %v11684_v37 }
 0x11a   :  { %6704 = vmatprep.subr.mxu1 %v11684_v37  ;;  %6670 = vmatpush3.msra.mxu0 %v9129_v50 }
 0x11b   :  { %6705 = vmatpush3.msra.mxu1 %v9267_v23  ;;  %6671 = vmatprep.subr.mxu0 %v11684_v37 }
 0x11c   :  { %6706 = vmatprep.subr.mxu1 %v11684_v37  ;;  %6672 = vmatpush3.msra.mxu0 %v9133_v52 }
 0x11d   :  { %6707 = vmatpush3.msra.mxu1 %v9275_v25  ;;  %6673 = vmatprep.subr.mxu0 %v11684_v37 }
 0x11e   :  { %6708 = vmatprep.subr.mxu1 %v11684_v37  ;;  %6674 = vmatpush3.msra.mxu0 %v9149_v56 }
 0x11f   :  { %6709 = vmatpush3.msra.mxu1 %v9285_v27  ;;  %6675 = vmatprep.subr.mxu0 %v11684_v37 }
 0x120   :  { %6710 = vmatprep.subr.mxu1 %v11684_v37  ;;  %6676 = vmatpush3.msra.mxu0 %v9154_v58 }
 0x121   :  { %6711 = vmatpush3.msra.mxu1 %v9293_v29  ;;  %6677 = vmatprep.subr.mxu0 %v11684_v37 }
 0x122   :  { %6712 = vmatprep.subr.mxu1 %v11684_v37  ;;  %6678 = vmatpush3.msra.mxu0 %v9171_v62 }
 0x123   :  { %6713 = vmatpush3.msra.mxu1 %v9303_v31  ;;  %6679 = vmatprep.subr.mxu0 %v11684_v37 }
 0x124   :  { %6714 = vmatprep.subr.mxu1 %v11684_v37  ;;  %6680 = vmatpush3.msra.mxu0 %v9176_v0 }
 0x125   :  { %6715 = vmatpush3.msra.mxu1 %v9311_v33  ;;  %6681 = vmatprep.subr.mxu0 %v11684_v37 }
 0x126   :  { %6716 = vmatprep.subr.mxu1 %v11684_v37  ;;  %6682 = vmatpush3.msra.mxu0 %v9193_v4 }
 0x127   :  { %6717 = vmatpush3.msra.mxu1 %v9321_v36  ;;  %6683 = vmatprep.subr.mxu0 %v11684_v37 }
 0x128   :  { %6718 = vmatprep.subr.mxu1 %v11684_v37  ;;  %6684 = vmatpush3.msra.mxu0 %v9198_v6 }
 0x129   :  { %6719 = vmatpush3.msra.mxu1 %v9329_v41  ;;  %6685 = vmatprep.subr.mxu0 %v11684_v37 }
 0x12a   :  { %6720 = vmatprep.subr.mxu1 %v11684_v37  ;;  %6686 = vmatpush3.msra.mxu0 %v9204_v8 }
 0x12b   :  { %6687 = vmatprep.mubr.msk.f32.mxu0 %vm8895_vm0, %v11684_v37  ;;  %6721 = vmatpush3.msra.mxu1 %v9337_v45 }
 0x12c   :  { %6722 = vmatprep.mubr.msk.f32.mxu1 %vm8895_vm0, %v11684_v37  ;;  %6725 = vmatprep.subr.mxu0 %v11684_v37 }
 0x12d   :  { %6760 = vmatprep.subr.mxu1 %v11684_v37 }
 0x17d   :  { %v6452_v51 = vpop.f32.mrf.mxu0 }
 0x17e   :  { %v9429_v54 = vadd.f32 %v6452_v51, %v5400_v49 }
 0x17f   :  { %v6496_v55 = vpop.f32.mrf.mxu1  ;;  %v334_v59 = vpop.f32.mrf.mxu0 }
 0x180   :  { %11744 = vst [vmem:[#allocation37_spill] sm:$0xff] %v9429_v54  ;;  %v9431_v57 = vadd.f32 %v6496_v55, %v5401_v53 }
 0x181   :  { %v470_v60 = vpop.f32.mrf.mxu1 }
 0x182   :  { %11745 = vst [vmem:[#allocation38_spill] sm:$0xff] %v9431_v57 }
 0x192   :  { %v6455_v61 = vpop.f32.mrf.mxu0 }
 0x193   :  { %v9433_v63 = vadd.f32 %v6455_v61, %v5400_v49 }
 0x194   :  { %v344_v1 = vpop.f32.mrf.mxu0  ;;  %v6499_v2 = vpop.f32.mrf.mxu1 }
 0x195   :  { %11746 = vst [vmem:[#allocation39_spill] sm:$0xff] %v9433_v63  ;;  %v9435_v3 = vadd.f32 %v5400_v49, %v344_v1  ;;  %v9437_v5 = vadd.f32 %v6499_v2, %v5401_v53 }
 0x196   :  { %v480_v7 = vpop.f32.mrf.mxu1 }
 0x197   :  { %11747 = vst [vmem:[#allocation40_spill] sm:$0xff] %v9435_v3  ;;  %11748 = vst [vmem:[#allocation41_spill] sm:$0xff] %v9437_v5  ;;  %v9439_v37 = vadd.f32 %v5401_v53, %v480_v7 }
 0x198   :  { %v6458_v45 = vpop.f32.mrf.mxu0 }
 0x199   :  { %11749 = vst [vmem:[#allocation42_spill] sm:$0xff] %v9439_v37  ;;  %v9441_v51 = vadd.f32 %v6458_v45, %v5400_v49 }
 0x19a   :  { %v354_v54 = vpop.f32.mrf.mxu0  ;;  %v6502_v55 = vpop.f32.mrf.mxu1 }
 0x19b   :  { %11750 = vst [vmem:[#allocation43_spill] sm:$0xff] %v9441_v51  ;;  %v9443_v57 = vadd.f32 %v5400_v49, %v354_v54  ;;  %v9445_v41 = vadd.f32 %v6502_v55, %v5401_v53  ;;  %v5402_v54 = vld [vmem:[%s11668_s9] ss:$0 sm:$0xff] }
 0x19c   :  { %v490_v61 = vpop.f32.mrf.mxu1 }
 0x19d   :  { %11751 = vst [vmem:[#allocation44_spill] sm:$0xff] %v9443_v57  ;;  %11752 = vst [vmem:[#allocation45_spill] sm:$0xff] %v9445_v41  ;;  %v9447_v63 = vadd.f32 %v5401_v53, %v490_v61 }
 0x19e   :  { %v6461_v36 = vpop.f32.mrf.mxu0 }
 0x19f   :  { %11753 = vst [vmem:[#allocation46_spill] sm:$0xff] %v9447_v63  ;;  %v9449_v1 = vadd.f32 %v6461_v36, %v5400_v49  ;;  %v335_v36 = vadd.f32 %v5400_v49, %v334_v59  ;;  %v471_v59 = vadd.f32 %v5401_v53, %v470_v60 }
 0x1a0   :  { %v364_v2 = vpop.f32.mrf.mxu0  ;;  %v6505_v5 = vpop.f32.mrf.mxu1 }
 0x1a1   :  { %11754 = vst [vmem:[#allocation47_spill] sm:$0xff] %v9449_v1  ;;  %v9451_v3 = vadd.f32 %v5400_v49, %v364_v2  ;;  %v9453_v7 = vadd.f32 %v6505_v5, %v5401_v53 }
 0x1a2   :  { %v500_v45 = vpop.f32.mrf.mxu1 }
 0x1a3   :  { %11755 = vst [vmem:[#allocation48_spill] sm:$0xff] %v9451_v3  ;;  %11756 = vst [vmem:[#allocation49_spill] sm:$0xff] %v9453_v7  ;;  %v9455_v51 = vadd.f32 %v5401_v53, %v500_v45 }
 0x1a5   :  { %11757 = vst [vmem:[#allocation50_spill] sm:$0xff] %v9455_v51  ;;  %v6540_v55 = vpop.f32.mrf.mxu0 }
 0x1a6   :  { %v736_v41 = vpop.f32.mrf.mxu1  ;;  %v9460_v61 = vadd.f32 %v6540_v55, %v5402_v54 }
 0x1a7   :  { %v843_v1 = vadd.f32 %v736_v41, %v335_v36  ;;  %v606_v2 = vpop.f32.mrf.mxu0 }
 0x1a8   :  { %11758 = vst [vmem:[#allocation51_spill] sm:$0xff] %v9460_v61  ;;  %v6584_v63 = vpop.f32.mrf.mxu1 }
 0x1a9   :  { %v5403_v57 = vmul.f32 -1.442695, %v843_v1 }
 0x1ab   :  { %8413 = vpow2.f32 %v5403_v57 }
 0x1b8   :  { %v8414_v55 = vpop.eup %8413 }
 0x1b9   :  { %v6543_v3 = vpop.f32.mrf.mxu0  ;;  %v847_v49 = vadd.f32 1.0, %v8414_v55 }
 0x1ba   :  { %v9462_v5 = vadd.f32 %v6543_v3, %v5402_v54 }
 0x1bb   :  { %v616_v7 = vpop.f32.mrf.mxu0  ;;  %8415 = vrcp.f32 %v847_v49 }
 0x1bc   :  { %11759 = vst [vmem:[#allocation52_spill] sm:$0xff] %v9462_v5  ;;  %v9464_v45 = vadd.f32 %v5402_v54, %v616_v7 }
 0x1be   :  { %v6546_v51 = vpop.f32.mrf.mxu0 }
 0x1bf   :  { %v9466_v37 = vadd.f32 %v6546_v51, %v5402_v54 }
 0x1c0   :  { %v626_v33 = vpop.f32.mrf.mxu0 }
 0x1c1   :  { %11760 = vst [vmem:[#allocation53_spill] sm:$0xff] %v9466_v37  ;;  %v9468_v31 = vadd.f32 %v5402_v54, %v626_v33  ;;  %v9477_v33 = vld [vmem:[%s11669_s10] ss:$0 sm:$0xff] }
 0x1c3   :  { %11761 = vst [vmem:[#allocation54_spill] sm:$0xff] %v9468_v31  ;;  %v6549_v61 = vpop.f32.mrf.mxu0 }
 0x1c4   :  { %v9470_v63 = vadd.f32 %v6549_v61, %v5402_v54 }
 0x1c5   :  { %v636_v41 = vpop.f32.mrf.mxu0 }
 0x1c6   :  { %11762 = vst [vmem:[#allocation55_spill] sm:$0xff] %v9470_v63  ;;  %v9472_v57 = vadd.f32 %v5402_v54, %v636_v41  ;;  %v607_v41 = vadd.f32 %v5402_v54, %v606_v2 }
 0x1c8   :  { %11763 = vst [vmem:[#allocation56_spill] sm:$0xff] %v9472_v57  ;;  %v8416_v63 = vpop.eup %8415 }
 0x1ca   :  { %v822_v3 = vpop.f32.mrf.mxu0 }
 0x1cb   :  { %v931_v1 = vpop.f32.mrf.mxu1  ;;  %v851_v7 = vadd.f32 %v822_v3, %v471_v59 }
 0x1cc   :  { %v6619_v36 = vpop.f32.mrf.mxu0  ;;  %v932_v61 = vadd.f32 %v9477_v33, %v931_v1 }
 0x1cd   :  { %v6654_v5 = vpop.f32.mrf.mxu1  ;;  %v5404_v51 = vmul.f32 -1.442695, %v851_v7 }
 0x1ce   :  { %v935_v55 = vmul.f32 %v8416_v63, %v932_v61  ;;  %v11765_v63 = vmov 0.0   ;;  %v9698_v61 = vld [vmem:[#allocation11 + $0x38] sm:$0xff] }
 0x1cf   :  { %8417 = vpow2.f32 %v5404_v51 }
 0x1d0   :  { %v936_v60 = vadd.f32 %v935_v55, %v607_v41  ;;  %v9702_v55 = vld [vmem:[#allocation13 + $0x38] sm:$0xff]  ;;  %v9706_v41 = vld [vmem:[#allocation11 + $0x30] sm:$0xff] }
 0x1dc   :  { %v8418_v57 = vpop.eup %8417 }
 0x1dd   :  { %v855_v53 = vadd.f32 1.0, %v8418_v57 }
 0x1df   :  { %8419 = vrcp.f32 %v855_v53  ;;  %v9710_v53 = vld [vmem:[#allocation13 + $0x30] sm:$0xff] }
 0x1e0   :  { %8421 = vtanh.f32 %v936_v60  ;;  %v9714_v60 = vld [vmem:[#allocation11 + $0x28] sm:$0xff] }
 0x1ec   :  { %v8420_v49 = vpop.eup %8419 }
 0x1ed   :  { %v938_v59 = vsub.f32 1.0, %v8420_v49  ;;  %v8422_v5 = vpop.eup %8421  ;;  %v940_v3 = vmul.f32 0.0, %v8420_v49  ;;  %v9718_v49 = vld [vmem:[#allocation13 + $0x28] sm:$0xff] }
 0x1ef   :  { %v939_v7 = vmul.f32 %v8422_v5, %v938_v59  ;;  %v9722_v59 = vld [vmem:[#allocation11 + $0x20] sm:$0xff] }
 0x1f0   :  { %v9726_v5 = vld [vmem:[#allocation13 + $0x20] sm:$0xff] }
 0x1f1   :  { %v9480_v36 = vadd.f32 %v940_v3, %v939_v7  ;;  %v9730_v3 = vld [vmem:[#allocation11 + $0x18] sm:$0xff] }
 0x1f2   :  { %v9734_v7 = vld [vmem:[#allocation13 + $0x18] sm:$0xff] }
 0x1f3   :  { %11764 = vst [vmem:[#allocation57_spill] sm:$0xff] %v9480_v36  ;;  %6688 = vmatmul.mubr.f32.vlgmr.msra.gmra.mxu0 %v9480_v36  ;;  %6723 = vmatmul.mubr.f32.vlgmr.msra.gmra.mxu1 %v9480_v36 }
 0x1f4   :  { %6726 = vmatpush3.msra.mxu0 %v9213_v10  ;;  %6757 = vmatprep.mubr.msk.f32.mxu0 %vm8895_vm0, %v11765_v63 }
 0x1f5   :  { %6727 = vmatprep.subr.mxu0 %v11765_v63  ;;  %6761 = vmatpush3.msra.mxu1 %v9100_v35  ;;  %v11766_v35 = vld [vmem:[#allocation32_spill] sm:$0xff] }
 0x1f6   :  { %6728 = vmatpush3.msra.mxu0 %v9221_v12  ;;  %6762 = vmatprep.subr.mxu1 %v11765_v63 }
 0x1f7   :  { %6729 = vmatprep.subr.mxu0 %v11765_v63  ;;  %6763 = vmatpush3.msra.mxu1 %v9105_v38  ;;  %v11767_v38 = vld [vmem:[#allocation33_spill] sm:$0xff] }
 0x1f8   :  { %6730 = vmatpush3.msra.mxu0 %v9229_v14  ;;  %6764 = vmatprep.subr.mxu1 %v11765_v63  ;;  %11775 = vst [vmem:[#allocation33_spill] sm:$0xff] %v9726_v5 }
 0x1f9   :  { %6731 = vmatprep.subr.mxu0 %v11765_v63  ;;  %6765 = vmatpush3.msra.mxu1 %v9109_v40  ;;  %v11768_v40 = vld [vmem:[#allocation34_spill] sm:$0xff] }
 0x1fa   :  { %6732 = vmatpush3.msra.mxu0 %v9237_v16  ;;  %6766 = vmatprep.subr.mxu1 %v11765_v63  ;;  %11776 = vst [vmem:[#allocation34_spill] sm:$0xff] %v9734_v7 }
 0x1fb   :  { %6733 = vmatprep.subr.mxu0 %v11765_v63  ;;  %6767 = vmatpush3.msra.mxu1 %v9113_v42  ;;  %v11769_v42 = vld [vmem:[#allocation35_spill] sm:$0xff] }
 0x1fc   :  { %6734 = vmatpush3.msra.mxu0 %v9245_v18  ;;  %6768 = vmatprep.subr.mxu1 %v11765_v63 }
 0x1fd   :  { %6735 = vmatprep.subr.mxu0 %v11765_v63  ;;  %6769 = vmatpush3.msra.mxu1 %v9117_v44  ;;  %v11770_v44 = vld [vmem:[#allocation36_spill] sm:$0xff] }
 0x1fe   :  { %6736 = vmatpush3.msra.mxu0 %v9253_v20  ;;  %6770 = vmatprep.subr.mxu1 %v11765_v63 }
 0x1ff   :  { %6737 = vmatprep.subr.mxu0 %v11765_v63  ;;  %6771 = vmatpush3.msra.mxu1 %v9121_v46 }
 0x200   :  { %6738 = vmatpush3.msra.mxu0 %v9261_v22  ;;  %6772 = vmatprep.subr.mxu1 %v11765_v63 }
 0x201   :  { %6739 = vmatprep.subr.mxu0 %v11765_v63  ;;  %6773 = vmatpush3.msra.mxu1 %v9125_v48 }
 0x202   :  { %6740 = vmatpush3.msra.mxu0 %v9269_v24  ;;  %6774 = vmatprep.subr.mxu1 %v11765_v63 }
 0x203   :  { %6741 = vmatprep.subr.mxu0 %v11765_v63  ;;  %6775 = vmatpush3.msra.mxu1 %v9129_v50  ;;  %v11771_v50 = vld [vmem:[#allocation37_spill] sm:$0xff] }
 0x204   :  { %6742 = vmatpush3.msra.mxu0 %v9279_v26  ;;  %6776 = vmatprep.subr.mxu1 %v11765_v63 }
 0x205   :  { %6743 = vmatprep.subr.mxu0 %v11765_v63  ;;  %6777 = vmatpush3.msra.mxu1 %v9133_v52 }
 0x206   :  { %6744 = vmatpush3.msra.mxu0 %v9287_v28  ;;  %6778 = vmatprep.subr.mxu1 %v11765_v63 }
 0x207   :  { %6745 = vmatprep.subr.mxu0 %v11765_v63  ;;  %6779 = vmatpush3.msra.mxu1 %v9149_v56 }
 0x208   :  { %6746 = vmatpush3.msra.mxu0 %v9297_v30  ;;  %6780 = vmatprep.subr.mxu1 %v11765_v63 }
 0x209   :  { %6747 = vmatprep.subr.mxu0 %v11765_v63  ;;  %6781 = vmatpush3.msra.mxu1 %v9154_v58 }
 0x20a   :  { %6748 = vmatpush3.msra.mxu0 %v9305_v32  ;;  %6782 = vmatprep.subr.mxu1 %v11765_v63 }
 0x20b   :  { %6749 = vmatprep.subr.mxu0 %v11765_v63  ;;  %6783 = vmatpush3.msra.mxu1 %v9171_v62 }
 0x20c   :  { %6750 = vmatpush3.msra.mxu0 %v9315_v34  ;;  %6784 = vmatprep.subr.mxu1 %v11765_v63 }
 0x20d   :  { %6751 = vmatprep.subr.mxu0 %v11765_v63  ;;  %6785 = vmatpush3.msra.mxu1 %v9176_v0  ;;  %v11772_v0 = vld [vmem:[#allocation38_spill] sm:$0xff] }
 0x20e   :  { %6752 = vmatpush3.msra.mxu0 %v9323_v39  ;;  %6786 = vmatprep.subr.mxu1 %v11765_v63 }
 0x20f   :  { %6753 = vmatprep.subr.mxu0 %v11765_v63  ;;  %6787 = vmatpush3.msra.mxu1 %v9193_v4 }
 0x210   :  { %6754 = vmatpush3.msra.mxu0 %v9331_v43  ;;  %6788 = vmatprep.subr.mxu1 %v11765_v63 }
 0x211   :  { %6755 = vmatprep.subr.mxu0 %v11765_v63  ;;  %6789 = vmatpush3.msra.mxu1 %v9198_v6 }
 0x212   :  { %6756 = vmatpush3.msra.mxu0 %v9341_v47  ;;  %6790 = vmatprep.subr.mxu1 %v11765_v63 }
 0x213   :  { %6758 = vmatmul.mubr.f32.vlgmr.msra.gmra.mxu0 %v9480_v36  ;;  %6795 = vmatprep.subr.mxu0 %v11765_v63 }
 0x214   :  { %6796 = vmatpush3.msra.mxu0 %v9211_v9  ;;  %6791 = vmatpush3.msra.mxu1 %v9204_v8 }
 0x215   :  { %6797 = vmatprep.subr.mxu0 %v11765_v63  ;;  %6792 = vmatprep.mubr.msk.f32.mxu1 %vm8895_vm0, %v11765_v63 }
 0x216   :  { %6798 = vmatpush3.msra.mxu0 %v9219_v11  ;;  %6827 = vmatprep.mubr.msk.f32.mxu0 %vm8895_vm0, %v11765_v63 }
 0x217   :  { %6799 = vmatprep.subr.mxu0 %v11765_v63  ;;  %6830 = vmatprep.subr.mxu1 %v11765_v63 }
 0x218   :  { %6800 = vmatpush3.msra.mxu0 %v9227_v13 }
 0x219   :  { %6801 = vmatprep.subr.mxu0 %v11765_v63 }
 0x21a   :  { %6802 = vmatpush3.msra.mxu0 %v9235_v15 }
 0x21b   :  { %6803 = vmatprep.subr.mxu0 %v11765_v63 }
 0x21c   :  { %6804 = vmatpush3.msra.mxu0 %v9243_v17 }
 0x21d   :  { %6805 = vmatprep.subr.mxu0 %v11765_v63 }
 0x21e   :  { %6806 = vmatpush3.msra.mxu0 %v9251_v19 }
 0x21f   :  { %6807 = vmatprep.subr.mxu0 %v11765_v63 }
 0x220   :  { %6808 = vmatpush3.msra.mxu0 %v9259_v21 }
 0x221   :  { %6809 = vmatprep.subr.mxu0 %v11765_v63 }
 0x222   :  { %6810 = vmatpush3.msra.mxu0 %v9267_v23 }
 0x223   :  { %6811 = vmatprep.subr.mxu0 %v11765_v63 }
 0x224   :  { %6812 = vmatpush3.msra.mxu0 %v9275_v25  ;;  %v11773_v25 = vld [vmem:[#allocation51_spill] sm:$0xff] }
 0x225   :  { %6813 = vmatprep.subr.mxu0 %v11765_v63 }
 0x226   :  { %6814 = vmatpush3.msra.mxu0 %v9285_v27 }
 0x227   :  { %6815 = vmatprep.subr.mxu0 %v11765_v63 }
 0x228   :  { %6816 = vmatpush3.msra.mxu0 %v9293_v29 }
 0x229   :  { %6817 = vmatprep.subr.mxu0 %v11765_v63 }
 0x22a   :  { %6818 = vmatpush3.msra.mxu0 %v11766_v35  ;;  %v9738_v35 = vld [vmem:[#allocation11 + $0x10] sm:$0xff] }
 0x22b   :  { %6819 = vmatprep.subr.mxu0 %v11765_v63 }
 0x22c   :  { %6820 = vmatpush3.msra.mxu0 %v11767_v38  ;;  %v9742_v38 = vld [vmem:[#allocation13 + $0x10] sm:$0xff] }
 0x22d   :  { %6821 = vmatprep.subr.mxu0 %v11765_v63  ;;  %11777 = vst [vmem:[#allocation35_spill] sm:$0xff] %v9742_v38 }
 0x22e   :  { %6822 = vmatpush3.msra.mxu0 %v11768_v40  ;;  %v9746_v40 = vld [vmem:[#allocation11 + $0x8] sm:$0xff] }
 0x22f   :  { %6823 = vmatprep.subr.mxu0 %v11765_v63 }
 0x230   :  { %6824 = vmatpush3.msra.mxu0 %v11769_v42  ;;  %v9750_v42 = vld [vmem:[#allocation13 + $0x8] sm:$0xff] }
 0x231   :  { %6825 = vmatprep.subr.mxu0 %v11765_v63  ;;  %11778 = vst [vmem:[#allocation36_spill] sm:$0xff] %v9750_v42 }
 0x232   :  { %6826 = vmatpush3.msra.mxu0 %v11770_v44  ;;  %v9754_v44 = vld [vmem:[#allocation11] sm:$0xff] }
 0x233   :  { %6865 = vmatprep.subr.mxu0 %v11765_v63 }
 0x2b3   :  { %v1025_v46 = vpop.f32.mrf.mxu0  ;;  %v1111_v48 = vpop.f32.mrf.mxu1 }
 0x2b4   :  { %v1133_v52 = vadd.f32 %v1025_v46, %v11771_v50  ;;  %v1142_v4 = vadd.f32 %v1111_v48, %v11772_v0  ;;  %v9756_v46 = vld [vmem:[#allocation13] sm:$0xff] }
 0x2b5   :  { %v6689_v56 = vpop.f32.mrf.mxu0  ;;  %v6724_v58 = vpop.f32.mrf.mxu1  ;;  %11779 = vst [vmem:[#allocation37_spill] sm:$0xff] %v9756_v46 }
 0x2b6   :  { %v5406_v62 = vmul.f32 -1.442695, %v1133_v52  ;;  %v5407_v6 = vmul.f32 -1.442695, %v1142_v4  ;;  %v11780_v52 = vld [vmem:[#allocation40_spill] sm:$0xff]  ;;  %v11781_v4 = vld [vmem:[#allocation42_spill] sm:$0xff] }
 0x2b8   :  { %8423 = vpow2.f32 %v5406_v62 }
 0x2b9   :  { %8425 = vpow2.f32 %v5407_v6 }
 0x2c5   :  { %v8424_v8 = vpop.eup %8423 }
 0x2c6   :  { %v1137_v9 = vadd.f32 1.0, %v8424_v8  ;;  %v8426_v11 = vpop.eup %8425 }
 0x2c7   :  { %v1146_v13 = vadd.f32 1.0, %v8426_v11 }
 0x2c8   :  { %8427 = vrcp.f32 %v1137_v9 }
 0x2c9   :  { %8429 = vrcp.f32 %v1146_v13 }
 0x2d3   :  { %v1217_v15 = vpop.f32.mrf.mxu0 }
 0x2d4   :  { %v1218_v17 = vadd.f32 %v9477_v33, %v1217_v15 }
 0x2d5   :  { %v8428_v19 = vpop.eup %8427  ;;  %v6759_v21 = vpop.f32.mrf.mxu0 }
 0x2d6   :  { %v1221_v23 = vmul.f32 %v8428_v19, %v1218_v17  ;;  %v8430_v29 = vpop.eup %8429 }
 0x2d7   :  { %v1224_v54 = vsub.f32 1.0, %v8430_v29  ;;  %v1226_v57 = vmul.f32 %v8430_v29, %v9480_v36 }
 0x2d8   :  { %v1222_v27 = vadd.f32 %v1221_v23, %v11773_v25 }
 0x2da   :  { %8431 = vtanh.f32 %v1222_v27 }
 0x2e7   :  { %v8432_v2 = vpop.eup %8431 }
 0x2e8   :  { %v1225_v1 = vmul.f32 %v8432_v2, %v1224_v54 }
 0x2ea   :  { %v9592_v51 = vadd.f32 %v1226_v57, %v1225_v1 }
 0x2ec   :  { %11774 = vst [vmem:[#allocation32_spill] sm:$0xff] %v9592_v51  ;;  %6793 = vmatmul.mubr.f32.vlgmr.msra.gmra.mxu1 %v9592_v51  ;;  %6828 = vmatmul.mubr.f32.vlgmr.msra.gmra.mxu0 %v9592_v51 }
 0x2ed   :  { %6831 = vmatpush3.msra.mxu1 %v9213_v10  ;;  %6862 = vmatprep.mubr.msk.f32.mxu1 %vm8895_vm0, %v11765_v63  ;;  %v9635_v10 = vld [vmem:[#allocation11 + $0x78] sm:$0xff] }
 0x2ee   :  { %6832 = vmatprep.subr.mxu1 %v11765_v63  ;;  %6897 = vmatprep.mubr.msk.f32.mxu0 %vm8895_vm0, %v11765_v63 }
 0x2ef   :  { %6833 = vmatpush3.msra.mxu1 %v9221_v12  ;;  %6866 = vmatpush3.msra.mxu0 %v9635_v10  ;;  %v9638_v12 = vld [vmem:[#allocation13 + $0x78] sm:$0xff] }
 0x2f0   :  { %6834 = vmatprep.subr.mxu1 %v11765_v63  ;;  %6867 = vmatprep.subr.mxu0 %v11765_v63 }
 0x2f1   :  { %6835 = vmatpush3.msra.mxu1 %v9229_v14  ;;  %v9642_v14 = vld [vmem:[#allocation11 + $0x70] sm:$0xff] }
 0x2f2   :  { %6836 = vmatprep.subr.mxu1 %v11765_v63  ;;  %6868 = vmatpush3.msra.mxu0 %v9642_v14 }
 0x2f3   :  { %6837 = vmatpush3.msra.mxu1 %v9237_v16  ;;  %v9646_v16 = vld [vmem:[#allocation13 + $0x70] sm:$0xff]  ;;  %6869 = vmatprep.subr.mxu0 %v11765_v63 }
 0x2f4   :  { %6838 = vmatprep.subr.mxu1 %v11765_v63 }
 0x2f5   :  { %6839 = vmatpush3.msra.mxu1 %v9245_v18  ;;  %v9650_v18 = vld [vmem:[#allocation11 + $0x68] sm:$0xff] }
 0x2f6   :  { %6840 = vmatprep.subr.mxu1 %v11765_v63  ;;  %6870 = vmatpush3.msra.mxu0 %v9650_v18 }
 0x2f7   :  { %6841 = vmatpush3.msra.mxu1 %v9253_v20  ;;  %v9654_v20 = vld [vmem:[#allocation13 + $0x68] sm:$0xff]  ;;  %6871 = vmatprep.subr.mxu0 %v11765_v63 }
 0x2f8   :  { %6842 = vmatprep.subr.mxu1 %v11765_v63 }
 0x2f9   :  { %6843 = vmatpush3.msra.mxu1 %v9261_v22  ;;  %v9658_v22 = vld [vmem:[#allocation11 + $0x60] sm:$0xff] }
 0x2fa   :  { %6844 = vmatprep.subr.mxu1 %v11765_v63  ;;  %6872 = vmatpush3.msra.mxu0 %v9658_v22 }
 0x2fb   :  { %6845 = vmatpush3.msra.mxu1 %v9269_v24  ;;  %v9662_v24 = vld [vmem:[#allocation13 + $0x60] sm:$0xff]  ;;  %6873 = vmatprep.subr.mxu0 %v11765_v63 }
 0x2fc   :  { %6846 = vmatprep.subr.mxu1 %v11765_v63 }
 0x2fd   :  { %6847 = vmatpush3.msra.mxu1 %v9279_v26  ;;  %v9666_v26 = vld [vmem:[#allocation11 + $0x58] sm:$0xff] }
 0x2fe   :  { %6848 = vmatprep.subr.mxu1 %v11765_v63  ;;  %6874 = vmatpush3.msra.mxu0 %v9666_v26 }
 0x2ff   :  { %6849 = vmatpush3.msra.mxu1 %v9287_v28  ;;  %v9670_v28 = vld [vmem:[#allocation13 + $0x58] sm:$0xff]  ;;  %6875 = vmatprep.subr.mxu0 %v11765_v63 }
 0x300   :  { %6850 = vmatprep.subr.mxu1 %v11765_v63 }
 0x301   :  { %6851 = vmatpush3.msra.mxu1 %v9297_v30  ;;  %v9674_v30 = vld [vmem:[#allocation11 + $0x50] sm:$0xff] }
 0x302   :  { %6852 = vmatprep.subr.mxu1 %v11765_v63  ;;  %6876 = vmatpush3.msra.mxu0 %v9674_v30 }
 0x303   :  { %6853 = vmatpush3.msra.mxu1 %v9305_v32  ;;  %v9678_v32 = vld [vmem:[#allocation13 + $0x50] sm:$0xff]  ;;  %6877 = vmatprep.subr.mxu0 %v11765_v63 }
 0x304   :  { %6854 = vmatprep.subr.mxu1 %v11765_v63 }
 0x305   :  { %6855 = vmatpush3.msra.mxu1 %v9315_v34  ;;  %v9682_v34 = vld [vmem:[#allocation11 + $0x48] sm:$0xff] }
 0x306   :  { %6856 = vmatprep.subr.mxu1 %v11765_v63  ;;  %6878 = vmatpush3.msra.mxu0 %v9682_v34 }
 0x307   :  { %6857 = vmatpush3.msra.mxu1 %v9323_v39  ;;  %v9686_v39 = vld [vmem:[#allocation13 + $0x48] sm:$0xff]  ;;  %6879 = vmatprep.subr.mxu0 %v11765_v63 }
 0x308   :  { %6858 = vmatprep.subr.mxu1 %v11765_v63 }
 0x309   :  { %6859 = vmatpush3.msra.mxu1 %v9331_v43  ;;  %v9690_v43 = vld [vmem:[#allocation11 + $0x40] sm:$0xff] }
 0x30a   :  { %6860 = vmatprep.subr.mxu1 %v11765_v63  ;;  %6880 = vmatpush3.msra.mxu0 %v9690_v43 }
 0x30b   :  { %6861 = vmatpush3.msra.mxu1 %v9341_v47  ;;  %v9694_v47 = vld [vmem:[#allocation13 + $0x40] sm:$0xff]  ;;  %6881 = vmatprep.subr.mxu0 %v11765_v63 }
 0x30c   :  { %6863 = vmatmul.mubr.f32.vlgmr.msra.gmra.mxu1 %v9592_v51  ;;  %6900 = vmatprep.subr.mxu1 %v11765_v63 }
 0x30d   :  { %6932 = vmatprep.mubr.msk.f32.mxu1 %vm8895_vm0, %v11765_v63  ;;  %6901 = vmatpush3.msra.mxu1 %v9638_v12 }
 0x30e   :  { %6902 = vmatprep.subr.mxu1 %v11765_v63  ;;  %6882 = vmatpush3.msra.mxu0 %v9698_v61 }
 0x30f   :  { %6903 = vmatpush3.msra.mxu1 %v9646_v16  ;;  %6883 = vmatprep.subr.mxu0 %v11765_v63 }
 0x310   :  { %6904 = vmatprep.subr.mxu1 %v11765_v63  ;;  %6884 = vmatpush3.msra.mxu0 %v9706_v41 }
 0x311   :  { %6905 = vmatpush3.msra.mxu1 %v9654_v20  ;;  %6885 = vmatprep.subr.mxu0 %v11765_v63 }
 0x312   :  { %6906 = vmatprep.subr.mxu1 %v11765_v63  ;;  %6886 = vmatpush3.msra.mxu0 %v9714_v60 }
 0x313   :  { %6907 = vmatpush3.msra.mxu1 %v9662_v24  ;;  %6887 = vmatprep.subr.mxu0 %v11765_v63 }
 0x314   :  { %6908 = vmatprep.subr.mxu1 %v11765_v63  ;;  %6888 = vmatpush3.msra.mxu0 %v9722_v59 }
 0x315   :  { %6909 = vmatpush3.msra.mxu1 %v9670_v28  ;;  %6889 = vmatprep.subr.mxu0 %v11765_v63 }
 0x316   :  { %6910 = vmatprep.subr.mxu1 %v11765_v63  ;;  %6890 = vmatpush3.msra.mxu0 %v9730_v3 }
 0x317   :  { %6911 = vmatpush3.msra.mxu1 %v9678_v32  ;;  %6891 = vmatprep.subr.mxu0 %v11765_v63 }
 0x318   :  { %6912 = vmatprep.subr.mxu1 %v11765_v63  ;;  %6892 = vmatpush3.msra.mxu0 %v9738_v35 }
 0x319   :  { %6913 = vmatpush3.msra.mxu1 %v9686_v39  ;;  %6893 = vmatprep.subr.mxu0 %v11765_v63 }
 0x31a   :  { %6914 = vmatprep.subr.mxu1 %v11765_v63  ;;  %6894 = vmatpush3.msra.mxu0 %v9746_v40 }
 0x31b   :  { %6915 = vmatpush3.msra.mxu1 %v9694_v47  ;;  %6895 = vmatprep.subr.mxu0 %v11765_v63 }
 0x31c   :  { %6916 = vmatprep.subr.mxu1 %v11765_v63  ;;  %6896 = vmatpush3.msra.mxu0 %v9754_v44 }
 0x31d   :  { %6917 = vmatpush3.msra.mxu1 %v9702_v55  ;;  %6935 = vmatprep.subr.mxu0 %v11765_v63 }
 0x31e   :  { %6918 = vmatprep.subr.mxu1 %v11765_v63 }
 0x31f   :  { %6919 = vmatpush3.msra.mxu1 %v9710_v53 }
 0x320   :  { %6920 = vmatprep.subr.mxu1 %v11765_v63 }
 0x321   :  { %6921 = vmatpush3.msra.mxu1 %v9718_v49 }
 0x322   :  { %6922 = vmatprep.subr.mxu1 %v11765_v63 }
 0x323   :  { %6923 = vmatpush3.msra.mxu1 %v9726_v5 }
 0x324   :  { %6924 = vmatprep.subr.mxu1 %v11765_v63 }
 0x325   :  { %6925 = vmatpush3.msra.mxu1 %v9734_v7 }
 0x326   :  { %6926 = vmatprep.subr.mxu1 %v11765_v63 }
 0x327   :  { %6927 = vmatpush3.msra.mxu1 %v9742_v38 }
 0x328   :  { %6928 = vmatprep.subr.mxu1 %v11765_v63 }
 0x329   :  { %6929 = vmatpush3.msra.mxu1 %v9750_v42 }
 0x32a   :  { %6930 = vmatprep.subr.mxu1 %v11765_v63 }
 0x32b   :  { %6931 = vmatpush3.msra.mxu1 %v9756_v46 }
 0x32c   :  { %6970 = vmatprep.subr.mxu1 %v11765_v63 }
 0x3ac   :  { %v1312_v48 = vpop.f32.mrf.mxu1  ;;  %v1398_v50 = vpop.f32.mrf.mxu0 }
 0x3ad   :  { %v1420_v56 = vadd.f32 %v1312_v48, %v11780_v52  ;;  %v1429_v6 = vadd.f32 %v1398_v50, %v11781_v4  ;;  %v9770_v50 = vld [vmem:[#allocation14 + $0x78] sm:$0xff]  ;;  %v9774_v52 = vld [vmem:[#allocation14 + $0x70] sm:$0xff]  ;;  %v9810_v4 = vld [vmem:[#allocation14 + $0x40] sm:$0xff] }
 0x3ae   :  { %v6794_v58 = vpop.f32.mrf.mxu1  ;;  %v6829_v62 = vpop.f32.mrf.mxu0 }
 0x3af   :  { %v5408_v0 = vmul.f32 -1.442695, %v1420_v56  ;;  %v5409_v8 = vmul.f32 -1.442695, %v1429_v6  ;;  %v9786_v56 = vld [vmem:[#allocation14 + $0x60] sm:$0xff]  ;;  %v9792_v58 = vld [vmem:[#allocation14 + $0x58] sm:$0xff] }
 0x3b0   :  { %v9798_v62 = vld [vmem:[#allocation14 + $0x50] sm:$0xff]  ;;  %v9816_v6 = vld [vmem:[#allocation14 + $0x38] sm:$0xff] }
 0x3b1   :  { %8433 = vpow2.f32 %v5408_v0  ;;  %v9804_v0 = vld [vmem:[#allocation14 + $0x48] sm:$0xff] }
 0x3b2   :  { %8435 = vpow2.f32 %v5409_v8  ;;  %v9822_v8 = vld [vmem:[#allocation14 + $0x30] sm:$0xff] }
 0x3be   :  { %v8434_v9 = vpop.eup %8433 }
 0x3bf   :  { %v1424_v11 = vadd.f32 1.0, %v8434_v9  ;;  %v8436_v13 = vpop.eup %8435  ;;  %v9828_v9 = vld [vmem:[#allocation14 + $0x28] sm:$0xff] }
 0x3c0   :  { %v1433_v15 = vadd.f32 1.0, %v8436_v13  ;;  %v9840_v13 = vld [vmem:[#allocation14 + $0x18] sm:$0xff] }
 0x3c1   :  { %8437 = vrcp.f32 %v1424_v11  ;;  %v9834_v11 = vld [vmem:[#allocation14 + $0x20] sm:$0xff] }
 0x3c2   :  { %8439 = vrcp.f32 %v1433_v15  ;;  %v9846_v15 = vld [vmem:[#allocation14 + $0x10] sm:$0xff] }
 0x3cc   :  { %v1504_v17 = vpop.f32.mrf.mxu1 }
 0x3cd   :  { %v1505_v19 = vadd.f32 %v9477_v33, %v1504_v17  ;;  %v9852_v17 = vld [vmem:[#allocation14 + $0x8] sm:$0xff] }
 0x3ce   :  { %v8438_v21 = vpop.eup %8437  ;;  %v6864_v23 = vpop.f32.mrf.mxu1 }
 0x3cf   :  { %v1508_v25 = vmul.f32 %v8438_v21, %v1505_v19  ;;  %v8440_v29 = vpop.eup %8439  ;;  %v9858_v19 = vld [vmem:[#allocation14] sm:$0xff] }
 0x3d0   :  { %v1511_v54 = vsub.f32 1.0, %v8440_v29  ;;  %v1513_v57 = vmul.f32 %v8440_v29, %v9592_v51 }
 0x3d1   :  { %v1509_v27 = vadd.f32 %v1508_v25, %v9464_v45  ;;  %v9780_v45 = vld [vmem:[#allocation14 + $0x68] sm:$0xff]  ;;  %v11782_v25 = vld [vmem:[#allocation39_spill] sm:$0xff] }
 0x3d3   :  { %8441 = vtanh.f32 %v1509_v27 }
 0x3e0   :  { %v8442_v2 = vpop.eup %8441 }
 0x3e1   :  { %v1512_v1 = vmul.f32 %v8442_v2, %v1511_v54 }
 0x3e3   :  { %v9768_v48 = vadd.f32 %v1513_v57, %v1512_v1  ;;  %v11783_v57 = vld [vmem:[#allocation41_spill] sm:$0xff] }
 0x3e5   :  { %6898 = vmatmul.mubr.f32.vlgmr.msra.gmra.mxu0 %v9768_v48  ;;  %6933 = vmatmul.mubr.f32.vlgmr.msra.gmra.mxu1 %v9768_v48 }
 0x3e6   :  { %6936 = vmatpush3.msra.mxu0 %v9770_v50  ;;  %6967 = vmatprep.mubr.msk.f32.mxu0 %vm8895_vm0, %v11765_v63 }
 0x3e7   :  { %6937 = vmatprep.subr.mxu0 %v11765_v63  ;;  %6971 = vmatpush3.msra.mxu1 %v9635_v10 }
 0x3e8   :  { %6938 = vmatpush3.msra.mxu0 %v9774_v52  ;;  %6972 = vmatprep.subr.mxu1 %v11765_v63 }
 0x3e9   :  { %6939 = vmatprep.subr.mxu0 %v11765_v63  ;;  %6973 = vmatpush3.msra.mxu1 %v9642_v14 }
 0x3ea   :  { %6940 = vmatpush3.msra.mxu0 %v9780_v45  ;;  %6974 = vmatprep.subr.mxu1 %v11765_v63 }
 0x3eb   :  { %6941 = vmatprep.subr.mxu0 %v11765_v63  ;;  %6975 = vmatpush3.msra.mxu1 %v9650_v18 }
 0x3ec   :  { %6942 = vmatpush3.msra.mxu0 %v9786_v56  ;;  %6976 = vmatprep.subr.mxu1 %v11765_v63 }
 0x3ed   :  { %6943 = vmatprep.subr.mxu0 %v11765_v63  ;;  %6977 = vmatpush3.msra.mxu1 %v9658_v22 }
 0x3ee   :  { %6944 = vmatpush3.msra.mxu0 %v9792_v58  ;;  %6978 = vmatprep.subr.mxu1 %v11765_v63 }
 0x3ef   :  { %6945 = vmatprep.subr.mxu0 %v11765_v63  ;;  %6979 = vmatpush3.msra.mxu1 %v9666_v26 }
 0x3f0   :  { %6946 = vmatpush3.msra.mxu0 %v9798_v62  ;;  %6980 = vmatprep.subr.mxu1 %v11765_v63 }
 0x3f1   :  { %6947 = vmatprep.subr.mxu0 %v11765_v63  ;;  %6981 = vmatpush3.msra.mxu1 %v9674_v30 }
 0x3f2   :  { %6948 = vmatpush3.msra.mxu0 %v9804_v0  ;;  %6982 = vmatprep.subr.mxu1 %v11765_v63 }
 0x3f3   :  { %6949 = vmatprep.subr.mxu0 %v11765_v63  ;;  %6983 = vmatpush3.msra.mxu1 %v9682_v34 }
 0x3f4   :  { %6950 = vmatpush3.msra.mxu0 %v9810_v4  ;;  %6984 = vmatprep.subr.mxu1 %v11765_v63 }
 0x3f5   :  { %6951 = vmatprep.subr.mxu0 %v11765_v63  ;;  %6985 = vmatpush3.msra.mxu1 %v9690_v43 }
 0x3f6   :  { %6952 = vmatpush3.msra.mxu0 %v9816_v6  ;;  %6986 = vmatprep.subr.mxu1 %v11765_v63 }
 0x3f7   :  { %6953 = vmatprep.subr.mxu0 %v11765_v63  ;;  %6987 = vmatpush3.msra.mxu1 %v9698_v61 }
 0x3f8   :  { %6954 = vmatpush3.msra.mxu0 %v9822_v8  ;;  %6988 = vmatprep.subr.mxu1 %v11765_v63 }
 0x3f9   :  { %6955 = vmatprep.subr.mxu0 %v11765_v63  ;;  %6989 = vmatpush3.msra.mxu1 %v9706_v41 }
 0x3fa   :  { %6956 = vmatpush3.msra.mxu0 %v9828_v9  ;;  %6990 = vmatprep.subr.mxu1 %v11765_v63 }
 0x3fb   :  { %6957 = vmatprep.subr.mxu0 %v11765_v63  ;;  %6991 = vmatpush3.msra.mxu1 %v9714_v60 }
 0x3fc   :  { %6958 = vmatpush3.msra.mxu0 %v9834_v11  ;;  %6992 = vmatprep.subr.mxu1 %v11765_v63 }
 0x3fd   :  { %6959 = vmatprep.subr.mxu0 %v11765_v63  ;;  %6993 = vmatpush3.msra.mxu1 %v9722_v59 }
 0x3fe   :  { %6960 = vmatpush3.msra.mxu0 %v9840_v13  ;;  %6994 = vmatprep.subr.mxu1 %v11765_v63 }
 0x3ff   :  { %6961 = vmatprep.subr.mxu0 %v11765_v63  ;;  %6995 = vmatpush3.msra.mxu1 %v9730_v3 }
 0x400   :  { %6962 = vmatpush3.msra.mxu0 %v9846_v15  ;;  %6996 = vmatprep.subr.mxu1 %v11765_v63 }
 0x401   :  { %6963 = vmatprep.subr.mxu0 %v11765_v63  ;;  %6997 = vmatpush3.msra.mxu1 %v9738_v35 }
 0x402   :  { %6964 = vmatpush3.msra.mxu0 %v9852_v17  ;;  %6998 = vmatprep.subr.mxu1 %v11765_v63 }
 0x403   :  { %6965 = vmatprep.subr.mxu0 %v11765_v63  ;;  %6999 = vmatpush3.msra.mxu1 %v9746_v40 }
 0x404   :  { %6966 = vmatpush3.msra.mxu0 %v9858_v19  ;;  %7000 = vmatprep.subr.mxu1 %v11765_v63 }
 0x405   :  { %6968 = vmatmul.mubr.f32.vlgmr.msra.gmra.mxu0 %v9768_v48  ;;  %7005 = vmatprep.subr.mxu0 %v11765_v63 }
 0x406   :  { %7006 = vmatpush3.msra.mxu0 %v9638_v12  ;;  %7001 = vmatpush3.msra.mxu1 %v9754_v44 }
 0x407   :  { %7007 = vmatprep.subr.mxu0 %v11765_v63  ;;  %7002 = vmatprep.mubr.msk.f32.mxu1 %vm8895_vm0, %v11765_v63 }
 0x408   :  { %7008 = vmatpush3.msra.mxu0 %v9646_v16  ;;  %7037 = vmatprep.mubr.msk.f32.mxu0 %vm8895_vm0, %v11765_v63 }
 0x409   :  { %7009 = vmatprep.subr.mxu0 %v11765_v63  ;;  %7040 = vmatprep.subr.mxu1 %v11765_v63 }
 0x40a   :  { %7010 = vmatpush3.msra.mxu0 %v9654_v20 }
 0x40b   :  { %7011 = vmatprep.subr.mxu0 %v11765_v63 }
 0x40c   :  { %7012 = vmatpush3.msra.mxu0 %v9662_v24 }
 0x40d   :  { %7013 = vmatprep.subr.mxu0 %v11765_v63 }
 0x40e   :  { %7014 = vmatpush3.msra.mxu0 %v9670_v28 }
 0x40f   :  { %7015 = vmatprep.subr.mxu0 %v11765_v63 }
 0x410   :  { %7016 = vmatpush3.msra.mxu0 %v9678_v32 }
 0x411   :  { %7017 = vmatprep.subr.mxu0 %v11765_v63 }
 0x412   :  { %7018 = vmatpush3.msra.mxu0 %v9686_v39 }
 0x413   :  { %7019 = vmatprep.subr.mxu0 %v11765_v63 }
 0x414   :  { %7020 = vmatpush3.msra.mxu0 %v9694_v47 }
 0x415   :  { %7021 = vmatprep.subr.mxu0 %v11765_v63 }
 0x416   :  { %7022 = vmatpush3.msra.mxu0 %v9702_v55 }
 0x417   :  { %7023 = vmatprep.subr.mxu0 %v11765_v63 }
 0x418   :  { %7024 = vmatpush3.msra.mxu0 %v9710_v53 }
 0x419   :  { %7025 = vmatprep.subr.mxu0 %v11765_v63 }
 0x41a   :  { %7026 = vmatpush3.msra.mxu0 %v9718_v49 }
 0x41b   :  { %7027 = vmatprep.subr.mxu0 %v11765_v63 }
 0x41c   :  { %7028 = vmatpush3.msra.mxu0 %v9726_v5 }
 0x41d   :  { %7029 = vmatprep.subr.mxu0 %v11765_v63 }
 0x41e   :  { %7030 = vmatpush3.msra.mxu0 %v9734_v7 }
 0x41f   :  { %7031 = vmatprep.subr.mxu0 %v11765_v63 }
 0x420   :  { %7032 = vmatpush3.msra.mxu0 %v9742_v38 }
 0x421   :  { %7033 = vmatprep.subr.mxu0 %v11765_v63 }
 0x422   :  { %7034 = vmatpush3.msra.mxu0 %v9750_v42 }
 0x423   :  { %7035 = vmatprep.subr.mxu0 %v11765_v63 }
 0x424   :  { %7036 = vmatpush3.msra.mxu0 %v9756_v46 }
 0x425   :  { %7075 = vmatprep.subr.mxu0 %v11765_v63 }
 0x4a5   :  { %v1599_v21 = vpop.f32.mrf.mxu0  ;;  %v1685_v23 = vpop.f32.mrf.mxu1 }
 0x4a6   :  { %v1707_v27 = vadd.f32 %v1599_v21, %v11782_v25  ;;  %v1716_v1 = vadd.f32 %v1685_v23, %v11783_v57  ;;  %v11784_v25 = vld [vmem:[#allocation52_spill] sm:$0xff]  ;;  %v10143_v57 = vld [vmem:[#allocation11 + $0x30] sm:$0xff] }
 0x4a7   :  { %v6899_v29 = vpop.f32.mrf.mxu0  ;;  %v6934_v54 = vpop.f32.mrf.mxu1 }
 0x4a8   :  { %v5410_v2 = vmul.f32 -1.442695, %v1707_v27  ;;  %v5411_v51 = vmul.f32 -1.442695, %v1716_v1  ;;  %v10147_v1 = vld [vmem:[#allocation13 + $0x30] sm:$0xff] }
 0x4aa   :  { %8443 = vpow2.f32 %v5410_v2 }
 0x4ab   :  { %8445 = vpow2.f32 %v5411_v51 }
 0x4b7   :  { %v8444_v36 = vpop.eup %8443 }
 0x4b8   :  { %v1711_v37 = vadd.f32 1.0, %v8444_v36  ;;  %v8446_v31 = vpop.eup %8445 }
 0x4b9   :  { %v1720_v42 = vadd.f32 1.0, %v8446_v31  ;;  %v11786_v31 = vld [vmem:[#allocation34_spill] sm:$0xff] }
 0x4ba   :  { %8447 = vrcp.f32 %v1711_v37  ;;  %v11785_v37 = vld [vmem:[#allocation33_spill] sm:$0xff] }
 0x4bb   :  { %8449 = vrcp.f32 %v1720_v42 }
 0x4c5   :  { %v1791_v46 = vpop.f32.mrf.mxu0 }
 0x4c6   :  { %v1792_v38 = vadd.f32 %v9477_v33, %v1791_v46  ;;  %v11787_v33 = vld [vmem:[#allocation35_spill] sm:$0xff] }
 0x4c7   :  { %v8448_v7 = vpop.eup %8447  ;;  %v6969_v5 = vpop.f32.mrf.mxu0  ;;  %v10075_v46 = vld [vmem:[#allocation13 + $0x78] sm:$0xff] }
 0x4c8   :  { %v1795_v21 = vmul.f32 %v8448_v7, %v1792_v38  ;;  %v8450_v27 = vpop.eup %8449 }
 0x4c9   :  { %v1798_v54 = vsub.f32 1.0, %v8450_v27  ;;  %v1800_v51 = vmul.f32 %v8450_v27, %v9768_v48  ;;  %v10163_v27 = vld [vmem:[#allocation13 + $0x20] sm:$0xff] }
 0x4ca   :  { %v1796_v29 = vadd.f32 %v1795_v21, %v11784_v25  ;;  %v10151_v21 = vld [vmem:[#allocation11 + $0x28] sm:$0xff] }
 0x4cb   :  { %v10155_v25 = vld [vmem:[#allocation13 + $0x28] sm:$0xff] }
 0x4cc   :  { %8451 = vtanh.f32 %v1796_v29  ;;  %v10159_v29 = vld [vmem:[#allocation11 + $0x20] sm:$0xff] }
 0x4d9   :  { %v8452_v23 = vpop.eup %8451 }
 0x4da   :  { %v1799_v2 = vmul.f32 %v8452_v23, %v1798_v54  ;;  %v10167_v54 = vld [vmem:[#allocation11 + $0x18] sm:$0xff] }
 0x4db   :  { %v10171_v23 = vld [vmem:[#allocation13 + $0x18] sm:$0xff] }
 0x4dc   :  { %v9912_v36 = vadd.f32 %v1800_v51, %v1799_v2  ;;  %v10175_v51 = vld [vmem:[#allocation11 + $0x10] sm:$0xff] }
 0x4dd   :  { %v10179_v2 = vld [vmem:[#allocation13 + $0x10] sm:$0xff] }
 0x4de   :  { %7003 = vmatmul.mubr.f32.vlgmr.msra.gmra.mxu1 %v9912_v36  ;;  %7038 = vmatmul.mubr.f32.vlgmr.msra.gmra.mxu0 %v9912_v36 }
 0x4df   :  { %7041 = vmatpush3.msra.mxu1 %v9770_v50  ;;  %7072 = vmatprep.mubr.msk.f32.mxu1 %vm8895_vm0, %v11765_v63 }
 0x4e0   :  { %7042 = vmatprep.subr.mxu1 %v11765_v63  ;;  %7076 = vmatpush3.msra.mxu0 %v9635_v10  ;;  %v11788_v10 = vld [vmem:[#allocation36_spill] sm:$0xff] }
 0x4e1   :  { %7043 = vmatpush3.msra.mxu1 %v9774_v52  ;;  %7077 = vmatprep.subr.mxu0 %v11765_v63 }
 0x4e2   :  { %7044 = vmatprep.subr.mxu1 %v11765_v63  ;;  %7078 = vmatpush3.msra.mxu0 %v9642_v14 }
 0x4e3   :  { %7045 = vmatpush3.msra.mxu1 %v9780_v45  ;;  %7079 = vmatprep.subr.mxu0 %v11765_v63 }
 0x4e4   :  { %7046 = vmatprep.subr.mxu1 %v11765_v63  ;;  %7080 = vmatpush3.msra.mxu0 %v9650_v18  ;;  %v11790_v18 = vld [vmem:[#allocation44_spill] sm:$0xff] }
 0x4e5   :  { %7047 = vmatpush3.msra.mxu1 %v9786_v56  ;;  %7081 = vmatprep.subr.mxu0 %v11765_v63 }
 0x4e6   :  { %7048 = vmatprep.subr.mxu1 %v11765_v63  ;;  %7082 = vmatpush3.msra.mxu0 %v9658_v22 }
 0x4e7   :  { %7049 = vmatpush3.msra.mxu1 %v9792_v58  ;;  %7083 = vmatprep.subr.mxu0 %v11765_v63 }
 0x4e8   :  { %7050 = vmatprep.subr.mxu1 %v11765_v63  ;;  %7084 = vmatpush3.msra.mxu0 %v9666_v26 }
 0x4e9   :  { %7051 = vmatpush3.msra.mxu1 %v9798_v62  ;;  %7085 = vmatprep.subr.mxu0 %v11765_v63 }
 0x4ea   :  { %7052 = vmatprep.subr.mxu1 %v11765_v63  ;;  %7086 = vmatpush3.msra.mxu0 %v9674_v30 }
 0x4eb   :  { %7053 = vmatpush3.msra.mxu1 %v9804_v0  ;;  %7087 = vmatprep.subr.mxu0 %v11765_v63 }
 0x4ec   :  { %7054 = vmatprep.subr.mxu1 %v11765_v63  ;;  %7088 = vmatpush3.msra.mxu0 %v9682_v34 }
 0x4ed   :  { %7055 = vmatpush3.msra.mxu1 %v9810_v4  ;;  %7089 = vmatprep.subr.mxu0 %v11765_v63 }
 0x4ee   :  { %7056 = vmatprep.subr.mxu1 %v11765_v63  ;;  %7090 = vmatpush3.msra.mxu0 %v9690_v43 }
 0x4ef   :  { %7057 = vmatpush3.msra.mxu1 %v9816_v6  ;;  %7091 = vmatprep.subr.mxu0 %v11765_v63 }
 0x4f0   :  { %7058 = vmatprep.subr.mxu1 %v11765_v63  ;;  %7092 = vmatpush3.msra.mxu0 %v9698_v61 }
 0x4f1   :  { %7059 = vmatpush3.msra.mxu1 %v9822_v8  ;;  %7093 = vmatprep.subr.mxu0 %v11765_v63 }
 0x4f2   :  { %7060 = vmatprep.subr.mxu1 %v11765_v63  ;;  %7094 = vmatpush3.msra.mxu0 %v9706_v41 }
 0x4f3   :  { %7061 = vmatpush3.msra.mxu1 %v9828_v9  ;;  %7095 = vmatprep.subr.mxu0 %v11765_v63 }
 0x4f4   :  { %7062 = vmatprep.subr.mxu1 %v11765_v63  ;;  %7096 = vmatpush3.msra.mxu0 %v9714_v60 }
 0x4f5   :  { %7063 = vmatpush3.msra.mxu1 %v9834_v11  ;;  %7097 = vmatprep.subr.mxu0 %v11765_v63 }
 0x4f6   :  { %7064 = vmatprep.subr.mxu1 %v11765_v63  ;;  %7098 = vmatpush3.msra.mxu0 %v9722_v59  ;;  %v11792_v59 = vld [vmem:[#allocation54_spill] sm:$0xff] }
 0x4f7   :  { %7065 = vmatpush3.msra.mxu1 %v9840_v13  ;;  %7099 = vmatprep.subr.mxu0 %v11765_v63 }
 0x4f8   :  { %7066 = vmatprep.subr.mxu1 %v11765_v63  ;;  %7100 = vmatpush3.msra.mxu0 %v9730_v3 }
 0x4f9   :  { %7067 = vmatpush3.msra.mxu1 %v9846_v15  ;;  %7101 = vmatprep.subr.mxu0 %v11765_v63 }
 0x4fa   :  { %7068 = vmatprep.subr.mxu1 %v11765_v63  ;;  %7102 = vmatpush3.msra.mxu0 %v9738_v35 }
 0x4fb   :  { %7069 = vmatpush3.msra.mxu1 %v9852_v17  ;;  %7103 = vmatprep.subr.mxu0 %v11765_v63 }
 0x4fc   :  { %7070 = vmatprep.subr.mxu1 %v11765_v63  ;;  %7104 = vmatpush3.msra.mxu0 %v9746_v40 }
 0x4fd   :  { %7071 = vmatpush3.msra.mxu1 %v9858_v19  ;;  %7105 = vmatprep.subr.mxu0 %v11765_v63 }
 0x4fe   :  { %7073 = vmatmul.mubr.f32.vlgmr.msra.gmra.mxu1 %v9912_v36  ;;  %7110 = vmatprep.subr.mxu1 %v11765_v63 }
 0x4ff   :  { %7111 = vmatpush3.msra.mxu1 %v9638_v12  ;;  %7106 = vmatpush3.msra.mxu0 %v9754_v44  ;;  %v11789_v12 = vld [vmem:[#allocation37_spill] sm:$0xff]  ;;  %v10072_v44 = vld [vmem:[#allocation11 + $0x78] sm:$0xff] }
 0x500   :  { %7112 = vmatprep.subr.mxu1 %v11765_v63  ;;  %7107 = vmatprep.mubr.msk.f32.mxu0 %vm8895_vm0, %v11765_v63 }
 0x501   :  { %7113 = vmatpush3.msra.mxu1 %v9646_v16  ;;  %7142 = vmatprep.mubr.msk.f32.mxu1 %vm8895_vm0, %v11765_v63 }
 0x502   :  { %7114 = vmatprep.subr.mxu1 %v11765_v63  ;;  %7145 = vmatprep.subr.mxu0 %v11765_v63 }
 0x503   :  { %7115 = vmatpush3.msra.mxu1 %v9654_v20 }
 0x504   :  { %7116 = vmatprep.subr.mxu1 %v11765_v63 }
 0x505   :  { %7117 = vmatpush3.msra.mxu1 %v9662_v24 }
 0x506   :  { %7118 = vmatprep.subr.mxu1 %v11765_v63 }
 0x507   :  { %7119 = vmatpush3.msra.mxu1 %v9670_v28  ;;  %v11791_v28 = vld [vmem:[#allocation46_spill] sm:$0xff] }
 0x508   :  { %7120 = vmatprep.subr.mxu1 %v11765_v63 }
 0x509   :  { %7121 = vmatpush3.msra.mxu1 %v9678_v32 }
 0x50a   :  { %7122 = vmatprep.subr.mxu1 %v11765_v63 }
 0x50b   :  { %7123 = vmatpush3.msra.mxu1 %v9686_v39 }
 0x50c   :  { %7124 = vmatprep.subr.mxu1 %v11765_v63 }
 0x50d   :  { %7125 = vmatpush3.msra.mxu1 %v9694_v47 }
 0x50e   :  { %7126 = vmatprep.subr.mxu1 %v11765_v63 }
 0x50f   :  { %7127 = vmatpush3.msra.mxu1 %v9702_v55  ;;  %v10024_v55 = vld [vmem:[%s11669_s10] ss:$0 sm:$0xff] }
 0x510   :  { %7128 = vmatprep.subr.mxu1 %v11765_v63 }
 0x511   :  { %7129 = vmatpush3.msra.mxu1 %v9710_v53 }
 0x512   :  { %7130 = vmatprep.subr.mxu1 %v11765_v63 }
 0x513   :  { %7131 = vmatpush3.msra.mxu1 %v9718_v49 }
 0x514   :  { %7132 = vmatprep.subr.mxu1 %v11765_v63 }
 0x515   :  { %7133 = vmatpush3.msra.mxu1 %v11785_v37  ;;  %v10183_v37 = vld [vmem:[#allocation11 + $0x8] sm:$0xff] }
 0x516   :  { %7134 = vmatprep.subr.mxu1 %v11765_v63 }
 0x517   :  { %7135 = vmatpush3.msra.mxu1 %v11786_v31  ;;  %v10187_v31 = vld [vmem:[#allocation13 + $0x8] sm:$0xff] }
 0x518   :  { %7136 = vmatprep.subr.mxu1 %v11765_v63 }
 0x519   :  { %7137 = vmatpush3.msra.mxu1 %v11787_v33  ;;  %v10191_v33 = vld [vmem:[#allocation11] sm:$0xff] }
 0x51a   :  { %7138 = vmatprep.subr.mxu1 %v11765_v63 }
 0x51b   :  { %7139 = vmatpush3.msra.mxu1 %v11788_v10  ;;  %v10193_v10 = vld [vmem:[#allocation13] sm:$0xff] }
 0x51c   :  { %7140 = vmatprep.subr.mxu1 %v11765_v63 }
 0x51d   :  { %7141 = vmatpush3.msra.mxu1 %v11789_v12 }
 0x51e   :  { %7180 = vmatprep.subr.mxu1 %v11765_v63 }
 0x59e   :  { %v1886_v14 = vpop.f32.mrf.mxu1  ;;  %v1972_v16 = vpop.f32.mrf.mxu0 }
 0x59f   :  { %v1994_v20 = vadd.f32 %v1886_v14, %v11790_v18  ;;  %v2003_v30 = vadd.f32 %v1972_v16, %v11791_v28  ;;  %v11793_v16 = vld [vmem:[#allocation43_spill] sm:$0xff] }
 0x5a0   :  { %v7004_v22 = vpop.f32.mrf.mxu1  ;;  %v7039_v24 = vpop.f32.mrf.mxu0 }
 0x5a1   :  { %v5412_v26 = vmul.f32 -1.442695, %v1994_v20  ;;  %v5413_v32 = vmul.f32 -1.442695, %v2003_v30 }
 0x5a3   :  { %8453 = vpow2.f32 %v5412_v26  ;;  %v11794_v26 = vld [vmem:[#allocation45_spill] sm:$0xff] }
 0x5a4   :  { %8455 = vpow2.f32 %v5413_v32 }
 0x5b0   :  { %v8454_v34 = vpop.eup %8453 }
 0x5b1   :  { %v1998_v39 = vadd.f32 1.0, %v8454_v34  ;;  %v8456_v43 = vpop.eup %8455 }
 0x5b2   :  { %v2007_v47 = vadd.f32 1.0, %v8456_v43 }
 0x5b3   :  { %8457 = vrcp.f32 %v1998_v39 }
 0x5b4   :  { %8459 = vrcp.f32 %v2007_v47 }
 0x5be   :  { %v2078_v61 = vpop.f32.mrf.mxu1 }
 0x5bf   :  { %v2079_v41 = vadd.f32 %v10024_v55, %v2078_v61 }
 0x5c0   :  { %v8458_v53 = vpop.eup %8457  ;;  %v7074_v60 = vpop.f32.mrf.mxu1 }
 0x5c1   :  { %v2082_v49 = vmul.f32 %v8458_v53, %v2079_v41  ;;  %v8460_v3 = vpop.eup %8459 }
 0x5c2   :  { %v2085_v7 = vsub.f32 1.0, %v8460_v3  ;;  %v2087_v38 = vmul.f32 %v8460_v3, %v9912_v36 }
 0x5c3   :  { %v2083_v5 = vadd.f32 %v2082_v49, %v11792_v59  ;;  %v11795_v49 = vld [vmem:[#allocation53_spill] sm:$0xff] }
 0x5c5   :  { %8461 = vtanh.f32 %v2083_v5 }
 0x5d2   :  { %v8462_v35 = vpop.eup %8461 }
 0x5d3   :  { %v2086_v40 = vmul.f32 %v8462_v35, %v2085_v7 }
 0x5d5   :  { %v10029_v42 = vadd.f32 %v2087_v38, %v2086_v40 }
 0x5d7   :  { %7108 = vmatmul.mubr.f32.vlgmr.msra.gmra.mxu0 %v10029_v42  ;;  %7143 = vmatmul.mubr.f32.vlgmr.msra.gmra.mxu1 %v10029_v42 }
 0x5d8   :  { %7146 = vmatpush3.msra.mxu0 %v9770_v50  ;;  %7177 = vmatprep.mubr.msk.f32.mxu0 %vm8895_vm0, %v11765_v63  ;;  %v10079_v50 = vld [vmem:[#allocation11 + $0x70] sm:$0xff] }
 0x5d9   :  { %7147 = vmatprep.subr.mxu0 %v11765_v63  ;;  %7212 = vmatprep.mubr.msk.f32.mxu1 %vm8895_vm0, %v11765_v63 }
 0x5da   :  { %7148 = vmatpush3.msra.mxu0 %v9774_v52  ;;  %7181 = vmatpush3.msra.mxu1 %v10072_v44  ;;  %v10083_v52 = vld [vmem:[#allocation13 + $0x70] sm:$0xff] }
 0x5db   :  { %7149 = vmatprep.subr.mxu0 %v11765_v63  ;;  %7182 = vmatprep.subr.mxu1 %v11765_v63 }
 0x5dc   :  { %7150 = vmatpush3.msra.mxu0 %v9780_v45  ;;  %7183 = vmatpush3.msra.mxu1 %v10079_v50  ;;  %v10087_v45 = vld [vmem:[#allocation11 + $0x68] sm:$0xff] }
 0x5dd   :  { %7151 = vmatprep.subr.mxu0 %v11765_v63  ;;  %7184 = vmatprep.subr.mxu1 %v11765_v63 }
 0x5de   :  { %7152 = vmatpush3.msra.mxu0 %v9786_v56  ;;  %7185 = vmatpush3.msra.mxu1 %v10087_v45  ;;  %v10091_v56 = vld [vmem:[#allocation13 + $0x68] sm:$0xff] }
 0x5df   :  { %7153 = vmatprep.subr.mxu0 %v11765_v63  ;;  %7186 = vmatprep.subr.mxu1 %v11765_v63 }
 0x5e0   :  { %7154 = vmatpush3.msra.mxu0 %v9792_v58  ;;  %v10095_v58 = vld [vmem:[#allocation11 + $0x60] sm:$0xff] }
 0x5e1   :  { %7155 = vmatprep.subr.mxu0 %v11765_v63  ;;  %7187 = vmatpush3.msra.mxu1 %v10095_v58 }
 0x5e2   :  { %7156 = vmatpush3.msra.mxu0 %v9798_v62  ;;  %v10099_v62 = vld [vmem:[#allocation13 + $0x60] sm:$0xff]  ;;  %7188 = vmatprep.subr.mxu1 %v11765_v63 }
 0x5e3   :  { %7157 = vmatprep.subr.mxu0 %v11765_v63 }
 0x5e4   :  { %7158 = vmatpush3.msra.mxu0 %v9804_v0  ;;  %v10103_v0 = vld [vmem:[#allocation11 + $0x58] sm:$0xff] }
 0x5e5   :  { %7159 = vmatprep.subr.mxu0 %v11765_v63  ;;  %7189 = vmatpush3.msra.mxu1 %v10103_v0 }
 0x5e6   :  { %7160 = vmatpush3.msra.mxu0 %v9810_v4  ;;  %v10107_v4 = vld [vmem:[#allocation13 + $0x58] sm:$0xff]  ;;  %7190 = vmatprep.subr.mxu1 %v11765_v63 }
 0x5e7   :  { %7161 = vmatprep.subr.mxu0 %v11765_v63 }
 0x5e8   :  { %7162 = vmatpush3.msra.mxu0 %v9816_v6  ;;  %v10111_v6 = vld [vmem:[#allocation11 + $0x50] sm:$0xff] }
 0x5e9   :  { %7163 = vmatprep.subr.mxu0 %v11765_v63  ;;  %7191 = vmatpush3.msra.mxu1 %v10111_v6 }
 0x5ea   :  { %7164 = vmatpush3.msra.mxu0 %v9822_v8  ;;  %v10115_v8 = vld [vmem:[#allocation13 + $0x50] sm:$0xff]  ;;  %7192 = vmatprep.subr.mxu1 %v11765_v63 }
 0x5eb   :  { %7165 = vmatprep.subr.mxu0 %v11765_v63 }
 0x5ec   :  { %7166 = vmatpush3.msra.mxu0 %v9828_v9  ;;  %v10119_v9 = vld [vmem:[#allocation11 + $0x48] sm:$0xff] }
 0x5ed   :  { %7167 = vmatprep.subr.mxu0 %v11765_v63  ;;  %7193 = vmatpush3.msra.mxu1 %v10119_v9 }
 0x5ee   :  { %7168 = vmatpush3.msra.mxu0 %v9834_v11  ;;  %v10123_v11 = vld [vmem:[#allocation13 + $0x48] sm:$0xff]  ;;  %7194 = vmatprep.subr.mxu1 %v11765_v63 }
 0x5ef   :  { %7169 = vmatprep.subr.mxu0 %v11765_v63 }
 0x5f0   :  { %7170 = vmatpush3.msra.mxu0 %v9840_v13  ;;  %v10127_v13 = vld [vmem:[#allocation11 + $0x40] sm:$0xff] }
 0x5f1   :  { %7171 = vmatprep.subr.mxu0 %v11765_v63  ;;  %7195 = vmatpush3.msra.mxu1 %v10127_v13 }
 0x5f2   :  { %7172 = vmatpush3.msra.mxu0 %v9846_v15  ;;  %v10131_v15 = vld [vmem:[#allocation13 + $0x40] sm:$0xff]  ;;  %7196 = vmatprep.subr.mxu1 %v11765_v63 }
 0x5f3   :  { %7173 = vmatprep.subr.mxu0 %v11765_v63 }
 0x5f4   :  { %7174 = vmatpush3.msra.mxu0 %v9852_v17  ;;  %v10135_v17 = vld [vmem:[#allocation11 + $0x38] sm:$0xff] }
 0x5f5   :  { %7175 = vmatprep.subr.mxu0 %v11765_v63  ;;  %7197 = vmatpush3.msra.mxu1 %v10135_v17 }
 0x5f6   :  { %7176 = vmatpush3.msra.mxu0 %v9858_v19  ;;  %v10139_v19 = vld [vmem:[#allocation13 + $0x38] sm:$0xff]  ;;  %7198 = vmatprep.subr.mxu1 %v11765_v63 }
 0x5f7   :  { %7178 = vmatmul.mubr.f32.vlgmr.msra.gmra.mxu0 %v10029_v42  ;;  %7215 = vmatprep.subr.mxu0 %v11765_v63 }
 0x5f8   :  { %7247 = vmatprep.mubr.msk.f32.mxu0 %vm8895_vm0, %v11765_v63  ;;  %7216 = vmatpush3.msra.mxu0 %v10075_v46 }
 0x5f9   :  { %7217 = vmatprep.subr.mxu0 %v11765_v63  ;;  %7199 = vmatpush3.msra.mxu1 %v10143_v57 }
 0x5fa   :  { %7218 = vmatpush3.msra.mxu0 %v10083_v52  ;;  %7200 = vmatprep.subr.mxu1 %v11765_v63 }
 0x5fb   :  { %7219 = vmatprep.subr.mxu0 %v11765_v63  ;;  %7201 = vmatpush3.msra.mxu1 %v10151_v21 }
 0x5fc   :  { %7220 = vmatpush3.msra.mxu0 %v10091_v56  ;;  %7202 = vmatprep.subr.mxu1 %v11765_v63 }
 0x5fd   :  { %7221 = vmatprep.subr.mxu0 %v11765_v63  ;;  %7203 = vmatpush3.msra.mxu1 %v10159_v29 }
 0x5fe   :  { %7222 = vmatpush3.msra.mxu0 %v10099_v62  ;;  %7204 = vmatprep.subr.mxu1 %v11765_v63 }
 0x5ff   :  { %7223 = vmatprep.subr.mxu0 %v11765_v63  ;;  %7205 = vmatpush3.msra.mxu1 %v10167_v54 }
 0x600   :  { %7224 = vmatpush3.msra.mxu0 %v10107_v4  ;;  %7206 = vmatprep.subr.mxu1 %v11765_v63 }
 0x601   :  { %7225 = vmatprep.subr.mxu0 %v11765_v63  ;;  %7207 = vmatpush3.msra.mxu1 %v10175_v51 }
 0x602   :  { %7226 = vmatpush3.msra.mxu0 %v10115_v8  ;;  %7208 = vmatprep.subr.mxu1 %v11765_v63 }
 0x603   :  { %7227 = vmatprep.subr.mxu0 %v11765_v63  ;;  %7209 = vmatpush3.msra.mxu1 %v10183_v37 }
 0x604   :  { %7228 = vmatpush3.msra.mxu0 %v10123_v11  ;;  %7210 = vmatprep.subr.mxu1 %v11765_v63 }
 0x605   :  { %7229 = vmatprep.subr.mxu0 %v11765_v63  ;;  %7211 = vmatpush3.msra.mxu1 %v10191_v33 }
 0x606   :  { %7230 = vmatpush3.msra.mxu0 %v10131_v15  ;;  %7250 = vmatprep.subr.mxu1 %v11765_v63 }
 0x607   :  { %7231 = vmatprep.subr.mxu0 %v11765_v63 }
 0x608   :  { %7232 = vmatpush3.msra.mxu0 %v10139_v19 }
 0x609   :  { %7233 = vmatprep.subr.mxu0 %v11765_v63 }
 0x60a   :  { %7234 = vmatpush3.msra.mxu0 %v10147_v1 }
 0x60b   :  { %7235 = vmatprep.subr.mxu0 %v11765_v63 }
 0x60c   :  { %7236 = vmatpush3.msra.mxu0 %v10155_v25 }
 0x60d   :  { %7237 = vmatprep.subr.mxu0 %v11765_v63 }
 0x60e   :  { %7238 = vmatpush3.msra.mxu0 %v10163_v27 }
 0x60f   :  { %7239 = vmatprep.subr.mxu0 %v11765_v63 }
 0x610   :  { %7240 = vmatpush3.msra.mxu0 %v10171_v23 }
 0x611   :  { %7241 = vmatprep.subr.mxu0 %v11765_v63 }
 0x612   :  { %7242 = vmatpush3.msra.mxu0 %v10179_v2 }
 0x613   :  { %7243 = vmatprep.subr.mxu0 %v11765_v63 }
 0x614   :  { %7244 = vmatpush3.msra.mxu0 %v10187_v31 }
 0x615   :  { %7245 = vmatprep.subr.mxu0 %v11765_v63 }
 0x616   :  { %7246 = vmatpush3.msra.mxu0 %v10193_v10 }
 0x617   :  { %7285 = vmatprep.subr.mxu0 %v11765_v63 }
 0x697   :  { %v2173_v12 = vpop.f32.mrf.mxu0  ;;  %v2259_v14 = vpop.f32.mrf.mxu1 }
 0x698   :  { %v2281_v18 = vadd.f32 %v2173_v12, %v11793_v16  ;;  %v2290_v28 = vadd.f32 %v2259_v14, %v11794_v26  ;;  %v10207_v12 = vld [vmem:[#allocation14 + $0x78] sm:$0xff]  ;;  %v10211_v14 = vld [vmem:[#allocation14 + $0x70] sm:$0xff]  ;;  %v10217_v16 = vld [vmem:[#allocation14 + $0x68] sm:$0xff] }
 0x699   :  { %v7109_v20 = vpop.f32.mrf.mxu0  ;;  %v7144_v22 = vpop.f32.mrf.mxu1 }
 0x69a   :  { %v5414_v24 = vmul.f32 -1.442695, %v2281_v18  ;;  %v5415_v30 = vmul.f32 -1.442695, %v2290_v28  ;;  %v10223_v18 = vld [vmem:[#allocation14 + $0x60] sm:$0xff]  ;;  %v10229_v20 = vld [vmem:[#allocation14 + $0x58] sm:$0xff] }
 0x69c   :  { %8463 = vpow2.f32 %v5414_v24 }
 0x69d   :  { %8465 = vpow2.f32 %v5415_v30 }
 0x6a9   :  { %v8464_v32 = vpop.eup %8463 }
 0x6aa   :  { %v2285_v34 = vadd.f32 1.0, %v8464_v32  ;;  %v8466_v39 = vpop.eup %8465 }
 0x6ab   :  { %v2294_v43 = vadd.f32 1.0, %v8466_v39  ;;  %v2974_v39 = vld [vmem:[#allocation16 + $0x70] sm:$0xff] }
 0x6ac   :  { %8467 = vrcp.f32 %v2285_v34 }
 0x6ad   :  { %8469 = vrcp.f32 %v2294_v43  ;;  %v11799_v43 = vld [vmem:[#allocation57_spill] sm:$0xff] }
 0x6b7   :  { %v2365_v47 = vpop.f32.mrf.mxu0 }
 0x6b8   :  { %v2366_v61 = vadd.f32 %v10024_v55, %v2365_v47  ;;  %v2972_v47 = vld [vmem:[#allocation16 + $0x60] sm:$0xff] }
 0x6b9   :  { %v8468_v41 = vpop.eup %8467  ;;  %v7179_v53 = vpop.f32.mrf.mxu0 }
 0x6ba   :  { %v2369_v60 = vmul.f32 %v8468_v41, %v2366_v61  ;;  %v8470_v5 = vpop.eup %8469  ;;  %v2971_v61 = vld [vmem:[#allocation16 + $0x58] sm:$0xff]  ;;  %v2970_v41 = vld [vmem:[#allocation16 + $0x50] sm:$0xff]  ;;  %v2969_v53 = vld [vmem:[#allocation16 + $0x48] sm:$0xff] }
 0x6bb   :  { %v2372_v3 = vsub.f32 1.0, %v8470_v5  ;;  %v2374_v35 = vmul.f32 %v8470_v5, %v10029_v42  ;;  %v2965_v5 = vld [vmem:[#allocation16 + $0x28] sm:$0xff] }
 0x6bc   :  { %v2370_v59 = vadd.f32 %v2369_v60, %v11795_v49  ;;  %v2968_v60 = vld [vmem:[#allocation16 + $0x40] sm:$0xff]  ;;  %v2967_v49 = vld [vmem:[#allocation16 + $0x38] sm:$0xff] }
 0x6be   :  { %8471 = vtanh.f32 %v2370_v59  ;;  %v2966_v59 = vld [vmem:[#allocation16 + $0x30] sm:$0xff] }
 0x6cb   :  { %v8472_v7 = vpop.eup %8471 }
 0x6cc   :  { %v2373_v38 = vmul.f32 %v8472_v7, %v2372_v3  ;;  %v2964_v3 = vld [vmem:[#allocation16 + $0x20] sm:$0xff]  ;;  %v2963_v7 = vld [vmem:[#allocation16 + $0x18] sm:$0xff] }
 0x6ce   :  { %v10205_v40 = vadd.f32 %v2374_v35, %v2373_v38  ;;  %v2962_v35 = vld [vmem:[#allocation16 + $0x10] sm:$0xff]  ;;  %v2961_v38 = vld [vmem:[#allocation16 + $0x8] sm:$0xff] }
 0x6d0   :  { %7213 = vmatmul.mubr.f32.vlgmr.msra.gmra.mxu1 %v10205_v40  ;;  %7248 = vmatmul.mubr.f32.vlgmr.msra.gmra.mxu0 %v10205_v40 }
 0x6d1   :  { %7251 = vmatpush3.msra.mxu1 %v10207_v12  ;;  %7282 = vmatprep.mubr.msk.f32.mxu1 %vm8895_vm0, %v11765_v63 }
 0x6d2   :  { %7252 = vmatprep.subr.mxu1 %v11765_v63  ;;  %7286 = vmatpush3.msra.mxu0 %v10072_v44  ;;  %v10235_v44 = vld [vmem:[#allocation14 + $0x50] sm:$0xff] }
 0x6d3   :  { %7253 = vmatpush3.msra.mxu1 %v10211_v14  ;;  %7287 = vmatprep.subr.mxu0 %v11765_v63 }
 0x6d4   :  { %7254 = vmatprep.subr.mxu1 %v11765_v63  ;;  %7288 = vmatpush3.msra.mxu0 %v10079_v50  ;;  %v10241_v50 = vld [vmem:[#allocation14 + $0x48] sm:$0xff] }
 0x6d5   :  { %7255 = vmatpush3.msra.mxu1 %v10217_v16  ;;  %7289 = vmatprep.subr.mxu0 %v11765_v63 }
 0x6d6   :  { %7256 = vmatprep.subr.mxu1 %v11765_v63  ;;  %7290 = vmatpush3.msra.mxu0 %v10087_v45  ;;  %v10247_v45 = vld [vmem:[#allocation14 + $0x40] sm:$0xff] }
 0x6d7   :  { %7257 = vmatpush3.msra.mxu1 %v10223_v18  ;;  %7291 = vmatprep.subr.mxu0 %v11765_v63 }
 0x6d8   :  { %7258 = vmatprep.subr.mxu1 %v11765_v63  ;;  %7292 = vmatpush3.msra.mxu0 %v10095_v58  ;;  %v10253_v58 = vld [vmem:[#allocation14 + $0x38] sm:$0xff] }
 0x6d9   :  { %7259 = vmatpush3.msra.mxu1 %v10229_v20  ;;  %7293 = vmatprep.subr.mxu0 %v11765_v63 }
 0x6da   :  { %7260 = vmatprep.subr.mxu1 %v11765_v63  ;;  %7294 = vmatpush3.msra.mxu0 %v10103_v0  ;;  %v10259_v0 = vld [vmem:[#allocation14 + $0x30] sm:$0xff] }
 0x6db   :  { %7261 = vmatpush3.msra.mxu1 %v10235_v44  ;;  %7295 = vmatprep.subr.mxu0 %v11765_v63 }
 0x6dc   :  { %7262 = vmatprep.subr.mxu1 %v11765_v63  ;;  %7296 = vmatpush3.msra.mxu0 %v10111_v6  ;;  %v10265_v6 = vld [vmem:[#allocation14 + $0x28] sm:$0xff] }
 0x6dd   :  { %7263 = vmatpush3.msra.mxu1 %v10241_v50  ;;  %7297 = vmatprep.subr.mxu0 %v11765_v63 }
 0x6de   :  { %7264 = vmatprep.subr.mxu1 %v11765_v63  ;;  %7298 = vmatpush3.msra.mxu0 %v10119_v9  ;;  %v10271_v9 = vld [vmem:[#allocation14 + $0x20] sm:$0xff] }
 0x6df   :  { %7265 = vmatpush3.msra.mxu1 %v10247_v45  ;;  %7299 = vmatprep.subr.mxu0 %v11765_v63 }
 0x6e0   :  { %7266 = vmatprep.subr.mxu1 %v11765_v63  ;;  %7300 = vmatpush3.msra.mxu0 %v10127_v13  ;;  %v10277_v13 = vld [vmem:[#allocation14 + $0x18] sm:$0xff] }
 0x6e1   :  { %7267 = vmatpush3.msra.mxu1 %v10253_v58  ;;  %7301 = vmatprep.subr.mxu0 %v11765_v63 }
 0x6e2   :  { %7268 = vmatprep.subr.mxu1 %v11765_v63  ;;  %7302 = vmatpush3.msra.mxu0 %v10135_v17  ;;  %v10283_v17 = vld [vmem:[#allocation14 + $0x10] sm:$0xff] }
 0x6e3   :  { %7269 = vmatpush3.msra.mxu1 %v10259_v0  ;;  %7303 = vmatprep.subr.mxu0 %v11765_v63 }
 0x6e4   :  { %7270 = vmatprep.subr.mxu1 %v11765_v63  ;;  %7304 = vmatpush3.msra.mxu0 %v10143_v57  ;;  %v10289_v57 = vld [vmem:[#allocation14 + $0x8] sm:$0xff] }
 0x6e5   :  { %7271 = vmatpush3.msra.mxu1 %v10265_v6  ;;  %7305 = vmatprep.subr.mxu0 %v11765_v63 }
 0x6e6   :  { %7272 = vmatprep.subr.mxu1 %v11765_v63  ;;  %7306 = vmatpush3.msra.mxu0 %v10151_v21  ;;  %v10295_v21 = vld [vmem:[#allocation14] sm:$0xff] }
 0x6e7   :  { %7273 = vmatpush3.msra.mxu1 %v10271_v9  ;;  %7307 = vmatprep.subr.mxu0 %v11765_v63 }
 0x6e8   :  { %7274 = vmatprep.subr.mxu1 %v11765_v63  ;;  %7308 = vmatpush3.msra.mxu0 %v10159_v29 }
 0x6e9   :  { %7275 = vmatpush3.msra.mxu1 %v10277_v13  ;;  %7309 = vmatprep.subr.mxu0 %v11765_v63 }
 0x6ea   :  { %7276 = vmatprep.subr.mxu1 %v11765_v63  ;;  %7310 = vmatpush3.msra.mxu0 %v10167_v54 }
 0x6eb   :  { %7277 = vmatpush3.msra.mxu1 %v10283_v17  ;;  %7311 = vmatprep.subr.mxu0 %v11765_v63 }
 0x6ec   :  { %7278 = vmatprep.subr.mxu1 %v11765_v63  ;;  %7312 = vmatpush3.msra.mxu0 %v10175_v51 }
 0x6ed   :  { %7279 = vmatpush3.msra.mxu1 %v10289_v57  ;;  %7313 = vmatprep.subr.mxu0 %v11765_v63 }
 0x6ee   :  { %7280 = vmatprep.subr.mxu1 %v11765_v63  ;;  %7314 = vmatpush3.msra.mxu0 %v10183_v37 }
 0x6ef   :  { %7281 = vmatpush3.msra.mxu1 %v10295_v21  ;;  %7315 = vmatprep.subr.mxu0 %v11765_v63 }
 0x6f0   :  { %7283 = vmatmul.mubr.f32.vlgmr.msra.gmra.mxu1 %v10205_v40  ;;  %7320 = vmatprep.subr.mxu1 %v11765_v63 }
 0x6f1   :  { %7321 = vmatpush3.msra.mxu1 %v10075_v46  ;;  %7316 = vmatpush3.msra.mxu0 %v10191_v33  ;;  %v2975_v46 = vld [vmem:[#allocation16 + $0x78] sm:$0xff] }
 0x6f2   :  { %7322 = vmatprep.subr.mxu1 %v11765_v63  ;;  %7317 = vmatprep.mubr.msk.f32.mxu0 %vm8895_vm0, %v11765_v63 }
 0x6f3   :  { %7323 = vmatpush3.msra.mxu1 %v10083_v52  ;;  %7352 = vmatprep.mubr.msk.f32.mxu1 %vm8895_vm0, %v11765_v63 }
 0x6f4   :  { %7324 = vmatprep.subr.mxu1 %v11765_v63  ;;  %7355 = vmatprep.subr.mxu0 %v11765_v63 }
 0x6f5   :  { %7325 = vmatpush3.msra.mxu1 %v10091_v56 }
 0x6f6   :  { %7326 = vmatprep.subr.mxu1 %v11765_v63 }
 0x6f7   :  { %7327 = vmatpush3.msra.mxu1 %v10099_v62  ;;  %v11796_v62 = vld [vmem:[#allocation48_spill] sm:$0xff] }
 0x6f8   :  { %7328 = vmatprep.subr.mxu1 %v11765_v63 }
 0x6f9   :  { %7329 = vmatpush3.msra.mxu1 %v10107_v4 }
 0x6fa   :  { %7330 = vmatprep.subr.mxu1 %v11765_v63 }
 0x6fb   :  { %7331 = vmatpush3.msra.mxu1 %v10115_v8 }
 0x6fc   :  { %7332 = vmatprep.subr.mxu1 %v11765_v63 }
 0x6fd   :  { %7333 = vmatpush3.msra.mxu1 %v10123_v11 }
 0x6fe   :  { %7334 = vmatprep.subr.mxu1 %v11765_v63 }
 0x6ff   :  { %7335 = vmatpush3.msra.mxu1 %v10131_v15 }
 0x700   :  { %7336 = vmatprep.subr.mxu1 %v11765_v63 }
 0x701   :  { %7337 = vmatpush3.msra.mxu1 %v10139_v19  ;;  %v11797_v19 = vld [vmem:[#allocation50_spill] sm:$0xff] }
 0x702   :  { %7338 = vmatprep.subr.mxu1 %v11765_v63 }
 0x703   :  { %7339 = vmatpush3.msra.mxu1 %v10147_v1 }
 0x704   :  { %7340 = vmatprep.subr.mxu1 %v11765_v63 }
 0x705   :  { %7341 = vmatpush3.msra.mxu1 %v10155_v25 }
 0x706   :  { %7342 = vmatprep.subr.mxu1 %v11765_v63 }
 0x707   :  { %7343 = vmatpush3.msra.mxu1 %v10163_v27 }
 0x708   :  { %7344 = vmatprep.subr.mxu1 %v11765_v63 }
 0x709   :  { %7345 = vmatpush3.msra.mxu1 %v10171_v23 }
 0x70a   :  { %7346 = vmatprep.subr.mxu1 %v11765_v63 }
 0x70b   :  { %7347 = vmatpush3.msra.mxu1 %v10179_v2 }
 0x70c   :  { %7348 = vmatprep.subr.mxu1 %v11765_v63 }
 0x70d   :  { %7349 = vmatpush3.msra.mxu1 %v10187_v31 }
 0x70e   :  { %7350 = vmatprep.subr.mxu1 %v11765_v63 }
 0x70f   :  { %7351 = vmatpush3.msra.mxu1 %v10193_v10  ;;  %v11798_v10 = vld [vmem:[#allocation56_spill] sm:$0xff] }
 0x710   :  { %7390 = vmatprep.subr.mxu1 %v2975_v46 }
 0x790   :  { %v2460_v52 = vpop.f32.mrf.mxu1  ;;  %v2546_v56 = vpop.f32.mrf.mxu0 }
 0x791   :  { %v2568_v4 = vadd.f32 %v2460_v52, %v11796_v62  ;;  %v2577_v1 = vadd.f32 %v2546_v56, %v11797_v19  ;;  %v3096_v52 = vld [vmem:[#allocation17] sm:$0xff]  ;;  %v3247_v56 = vld [vmem:[#allocation19 + $0x78] sm:$0xff]  ;;  %v3246_v62 = vld [vmem:[#allocation19 + $0x70] sm:$0xff] }
 0x792   :  { %v7214_v8 = vpop.f32.mrf.mxu1  ;;  %v7249_v11 = vpop.f32.mrf.mxu0  ;;  %v10409_v19 = vld [vmem:[#allocation20 + $0x68] sm:$0xff] }
 0x793   :  { %v5416_v15 = vmul.f32 -1.442695, %v2568_v4  ;;  %v5417_v25 = vmul.f32 -1.442695, %v2577_v1  ;;  %v10401_v4 = vld [vmem:[#allocation20 + $0x78] sm:$0xff]  ;;  %v3245_v8 = vld [vmem:[#allocation19 + $0x68] sm:$0xff] }
 0x794   :  { %v10405_v11 = vld [vmem:[#allocation20 + $0x70] sm:$0xff]  ;;  %v3243_v1 = vld [vmem:[#allocation19 + $0x58] sm:$0xff] }
 0x795   :  { %8473 = vpow2.f32 %v5416_v15  ;;  %v3244_v15 = vld [vmem:[#allocation19 + $0x60] sm:$0xff] }
 0x796   :  { %8475 = vpow2.f32 %v5417_v25  ;;  %v10413_v25 = vld [vmem:[#allocation20 + $0x60] sm:$0xff] }
 0x7a2   :  { %v8474_v29 = vpop.eup %8473 }
 0x7a3   :  { %v2572_v27 = vadd.f32 1.0, %v8474_v29  ;;  %v8476_v54 = vpop.eup %8475  ;;  %v3242_v29 = vld [vmem:[#allocation19 + $0x50] sm:$0xff] }
 0x7a4   :  { %v2581_v23 = vadd.f32 1.0, %v8476_v54  ;;  %v3241_v54 = vld [vmem:[#allocation19 + $0x48] sm:$0xff] }
 0x7a5   :  { %8477 = vrcp.f32 %v2572_v27  ;;  %v10417_v27 = vld [vmem:[#allocation20 + $0x58] sm:$0xff] }
 0x7a6   :  { %8479 = vrcp.f32 %v2581_v23  ;;  %v10421_v23 = vld [vmem:[#allocation20 + $0x50] sm:$0xff] }
 0x7b0   :  { %v2652_v51 = vpop.f32.mrf.mxu1 }
 0x7b1   :  { %v2653_v2 = vadd.f32 %v10024_v55, %v2652_v51  ;;  %v2973_v55 = vld [vmem:[#allocation16 + $0x68] sm:$0xff]  ;;  %v3240_v51 = vld [vmem:[#allocation19 + $0x40] sm:$0xff] }
 0x7b2   :  { %v8478_v37 = vpop.eup %8477  ;;  %v7284_v31 = vpop.f32.mrf.mxu1 }
 0x7b3   :  { %v2656_v33 = vmul.f32 %v8478_v37, %v2653_v2  ;;  %v8480_v24 = vpop.eup %8479  ;;  %v10425_v2 = vld [vmem:[#allocation20 + $0x48] sm:$0xff]  ;;  %v3239_v37 = vld [vmem:[#allocation19 + $0x38] sm:$0xff]  ;;  %v10428_v31 = vld [vmem:[#allocation20 + $0x40] sm:$0xff] }
 0x7b4   :  { %v2659_v26 = vsub.f32 1.0, %v8480_v24  ;;  %v2661_v30 = vmul.f32 %v8480_v24, %v10205_v40  ;;  %v10435_v24 = vld [vmem:[#allocation20 + $0x30] sm:$0xff] }
 0x7b5   :  { %v2657_v22 = vadd.f32 %v2656_v33, %v11798_v10  ;;  %v3238_v33 = vld [vmem:[#allocation19 + $0x30] sm:$0xff]  ;;  %v10431_v10 = vld [vmem:[#allocation20 + $0x38] sm:$0xff] }
 0x7b7   :  { %8481 = vtanh.f32 %v2657_v22  ;;  %v3237_v22 = vld [vmem:[#allocation19 + $0x28] sm:$0xff] }
 0x7c4   :  { %v8482_v28 = vpop.eup %8481 }
 0x7c5   :  { %v2660_v32 = vmul.f32 %v8482_v28, %v2659_v26  ;;  %v3236_v26 = vld [vmem:[#allocation19 + $0x20] sm:$0xff]  ;;  %v10439_v28 = vld [vmem:[#allocation20 + $0x28] sm:$0xff] }
 0x7c7   :  { %v10348_v34 = vadd.f32 %v2661_v30, %v2660_v32  ;;  %v3235_v30 = vld [vmem:[#allocation19 + $0x18] sm:$0xff]  ;;  %v10443_v32 = vld [vmem:[#allocation20 + $0x20] sm:$0xff] }
 0x7c9   :  { %7318 = vmatmul.mubr.f32.vlgmr.msra.gmra.mxu0 %v10348_v34  ;;  %7353 = vmatmul.mubr.f32.vlgmr.msra.gmra.mxu1 %v10348_v34 }
 0x7ca   :  { %7356 = vmatpush3.msra.mxu0 %v10207_v12  ;;  %7391 = vmatpush3.msra.mxu1 %v2975_v46  ;;  %v2960_v12 = vld [vmem:[#allocation16] sm:$0xff]  ;;  %v3097_v46 = vld [vmem:[#allocation17 + $0x8] sm:$0xff] }
 0x7cb   :  { %7357 = vmatprep.subr.mxu0 %v11765_v63  ;;  %7392 = vmatprep.subr.mxu1 %v2974_v39 }
 0x7cc   :  { %7422 = vmatprep.mubr.f32.mxu1 %v11799_v43  ;;  %7358 = vmatpush3.msra.mxu0 %v10211_v14  ;;  %v3111_v14 = vld [vmem:[#allocation17 + $0x78] sm:$0xff] }
 0x7cd   :  { %7393 = vmatpush3.msra.mxu1 %v2974_v39  ;;  %7359 = vmatprep.subr.mxu0 %v11765_v63  ;;  %v3234_v39 = vld [vmem:[#allocation19 + $0x10] sm:$0xff] }
 0x7ce   :  { %7394 = vmatprep.subr.mxu1 %v2973_v55  ;;  %7360 = vmatpush3.msra.mxu0 %v10217_v16  ;;  %v11800_v16 = vld [vmem:[#allocation32_spill] sm:$0xff] }
 0x7cf   :  { %7395 = vmatpush3.msra.mxu1 %v2973_v55  ;;  %7361 = vmatprep.subr.mxu0 %v11765_v63  ;;  %v10447_v55 = vld [vmem:[#allocation20 + $0x18] sm:$0xff] }
 0x7d0   :  { %7396 = vmatprep.subr.mxu1 %v2972_v47  ;;  %7362 = vmatpush3.msra.mxu0 %v10223_v18  ;;  %v3110_v18 = vld [vmem:[#allocation17 + $0x70] sm:$0xff] }
 0x7d1   :  { %7397 = vmatpush3.msra.mxu1 %v2972_v47  ;;  %7363 = vmatprep.subr.mxu0 %v11765_v63  ;;  %v3233_v47 = vld [vmem:[#allocation19 + $0x8] sm:$0xff] }
 0x7d2   :  { %7398 = vmatprep.subr.mxu1 %v2971_v61  ;;  %7364 = vmatpush3.msra.mxu0 %v10229_v20  ;;  %v3109_v20 = vld [vmem:[#allocation17 + $0x68] sm:$0xff] }
 0x7d3   :  { %7399 = vmatpush3.msra.mxu1 %v2971_v61  ;;  %7365 = vmatprep.subr.mxu0 %v11765_v63  ;;  %v10451_v61 = vld [vmem:[#allocation20 + $0x10] sm:$0xff] }
 0x7d4   :  { %7400 = vmatprep.subr.mxu1 %v2970_v41  ;;  %7366 = vmatpush3.msra.mxu0 %v10235_v44  ;;  %v3108_v44 = vld [vmem:[#allocation17 + $0x60] sm:$0xff] }
 0x7d5   :  { %7401 = vmatpush3.msra.mxu1 %v2970_v41  ;;  %7367 = vmatprep.subr.mxu0 %v11765_v63  ;;  %v3232_v41 = vld [vmem:[#allocation19] sm:$0xff] }
 0x7d6   :  { %7402 = vmatprep.subr.mxu1 %v2969_v53  ;;  %7368 = vmatpush3.msra.mxu0 %v10241_v50  ;;  %v3107_v50 = vld [vmem:[#allocation17 + $0x58] sm:$0xff] }
 0x7d7   :  { %7403 = vmatpush3.msra.mxu1 %v2969_v53  ;;  %7369 = vmatprep.subr.mxu0 %v11765_v63  ;;  %v10456_v53 = vld [vmem:[#allocation20 + $0x8] sm:$0xff] }
 0x7d8   :  { %7404 = vmatprep.subr.mxu1 %v2968_v60  ;;  %7370 = vmatpush3.msra.mxu0 %v10247_v45  ;;  %v3106_v45 = vld [vmem:[#allocation17 + $0x50] sm:$0xff] }
 0x7d9   :  { %7405 = vmatpush3.msra.mxu1 %v2968_v60  ;;  %7371 = vmatprep.subr.mxu0 %v11765_v63  ;;  %v10459_v60 = vld [vmem:[#allocation20] sm:$0xff] }
 0x7da   :  { %7406 = vmatprep.subr.mxu1 %v2967_v49  ;;  %7372 = vmatpush3.msra.mxu0 %v10253_v58  ;;  %v3105_v58 = vld [vmem:[#allocation17 + $0x48] sm:$0xff] }
 0x7db   :  { %7407 = vmatpush3.msra.mxu1 %v2967_v49  ;;  %7373 = vmatprep.subr.mxu0 %v11765_v63 }
 0x7dc   :  { %7408 = vmatprep.subr.mxu1 %v2966_v59  ;;  %7374 = vmatpush3.msra.mxu0 %v10259_v0  ;;  %v3104_v0 = vld [vmem:[#allocation17 + $0x40] sm:$0xff] }
 0x7dd   :  { %7409 = vmatpush3.msra.mxu1 %v2966_v59  ;;  %7375 = vmatprep.subr.mxu0 %v11765_v63 }
 0x7de   :  { %7410 = vmatprep.subr.mxu1 %v2965_v5  ;;  %7376 = vmatpush3.msra.mxu0 %v10265_v6  ;;  %v3103_v6 = vld [vmem:[#allocation17 + $0x38] sm:$0xff] }
 0x7df   :  { %7411 = vmatpush3.msra.mxu1 %v2965_v5  ;;  %7377 = vmatprep.subr.mxu0 %v11765_v63  ;;  %v11801_v5 = vld [vmem:[#allocation47_spill] sm:$0xff] }
 0x7e0   :  { %7412 = vmatprep.subr.mxu1 %v2964_v3  ;;  %7378 = vmatpush3.msra.mxu0 %v10271_v9  ;;  %v3102_v9 = vld [vmem:[#allocation17 + $0x30] sm:$0xff] }
 0x7e1   :  { %7413 = vmatpush3.msra.mxu1 %v2964_v3  ;;  %7379 = vmatprep.subr.mxu0 %v11765_v63 }
 0x7e2   :  { %7414 = vmatprep.subr.mxu1 %v2963_v7  ;;  %7380 = vmatpush3.msra.mxu0 %v10277_v13  ;;  %v3101_v13 = vld [vmem:[#allocation17 + $0x28] sm:$0xff] }
 0x7e3   :  { %7415 = vmatpush3.msra.mxu1 %v2963_v7  ;;  %7381 = vmatprep.subr.mxu0 %v11765_v63 }
 0x7e4   :  { %7416 = vmatprep.subr.mxu1 %v2962_v35  ;;  %7382 = vmatpush3.msra.mxu0 %v10283_v17  ;;  %v3100_v17 = vld [vmem:[#allocation17 + $0x20] sm:$0xff] }
 0x7e5   :  { %7417 = vmatpush3.msra.mxu1 %v2962_v35  ;;  %7383 = vmatprep.subr.mxu0 %v11765_v63 }
 0x7e6   :  { %7418 = vmatprep.subr.mxu1 %v2961_v38  ;;  %7384 = vmatpush3.msra.mxu0 %v10289_v57  ;;  %v3099_v57 = vld [vmem:[#allocation17 + $0x18] sm:$0xff] }
 0x7e7   :  { %7419 = vmatpush3.msra.mxu1 %v2961_v38  ;;  %7385 = vmatprep.subr.mxu0 %v11765_v63 }
 0x7e8   :  { %7420 = vmatprep.subr.mxu1 %v2960_v12  ;;  %7386 = vmatpush3.msra.mxu0 %v10295_v21  ;;  %v3098_v21 = vld [vmem:[#allocation17 + $0x10] sm:$0xff] }
 0x7e9   :  { %7387 = vmatprep.mubr.msk.f32.mxu0 %vm8895_vm0, %v11765_v63  ;;  %7421 = vmatpush3.msra.mxu1 %v2960_v12  ;;  %v11802_v12 = vld [vmem:[#allocation49_spill] sm:$0xff] }
 0x7ea   :  { %7388 = vmatmul.mubr.f32.vlgmr.msra.gmra.mxu0 %v10348_v34  ;;  %7423 = vmatmul.mubr.f32.vlgmr.msra.gmra.mxu1 %v11800_v16 }
 0x7eb   :  { %7434 = vmatprep.subr.mxu0 %v3111_v14  ;;  %7425 = vmatprep.mubr.f32.mxu1 %v9768_v48 }
 0x7ec   :  { %7435 = vmatpush3.msra.mxu0 %v3111_v14  ;;  %7466 = vmatprep.mubr.f32.mxu0 %v11799_v43 }
 0x7ed   :  { %7436 = vmatprep.subr.mxu0 %v3110_v18  ;;  %7478 = vmatprep.subr.mxu1 %v3247_v56 }
 0x7ee   :  { %7437 = vmatpush3.msra.mxu0 %v3110_v18  ;;  %7426 = vmatmul.mubr.f32.gmra.mxu1 %v9912_v36 }
 0x7ef   :  { %7438 = vmatprep.subr.mxu0 %v3109_v20  ;;  %7428 = vmatprep.mubr.f32.mxu1 %v10029_v42 }
 0x7f0   :  { %7439 = vmatpush3.msra.mxu0 %v3109_v20  ;;  %7479 = vmatpush3.msra.mxu1 %v3247_v56 }
 0x7f1   :  { %7440 = vmatprep.subr.mxu0 %v3108_v44  ;;  %7480 = vmatprep.subr.mxu1 %v3246_v62 }
 0x7f2   :  { %7441 = vmatpush3.msra.mxu0 %v3108_v44  ;;  %7429 = vmatmul.mubr.f32.gmra.mxu1 %v10205_v40 }
 0x7f3   :  { %7442 = vmatprep.subr.mxu0 %v3107_v50  ;;  %7431 = vmatprep.mubr.f32.mxu1 %v10348_v34 }
 0x7f4   :  { %7443 = vmatpush3.msra.mxu0 %v3107_v50  ;;  %7481 = vmatpush3.msra.mxu1 %v3246_v62 }
 0x7f5   :  { %7444 = vmatprep.subr.mxu0 %v3106_v45  ;;  %7482 = vmatprep.subr.mxu1 %v3245_v8 }
 0x7f6   :  { %7445 = vmatpush3.msra.mxu0 %v3106_v45  ;;  %7483 = vmatpush3.msra.mxu1 %v3245_v8 }
 0x7f7   :  { %7446 = vmatprep.subr.mxu0 %v3105_v58  ;;  %7484 = vmatprep.subr.mxu1 %v3244_v15 }
 0x7f8   :  { %7447 = vmatpush3.msra.mxu0 %v3105_v58  ;;  %7485 = vmatpush3.msra.mxu1 %v3244_v15 }
 0x7f9   :  { %7448 = vmatprep.subr.mxu0 %v3104_v0  ;;  %7486 = vmatprep.subr.mxu1 %v3243_v1 }
 0x7fa   :  { %7449 = vmatpush3.msra.mxu0 %v3104_v0  ;;  %7487 = vmatpush3.msra.mxu1 %v3243_v1  ;;  %v10476_v1 = vld [vmem:[#allocation22 + $0x78] sm:$0xff] }
 0x7fb   :  { %7450 = vmatprep.subr.mxu0 %v3103_v6  ;;  %7488 = vmatprep.subr.mxu1 %v3242_v29 }
 0x7fc   :  { %7451 = vmatpush3.msra.mxu0 %v3103_v6  ;;  %7489 = vmatpush3.msra.mxu1 %v3242_v29  ;;  %v8574_v6 = vld [vmem:[%s11669_s10] ss:$0 sm:$0xff]  ;;  %v10478_v29 = vld [vmem:[#allocation23 + $0x78] sm:$0xff] }
 0x7fd   :  { %7452 = vmatprep.subr.mxu0 %v3102_v9  ;;  %7490 = vmatprep.subr.mxu1 %v3241_v54 }
 0x7fe   :  { %7453 = vmatpush3.msra.mxu0 %v3102_v9  ;;  %7491 = vmatpush3.msra.mxu1 %v3241_v54  ;;  %v10482_v54 = vld [vmem:[#allocation22 + $0x70] sm:$0xff] }
 0x7ff   :  { %7454 = vmatprep.subr.mxu0 %v3101_v13  ;;  %7492 = vmatprep.subr.mxu1 %v3240_v51 }
 0x800   :  { %7455 = vmatpush3.msra.mxu0 %v3101_v13  ;;  %7493 = vmatpush3.msra.mxu1 %v3240_v51  ;;  %v10486_v51 = vld [vmem:[#allocation23 + $0x70] sm:$0xff] }
 0x801   :  { %7456 = vmatprep.subr.mxu0 %v3100_v17  ;;  %7494 = vmatprep.subr.mxu1 %v3239_v37 }
 0x802   :  { %7457 = vmatpush3.msra.mxu0 %v3100_v17  ;;  %7495 = vmatpush3.msra.mxu1 %v3239_v37  ;;  %v10504_v37 = vld [vmem:[#allocation23 + $0x60] sm:$0xff] }
 0x803   :  { %7458 = vmatprep.subr.mxu0 %v3099_v57  ;;  %7496 = vmatprep.subr.mxu1 %v3238_v33 }
 0x804   :  { %7459 = vmatpush3.msra.mxu0 %v3099_v57  ;;  %7497 = vmatpush3.msra.mxu1 %v3238_v33  ;;  %v11803_v57 = vld [vmem:[#allocation55_spill] sm:$0xff] }
 0x805   :  { %7460 = vmatprep.subr.mxu0 %v3098_v21  ;;  %7498 = vmatprep.subr.mxu1 %v3237_v22  ;;  %v10510_v33 = vld [vmem:[#allocation22 + $0x58] sm:$0xff] }
 0x806   :  { %7461 = vmatpush3.msra.mxu0 %v3098_v21  ;;  %7499 = vmatpush3.msra.mxu1 %v3237_v22  ;;  %v10522_v22 = vld [vmem:[#allocation23 + $0x50] sm:$0xff] }
 0x807   :  { %7462 = vmatprep.subr.mxu0 %v3097_v46  ;;  %7500 = vmatprep.subr.mxu1 %v3236_v26 }
 0x808   :  { %7463 = vmatpush3.msra.mxu0 %v3097_v46  ;;  %7501 = vmatpush3.msra.mxu1 %v3236_v26  ;;  %v10528_v26 = vld [vmem:[#allocation22 + $0x48] sm:$0xff] }
 0x809   :  { %7464 = vmatprep.subr.mxu0 %v3096_v52  ;;  %7502 = vmatprep.subr.mxu1 %v3235_v30 }
 0x80a   :  { %7465 = vmatpush3.msra.mxu0 %v3096_v52  ;;  %7503 = vmatpush3.msra.mxu1 %v3235_v30  ;;  %v10537_v30 = vld [vmem:[#allocation23 + $0x40] sm:$0xff] }
 0x80b   :  { %7467 = vmatmul.mubr.f32.vlgmr.msra.gmra.mxu0 %v11800_v16  ;;  %7522 = vmatprep.subr.mxu0 %v11765_v63 }
 0x80c   :  { %7469 = vmatprep.mubr.f32.mxu0 %v9768_v48  ;;  %7523 = vmatpush3.msra.mxu0 %v10401_v4 }
 0x80d   :  { %7524 = vmatprep.subr.mxu0 %v11765_v63  ;;  %7504 = vmatprep.subr.mxu1 %v3234_v39 }
 0x80e   :  { %7525 = vmatpush3.msra.mxu0 %v10405_v11  ;;  %7505 = vmatpush3.msra.mxu1 %v3234_v39  ;;  %v10543_v39 = vld [vmem:[#allocation22 + $0x38] sm:$0xff] }
 0x80f   :  { %7470 = vmatmul.mubr.f32.gmra.mxu0 %v9912_v36  ;;  %7526 = vmatprep.subr.mxu0 %v11765_v63 }
 0x810   :  { %7472 = vmatprep.mubr.f32.mxu0 %v10029_v42  ;;  %7527 = vmatpush3.msra.mxu0 %v10409_v19 }
 0x811   :  { %7528 = vmatprep.subr.mxu0 %v11765_v63  ;;  %7506 = vmatprep.subr.mxu1 %v3233_v47 }
 0x812   :  { %7529 = vmatpush3.msra.mxu0 %v10413_v25  ;;  %7507 = vmatpush3.msra.mxu1 %v3233_v47  ;;  %v10545_v47 = vld [vmem:[#allocation23 + $0x38] sm:$0xff] }
 0x813   :  { %7473 = vmatmul.mubr.f32.gmra.mxu0 %v10205_v40  ;;  %7530 = vmatprep.subr.mxu0 %v11765_v63 }
 0x814   :  { %7475 = vmatprep.mubr.f32.mxu0 %v10348_v34  ;;  %7531 = vmatpush3.msra.mxu0 %v10417_v27 }
 0x815   :  { %7532 = vmatprep.subr.mxu0 %v11765_v63  ;;  %7508 = vmatprep.subr.mxu1 %v3232_v41 }
 0x816   :  { %7533 = vmatpush3.msra.mxu0 %v10421_v23  ;;  %7509 = vmatpush3.msra.mxu1 %v3232_v41  ;;  %v10551_v41 = vld [vmem:[#allocation22 + $0x30] sm:$0xff] }
 0x817   :  { %7534 = vmatprep.subr.mxu0 %v11765_v63  ;;  %7557 = vmatprep.subr.mxu1 %v11765_v63 }
 0x818   :  { %7535 = vmatpush3.msra.mxu0 %v10425_v2 }
 0x819   :  { %7536 = vmatprep.subr.mxu0 %v11765_v63 }
 0x81a   :  { %7537 = vmatpush3.msra.mxu0 %v10428_v31 }
 0x81b   :  { %7538 = vmatprep.subr.mxu0 %v11765_v63 }
 0x81c   :  { %7539 = vmatpush3.msra.mxu0 %v10431_v10 }
 0x81d   :  { %7540 = vmatprep.subr.mxu0 %v11765_v63 }
 0x81e   :  { %7541 = vmatpush3.msra.mxu0 %v10435_v24 }
 0x81f   :  { %7542 = vmatprep.subr.mxu0 %v11765_v63 }
 0x820   :  { %7543 = vmatpush3.msra.mxu0 %v10439_v28 }
 0x821   :  { %7544 = vmatprep.subr.mxu0 %v11765_v63 }
 0x822   :  { %7545 = vmatpush3.msra.mxu0 %v10443_v32 }
 0x823   :  { %7546 = vmatprep.subr.mxu0 %v11765_v63 }
 0x824   :  { %7547 = vmatpush3.msra.mxu0 %v10447_v55 }
 0x825   :  { %7548 = vmatprep.subr.mxu0 %v11765_v63 }
 0x826   :  { %7549 = vmatpush3.msra.mxu0 %v10451_v61 }
 0x827   :  { %7550 = vmatprep.subr.mxu0 %v11765_v63 }
 0x828   :  { %7551 = vmatpush3.msra.mxu0 %v10456_v53 }
 0x829   :  { %7552 = vmatprep.subr.mxu0 %v11765_v63 }
 0x82a   :  { %7553 = vmatpush3.msra.mxu0 %v10459_v60 }
 0x82b   :  { %7592 = vmatprep.subr.mxu0 %v11765_v63 }
 0x889   :  { %v2747_v49 = vpop.f32.mrf.mxu0  ;;  %v2833_v59 = vpop.f32.mrf.mxu1 }
 0x88a   :  { %v2855_v3 = vadd.f32 %v2747_v49, %v11801_v5  ;;  %v2864_v14 = vadd.f32 %v2833_v59, %v11802_v12  ;;  %v10553_v49 = vld [vmem:[#allocation23 + $0x30] sm:$0xff]  ;;  %v10559_v59 = vld [vmem:[#allocation22 + $0x28] sm:$0xff] }
 0x88b   :  { %v7319_v7 = vpop.f32.mrf.mxu0  ;;  %v7354_v35 = vpop.f32.mrf.mxu1  ;;  %11804 = vst [vmem:[#allocation38_spill] sm:$0xff] %v10559_v59  ;;  %v10561_v5 = vld [vmem:[#allocation23 + $0x28] sm:$0xff]  ;;  %v10583_v12 = vld [vmem:[#allocation22 + $0x10] sm:$0xff] }
 0x88c   :  { %v5418_v38 = vmul.f32 -1.442695, %v2855_v3  ;;  %v5419_v18 = vmul.f32 -1.442695, %v2864_v14  ;;  %v10567_v3 = vld [vmem:[#allocation22 + $0x20] sm:$0xff]  ;;  %v10575_v35 = vld [vmem:[#allocation22 + $0x18] sm:$0xff] }
 0x88d   :  { %11805 = vst [vmem:[#allocation51_spill] sm:$0xff] %v10567_v3  ;;  %v10569_v7 = vld [vmem:[#allocation23 + $0x20] sm:$0xff]  ;;  %11806 = vst [vmem:[#allocation40_spill] sm:$0xff] %v10575_v35  ;;  %v10585_v14 = vld [vmem:[#allocation23 + $0x10] sm:$0xff] }
 0x88e   :  { %8483 = vpow2.f32 %v5418_v38  ;;  %v10577_v38 = vld [vmem:[#allocation23 + $0x18] sm:$0xff]  ;;  %11807 = vst [vmem:[#allocation42_spill] sm:$0xff] %v10583_v12 }
 0x88f   :  { %8485 = vpow2.f32 %v5419_v18  ;;  %v10591_v18 = vld [vmem:[#allocation22 + $0x8] sm:$0xff] }
 0x890   :  { %11808 = vst [vmem:[#allocation39_spill] sm:$0xff] %v10591_v18 }
 0x89b   :  { %v8484_v20 = vpop.eup %8483 }
 0x89c   :  { %v2859_v44 = vadd.f32 1.0, %v8484_v20  ;;  %v8486_v50 = vpop.eup %8485  ;;  %v10593_v20 = vld [vmem:[#allocation23 + $0x8] sm:$0xff] }
 0x89d   :  { %v2868_v45 = vadd.f32 1.0, %v8486_v50  ;;  %v10603_v50 = vld [vmem:[#allocation23] sm:$0xff] }
 0x89e   :  { %8487 = vrcp.f32 %v2859_v44  ;;  %v10599_v44 = vld [vmem:[#allocation22] sm:$0xff] }
 0x89f   :  { %8489 = vrcp.f32 %v2868_v45  ;;  %11809 = vst [vmem:[#allocation41_spill] sm:$0xff] %v10599_v44 }
 0x8aa   :  { %v2939_v58 = vpop.f32.mrf.mxu0  ;;  %v10685_v45 = vpop.f32.mrf.mxu1 }
 0x8ab   :  { %v8488_v0 = vpop.eup %8487  ;;  %v2940_v9 = vadd.f32 %v8574_v6, %v2939_v58  ;;  %11810 = vst [vmem:[#allocation52_spill] sm:$0xff] %v10685_v45 }
 0x8ac   :  { %v7389_v13 = vpop.f32.mrf.mxu0  ;;  %v8490_v46 = vpop.eup %8489 }
 0x8ad   :  { %v2943_v17 = vmul.f32 %v8488_v0, %v2940_v9  ;;  %v2946_v52 = vsub.f32 1.0, %v8490_v46  ;;  %v2948_v8 = vmul.f32 %v8490_v46, %v10348_v34  ;;  %v3049_v0 = vpop.f32.mrf.mxu1 }
 0x8af   :  { %v2944_v21 = vadd.f32 %v2943_v17, %v11803_v57  ;;  %v10689_v9 = vpop.f32.mrf.mxu1 }
 0x8b0   :  { %11812 = vst [vmem:[#allocation34_spill] sm:$0xff] %v10689_v9 }
 0x8b1   :  { %8491 = vtanh.f32 %v2944_v21  ;;  %v10693_v17 = vpop.f32.mrf.mxu1 }
 0x8b2   :  { %11814 = vst [vmem:[#allocation36_spill] sm:$0xff] %v10693_v17 }
 0x8b3   :  { %v10697_v21 = vpop.f32.mrf.mxu1 }
 0x8b4   :  { %11816 = vst [vmem:[#allocation44_spill] sm:$0xff] %v10697_v21 }
 0x8be   :  { %v8492_v56 = vpop.eup %8491 }
 0x8bf   :  { %v2947_v62 = vmul.f32 %v8492_v56, %v2946_v52  ;;  %v10701_v52 = vpop.f32.mrf.mxu1 }
 0x8c0   :  { %11818 = vst [vmem:[#allocation54_spill] sm:$0xff] %v10701_v52 }
 0x8c1   :  { %v2949_v15 = vadd.f32 %v2948_v8, %v2947_v62 }
 0x8c3   :  { %7432 = vmatmul.mubr.f32.gmra.mxu1 %v2949_v15  ;;  %7476 = vmatmul.mubr.f32.gmra.mxu0 %v2949_v15 }
 0x8c4   :  { %7510 = vmatprep.mubr.f32.mxu1 %v11799_v43  ;;  %7554 = vmatprep.mubr.msk.f32.mxu0 %vm8895_vm0, %v11765_v63  ;;  %v10492_v43 = vld [vmem:[#allocation22 + $0x68] sm:$0xff] }
 0x8c7   :  { %7511 = vmatmul.mubr.f32.vlgmr.msra.gmra.mxu1 %v11800_v16  ;;  %7555 = vmatmul.mubr.f32.vlgmr.msra.gmra.mxu0 %v11765_v63  ;;  %v10496_v16 = vld [vmem:[#allocation23 + $0x68] sm:$0xff] }
 0x8c8   :  { %7558 = vmatpush3.msra.mxu1 %v10476_v1  ;;  %7513 = vmatprep.mubr.f32.mxu1 %v9768_v48  ;;  %v10500_v48 = vld [vmem:[#allocation22 + $0x60] sm:$0xff] }
 0x8c9   :  { %7559 = vmatprep.subr.mxu1 %v11765_v63  ;;  %7593 = vmatpush3.msra.mxu0 %v10478_v29 }
 0x8ca   :  { %7560 = vmatpush3.msra.mxu1 %v10482_v54  ;;  %7594 = vmatprep.subr.mxu0 %v11765_v63 }
 0x8cb   :  { %7561 = vmatprep.subr.mxu1 %v11765_v63  ;;  %7595 = vmatpush3.msra.mxu0 %v10486_v51  ;;  %v10687_v58 = vpop.f32.mrf.mxu0 }
 0x8cc   :  { %7514 = vmatmul.mubr.f32.gmra.mxu1 %v9912_v36  ;;  %7596 = vmatprep.subr.mxu0 %v11765_v63  ;;  %v10514_v36 = vld [vmem:[#allocation23 + $0x58] sm:$0xff]  ;;  %11811 = vst [vmem:[#allocation33_spill] sm:$0xff] %v10687_v58 }
 0x8cd   :  { %7562 = vmatpush3.msra.mxu1 %v10492_v43  ;;  %7516 = vmatprep.mubr.f32.mxu1 %v10029_v42  ;;  %v10518_v42 = vld [vmem:[#allocation22 + $0x50] sm:$0xff]  ;;  %v3185_v6 = vpop.f32.mrf.mxu0 }
 0x8ce   :  { %7563 = vmatprep.subr.mxu1 %v11765_v63  ;;  %7597 = vmatpush3.msra.mxu0 %v10496_v16 }
 0x8cf   :  { %7564 = vmatpush3.msra.mxu1 %v10500_v48  ;;  %7598 = vmatprep.subr.mxu0 %v11765_v63  ;;  %v10691_v13 = vpop.f32.mrf.mxu0 }
 0x8d0   :  { %7565 = vmatprep.subr.mxu1 %v11765_v63  ;;  %7599 = vmatpush3.msra.mxu0 %v10504_v37  ;;  %11813 = vst [vmem:[#allocation35_spill] sm:$0xff] %v10691_v13  ;;  %v5422_v13 = vld [vmem:[%s11678_s19] ss:$0 sm:$0xff] }
 0x8d1   :  { %7517 = vmatmul.mubr.f32.gmra.mxu1 %v10205_v40  ;;  %7600 = vmatprep.subr.mxu0 %v11765_v63  ;;  %v10530_v40 = vld [vmem:[#allocation23 + $0x48] sm:$0xff]  ;;  %v10695_v57 = vpop.f32.mrf.mxu0 }
 0x8d2   :  { %7566 = vmatpush3.msra.mxu1 %v10510_v33  ;;  %7519 = vmatprep.mubr.f32.mxu1 %v10348_v34  ;;  %v10535_v34 = vld [vmem:[#allocation22 + $0x40] sm:$0xff]  ;;  %11815 = vst [vmem:[#allocation37_spill] sm:$0xff] %v10695_v57 }
 0x8d3   :  { %7567 = vmatprep.subr.mxu1 %v11765_v63  ;;  %7601 = vmatpush3.msra.mxu0 %v10514_v36  ;;  %v10699_v46 = vpop.f32.mrf.mxu0 }
 0x8d4   :  { %7568 = vmatpush3.msra.mxu1 %v10518_v42  ;;  %7602 = vmatprep.subr.mxu0 %v11765_v63  ;;  %11817 = vst [vmem:[#allocation46_spill] sm:$0xff] %v10699_v46 }
 0x8d5   :  { %7569 = vmatprep.subr.mxu1 %v11765_v63  ;;  %7603 = vmatpush3.msra.mxu0 %v10522_v22  ;;  %v10703_v56 = vpop.f32.mrf.mxu0 }
 0x8d6   :  { %7520 = vmatmul.mubr.f32.gmra.mxu1 %v2949_v15  ;;  %7604 = vmatprep.subr.mxu0 %v11765_v63  ;;  %11819 = vst [vmem:[#allocation43_spill] sm:$0xff] %v10703_v56 }
 0x8d7   :  { %7570 = vmatpush3.msra.mxu1 %v10528_v26  ;;  %7605 = vmatpush3.msra.mxu0 %v10530_v40 }
 0x8d8   :  { %7571 = vmatprep.subr.mxu1 %v11765_v63  ;;  %7606 = vmatprep.subr.mxu0 %v11765_v63 }
 0x8d9   :  { %7572 = vmatpush3.msra.mxu1 %v10535_v34  ;;  %7607 = vmatpush3.msra.mxu0 %v10537_v30 }
 0x8da   :  { %7573 = vmatprep.subr.mxu1 %v11765_v63  ;;  %7608 = vmatprep.subr.mxu0 %v11765_v63 }
 0x8db   :  { %7574 = vmatpush3.msra.mxu1 %v10543_v39  ;;  %7609 = vmatpush3.msra.mxu0 %v10545_v47 }
 0x8dc   :  { %7575 = vmatprep.subr.mxu1 %v11765_v63  ;;  %7610 = vmatprep.subr.mxu0 %v11765_v63 }
 0x8dd   :  { %7576 = vmatpush3.msra.mxu1 %v10551_v41  ;;  %7611 = vmatpush3.msra.mxu0 %v10553_v49 }
 0x8de   :  { %7577 = vmatprep.subr.mxu1 %v11765_v63  ;;  %7612 = vmatprep.subr.mxu0 %v11765_v63 }
 0x8df   :  { %7578 = vmatpush3.msra.mxu1 %v10559_v59  ;;  %7613 = vmatpush3.msra.mxu0 %v10561_v5 }
 0x8e0   :  { %7579 = vmatprep.subr.mxu1 %v11765_v63  ;;  %7614 = vmatprep.subr.mxu0 %v11765_v63 }
 0x8e1   :  { %7580 = vmatpush3.msra.mxu1 %v10567_v3  ;;  %7615 = vmatpush3.msra.mxu0 %v10569_v7 }
 0x8e2   :  { %7581 = vmatprep.subr.mxu1 %v11765_v63  ;;  %7616 = vmatprep.subr.mxu0 %v11765_v63 }
 0x8e3   :  { %7582 = vmatpush3.msra.mxu1 %v10575_v35  ;;  %7617 = vmatpush3.msra.mxu0 %v10577_v38 }
 0x8e4   :  { %7583 = vmatprep.subr.mxu1 %v11765_v63  ;;  %7618 = vmatprep.subr.mxu0 %v11765_v63 }
 0x8e5   :  { %7584 = vmatpush3.msra.mxu1 %v10583_v12  ;;  %7619 = vmatpush3.msra.mxu0 %v10585_v14 }
 0x8e6   :  { %7585 = vmatprep.subr.mxu1 %v11765_v63  ;;  %7620 = vmatprep.subr.mxu0 %v11765_v63 }
 0x8e7   :  { %7586 = vmatpush3.msra.mxu1 %v10591_v18  ;;  %7621 = vmatpush3.msra.mxu0 %v10593_v20 }
 0x8e8   :  { %7587 = vmatprep.subr.mxu1 %v11765_v63  ;;  %7589 = vmatprep.mubr.msk.f32.mxu1 %vm8895_vm0, %v11765_v63 }
 0x8e9   :  { %7588 = vmatpush3.msra.mxu1 %v10599_v44  ;;  %7622 = vmatprep.subr.mxu0 %v11765_v63 }
 0x8ea   :  { %7590 = vmatmul.mubr.f32.vlgmr.msra.gmra.mxu1 %v11765_v63  ;;  %7623 = vmatpush3.msra.mxu0 %v10603_v50 }
 0x8eb   :  { %7624 = vmatprep.mubr.msk.f32.mxu0 %vm8895_vm0, %v11765_v63  ;;  %7627 = vmatprep.subr.mxu1 %v11765_v63 }
 0x8ec   :  { %7625 = vmatmul.mubr.f32.vlgmr.msra.gmra.mxu0 %v11765_v63  ;;  %7628 = vmatpush3.msra.mxu1 %v10401_v4 }
 0x8ed   :  { %7662 = vmatprep.subr.mxu0 %v11765_v63  ;;  %7629 = vmatprep.subr.mxu1 %v11765_v63 }
 0x8ee   :  { %7663 = vmatpush3.msra.mxu0 %v10476_v1  ;;  %7630 = vmatpush3.msra.mxu1 %v10405_v11 }
 0x8ef   :  { %7664 = vmatprep.subr.mxu0 %v11765_v63  ;;  %7631 = vmatprep.subr.mxu1 %v11765_v63 }
 0x8f0   :  { %7665 = vmatpush3.msra.mxu0 %v10482_v54  ;;  %7632 = vmatpush3.msra.mxu1 %v10409_v19 }
 0x8f1   :  { %7666 = vmatprep.subr.mxu0 %v11765_v63  ;;  %7633 = vmatprep.subr.mxu1 %v11765_v63 }
 0x8f2   :  { %7667 = vmatpush3.msra.mxu0 %v10492_v43  ;;  %7634 = vmatpush3.msra.mxu1 %v10413_v25 }
 0x8f3   :  { %7668 = vmatprep.subr.mxu0 %v11765_v63  ;;  %7635 = vmatprep.subr.mxu1 %v11765_v63 }
 0x8f4   :  { %7669 = vmatpush3.msra.mxu0 %v10500_v48  ;;  %7636 = vmatpush3.msra.mxu1 %v10417_v27 }
 0x8f5   :  { %7670 = vmatprep.subr.mxu0 %v11765_v63  ;;  %7637 = vmatprep.subr.mxu1 %v11765_v63 }
 0x8f6   :  { %7671 = vmatpush3.msra.mxu0 %v10510_v33  ;;  %7638 = vmatpush3.msra.mxu1 %v10421_v23 }
 0x8f7   :  { %7672 = vmatprep.subr.mxu0 %v11765_v63  ;;  %7639 = vmatprep.subr.mxu1 %v11765_v63 }
 0x8f8   :  { %7673 = vmatpush3.msra.mxu0 %v10518_v42  ;;  %7640 = vmatpush3.msra.mxu1 %v10425_v2 }
 0x8f9   :  { %7674 = vmatprep.subr.mxu0 %v11765_v63  ;;  %7641 = vmatprep.subr.mxu1 %v11765_v63 }
 0x8fa   :  { %7675 = vmatpush3.msra.mxu0 %v10528_v26  ;;  %7642 = vmatpush3.msra.mxu1 %v10428_v31 }
 0x8fb   :  { %7676 = vmatprep.subr.mxu0 %v11765_v63  ;;  %7643 = vmatprep.subr.mxu1 %v11765_v63 }
 0x8fc   :  { %7677 = vmatpush3.msra.mxu0 %v10535_v34  ;;  %7644 = vmatpush3.msra.mxu1 %v10431_v10 }
 0x8fd   :  { %7678 = vmatprep.subr.mxu0 %v11765_v63  ;;  %7645 = vmatprep.subr.mxu1 %v11765_v63 }
 0x8fe   :  { %7679 = vmatpush3.msra.mxu0 %v10543_v39  ;;  %7646 = vmatpush3.msra.mxu1 %v10435_v24 }
 0x8ff   :  { %7680 = vmatprep.subr.mxu0 %v11765_v63  ;;  %7647 = vmatprep.subr.mxu1 %v11765_v63 }
 0x900   :  { %7681 = vmatpush3.msra.mxu0 %v10551_v41  ;;  %7648 = vmatpush3.msra.mxu1 %v10439_v28 }
 0x901   :  { %7682 = vmatprep.subr.mxu0 %v11765_v63  ;;  %7649 = vmatprep.subr.mxu1 %v11765_v63 }
 0x902   :  { %7683 = vmatpush3.msra.mxu0 %v10559_v59  ;;  %7650 = vmatpush3.msra.mxu1 %v10443_v32 }
 0x903   :  { %7684 = vmatprep.subr.mxu0 %v11765_v63  ;;  %7651 = vmatprep.subr.mxu1 %v11765_v63 }
 0x904   :  { %7685 = vmatpush3.msra.mxu0 %v10567_v3  ;;  %7652 = vmatpush3.msra.mxu1 %v10447_v55 }
 0x905   :  { %7686 = vmatprep.subr.mxu0 %v11765_v63  ;;  %7653 = vmatprep.subr.mxu1 %v11765_v63 }
 0x906   :  { %7687 = vmatpush3.msra.mxu0 %v10575_v35  ;;  %7654 = vmatpush3.msra.mxu1 %v10451_v61 }
 0x907   :  { %7688 = vmatprep.subr.mxu0 %v11765_v63  ;;  %7655 = vmatprep.subr.mxu1 %v11765_v63 }
 0x908   :  { %7689 = vmatpush3.msra.mxu0 %v10583_v12  ;;  %7656 = vmatpush3.msra.mxu1 %v10456_v53 }
 0x909   :  { %7690 = vmatprep.subr.mxu0 %v11765_v63  ;;  %7657 = vmatprep.subr.mxu1 %v11765_v63 }
 0x90a   :  { %7691 = vmatpush3.msra.mxu0 %v10591_v18  ;;  %7658 = vmatpush3.msra.mxu1 %v10459_v60 }
 0x90b   :  { %7692 = vmatprep.subr.mxu0 %v11765_v63  ;;  %7659 = vmatprep.mubr.msk.f32.mxu1 %vm8895_vm0, %v11765_v63 }
 0x90c   :  { %7693 = vmatpush3.msra.mxu0 %v10599_v44  ;;  %7694 = vmatprep.mubr.msk.f32.mxu0 %vm8895_vm0, %v11765_v63 }
 0x90d   :  { %7697 = vmatprep.subr.mxu1 %v11765_v63  ;;  %7732 = vmatprep.subr.mxu0 %v11765_v63 }
 0x983   :  { %v10705_v62 = vpop.f32.mrf.mxu1  ;;  %v10707_v8 = vpop.f32.mrf.mxu0 }
 0x984   :  { %11820 = vst [vmem:[#allocation45_spill] sm:$0xff] %v10705_v62  ;;  %11821 = vst [vmem:[#allocation53_spill] sm:$0xff] %v10707_v8  ;;  %v10721_v62 = vld [vmem:[%s11676_s17] ss:$0 sm:$0xff] }
 0x985   :  { %v10709_v15 = vpop.f32.mrf.mxu1  ;;  %v10711_v9 = vpop.f32.mrf.mxu0  ;;  %11825 = vst [vmem:[#allocation57_spill] sm:$0xff] %v10721_v62  ;;  %v3050_v8 = vadd.f32 %v10721_v62, %v3049_v0 }
 0x986   :  { %11822 = vst [vmem:[#allocation48_spill] sm:$0xff] %v10709_v15  ;;  %11823 = vst [vmem:[#allocation50_spill] sm:$0xff] %v10711_v9 }
 0x987   :  { %v7512_v57 = vpop.f32.mrf.mxu1  ;;  %v3451_v21 = vpop.f32.mrf.mxu0 }
 0x988   :  { %v10716_v17 = vadd.f32 %v7512_v57, %v5422_v13  ;;  %v3558_v56 = vadd.f32 %v3451_v21, %v3050_v8 }
 0x989   :  { %v3321_v46 = vpop.f32.mrf.mxu1  ;;  %v7556_v52 = vpop.f32.mrf.mxu0 }
 0x98a   :  { %11824 = vst [vmem:[#allocation56_spill] sm:$0xff] %v10716_v17  ;;  %v5423_v44 = vmul.f32 -1.442695, %v3558_v56 }
 0x98c   :  { %v7515_v15 = vpop.f32.mrf.mxu1  ;;  %8493 = vpow2.f32 %v5423_v44 }
 0x98d   :  { %v10724_v9 = vadd.f32 %v7515_v15, %v5422_v13 }
 0x98e   :  { %v3331_v58 = vpop.f32.mrf.mxu1 }
 0x98f   :  { %11826 = vst [vmem:[#allocation32_spill] sm:$0xff] %v10724_v9  ;;  %v10726_v45 = vadd.f32 %v5422_v13, %v3331_v58  ;;  %v10739_v58 = vld [vmem:[%s11677_s18] ss:$0 sm:$0xff] }
 0x991   :  { %11827 = vst [vmem:[#allocation47_spill] sm:$0xff] %v10726_v45  ;;  %v7518_v18 = vpop.f32.mrf.mxu1 }
 0x992   :  { %v10728_v57 = vadd.f32 %v7518_v18, %v5422_v13  ;;  %v3186_v18 = vadd.f32 %v10739_v58, %v3185_v6 }
 0x993   :  { %v3341_v17 = vpop.f32.mrf.mxu1 }
 0x994   :  { %11828 = vst [vmem:[#allocation49_spill] sm:$0xff] %v10728_v57  ;;  %v10730_v52 = vadd.f32 %v5422_v13, %v3341_v17 }
 0x996   :  { %11829 = vst [vmem:[#allocation55_spill] sm:$0xff] %v10730_v52  ;;  %v7521_v12 = vpop.f32.mrf.mxu1  ;;  %v3322_v52 = vadd.f32 %v5422_v13, %v3321_v46  ;;  %v11835_v46 = vld [vmem:[#allocation39_spill] sm:$0xff] }
 0x997   :  { %v10732_v35 = vadd.f32 %v7521_v12, %v5422_v13 }
 0x998   :  { %v3351_v3 = vpop.f32.mrf.mxu1 }
 0x999   :  { %11830 = vst [vmem:[#allocation58_spill] sm:$0xff] %v10732_v35  ;;  %v10734_v0 = vadd.f32 %v5422_v13, %v3351_v3  ;;  %v8494_v21 = vpop.eup %8493  ;;  %v10745_v3 = vld [vmem:[%s11679_s20] ss:$0 sm:$0xff]  ;;  %v11834_v13 = vld [vmem:[#allocation42_spill] sm:$0xff] }
 0x99a   :  { %v3562_v8 = vadd.f32 1.0, %v8494_v21 }
 0x99b   :  { %11831 = vst [vmem:[#allocation59_spill] sm:$0xff] %v10734_v0 }
 0x99c   :  { %8495 = vrcp.f32 %v3562_v8 }
 0x9a9   :  { %v8496_v35 = vpop.eup %8495 }
 0x9aa   :  { %v3537_v56 = vpop.f32.mrf.mxu1 }
 0x9ab   :  { %v3566_v17 = vadd.f32 %v3537_v56, %v3186_v18 }
 0x9ac   :  { %v3646_v15 = vpop.f32.mrf.mxu0  ;;  %v7591_v44 = vpop.f32.mrf.mxu1 }
 0x9ad   :  { %v5424_v57 = vmul.f32 -1.442695, %v3566_v17  ;;  %v3647_v21 = vadd.f32 %v10745_v3, %v3646_v15 }
 0x9ae   :  { %v7626_v12 = vpop.f32.mrf.mxu0 }
 0x9af   :  { %8497 = vpow2.f32 %v5424_v57  ;;  %v3650_v0 = vmul.f32 %v8496_v35, %v3647_v21  ;;  %v11832_v35 = vld [vmem:[#allocation51_spill] sm:$0xff] }
 0x9b1   :  { %v3651_v8 = vadd.f32 %v3650_v0, %v3322_v52  ;;  %v11836_v52 = vld [vmem:[#allocation41_spill] sm:$0xff]  ;;  %v11837_v0 = vld [vmem:[#allocation52_spill] sm:$0xff] }
 0x9b2   :  { %v3055_v15 = vadd.f32 %v11837_v0, %v10721_v62 }
 0x9bc   :  { %v8498_v9 = vpop.eup %8497 }
 0x9bd   :  { %v3570_v6 = vadd.f32 1.0, %v8498_v9  ;;  %v11833_v9 = vld [vmem:[#allocation40_spill] sm:$0xff] }
 0x9bf   :  { %8499 = vrcp.f32 %v3570_v6 }
 0x9c0   :  { %8501 = vtanh.f32 %v3651_v8 }
 0x9cc   :  { %v8500_v18 = vpop.eup %8499 }
 0x9cd   :  { %v3653_v56 = vsub.f32 1.0, %v8500_v18  ;;  %v8502_v17 = vpop.eup %8501  ;;  %v3655_v57 = vmul.f32 0.0, %v8500_v18 }
 0x9cf   :  { %v3654_v44 = vmul.f32 %v8502_v17, %v3653_v56 }
 0x9d1   :  { %v10748_v12 = vadd.f32 %v3655_v57, %v3654_v44  ;;  %v11838_v44 = vld [vmem:[#allocation33_spill] sm:$0xff] }
 0x9d2   :  { %v3191_v57 = vadd.f32 %v11838_v44, %v10739_v58 }
 0x9d3   :  { %7660 = vmatmul.mubr.f32.vlgmr.msra.gmra.mxu1 %v10748_v12  ;;  %7695 = vmatmul.mubr.f32.vlgmr.msra.gmra.mxu0 %v10748_v12 }
 0x9d4   :  { %7698 = vmatpush3.msra.mxu1 %v10478_v29  ;;  %7729 = vmatprep.mubr.msk.f32.mxu1 %vm8895_vm0, %v11765_v63 }
 0x9d5   :  { %7699 = vmatprep.subr.mxu1 %v11765_v63  ;;  %7733 = vmatpush3.msra.mxu0 %v10401_v4 }
 0x9d6   :  { %7700 = vmatpush3.msra.mxu1 %v10486_v51  ;;  %7734 = vmatprep.subr.mxu0 %v11765_v63 }
 0x9d7   :  { %7701 = vmatprep.subr.mxu1 %v11765_v63  ;;  %7735 = vmatpush3.msra.mxu0 %v10405_v11 }
 0x9d8   :  { %7702 = vmatpush3.msra.mxu1 %v10496_v16  ;;  %7736 = vmatprep.subr.mxu0 %v11765_v63 }
 0x9d9   :  { %7703 = vmatprep.subr.mxu1 %v11765_v63  ;;  %7737 = vmatpush3.msra.mxu0 %v10409_v19 }
 0x9da   :  { %7704 = vmatpush3.msra.mxu1 %v10504_v37  ;;  %7738 = vmatprep.subr.mxu0 %v11765_v63 }
 0x9db   :  { %7705 = vmatprep.subr.mxu1 %v11765_v63  ;;  %7739 = vmatpush3.msra.mxu0 %v10413_v25 }
 0x9dc   :  { %7706 = vmatpush3.msra.mxu1 %v10514_v36  ;;  %7740 = vmatprep.subr.mxu0 %v11765_v63 }
 0x9dd   :  { %7707 = vmatprep.subr.mxu1 %v11765_v63  ;;  %7741 = vmatpush3.msra.mxu0 %v10417_v27 }
 0x9de   :  { %7708 = vmatpush3.msra.mxu1 %v10522_v22  ;;  %7742 = vmatprep.subr.mxu0 %v11765_v63 }
 0x9df   :  { %7709 = vmatprep.subr.mxu1 %v11765_v63  ;;  %7743 = vmatpush3.msra.mxu0 %v10421_v23 }
 0x9e0   :  { %7710 = vmatpush3.msra.mxu1 %v10530_v40  ;;  %7744 = vmatprep.subr.mxu0 %v11765_v63 }
 0x9e1   :  { %7711 = vmatprep.subr.mxu1 %v11765_v63  ;;  %7745 = vmatpush3.msra.mxu0 %v10425_v2 }
 0x9e2   :  { %7712 = vmatpush3.msra.mxu1 %v10537_v30  ;;  %7746 = vmatprep.subr.mxu0 %v11765_v63 }
 0x9e3   :  { %7713 = vmatprep.subr.mxu1 %v11765_v63  ;;  %7747 = vmatpush3.msra.mxu0 %v10428_v31 }
 0x9e4   :  { %7714 = vmatpush3.msra.mxu1 %v10545_v47  ;;  %7748 = vmatprep.subr.mxu0 %v11765_v63 }
 0x9e5   :  { %7715 = vmatprep.subr.mxu1 %v11765_v63  ;;  %7749 = vmatpush3.msra.mxu0 %v10431_v10 }
 0x9e6   :  { %7716 = vmatpush3.msra.mxu1 %v10553_v49  ;;  %7750 = vmatprep.subr.mxu0 %v11765_v63 }
 0x9e7   :  { %7717 = vmatprep.subr.mxu1 %v11765_v63  ;;  %7751 = vmatpush3.msra.mxu0 %v10435_v24 }
 0x9e8   :  { %7718 = vmatpush3.msra.mxu1 %v10561_v5  ;;  %7752 = vmatprep.subr.mxu0 %v11765_v63 }
 0x9e9   :  { %7719 = vmatprep.subr.mxu1 %v11765_v63  ;;  %7753 = vmatpush3.msra.mxu0 %v10439_v28 }
 0x9ea   :  { %7720 = vmatpush3.msra.mxu1 %v10569_v7  ;;  %7754 = vmatprep.subr.mxu0 %v11765_v63 }
 0x9eb   :  { %7721 = vmatprep.subr.mxu1 %v11765_v63  ;;  %7755 = vmatpush3.msra.mxu0 %v10443_v32 }
 0x9ec   :  { %7722 = vmatpush3.msra.mxu1 %v10577_v38  ;;  %7756 = vmatprep.subr.mxu0 %v11765_v63 }
 0x9ed   :  { %7723 = vmatprep.subr.mxu1 %v11765_v63  ;;  %7757 = vmatpush3.msra.mxu0 %v10447_v55 }
 0x9ee   :  { %7724 = vmatpush3.msra.mxu1 %v10585_v14  ;;  %7758 = vmatprep.subr.mxu0 %v11765_v63 }
 0x9ef   :  { %7725 = vmatprep.subr.mxu1 %v11765_v63  ;;  %7759 = vmatpush3.msra.mxu0 %v10451_v61 }
 0x9f0   :  { %7726 = vmatpush3.msra.mxu1 %v10593_v20  ;;  %7760 = vmatprep.subr.mxu0 %v11765_v63 }
 0x9f1   :  { %7727 = vmatprep.subr.mxu1 %v11765_v63  ;;  %7761 = vmatpush3.msra.mxu0 %v10456_v53 }
 0x9f2   :  { %7728 = vmatpush3.msra.mxu1 %v10603_v50  ;;  %7762 = vmatprep.subr.mxu0 %v11765_v63 }
 0x9f3   :  { %7730 = vmatmul.mubr.f32.vlgmr.msra.gmra.mxu1 %v10748_v12  ;;  %7767 = vmatprep.subr.mxu1 %v11765_v63 }
 0x9f4   :  { %7768 = vmatpush3.msra.mxu1 %v10476_v1  ;;  %7763 = vmatpush3.msra.mxu0 %v10459_v60 }
 0x9f5   :  { %7769 = vmatprep.subr.mxu1 %v11765_v63  ;;  %7764 = vmatprep.mubr.msk.f32.mxu0 %vm8895_vm0, %v11765_v63 }
 0x9f6   :  { %7770 = vmatpush3.msra.mxu1 %v10482_v54  ;;  %7799 = vmatprep.mubr.msk.f32.mxu1 %vm8895_vm0, %v11765_v63 }
 0x9f7   :  { %7771 = vmatprep.subr.mxu1 %v11765_v63  ;;  %7802 = vmatprep.subr.mxu0 %v11765_v63 }
 0x9f8   :  { %7772 = vmatpush3.msra.mxu1 %v10492_v43 }
 0x9f9   :  { %7773 = vmatprep.subr.mxu1 %v11765_v63 }
 0x9fa   :  { %7774 = vmatpush3.msra.mxu1 %v10500_v48 }
 0x9fb   :  { %7775 = vmatprep.subr.mxu1 %v11765_v63 }
 0x9fc   :  { %7776 = vmatpush3.msra.mxu1 %v10510_v33 }
 0x9fd   :  { %7777 = vmatprep.subr.mxu1 %v11765_v63 }
 0x9fe   :  { %7778 = vmatpush3.msra.mxu1 %v10518_v42 }
 0x9ff   :  { %7779 = vmatprep.subr.mxu1 %v11765_v63 }
 0xa00   :  { %7780 = vmatpush3.msra.mxu1 %v10528_v26 }
 0xa01   :  { %7781 = vmatprep.subr.mxu1 %v11765_v63 }
 0xa02   :  { %7782 = vmatpush3.msra.mxu1 %v10535_v34 }
 0xa03   :  { %7783 = vmatprep.subr.mxu1 %v11765_v63 }
 0xa04   :  { %7784 = vmatpush3.msra.mxu1 %v10543_v39 }
 0xa05   :  { %7785 = vmatprep.subr.mxu1 %v11765_v63 }
 0xa06   :  { %7786 = vmatpush3.msra.mxu1 %v10551_v41 }
 0xa07   :  { %7787 = vmatprep.subr.mxu1 %v11765_v63 }
 0xa08   :  { %7788 = vmatpush3.msra.mxu1 %v10559_v59 }
 0xa09   :  { %7789 = vmatprep.subr.mxu1 %v11765_v63 }
 0xa0a   :  { %7790 = vmatpush3.msra.mxu1 %v11832_v35 }
 0xa0b   :  { %7791 = vmatprep.subr.mxu1 %v11765_v63 }
 0xa0c   :  { %7792 = vmatpush3.msra.mxu1 %v11833_v9 }
 0xa0d   :  { %7793 = vmatprep.subr.mxu1 %v11765_v63 }
 0xa0e   :  { %7794 = vmatpush3.msra.mxu1 %v11834_v13 }
 0xa0f   :  { %7795 = vmatprep.subr.mxu1 %v11765_v63 }
 0xa10   :  { %7796 = vmatpush3.msra.mxu1 %v11835_v46 }
 0xa11   :  { %7797 = vmatprep.subr.mxu1 %v11765_v63 }
 0xa12   :  { %7798 = vmatpush3.msra.mxu1 %v11836_v52 }
 0xa13   :  { %7837 = vmatprep.subr.mxu1 %v11765_v63 }
 0xa93   :  { %v3723_v21 = vpop.f32.mrf.mxu1  ;;  %v3793_v6 = vpop.f32.mrf.mxu0 }
 0xa94   :  { %v3798_v8 = vadd.f32 %v3723_v21, %v3055_v15  ;;  %v3806_v45 = vadd.f32 %v3793_v6, %v3191_v57 }
 0xa95   :  { %v7661_v18 = vpop.f32.mrf.mxu1  ;;  %v7696_v56 = vpop.f32.mrf.mxu0 }
 0xa96   :  { %v5426_v17 = vmul.f32 -1.442695, %v3798_v8  ;;  %v5427_v46 = vmul.f32 -1.442695, %v3806_v45  ;;  %v11839_v8 = vld [vmem:[#allocation56_spill] sm:$0xff] }
 0xa98   :  { %8503 = vpow2.f32 %v5426_v17 }
 0xa99   :  { %8505 = vpow2.f32 %v5427_v46 }
 0xaa5   :  { %v8504_v13 = vpop.eup %8503 }
 0xaa6   :  { %v3802_v52 = vadd.f32 1.0, %v8504_v13  ;;  %v8506_v9 = vpop.eup %8505 }
 0xaa7   :  { %v3810_v35 = vadd.f32 1.0, %v8506_v9 }
 0xaa8   :  { %8507 = vrcp.f32 %v3802_v52 }
 0xaa9   :  { %8509 = vrcp.f32 %v3810_v35 }
 0xab3   :  { %v3880_v59 = vpop.f32.mrf.mxu1 }
 0xab4   :  { %v3881_v0 = vadd.f32 %v10745_v3, %v3880_v59 }
 0xab5   :  { %v8508_v62 = vpop.eup %8507  ;;  %v7731_v15 = vpop.f32.mrf.mxu1 }
 0xab6   :  { %v3884_v21 = vmul.f32 %v8508_v62, %v3881_v0  ;;  %v8510_v56 = vpop.eup %8509 }
 0xab7   :  { %v3887_v17 = vsub.f32 1.0, %v8510_v56  ;;  %v3889_v46 = vmul.f32 %v8510_v56, %v10748_v12  ;;  %v11849_v12 = vld [vmem:[#allocation47_spill] sm:$0xff]  ;;  %v11095_v56 = vld [vmem:[#allocation22 + $0x60] sm:$0xff] }
 0xab8   :  { %v3885_v18 = vadd.f32 %v3884_v21, %v11839_v8  ;;  %v10984_v21 = vld [vmem:[#allocation20 + $0x78] sm:$0xff]  ;;  %v10990_v8 = vld [vmem:[#allocation20 + $0x70] sm:$0xff] }
 0xaba   :  { %8511 = vtanh.f32 %v3885_v18  ;;  %v11091_v18 = vld [vmem:[#allocation22 + $0x68] sm:$0xff] }
 0xac7   :  { %v8512_v6 = vpop.eup %8511 }
 0xac8   :  { %v3888_v45 = vmul.f32 %v8512_v6, %v3887_v17  ;;  %v11099_v17 = vld [vmem:[#allocation22 + $0x58] sm:$0xff]  ;;  %v11103_v6 = vld [vmem:[#allocation22 + $0x50] sm:$0xff] }
 0xaca   :  { %v10862_v13 = vadd.f32 %v3889_v46, %v3888_v45  ;;  %v11107_v45 = vld [vmem:[#allocation22 + $0x48] sm:$0xff]  ;;  %v11111_v46 = vld [vmem:[#allocation22 + $0x40] sm:$0xff] }
 0xacc   :  { %7765 = vmatmul.mubr.f32.vlgmr.msra.gmra.mxu0 %v10862_v13  ;;  %7800 = vmatmul.mubr.f32.vlgmr.msra.gmra.mxu1 %v10862_v13 }
 0xacd   :  { %7803 = vmatpush3.msra.mxu0 %v10478_v29  ;;  %7834 = vmatprep.mubr.msk.f32.mxu0 %vm8895_vm0, %v11765_v63 }
 0xace   :  { %7804 = vmatprep.subr.mxu0 %v11765_v63  ;;  %7838 = vmatpush3.msra.mxu1 %v10401_v4  ;;  %v11840_v4 = vld [vmem:[#allocation38_spill] sm:$0xff] }
 0xacf   :  { %7805 = vmatpush3.msra.mxu0 %v10486_v51  ;;  %7839 = vmatprep.subr.mxu1 %v11765_v63 }
 0xad0   :  { %7806 = vmatprep.subr.mxu0 %v11765_v63  ;;  %7840 = vmatpush3.msra.mxu1 %v10405_v11  ;;  %v11841_v11 = vld [vmem:[#allocation51_spill] sm:$0xff] }
 0xad1   :  { %7807 = vmatpush3.msra.mxu0 %v10496_v16  ;;  %7841 = vmatprep.subr.mxu1 %v11765_v63 }
 0xad2   :  { %7808 = vmatprep.subr.mxu0 %v11765_v63  ;;  %7842 = vmatpush3.msra.mxu1 %v10409_v19  ;;  %v11842_v19 = vld [vmem:[#allocation40_spill] sm:$0xff] }
 0xad3   :  { %7809 = vmatpush3.msra.mxu0 %v10504_v37  ;;  %7843 = vmatprep.subr.mxu1 %v11765_v63 }
 0xad4   :  { %7810 = vmatprep.subr.mxu0 %v11765_v63  ;;  %7844 = vmatpush3.msra.mxu1 %v10413_v25  ;;  %v11843_v25 = vld [vmem:[#allocation42_spill] sm:$0xff] }
 0xad5   :  { %7811 = vmatpush3.msra.mxu0 %v10514_v36  ;;  %7845 = vmatprep.subr.mxu1 %v11765_v63 }
 0xad6   :  { %7812 = vmatprep.subr.mxu0 %v11765_v63  ;;  %7846 = vmatpush3.msra.mxu1 %v10417_v27  ;;  %v11844_v27 = vld [vmem:[#allocation39_spill] sm:$0xff] }
 0xad7   :  { %7813 = vmatpush3.msra.mxu0 %v10522_v22  ;;  %7847 = vmatprep.subr.mxu1 %v11765_v63 }
 0xad8   :  { %7814 = vmatprep.subr.mxu0 %v11765_v63  ;;  %7848 = vmatpush3.msra.mxu1 %v10421_v23  ;;  %v11845_v23 = vld [vmem:[#allocation41_spill] sm:$0xff] }
 0xad9   :  { %7815 = vmatpush3.msra.mxu0 %v10530_v40  ;;  %7849 = vmatprep.subr.mxu1 %v11765_v63 }
 0xada   :  { %7816 = vmatprep.subr.mxu0 %v11765_v63  ;;  %7850 = vmatpush3.msra.mxu1 %v10425_v2  ;;  %v11846_v2 = vld [vmem:[#allocation36_spill] sm:$0xff] }
 0xadb   :  { %7817 = vmatpush3.msra.mxu0 %v10537_v30  ;;  %7851 = vmatprep.subr.mxu1 %v11765_v63 }
 0xadc   :  { %7818 = vmatprep.subr.mxu0 %v11765_v63  ;;  %7852 = vmatpush3.msra.mxu1 %v10428_v31  ;;  %v11847_v31 = vld [vmem:[#allocation57_spill] sm:$0xff] }
 0xadd   :  { %7819 = vmatpush3.msra.mxu0 %v10545_v47  ;;  %7853 = vmatprep.subr.mxu1 %v11765_v63 }
 0xade   :  { %7820 = vmatprep.subr.mxu0 %v11765_v63  ;;  %7854 = vmatpush3.msra.mxu1 %v10431_v10  ;;  %v3060_v10 = vadd.f32 %v11847_v31, %v11846_v2  ;;  %v11143_v2 = vld [vmem:[#allocation22] sm:$0xff] }
 0xadf   :  { %7821 = vmatpush3.msra.mxu0 %v10553_v49  ;;  %7855 = vmatprep.subr.mxu1 %v11765_v63  ;;  %11855 = vst [vmem:[#allocation40_spill] sm:$0xff] %v11143_v2 }
 0xae0   :  { %7822 = vmatprep.subr.mxu0 %v11765_v63  ;;  %7856 = vmatpush3.msra.mxu1 %v10435_v24 }
 0xae1   :  { %7823 = vmatpush3.msra.mxu0 %v10561_v5  ;;  %7857 = vmatprep.subr.mxu1 %v11765_v63 }
 0xae2   :  { %7824 = vmatprep.subr.mxu0 %v11765_v63  ;;  %7858 = vmatpush3.msra.mxu1 %v10439_v28 }
 0xae3   :  { %7825 = vmatpush3.msra.mxu0 %v10569_v7  ;;  %7859 = vmatprep.subr.mxu1 %v11765_v63 }
 0xae4   :  { %7826 = vmatprep.subr.mxu0 %v11765_v63  ;;  %7860 = vmatpush3.msra.mxu1 %v10443_v32 }
 0xae5   :  { %7827 = vmatpush3.msra.mxu0 %v10577_v38  ;;  %7861 = vmatprep.subr.mxu1 %v11765_v63 }
 0xae6   :  { %7828 = vmatprep.subr.mxu0 %v11765_v63  ;;  %7862 = vmatpush3.msra.mxu1 %v10447_v55 }
 0xae7   :  { %7829 = vmatpush3.msra.mxu0 %v10585_v14  ;;  %7863 = vmatprep.subr.mxu1 %v11765_v63 }
 0xae8   :  { %7830 = vmatprep.subr.mxu0 %v11765_v63  ;;  %7864 = vmatpush3.msra.mxu1 %v10451_v61 }
 0xae9   :  { %7831 = vmatpush3.msra.mxu0 %v10593_v20  ;;  %7865 = vmatprep.subr.mxu1 %v11765_v63 }
 0xaea   :  { %7832 = vmatprep.subr.mxu0 %v11765_v63  ;;  %7866 = vmatpush3.msra.mxu1 %v10456_v53 }
 0xaeb   :  { %7833 = vmatpush3.msra.mxu0 %v10603_v50  ;;  %7867 = vmatprep.subr.mxu1 %v11765_v63 }
 0xaec   :  { %7835 = vmatmul.mubr.f32.vlgmr.msra.gmra.mxu0 %v10862_v13  ;;  %7872 = vmatprep.subr.mxu0 %v11765_v63 }
 0xaed   :  { %7873 = vmatpush3.msra.mxu0 %v10476_v1  ;;  %7868 = vmatpush3.msra.mxu1 %v10459_v60  ;;  %v11848_v60 = vld [vmem:[#allocation37_spill] sm:$0xff] }
 0xaee   :  { %7874 = vmatprep.subr.mxu0 %v11765_v63  ;;  %7869 = vmatprep.mubr.msk.f32.mxu1 %vm8895_vm0, %v11765_v63  ;;  %v3196_v1 = vadd.f32 %v10739_v58, %v11848_v60 }
 0xaef   :  { %7875 = vmatpush3.msra.mxu0 %v10482_v54  ;;  %7904 = vmatprep.mubr.msk.f32.mxu0 %vm8895_vm0, %v11765_v63 }
 0xaf0   :  { %7876 = vmatprep.subr.mxu0 %v11765_v63  ;;  %7907 = vmatprep.subr.mxu1 %v11765_v63 }
 0xaf1   :  { %7877 = vmatpush3.msra.mxu0 %v10492_v43 }
 0xaf2   :  { %7878 = vmatprep.subr.mxu0 %v11765_v63 }
 0xaf3   :  { %7879 = vmatpush3.msra.mxu0 %v10500_v48 }
 0xaf4   :  { %7880 = vmatprep.subr.mxu0 %v11765_v63 }
 0xaf5   :  { %7881 = vmatpush3.msra.mxu0 %v10510_v33 }
 0xaf6   :  { %7882 = vmatprep.subr.mxu0 %v11765_v63 }
 0xaf7   :  { %7883 = vmatpush3.msra.mxu0 %v10518_v42 }
 0xaf8   :  { %7884 = vmatprep.subr.mxu0 %v11765_v63 }
 0xaf9   :  { %7885 = vmatpush3.msra.mxu0 %v10528_v26 }
 0xafa   :  { %7886 = vmatprep.subr.mxu0 %v11765_v63 }
 0xafb   :  { %7887 = vmatpush3.msra.mxu0 %v10535_v34 }
 0xafc   :  { %7888 = vmatprep.subr.mxu0 %v11765_v63 }
 0xafd   :  { %7889 = vmatpush3.msra.mxu0 %v10543_v39 }
 0xafe   :  { %7890 = vmatprep.subr.mxu0 %v11765_v63 }
 0xaff   :  { %7891 = vmatpush3.msra.mxu0 %v10551_v41 }
 0xb00   :  { %7892 = vmatprep.subr.mxu0 %v11765_v63 }
 0xb01   :  { %7893 = vmatpush3.msra.mxu0 %v11840_v4  ;;  %v11119_v4 = vld [vmem:[#allocation22 + $0x30] sm:$0xff] }
 0xb02   :  { %7894 = vmatprep.subr.mxu0 %v11765_v63 }
 0xb03   :  { %7895 = vmatpush3.msra.mxu0 %v11841_v11  ;;  %v11123_v11 = vld [vmem:[#allocation22 + $0x28] sm:$0xff] }
 0xb04   :  { %7896 = vmatprep.subr.mxu0 %v11765_v63  ;;  %11850 = vst [vmem:[#allocation52_spill] sm:$0xff] %v11123_v11 }
 0xb05   :  { %7897 = vmatpush3.msra.mxu0 %v11842_v19  ;;  %v11127_v19 = vld [vmem:[#allocation22 + $0x20] sm:$0xff] }
 0xb06   :  { %7898 = vmatprep.subr.mxu0 %v11765_v63  ;;  %11851 = vst [vmem:[#allocation33_spill] sm:$0xff] %v11127_v19 }
 0xb07   :  { %7899 = vmatpush3.msra.mxu0 %v11843_v25  ;;  %v11131_v25 = vld [vmem:[#allocation22 + $0x18] sm:$0xff] }
 0xb08   :  { %7900 = vmatprep.subr.mxu0 %v11765_v63  ;;  %11852 = vst [vmem:[#allocation56_spill] sm:$0xff] %v11131_v25 }
 0xb09   :  { %7901 = vmatpush3.msra.mxu0 %v11844_v27  ;;  %v11135_v27 = vld [vmem:[#allocation22 + $0x10] sm:$0xff] }
 0xb0a   :  { %7902 = vmatprep.subr.mxu0 %v11765_v63  ;;  %11853 = vst [vmem:[#allocation38_spill] sm:$0xff] %v11135_v27 }
 0xb0b   :  { %7903 = vmatpush3.msra.mxu0 %v11845_v23  ;;  %v11139_v23 = vld [vmem:[#allocation22 + $0x8] sm:$0xff] }
 0xb0c   :  { %7942 = vmatprep.subr.mxu0 %v11765_v63  ;;  %11854 = vst [vmem:[#allocation51_spill] sm:$0xff] %v11139_v23 }
 0xb8c   :  { %v3957_v24 = vpop.f32.mrf.mxu0  ;;  %v4027_v28 = vpop.f32.mrf.mxu1 }
 0xb8d   :  { %v4032_v32 = vadd.f32 %v3957_v24, %v3060_v10  ;;  %v4040_v54 = vadd.f32 %v4027_v28, %v3196_v1  ;;  %v11856_v10 = vld [vmem:[#allocation34_spill] sm:$0xff]  ;;  %v11857_v1 = vld [vmem:[#allocation35_spill] sm:$0xff] }
 0xb8e   :  { %v7766_v55 = vpop.f32.mrf.mxu0  ;;  %v7801_v61 = vpop.f32.mrf.mxu1  ;;  %v3065_v24 = vadd.f32 %v11856_v10, %v11847_v31  ;;  %v11165_v10 = vld [vmem:[#allocation23 + $0x70] sm:$0xff] }
 0xb8f   :  { %v5428_v53 = vmul.f32 -1.442695, %v4032_v32  ;;  %v5429_v43 = vmul.f32 -1.442695, %v4040_v54  ;;  %v3201_v54 = vadd.f32 %v11857_v1, %v10739_v58  ;;  %v11219_v1 = vld [vmem:[#allocation23 + $0x28] sm:$0xff] }
 0xb91   :  { %8513 = vpow2.f32 %v5428_v53 }
 0xb92   :  { %8515 = vpow2.f32 %v5429_v43 }
 0xb9e   :  { %v8514_v48 = vpop.eup %8513 }
 0xb9f   :  { %v4036_v33 = vadd.f32 1.0, %v8514_v48  ;;  %v8516_v42 = vpop.eup %8515 }
 0xba0   :  { %v4044_v26 = vadd.f32 1.0, %v8516_v42 }
 0xba1   :  { %8517 = vrcp.f32 %v4036_v33 }
 0xba2   :  { %8519 = vrcp.f32 %v4044_v26 }
 0xbac   :  { %v4114_v34 = vpop.f32.mrf.mxu0 }
 0xbad   :  { %v4115_v39 = vadd.f32 %v10745_v3, %v4114_v34 }
 0xbae   :  { %v8518_v41 = vpop.eup %8517  ;;  %v7836_v59 = vpop.f32.mrf.mxu0 }
 0xbaf   :  { %v4118_v62 = vmul.f32 %v8518_v41, %v4115_v39  ;;  %v8520_v9 = vpop.eup %8519 }
 0xbb0   :  { %v4121_v52 = vsub.f32 1.0, %v8520_v9  ;;  %v4123_v0 = vmul.f32 %v8520_v9, %v10862_v13  ;;  %v11115_v13 = vld [vmem:[#allocation22 + $0x38] sm:$0xff] }
 0xbb1   :  { %v4119_v35 = vadd.f32 %v4118_v62, %v11849_v12  ;;  %v11858_v12 = vld [vmem:[#allocation32_spill] sm:$0xff] }
 0xbb3   :  { %8521 = vtanh.f32 %v4119_v35 }
 0xbc0   :  { %v8522_v44 = vpop.eup %8521 }
 0xbc1   :  { %v4122_v57 = vmul.f32 %v8522_v44, %v4121_v52 }
 0xbc3   :  { %v10976_v15 = vadd.f32 %v4123_v0, %v4122_v57 }
 0xbc5   :  { %7870 = vmatmul.mubr.f32.vlgmr.msra.gmra.mxu1 %v10976_v15  ;;  %7905 = vmatmul.mubr.f32.vlgmr.msra.gmra.mxu0 %v10976_v15 }
 0xbc6   :  { %7908 = vmatpush3.msra.mxu1 %v10478_v29  ;;  %7939 = vmatprep.mubr.msk.f32.mxu1 %vm8895_vm0, %v11765_v63  ;;  %v10996_v29 = vld [vmem:[#allocation20 + $0x68] sm:$0xff] }
 0xbc7   :  { %7909 = vmatprep.subr.mxu1 %v11765_v63  ;;  %7943 = vmatpush3.msra.mxu0 %v10984_v21 }
 0xbc8   :  { %7910 = vmatpush3.msra.mxu1 %v10486_v51  ;;  %7944 = vmatprep.subr.mxu0 %v11765_v63  ;;  %v11002_v51 = vld [vmem:[#allocation20 + $0x60] sm:$0xff] }
 0xbc9   :  { %7911 = vmatprep.subr.mxu1 %v11765_v63  ;;  %7945 = vmatpush3.msra.mxu0 %v10990_v8 }
 0xbca   :  { %7912 = vmatpush3.msra.mxu1 %v10496_v16  ;;  %7946 = vmatprep.subr.mxu0 %v11765_v63  ;;  %v11008_v16 = vld [vmem:[#allocation20 + $0x58] sm:$0xff] }
 0xbcb   :  { %7913 = vmatprep.subr.mxu1 %v11765_v63  ;;  %7947 = vmatpush3.msra.mxu0 %v10996_v29 }
 0xbcc   :  { %7914 = vmatpush3.msra.mxu1 %v10504_v37  ;;  %7948 = vmatprep.subr.mxu0 %v11765_v63  ;;  %v11014_v37 = vld [vmem:[#allocation20 + $0x50] sm:$0xff] }
 0xbcd   :  { %7915 = vmatprep.subr.mxu1 %v11765_v63  ;;  %7949 = vmatpush3.msra.mxu0 %v11002_v51 }
 0xbce   :  { %7916 = vmatpush3.msra.mxu1 %v10514_v36  ;;  %7950 = vmatprep.subr.mxu0 %v11765_v63  ;;  %v11020_v36 = vld [vmem:[#allocation20 + $0x48] sm:$0xff] }
 0xbcf   :  { %7917 = vmatprep.subr.mxu1 %v11765_v63  ;;  %7951 = vmatpush3.msra.mxu0 %v11008_v16 }
 0xbd0   :  { %7918 = vmatpush3.msra.mxu1 %v10522_v22  ;;  %7952 = vmatprep.subr.mxu0 %v11765_v63  ;;  %v11026_v22 = vld [vmem:[#allocation20 + $0x40] sm:$0xff] }
 0xbd1   :  { %7919 = vmatprep.subr.mxu1 %v11765_v63  ;;  %7953 = vmatpush3.msra.mxu0 %v11014_v37 }
 0xbd2   :  { %7920 = vmatpush3.msra.mxu1 %v10530_v40  ;;  %7954 = vmatprep.subr.mxu0 %v11765_v63  ;;  %v11032_v40 = vld [vmem:[#allocation20 + $0x38] sm:$0xff] }
 0xbd3   :  { %7921 = vmatprep.subr.mxu1 %v11765_v63  ;;  %7955 = vmatpush3.msra.mxu0 %v11020_v36 }
 0xbd4   :  { %7922 = vmatpush3.msra.mxu1 %v10537_v30  ;;  %7956 = vmatprep.subr.mxu0 %v11765_v63  ;;  %v11038_v30 = vld [vmem:[#allocation20 + $0x30] sm:$0xff] }
 0xbd5   :  { %7923 = vmatprep.subr.mxu1 %v11765_v63  ;;  %7957 = vmatpush3.msra.mxu0 %v11026_v22 }
 0xbd6   :  { %7924 = vmatpush3.msra.mxu1 %v10545_v47  ;;  %7958 = vmatprep.subr.mxu0 %v11765_v63  ;;  %v11044_v47 = vld [vmem:[#allocation20 + $0x28] sm:$0xff] }
 0xbd7   :  { %7925 = vmatprep.subr.mxu1 %v11765_v63  ;;  %7959 = vmatpush3.msra.mxu0 %v11032_v40 }
 0xbd8   :  { %7926 = vmatpush3.msra.mxu1 %v10553_v49  ;;  %7960 = vmatprep.subr.mxu0 %v11765_v63  ;;  %v11050_v49 = vld [vmem:[#allocation20 + $0x20] sm:$0xff] }
 0xbd9   :  { %7927 = vmatprep.subr.mxu1 %v11765_v63  ;;  %7961 = vmatpush3.msra.mxu0 %v11038_v30 }
 0xbda   :  { %7928 = vmatpush3.msra.mxu1 %v10561_v5  ;;  %7962 = vmatprep.subr.mxu0 %v11765_v63  ;;  %v11056_v5 = vld [vmem:[#allocation20 + $0x18] sm:$0xff] }
 0xbdb   :  { %7929 = vmatprep.subr.mxu1 %v11765_v63  ;;  %7963 = vmatpush3.msra.mxu0 %v11044_v47 }
 0xbdc   :  { %7930 = vmatpush3.msra.mxu1 %v10569_v7  ;;  %7964 = vmatprep.subr.mxu0 %v11765_v63  ;;  %v11062_v7 = vld [vmem:[#allocation20 + $0x10] sm:$0xff] }
 0xbdd   :  { %7931 = vmatprep.subr.mxu1 %v11765_v63  ;;  %7965 = vmatpush3.msra.mxu0 %v11050_v49 }
 0xbde   :  { %7932 = vmatpush3.msra.mxu1 %v10577_v38  ;;  %7966 = vmatprep.subr.mxu0 %v11765_v63  ;;  %v11068_v38 = vld [vmem:[#allocation20 + $0x8] sm:$0xff] }
 0xbdf   :  { %7933 = vmatprep.subr.mxu1 %v11765_v63  ;;  %7967 = vmatpush3.msra.mxu0 %v11056_v5 }
 0xbe0   :  { %7934 = vmatpush3.msra.mxu1 %v10585_v14  ;;  %7968 = vmatprep.subr.mxu0 %v11765_v63  ;;  %v11075_v14 = vld [vmem:[#allocation22 + $0x78] sm:$0xff] }
 0xbe1   :  { %7935 = vmatprep.subr.mxu1 %v11765_v63  ;;  %7969 = vmatpush3.msra.mxu0 %v11062_v7 }
 0xbe2   :  { %7936 = vmatpush3.msra.mxu1 %v10593_v20  ;;  %7970 = vmatprep.subr.mxu0 %v11765_v63  ;;  %v11078_v20 = vld [vmem:[#allocation20] sm:$0xff] }
 0xbe3   :  { %7937 = vmatprep.subr.mxu1 %v11765_v63  ;;  %7971 = vmatpush3.msra.mxu0 %v11068_v38 }
 0xbe4   :  { %7938 = vmatpush3.msra.mxu1 %v10603_v50  ;;  %7972 = vmatprep.subr.mxu0 %v11765_v63  ;;  %v11084_v50 = vld [vmem:[#allocation22 + $0x70] sm:$0xff] }
 0xbe5   :  { %7940 = vmatmul.mubr.f32.vlgmr.msra.gmra.mxu1 %v10976_v15  ;;  %7977 = vmatprep.subr.mxu1 %v11765_v63 }
 0xbe6   :  { %7978 = vmatpush3.msra.mxu1 %v11075_v14  ;;  %7973 = vmatpush3.msra.mxu0 %v11078_v20 }
 0xbe7   :  { %7979 = vmatprep.subr.mxu1 %v11765_v63  ;;  %7974 = vmatprep.mubr.msk.f32.mxu0 %vm8895_vm0, %v11765_v63 }
 0xbe8   :  { %7980 = vmatpush3.msra.mxu1 %v11084_v50  ;;  %8009 = vmatprep.mubr.msk.f32.mxu1 %vm8895_vm0, %v11765_v63 }
 0xbe9   :  { %7981 = vmatprep.subr.mxu1 %v11765_v63  ;;  %8012 = vmatprep.subr.mxu0 %v11765_v63 }
 0xbea   :  { %7982 = vmatpush3.msra.mxu1 %v11091_v18 }
 0xbeb   :  { %7983 = vmatprep.subr.mxu1 %v11765_v63 }
 0xbec   :  { %7984 = vmatpush3.msra.mxu1 %v11095_v56 }
 0xbed   :  { %7985 = vmatprep.subr.mxu1 %v11765_v63 }
 0xbee   :  { %7986 = vmatpush3.msra.mxu1 %v11099_v17 }
 0xbef   :  { %7987 = vmatprep.subr.mxu1 %v11765_v63 }
 0xbf0   :  { %7988 = vmatpush3.msra.mxu1 %v11103_v6 }
 0xbf1   :  { %7989 = vmatprep.subr.mxu1 %v11765_v63 }
 0xbf2   :  { %7990 = vmatpush3.msra.mxu1 %v11107_v45 }
 0xbf3   :  { %7991 = vmatprep.subr.mxu1 %v11765_v63 }
 0xbf4   :  { %7992 = vmatpush3.msra.mxu1 %v11111_v46 }
 0xbf5   :  { %7993 = vmatprep.subr.mxu1 %v11765_v63 }
 0xbf6   :  { %7994 = vmatpush3.msra.mxu1 %v11115_v13 }
 0xbf7   :  { %7995 = vmatprep.subr.mxu1 %v11765_v63 }
 0xbf8   :  { %7996 = vmatpush3.msra.mxu1 %v11119_v4 }
 0xbf9   :  { %7997 = vmatprep.subr.mxu1 %v11765_v63 }
 0xbfa   :  { %7998 = vmatpush3.msra.mxu1 %v11123_v11 }
 0xbfb   :  { %7999 = vmatprep.subr.mxu1 %v11765_v63 }
 0xbfc   :  { %8000 = vmatpush3.msra.mxu1 %v11127_v19 }
 0xbfd   :  { %8001 = vmatprep.subr.mxu1 %v11765_v63 }
 0xbfe   :  { %8002 = vmatpush3.msra.mxu1 %v11131_v25 }
 0xbff   :  { %8003 = vmatprep.subr.mxu1 %v11765_v63 }
 0xc00   :  { %8004 = vmatpush3.msra.mxu1 %v11135_v27 }
 0xc01   :  { %8005 = vmatprep.subr.mxu1 %v11765_v63 }
 0xc02   :  { %8006 = vmatpush3.msra.mxu1 %v11139_v23 }
 0xc03   :  { %8007 = vmatprep.subr.mxu1 %v11765_v63 }
 0xc04   :  { %8008 = vmatpush3.msra.mxu1 %v11143_v2 }
 0xc05   :  { %8047 = vmatprep.subr.mxu1 %v11765_v63 }
 0xc85   :  { %v4191_v28 = vpop.f32.mrf.mxu1  ;;  %v4261_v32 = vpop.f32.mrf.mxu0 }
 0xc86   :  { %v4266_v55 = vadd.f32 %v4191_v28, %v3065_v24  ;;  %v4274_v43 = vadd.f32 %v4261_v32, %v3201_v54  ;;  %v11177_v24 = vld [vmem:[#allocation23 + $0x60] sm:$0xff]  ;;  %v11183_v28 = vld [vmem:[#allocation23 + $0x58] sm:$0xff]  ;;  %v11189_v32 = vld [vmem:[#allocation23 + $0x50] sm:$0xff] }
 0xc87   :  { %v7871_v61 = vpop.f32.mrf.mxu1  ;;  %v7906_v53 = vpop.f32.mrf.mxu0  ;;  %v11225_v54 = vld [vmem:[#allocation23 + $0x20] sm:$0xff] }
 0xc88   :  { %v5430_v60 = vmul.f32 -1.442695, %v4266_v55  ;;  %v5431_v48 = vmul.f32 -1.442695, %v4274_v43  ;;  %v11195_v55 = vld [vmem:[#allocation23 + $0x48] sm:$0xff]  ;;  %v11201_v61 = vld [vmem:[#allocation23 + $0x40] sm:$0xff] }
 0xc89   :  { %v11207_v53 = vld [vmem:[#allocation23 + $0x38] sm:$0xff] }
 0xc8a   :  { %8523 = vpow2.f32 %v5430_v60  ;;  %v11213_v60 = vld [vmem:[#allocation23 + $0x30] sm:$0xff]  ;;  %v11231_v43 = vld [vmem:[#allocation23 + $0x18] sm:$0xff] }
 0xc8b   :  { %8525 = vpow2.f32 %v5431_v48  ;;  %v11237_v48 = vld [vmem:[#allocation23 + $0x10] sm:$0xff] }
 0xc97   :  { %v8524_v33 = vpop.eup %8523 }
 0xc98   :  { %v4270_v42 = vadd.f32 1.0, %v8524_v33  ;;  %v8526_v26 = vpop.eup %8525  ;;  %v11243_v33 = vld [vmem:[#allocation23 + $0x8] sm:$0xff] }
 0xc99   :  { %v4278_v34 = vadd.f32 1.0, %v8526_v26  ;;  %v11296_v26 = vld [vmem:[%s11676_s17] ss:$0 sm:$0xff] }
 0xc9a   :  { %8527 = vrcp.f32 %v4270_v42  ;;  %v11249_v42 = vld [vmem:[#allocation23] sm:$0xff]  ;;  %11859 = vst [vmem:[#allocation42_spill] sm:$0xff] %v11296_v26 }
 0xc9b   :  { %8529 = vrcp.f32 %v4278_v34  ;;  %v11860_v34 = vld [vmem:[#allocation54_spill] sm:$0xff] }
 0xca5   :  { %v4348_v39 = vpop.f32.mrf.mxu1 }
 0xca6   :  { %v4349_v31 = vadd.f32 %v10745_v3, %v4348_v39  ;;  %v11158_v3 = vld [vmem:[#allocation23 + $0x78] sm:$0xff]  ;;  %v3070_v39 = vadd.f32 %v11296_v26, %v11860_v34 }
 0xca7   :  { %v8528_v41 = vpop.eup %8527  ;;  %v7941_v59 = vpop.f32.mrf.mxu1 }
 0xca8   :  { %v4352_v62 = vmul.f32 %v8528_v41, %v4349_v31  ;;  %v8530_v58 = vpop.eup %8529 }
 0xca9   :  { %v4355_v9 = vsub.f32 1.0, %v8530_v58  ;;  %v4357_v57 = vmul.f32 %v8530_v58, %v10976_v15  ;;  %v11171_v15 = vld [vmem:[#allocation23 + $0x68] sm:$0xff]  ;;  %v11303_v58 = vld [vmem:[%s11677_s18] ss:$0 sm:$0xff] }
 0xcaa   :  { %v4353_v35 = vadd.f32 %v4352_v62, %v11858_v12 }
 0xcac   :  { %8531 = vtanh.f32 %v4353_v35 }
 0xcb9   :  { %v8532_v52 = vpop.eup %8531 }
 0xcba   :  { %v4356_v44 = vmul.f32 %v8532_v52, %v4355_v9  ;;  %v11861_v9 = vld [vmem:[#allocation43_spill] sm:$0xff] }
 0xcbb   :  { %v3206_v52 = vadd.f32 %v11303_v58, %v11861_v9 }
 0xcbc   :  { %v11154_v0 = vadd.f32 %v4357_v57, %v4356_v44 }
 0xcbe   :  { %7975 = vmatmul.mubr.f32.vlgmr.msra.gmra.mxu0 %v11154_v0  ;;  %8010 = vmatmul.mubr.f32.vlgmr.msra.gmra.mxu1 %v11154_v0 }
 0xcbf   :  { %8013 = vmatpush3.msra.mxu0 %v11158_v3  ;;  %8044 = vmatprep.mubr.msk.f32.mxu0 %vm8895_vm0, %v11765_v63 }
 0xcc0   :  { %8014 = vmatprep.subr.mxu0 %v11765_v63  ;;  %8048 = vmatpush3.msra.mxu1 %v10984_v21 }
 0xcc1   :  { %8015 = vmatpush3.msra.mxu0 %v11165_v10  ;;  %8049 = vmatprep.subr.mxu1 %v11765_v63 }
 0xcc2   :  { %8016 = vmatprep.subr.mxu0 %v11765_v63  ;;  %8050 = vmatpush3.msra.mxu1 %v10990_v8 }
 0xcc3   :  { %8017 = vmatpush3.msra.mxu0 %v11171_v15  ;;  %8051 = vmatprep.subr.mxu1 %v11765_v63 }
 0xcc4   :  { %8018 = vmatprep.subr.mxu0 %v11765_v63  ;;  %8052 = vmatpush3.msra.mxu1 %v10996_v29 }
 0xcc5   :  { %8019 = vmatpush3.msra.mxu0 %v11177_v24  ;;  %8053 = vmatprep.subr.mxu1 %v11765_v63 }
 0xcc6   :  { %8020 = vmatprep.subr.mxu0 %v11765_v63  ;;  %8054 = vmatpush3.msra.mxu1 %v11002_v51 }
 0xcc7   :  { %8021 = vmatpush3.msra.mxu0 %v11183_v28  ;;  %8055 = vmatprep.subr.mxu1 %v11765_v63 }
 0xcc8   :  { %8022 = vmatprep.subr.mxu0 %v11765_v63  ;;  %8056 = vmatpush3.msra.mxu1 %v11008_v16 }
 0xcc9   :  { %8023 = vmatpush3.msra.mxu0 %v11189_v32  ;;  %8057 = vmatprep.subr.mxu1 %v11765_v63 }
 0xcca   :  { %8024 = vmatprep.subr.mxu0 %v11765_v63  ;;  %8058 = vmatpush3.msra.mxu1 %v11014_v37 }
 0xccb   :  { %8025 = vmatpush3.msra.mxu0 %v11195_v55  ;;  %8059 = vmatprep.subr.mxu1 %v11765_v63 }
 0xccc   :  { %8026 = vmatprep.subr.mxu0 %v11765_v63  ;;  %8060 = vmatpush3.msra.mxu1 %v11020_v36 }
 0xccd   :  { %8027 = vmatpush3.msra.mxu0 %v11201_v61  ;;  %8061 = vmatprep.subr.mxu1 %v11765_v63 }
 0xcce   :  { %8028 = vmatprep.subr.mxu0 %v11765_v63  ;;  %8062 = vmatpush3.msra.mxu1 %v11026_v22 }
 0xccf   :  { %8029 = vmatpush3.msra.mxu0 %v11207_v53  ;;  %8063 = vmatprep.subr.mxu1 %v11765_v63 }
 0xcd0   :  { %8030 = vmatprep.subr.mxu0 %v11765_v63  ;;  %8064 = vmatpush3.msra.mxu1 %v11032_v40 }
 0xcd1   :  { %8031 = vmatpush3.msra.mxu0 %v11213_v60  ;;  %8065 = vmatprep.subr.mxu1 %v11765_v63 }
 0xcd2   :  { %8032 = vmatprep.subr.mxu0 %v11765_v63  ;;  %8066 = vmatpush3.msra.mxu1 %v11038_v30 }
 0xcd3   :  { %8033 = vmatpush3.msra.mxu0 %v11219_v1  ;;  %8067 = vmatprep.subr.mxu1 %v11765_v63 }
 0xcd4   :  { %8034 = vmatprep.subr.mxu0 %v11765_v63  ;;  %8068 = vmatpush3.msra.mxu1 %v11044_v47 }
 0xcd5   :  { %8035 = vmatpush3.msra.mxu0 %v11225_v54  ;;  %8069 = vmatprep.subr.mxu1 %v11765_v63 }
 0xcd6   :  { %8036 = vmatprep.subr.mxu0 %v11765_v63  ;;  %8070 = vmatpush3.msra.mxu1 %v11050_v49 }
 0xcd7   :  { %8037 = vmatpush3.msra.mxu0 %v11231_v43  ;;  %8071 = vmatprep.subr.mxu1 %v11765_v63 }
 0xcd8   :  { %8038 = vmatprep.subr.mxu0 %v11765_v63  ;;  %8072 = vmatpush3.msra.mxu1 %v11056_v5 }
 0xcd9   :  { %8039 = vmatpush3.msra.mxu0 %v11237_v48  ;;  %8073 = vmatprep.subr.mxu1 %v11765_v63 }
 0xcda   :  { %8040 = vmatprep.subr.mxu0 %v11765_v63  ;;  %8074 = vmatpush3.msra.mxu1 %v11062_v7 }
 0xcdb   :  { %8041 = vmatpush3.msra.mxu0 %v11243_v33  ;;  %8075 = vmatprep.subr.mxu1 %v11765_v63 }
 0xcdc   :  { %8042 = vmatprep.subr.mxu0 %v11765_v63  ;;  %8076 = vmatpush3.msra.mxu1 %v11068_v38 }
 0xcdd   :  { %8043 = vmatpush3.msra.mxu0 %v11249_v42  ;;  %8077 = vmatprep.subr.mxu1 %v11765_v63 }
 0xcde   :  { %8045 = vmatmul.mubr.f32.vlgmr.msra.gmra.mxu0 %v11154_v0  ;;  %8082 = vmatprep.subr.mxu0 %v11765_v63 }
 0xcdf   :  { %8083 = vmatpush3.msra.mxu0 %v11075_v14  ;;  %8078 = vmatpush3.msra.mxu1 %v11078_v20 }
 0xce0   :  { %8084 = vmatprep.subr.mxu0 %v11765_v63  ;;  %8079 = vmatprep.mubr.msk.f32.mxu1 %vm8895_vm0, %v11765_v63 }
 0xce1   :  { %8085 = vmatpush3.msra.mxu0 %v11084_v50  ;;  %8114 = vmatprep.mubr.msk.f32.mxu0 %vm8895_vm0, %v11765_v63 }
 0xce2   :  { %8086 = vmatprep.subr.mxu0 %v11765_v63  ;;  %8117 = vmatprep.subr.mxu1 %v11765_v63 }
 0xce3   :  { %8087 = vmatpush3.msra.mxu0 %v11091_v18 }
 0xce4   :  { %8088 = vmatprep.subr.mxu0 %v11765_v63 }
 0xce5   :  { %8089 = vmatpush3.msra.mxu0 %v11095_v56 }
 0xce6   :  { %8090 = vmatprep.subr.mxu0 %v11765_v63 }
 0xce7   :  { %8091 = vmatpush3.msra.mxu0 %v11099_v17 }
 0xce8   :  { %8092 = vmatprep.subr.mxu0 %v11765_v63 }
 0xce9   :  { %8093 = vmatpush3.msra.mxu0 %v11103_v6 }
 0xcea   :  { %8094 = vmatprep.subr.mxu0 %v11765_v63 }
 0xceb   :  { %8095 = vmatpush3.msra.mxu0 %v11107_v45 }
 0xcec   :  { %8096 = vmatprep.subr.mxu0 %v11765_v63 }
 0xced   :  { %8097 = vmatpush3.msra.mxu0 %v11111_v46 }
 0xcee   :  { %8098 = vmatprep.subr.mxu0 %v11765_v63 }
 0xcef   :  { %8099 = vmatpush3.msra.mxu0 %v11115_v13 }
 0xcf0   :  { %8100 = vmatprep.subr.mxu0 %v11765_v63 }
 0xcf1   :  { %8101 = vmatpush3.msra.mxu0 %v11119_v4 }
 0xcf2   :  { %8102 = vmatprep.subr.mxu0 %v11765_v63 }
 0xcf3   :  { %8103 = vmatpush3.msra.mxu0 %v11123_v11 }
 0xcf4   :  { %8104 = vmatprep.subr.mxu0 %v11765_v63 }
 0xcf5   :  { %8105 = vmatpush3.msra.mxu0 %v11127_v19 }
 0xcf6   :  { %8106 = vmatprep.subr.mxu0 %v11765_v63 }
 0xcf7   :  { %8107 = vmatpush3.msra.mxu0 %v11131_v25 }
 0xcf8   :  { %8108 = vmatprep.subr.mxu0 %v11765_v63 }
 0xcf9   :  { %8109 = vmatpush3.msra.mxu0 %v11135_v27 }
 0xcfa   :  { %8110 = vmatprep.subr.mxu0 %v11765_v63 }
 0xcfb   :  { %8111 = vmatpush3.msra.mxu0 %v11139_v23 }
 0xcfc   :  { %8112 = vmatprep.subr.mxu0 %v11765_v63 }
 0xcfd   :  { %8113 = vmatpush3.msra.mxu0 %v11143_v2 }
 0xcfe   :  { %8152 = vmatprep.subr.mxu0 %v11765_v63 }
 0xd7e   :  { %v4425_v31 = vpop.f32.mrf.mxu0  ;;  %v4495_v41 = vpop.f32.mrf.mxu1 }
 0xd7f   :  { %v4500_v59 = vadd.f32 %v4425_v31, %v3070_v39  ;;  %v4508_v44 = vadd.f32 %v4495_v41, %v3206_v52  ;;  %v11862_v41 = vld [vmem:[#allocation55_spill] sm:$0xff] }
 0xd80   :  { %v7976_v62 = vpop.f32.mrf.mxu0  ;;  %v8011_v12 = vpop.f32.mrf.mxu1 }
 0xd81   :  { %v5432_v35 = vmul.f32 -1.442695, %v4500_v59  ;;  %v5433_v57 = vmul.f32 -1.442695, %v4508_v44  ;;  %v11310_v59 = vld [vmem:[%s11679_s20] ss:$0 sm:$0xff] }
 0xd83   :  { %8533 = vpow2.f32 %v5432_v35 }
 0xd84   :  { %8535 = vpow2.f32 %v5433_v57 }
 0xd90   :  { %v8534_v2 = vpop.eup %8533 }
 0xd91   :  { %v4504_v34 = vadd.f32 1.0, %v8534_v2  ;;  %v8536_v26 = vpop.eup %8535 }
 0xd92   :  { %v4512_v39 = vadd.f32 1.0, %v8536_v26 }
 0xd93   :  { %8537 = vrcp.f32 %v4504_v34 }
 0xd94   :  { %8539 = vrcp.f32 %v4512_v39  ;;  %v11865_v39 = vld [vmem:[#allocation44_spill] sm:$0xff] }
 0xd9e   :  { %v4582_v31 = vpop.f32.mrf.mxu0 }
 0xd9f   :  { %v4583_v62 = vadd.f32 %v11310_v59, %v4582_v31  ;;  %v11866_v31 = vld [vmem:[#allocation42_spill] sm:$0xff] }
 0xda0   :  { %v8538_v12 = vpop.eup %8537  ;;  %v8046_v23 = vpop.f32.mrf.mxu0 }
 0xda1   :  { %v4586_v35 = vmul.f32 %v8538_v12, %v4583_v62  ;;  %v8540_v52 = vpop.eup %8539  ;;  %v11863_v23 = vld [vmem:[#allocation51_spill] sm:$0xff]  ;;  %v3075_v62 = vadd.f32 %v11866_v31, %v11865_v39 }
 0xda2   :  { %v4589_v2 = vsub.f32 1.0, %v8540_v52  ;;  %v4591_v26 = vmul.f32 %v8540_v52, %v11154_v0  ;;  %v11864_v0 = vld [vmem:[#allocation40_spill] sm:$0xff] }
 0xda3   :  { %v4587_v9 = vadd.f32 %v4586_v35, %v11862_v41 }
 0xda5   :  { %8541 = vtanh.f32 %v4587_v9 }
 0xdb2   :  { %v8542_v44 = vpop.eup %8541 }
 0xdb3   :  { %v4590_v57 = vmul.f32 %v8542_v44, %v4589_v2  ;;  %v11867_v44 = vld [vmem:[#allocation46_spill] sm:$0xff] }
 0xdb5   :  { %v11315_v34 = vadd.f32 %v4591_v26, %v4590_v57  ;;  %v3211_v57 = vadd.f32 %v11303_v58, %v11867_v44 }
 0xdb7   :  { %8080 = vmatmul.mubr.f32.vlgmr.msra.gmra.mxu1 %v11315_v34  ;;  %8115 = vmatmul.mubr.f32.vlgmr.msra.gmra.mxu0 %v11315_v34 }
 0xdb8   :  { %8118 = vmatpush3.msra.mxu1 %v11158_v3  ;;  %8149 = vmatprep.mubr.msk.f32.mxu1 %vm8895_vm0, %v11765_v63 }
 0xdb9   :  { %8119 = vmatprep.subr.mxu1 %v11765_v63  ;;  %8153 = vmatpush3.msra.mxu0 %v10984_v21 }
 0xdba   :  { %8120 = vmatpush3.msra.mxu1 %v11165_v10  ;;  %8154 = vmatprep.subr.mxu0 %v11765_v63 }
 0xdbb   :  { %8121 = vmatprep.subr.mxu1 %v11765_v63  ;;  %8155 = vmatpush3.msra.mxu0 %v10990_v8 }
 0xdbc   :  { %8122 = vmatpush3.msra.mxu1 %v11171_v15  ;;  %8156 = vmatprep.subr.mxu0 %v11765_v63 }
 0xdbd   :  { %8123 = vmatprep.subr.mxu1 %v11765_v63  ;;  %8157 = vmatpush3.msra.mxu0 %v10996_v29 }
 0xdbe   :  { %8124 = vmatpush3.msra.mxu1 %v11177_v24  ;;  %8158 = vmatprep.subr.mxu0 %v11765_v63 }
 0xdbf   :  { %8125 = vmatprep.subr.mxu1 %v11765_v63  ;;  %8159 = vmatpush3.msra.mxu0 %v11002_v51 }
 0xdc0   :  { %8126 = vmatpush3.msra.mxu1 %v11183_v28  ;;  %8160 = vmatprep.subr.mxu0 %v11765_v63 }
 0xdc1   :  { %8127 = vmatprep.subr.mxu1 %v11765_v63  ;;  %8161 = vmatpush3.msra.mxu0 %v11008_v16 }
 0xdc2   :  { %8128 = vmatpush3.msra.mxu1 %v11189_v32  ;;  %8162 = vmatprep.subr.mxu0 %v11765_v63 }
 0xdc3   :  { %8129 = vmatprep.subr.mxu1 %v11765_v63  ;;  %8163 = vmatpush3.msra.mxu0 %v11014_v37 }
 0xdc4   :  { %8130 = vmatpush3.msra.mxu1 %v11195_v55  ;;  %8164 = vmatprep.subr.mxu0 %v11765_v63 }
 0xdc5   :  { %8131 = vmatprep.subr.mxu1 %v11765_v63  ;;  %8165 = vmatpush3.msra.mxu0 %v11020_v36 }
 0xdc6   :  { %8132 = vmatpush3.msra.mxu1 %v11201_v61  ;;  %8166 = vmatprep.subr.mxu0 %v11765_v63 }
 0xdc7   :  { %8133 = vmatprep.subr.mxu1 %v11765_v63  ;;  %8167 = vmatpush3.msra.mxu0 %v11026_v22 }
 0xdc8   :  { %8134 = vmatpush3.msra.mxu1 %v11207_v53  ;;  %8168 = vmatprep.subr.mxu0 %v11765_v63 }
 0xdc9   :  { %8135 = vmatprep.subr.mxu1 %v11765_v63  ;;  %8169 = vmatpush3.msra.mxu0 %v11032_v40 }
 0xdca   :  { %8136 = vmatpush3.msra.mxu1 %v11213_v60  ;;  %8170 = vmatprep.subr.mxu0 %v11765_v63 }
 0xdcb   :  { %8137 = vmatprep.subr.mxu1 %v11765_v63  ;;  %8171 = vmatpush3.msra.mxu0 %v11038_v30 }
 0xdcc   :  { %8138 = vmatpush3.msra.mxu1 %v11219_v1  ;;  %8172 = vmatprep.subr.mxu0 %v11765_v63 }
 0xdcd   :  { %8139 = vmatprep.subr.mxu1 %v11765_v63  ;;  %8173 = vmatpush3.msra.mxu0 %v11044_v47 }
 0xdce   :  { %8140 = vmatpush3.msra.mxu1 %v11225_v54  ;;  %8174 = vmatprep.subr.mxu0 %v11765_v63 }
 0xdcf   :  { %8141 = vmatprep.subr.mxu1 %v11765_v63  ;;  %8175 = vmatpush3.msra.mxu0 %v11050_v49 }
 0xdd0   :  { %8142 = vmatpush3.msra.mxu1 %v11231_v43  ;;  %8176 = vmatprep.subr.mxu0 %v11765_v63 }
 0xdd1   :  { %8143 = vmatprep.subr.mxu1 %v11765_v63  ;;  %8177 = vmatpush3.msra.mxu0 %v11056_v5 }
 0xdd2   :  { %8144 = vmatpush3.msra.mxu1 %v11237_v48  ;;  %8178 = vmatprep.subr.mxu0 %v11765_v63 }
 0xdd3   :  { %8145 = vmatprep.subr.mxu1 %v11765_v63  ;;  %8179 = vmatpush3.msra.mxu0 %v11062_v7 }
 0xdd4   :  { %8146 = vmatpush3.msra.mxu1 %v11243_v33  ;;  %8180 = vmatprep.subr.mxu0 %v11765_v63 }
 0xdd5   :  { %8147 = vmatprep.subr.mxu1 %v11765_v63  ;;  %8181 = vmatpush3.msra.mxu0 %v11068_v38 }
 0xdd6   :  { %8148 = vmatpush3.msra.mxu1 %v11249_v42  ;;  %8182 = vmatprep.subr.mxu0 %v11765_v63 }
 0xdd7   :  { %8150 = vmatmul.mubr.f32.vlgmr.msra.gmra.mxu1 %v11315_v34  ;;  %8187 = vmatprep.subr.mxu1 %v11765_v63 }
 0xdd8   :  { %8188 = vmatpush3.msra.mxu1 %v11075_v14  ;;  %8183 = vmatpush3.msra.mxu0 %v11078_v20 }
 0xdd9   :  { %8189 = vmatprep.subr.mxu1 %v11765_v63  ;;  %8184 = vmatprep.mubr.msk.f32.mxu0 %vm8895_vm0, %v11765_v63 }
 0xdda   :  { %8190 = vmatpush3.msra.mxu1 %v11084_v50  ;;  %8219 = vmatprep.mubr.msk.f32.mxu1 %vm8895_vm0, %v11765_v63 }
 0xddb   :  { %8191 = vmatprep.subr.mxu1 %v11765_v63  ;;  %8222 = vmatprep.subr.mxu0 %v11765_v63 }
 0xddc   :  { %8192 = vmatpush3.msra.mxu1 %v11091_v18 }
 0xddd   :  { %8193 = vmatprep.subr.mxu1 %v11765_v63 }
 0xdde   :  { %8194 = vmatpush3.msra.mxu1 %v11095_v56 }
 0xddf   :  { %8195 = vmatprep.subr.mxu1 %v11765_v63 }
 0xde0   :  { %8196 = vmatpush3.msra.mxu1 %v11099_v17 }
 0xde1   :  { %8197 = vmatprep.subr.mxu1 %v11765_v63 }
 0xde2   :  { %8198 = vmatpush3.msra.mxu1 %v11103_v6 }
 0xde3   :  { %8199 = vmatprep.subr.mxu1 %v11765_v63 }
 0xde4   :  { %8200 = vmatpush3.msra.mxu1 %v11107_v45 }
 0xde5   :  { %8201 = vmatprep.subr.mxu1 %v11765_v63 }
 0xde6   :  { %8202 = vmatpush3.msra.mxu1 %v11111_v46 }
 0xde7   :  { %8203 = vmatprep.subr.mxu1 %v11765_v63 }
 0xde8   :  { %8204 = vmatpush3.msra.mxu1 %v11115_v13 }
 0xde9   :  { %8205 = vmatprep.subr.mxu1 %v11765_v63 }
 0xdea   :  { %8206 = vmatpush3.msra.mxu1 %v11119_v4 }
 0xdeb   :  { %8207 = vmatprep.subr.mxu1 %v11765_v63 }
 0xdec   :  { %8208 = vmatpush3.msra.mxu1 %v11123_v11 }
 0xded   :  { %8209 = vmatprep.subr.mxu1 %v11765_v63 }
 0xdee   :  { %8210 = vmatpush3.msra.mxu1 %v11127_v19 }
 0xdef   :  { %8211 = vmatprep.subr.mxu1 %v11765_v63 }
 0xdf0   :  { %8212 = vmatpush3.msra.mxu1 %v11131_v25 }
 0xdf1   :  { %8213 = vmatprep.subr.mxu1 %v11765_v63 }
 0xdf2   :  { %8214 = vmatpush3.msra.mxu1 %v11135_v27 }
 0xdf3   :  { %8215 = vmatprep.subr.mxu1 %v11765_v63 }
 0xdf4   :  { %8216 = vmatpush3.msra.mxu1 %v11863_v23 }
 0xdf5   :  { %8217 = vmatprep.subr.mxu1 %v11765_v63 }
 0xdf6   :  { %8218 = vmatpush3.msra.mxu1 %v11864_v0 }
 0xdf7   :  { %8257 = vmatprep.subr.mxu1 %v11765_v63 }
 0xe77   :  { %v4659_v12 = vpop.f32.mrf.mxu1  ;;  %v4729_v35 = vpop.f32.mrf.mxu0 }
 0xe78   :  { %v4734_v41 = vadd.f32 %v4659_v12, %v3075_v62  ;;  %v4742_v26 = vadd.f32 %v4729_v35, %v3211_v57 }
 0xe79   :  { %v8081_v9 = vpop.f32.mrf.mxu1  ;;  %v8116_v52 = vpop.f32.mrf.mxu0 }
 0xe7a   :  { %v5434_v2 = vmul.f32 -1.442695, %v4734_v41  ;;  %v5435_v23 = vmul.f32 -1.442695, %v4742_v26  ;;  %v11868_v41 = vld [vmem:[#allocation49_spill] sm:$0xff] }
 0xe7c   :  { %8543 = vpow2.f32 %v5434_v2 }
 0xe7d   :  { %8545 = vpow2.f32 %v5435_v23 }
 0xe89   :  { %v8544_v27 = vpop.eup %8543 }
 0xe8a   :  { %v4738_v0 = vadd.f32 1.0, %v8544_v27  ;;  %v8546_v25 = vpop.eup %8545 }
 0xe8b   :  { %v4746_v19 = vadd.f32 1.0, %v8546_v25  ;;  %v11878_v25 = vld [vmem:[#allocation59_spill] sm:$0xff] }
 0xe8c   :  { %8547 = vrcp.f32 %v4738_v0 }
 0xe8d   :  { %8549 = vrcp.f32 %v4746_v19 }
 0xe97   :  { %v4816_v11 = vpop.f32.mrf.mxu1 }
 0xe98   :  { %v4817_v39 = vadd.f32 %v11310_v59, %v4816_v11 }
 0xe99   :  { %v8548_v31 = vpop.eup %8547  ;;  %v8151_v62 = vpop.f32.mrf.mxu1 }
 0xe9a   :  { %v4820_v12 = vmul.f32 %v8548_v31, %v4817_v39  ;;  %v8550_v52 = vpop.eup %8549 }
 0xe9b   :  { %v4823_v2 = vsub.f32 1.0, %v8550_v52  ;;  %v4825_v23 = vmul.f32 %v8550_v52, %v11315_v34 }
 0xe9c   :  { %v4821_v9 = vadd.f32 %v4820_v12, %v11868_v41  ;;  %v11879_v12 = vld [vmem:[#allocation45_spill] sm:$0xff] }
 0xe9e   :  { %8551 = vtanh.f32 %v4821_v9 }
 0xeab   :  { %v8552_v35 = vpop.eup %8551 }
 0xeac   :  { %v4824_v44 = vmul.f32 %v8552_v35, %v4823_v2 }
 0xeae   :  { %v11429_v27 = vadd.f32 %v4825_v23, %v4824_v44 }
 0xeb0   :  { %8185 = vmatmul.mubr.f32.vlgmr.msra.gmra.mxu0 %v11429_v27  ;;  %8220 = vmatmul.mubr.f32.vlgmr.msra.gmra.mxu1 %v11429_v27 }
 0xeb1   :  { %8223 = vmatpush3.msra.mxu0 %v11158_v3  ;;  %8254 = vmatprep.mubr.msk.f32.mxu0 %vm8895_vm0, %v11765_v63 }
 0xeb2   :  { %8224 = vmatprep.subr.mxu0 %v11765_v63  ;;  %8258 = vmatpush3.msra.mxu1 %v10984_v21  ;;  %v11869_v21 = vld [vmem:[#allocation52_spill] sm:$0xff] }
 0xeb3   :  { %8225 = vmatpush3.msra.mxu0 %v11165_v10  ;;  %8259 = vmatprep.subr.mxu1 %v11765_v63 }
 0xeb4   :  { %8226 = vmatprep.subr.mxu0 %v11765_v63  ;;  %8260 = vmatpush3.msra.mxu1 %v10990_v8  ;;  %v11870_v8 = vld [vmem:[#allocation33_spill] sm:$0xff] }
 0xeb5   :  { %8227 = vmatpush3.msra.mxu0 %v11171_v15  ;;  %8261 = vmatprep.subr.mxu1 %v11765_v63 }
 0xeb6   :  { %8228 = vmatprep.subr.mxu0 %v11765_v63  ;;  %8262 = vmatpush3.msra.mxu1 %v10996_v29  ;;  %v11871_v29 = vld [vmem:[#allocation56_spill] sm:$0xff] }
 0xeb7   :  { %8229 = vmatpush3.msra.mxu0 %v11177_v24  ;;  %8263 = vmatprep.subr.mxu1 %v11765_v63 }
 0xeb8   :  { %8230 = vmatprep.subr.mxu0 %v11765_v63  ;;  %8264 = vmatpush3.msra.mxu1 %v11002_v51  ;;  %v11872_v51 = vld [vmem:[#allocation38_spill] sm:$0xff] }
 0xeb9   :  { %8231 = vmatpush3.msra.mxu0 %v11183_v28  ;;  %8265 = vmatprep.subr.mxu1 %v11765_v63 }
 0xeba   :  { %8232 = vmatprep.subr.mxu0 %v11765_v63  ;;  %8266 = vmatpush3.msra.mxu1 %v11008_v16  ;;  %v11873_v16 = vld [vmem:[#allocation51_spill] sm:$0xff] }
 0xebb   :  { %8233 = vmatpush3.msra.mxu0 %v11189_v32  ;;  %8267 = vmatprep.subr.mxu1 %v11765_v63 }
 0xebc   :  { %8234 = vmatprep.subr.mxu0 %v11765_v63  ;;  %8268 = vmatpush3.msra.mxu1 %v11014_v37  ;;  %v11874_v37 = vld [vmem:[#allocation40_spill] sm:$0xff] }
 0xebd   :  { %8235 = vmatpush3.msra.mxu0 %v11195_v55  ;;  %8269 = vmatprep.subr.mxu1 %v11765_v63 }
 0xebe   :  { %8236 = vmatprep.subr.mxu0 %v11765_v63  ;;  %8270 = vmatpush3.msra.mxu1 %v11020_v36  ;;  %v11875_v36 = vld [vmem:[#allocation48_spill] sm:$0xff] }
 0xebf   :  { %8237 = vmatpush3.msra.mxu0 %v11201_v61  ;;  %8271 = vmatprep.subr.mxu1 %v11765_v63 }
 0xec0   :  { %8238 = vmatprep.subr.mxu0 %v11765_v63  ;;  %8272 = vmatpush3.msra.mxu1 %v11026_v22  ;;  %v11876_v22 = vld [vmem:[#allocation42_spill] sm:$0xff] }
 0xec1   :  { %8239 = vmatpush3.msra.mxu0 %v11207_v53  ;;  %8273 = vmatprep.subr.mxu1 %v11765_v63  ;;  %v3085_v41 = vadd.f32 %v11876_v22, %v11879_v12 }
 0xec2   :  { %8240 = vmatprep.subr.mxu0 %v11765_v63  ;;  %8274 = vmatpush3.msra.mxu1 %v11032_v40  ;;  %v3080_v40 = vadd.f32 %v11876_v22, %v11875_v36 }
 0xec3   :  { %8241 = vmatpush3.msra.mxu0 %v11213_v60  ;;  %8275 = vmatprep.subr.mxu1 %v11765_v63 }
 0xec4   :  { %8242 = vmatprep.subr.mxu0 %v11765_v63  ;;  %8276 = vmatpush3.msra.mxu1 %v11038_v30 }
 0xec5   :  { %8243 = vmatpush3.msra.mxu0 %v11219_v1  ;;  %8277 = vmatprep.subr.mxu1 %v11765_v63 }
 0xec6   :  { %8244 = vmatprep.subr.mxu0 %v11765_v63  ;;  %8278 = vmatpush3.msra.mxu1 %v11044_v47 }
 0xec7   :  { %8245 = vmatpush3.msra.mxu0 %v11225_v54  ;;  %8279 = vmatprep.subr.mxu1 %v11765_v63 }
 0xec8   :  { %8246 = vmatprep.subr.mxu0 %v11765_v63  ;;  %8280 = vmatpush3.msra.mxu1 %v11050_v49 }
 0xec9   :  { %8247 = vmatpush3.msra.mxu0 %v11231_v43  ;;  %8281 = vmatprep.subr.mxu1 %v11765_v63 }
 0xeca   :  { %8248 = vmatprep.subr.mxu0 %v11765_v63  ;;  %8282 = vmatpush3.msra.mxu1 %v11056_v5 }
 0xecb   :  { %8249 = vmatpush3.msra.mxu0 %v11237_v48  ;;  %8283 = vmatprep.subr.mxu1 %v11765_v63 }
 0xecc   :  { %8250 = vmatprep.subr.mxu0 %v11765_v63  ;;  %8284 = vmatpush3.msra.mxu1 %v11062_v7 }
 0xecd   :  { %8251 = vmatpush3.msra.mxu0 %v11243_v33  ;;  %8285 = vmatprep.subr.mxu1 %v11765_v63 }
 0xece   :  { %8252 = vmatprep.subr.mxu0 %v11765_v63  ;;  %8286 = vmatpush3.msra.mxu1 %v11068_v38 }
 0xecf   :  { %8253 = vmatpush3.msra.mxu0 %v11249_v42  ;;  %8287 = vmatprep.subr.mxu1 %v11765_v63 }
 0xed0   :  { %8255 = vmatmul.mubr.f32.vlgmr.msra.gmra.mxu0 %v11429_v27  ;;  %8292 = vmatprep.subr.mxu0 %v11765_v63 }
 0xed1   :  { %8293 = vmatpush3.msra.mxu0 %v11075_v14  ;;  %8288 = vmatpush3.msra.mxu1 %v11078_v20  ;;  %v11877_v14 = vld [vmem:[#allocation50_spill] sm:$0xff] }
 0xed2   :  { %8294 = vmatprep.subr.mxu0 %v11765_v63  ;;  %8289 = vmatprep.mubr.msk.f32.mxu1 %vm8895_vm0, %v11765_v63  ;;  %v3216_v20 = vadd.f32 %v11303_v58, %v11877_v14 }
 0xed3   :  { %8295 = vmatpush3.msra.mxu0 %v11084_v50  ;;  %8324 = vmatprep.mubr.msk.f32.mxu0 %vm8895_vm0, %v11765_v63 }
 0xed4   :  { %8296 = vmatprep.subr.mxu0 %v11765_v63  ;;  %8327 = vmatprep.subr.mxu1 %v11765_v63 }
 0xed5   :  { %8297 = vmatpush3.msra.mxu0 %v11091_v18 }
 0xed6   :  { %8298 = vmatprep.subr.mxu0 %v11765_v63 }
 0xed7   :  { %8299 = vmatpush3.msra.mxu0 %v11095_v56 }
 0xed8   :  { %8300 = vmatprep.subr.mxu0 %v11765_v63 }
 0xed9   :  { %8301 = vmatpush3.msra.mxu0 %v11099_v17 }
 0xeda   :  { %8302 = vmatprep.subr.mxu0 %v11765_v63 }
 0xedb   :  { %8303 = vmatpush3.msra.mxu0 %v11103_v6 }
 0xedc   :  { %8304 = vmatprep.subr.mxu0 %v11765_v63 }
 0xedd   :  { %8305 = vmatpush3.msra.mxu0 %v11107_v45 }
 0xede   :  { %8306 = vmatprep.subr.mxu0 %v11765_v63 }
 0xedf   :  { %8307 = vmatpush3.msra.mxu0 %v11111_v46 }
 0xee0   :  { %8308 = vmatprep.subr.mxu0 %v11765_v63 }
 0xee1   :  { %8309 = vmatpush3.msra.mxu0 %v11115_v13 }
 0xee2   :  { %8310 = vmatprep.subr.mxu0 %v11765_v63 }
 0xee3   :  { %8311 = vmatpush3.msra.mxu0 %v11119_v4 }
 0xee4   :  { %8312 = vmatprep.subr.mxu0 %v11765_v63 }
 0xee5   :  { %8313 = vmatpush3.msra.mxu0 %v11869_v21 }
 0xee6   :  { %8314 = vmatprep.subr.mxu0 %v11765_v63 }
 0xee7   :  { %8315 = vmatpush3.msra.mxu0 %v11870_v8 }
 0xee8   :  { %8316 = vmatprep.subr.mxu0 %v11765_v63 }
 0xee9   :  { %8317 = vmatpush3.msra.mxu0 %v11871_v29 }
 0xeea   :  { %8318 = vmatprep.subr.mxu0 %v11765_v63 }
 0xeeb   :  { %8319 = vmatpush3.msra.mxu0 %v11872_v51 }
 0xeec   :  { %8320 = vmatprep.subr.mxu0 %v11765_v63 }
 0xeed   :  { %8321 = vmatpush3.msra.mxu0 %v11873_v16 }
 0xeee   :  { %8322 = vmatprep.subr.mxu0 %v11765_v63 }
 0xeef   :  { %8323 = vmatpush3.msra.mxu0 %v11874_v37 }
 0xef0   :  { %8362 = vmatprep.subr.mxu0 %v11765_v63 }
 0xf70   :  { %v4893_v30 = vpop.f32.mrf.mxu0  ;;  %v4963_v47 = vpop.f32.mrf.mxu1 }
 0xf71   :  { %v4968_v49 = vadd.f32 %v4893_v30, %v3080_v40  ;;  %v4976_v50 = vadd.f32 %v4963_v47, %v3216_v20 }
 0xf72   :  { %v8186_v5 = vpop.f32.mrf.mxu0  ;;  %v8221_v7 = vpop.f32.mrf.mxu1 }
 0xf73   :  { %v5436_v38 = vmul.f32 -1.442695, %v4968_v49  ;;  %v5437_v18 = vmul.f32 -1.442695, %v4976_v50  ;;  %v11881_v49 = vld [vmem:[#allocation58_spill] sm:$0xff] }
 0xf75   :  { %8553 = vpow2.f32 %v5436_v38 }
 0xf76   :  { %8555 = vpow2.f32 %v5437_v18  ;;  %v5440_v18 = vld [vmem:[%s11681_s22] ss:$0 sm:$0xff] }
 0xf82   :  { %v8554_v56 = vpop.eup %8553 }
 0xf83   :  { %v4972_v17 = vadd.f32 1.0, %v8554_v56  ;;  %v8556_v6 = vpop.eup %8555 }
 0xf84   :  { %v4980_v45 = vadd.f32 1.0, %v8556_v6 }
 0xf85   :  { %8557 = vrcp.f32 %v4972_v17 }
 0xf86   :  { %8559 = vrcp.f32 %v4980_v45 }
 0xf90   :  { %v5050_v46 = vpop.f32.mrf.mxu0 }
 0xf91   :  { %v5051_v13 = vadd.f32 %v11310_v59, %v5050_v46 }
 0xf92   :  { %v8558_v4 = vpop.eup %8557  ;;  %v8256_v11 = vpop.f32.mrf.mxu0 }
 0xf93   :  { %v5054_v19 = vmul.f32 %v8558_v4, %v5051_v13  ;;  %v8560_v0 = vpop.eup %8559 }
 0xf94   :  { %v5057_v31 = vsub.f32 1.0, %v8560_v0  ;;  %v5059_v39 = vmul.f32 %v8560_v0, %v11429_v27  ;;  %v11880_v27 = vld [vmem:[#allocation53_spill] sm:$0xff] }
 0xf95   :  { %v5055_v34 = vadd.f32 %v5054_v19, %v11878_v25  ;;  %v3221_v21 = vadd.f32 %v11303_v58, %v11880_v27 }
 0xf97   :  { %8561 = vtanh.f32 %v5055_v34 }
 0xfa4   :  { %v8562_v57 = vpop.eup %8561 }
 0xfa5   :  { %v5058_v26 = vmul.f32 %v8562_v57, %v5057_v31 }
 0xfa7   :  { %v11543_v62 = vadd.f32 %v5059_v39, %v5058_v26 }
 0xfa9   :  { %8290 = vmatmul.mubr.f32.vlgmr.msra.gmra.mxu1 %v11543_v62  ;;  %8325 = vmatmul.mubr.f32.vlgmr.msra.gmra.mxu0 %v11543_v62 }
 0xfaa   :  { %8328 = vmatpush3.msra.mxu1 %v11158_v3  ;;  %8359 = vmatprep.mubr.msk.f32.mxu1 %vm8895_vm0, %v11765_v63  ;;  %v5310_v3 = vld [vmem:[%s11680_s21 + $0x78] sm:$0xff] }
 0xfab   :  { %8329 = vmatprep.subr.mxu1 %v11765_v63  ;;  %8394 = vmatprep.mubr.msk.f32.mxu0 %vm8895_vm0, %v11765_v63 }
 0xfac   :  { %8330 = vmatpush3.msra.mxu1 %v11165_v10  ;;  %v5309_v10 = vld [vmem:[%s11680_s21 + $0x70] sm:$0xff]  ;;  %8363 = vmatpush3.msra.mxu0 %v5310_v3 }
 0xfad   :  { %8331 = vmatprep.subr.mxu1 %v11765_v63  ;;  %8364 = vmatprep.subr.mxu0 %v11765_v63 }
 0xfae   :  { %8332 = vmatpush3.msra.mxu1 %v11171_v15  ;;  %v5308_v15 = vld [vmem:[%s11680_s21 + $0x68] sm:$0xff]  ;;  %8365 = vmatpush3.msra.mxu0 %v5309_v10 }
 0xfaf   :  { %8333 = vmatprep.subr.mxu1 %v11765_v63  ;;  %8366 = vmatprep.subr.mxu0 %v11765_v63 }
 0xfb0   :  { %8334 = vmatpush3.msra.mxu1 %v11177_v24  ;;  %8367 = vmatpush3.msra.mxu0 %v5308_v15  ;;  %v5307_v24 = vld [vmem:[%s11680_s21 + $0x60] sm:$0xff] }
 0xfb1   :  { %8335 = vmatprep.subr.mxu1 %v11765_v63  ;;  %8368 = vmatprep.subr.mxu0 %v11765_v63 }
 0xfb2   :  { %8336 = vmatpush3.msra.mxu1 %v11183_v28  ;;  %8369 = vmatpush3.msra.mxu0 %v5307_v24  ;;  %v5306_v28 = vld [vmem:[%s11680_s21 + $0x58] sm:$0xff] }
 0xfb3   :  { %8337 = vmatprep.subr.mxu1 %v11765_v63  ;;  %8370 = vmatprep.subr.mxu0 %v11765_v63 }
 0xfb4   :  { %8338 = vmatpush3.msra.mxu1 %v11189_v32  ;;  %8371 = vmatpush3.msra.mxu0 %v5306_v28  ;;  %v5305_v32 = vld [vmem:[%s11680_s21 + $0x50] sm:$0xff] }
 0xfb5   :  { %8339 = vmatprep.subr.mxu1 %v11765_v63  ;;  %8372 = vmatprep.subr.mxu0 %v11765_v63 }
 0xfb6   :  { %8340 = vmatpush3.msra.mxu1 %v11195_v55  ;;  %8373 = vmatpush3.msra.mxu0 %v5305_v32  ;;  %v5304_v55 = vld [vmem:[%s11680_s21 + $0x48] sm:$0xff] }
 0xfb7   :  { %8341 = vmatprep.subr.mxu1 %v11765_v63  ;;  %8374 = vmatprep.subr.mxu0 %v11765_v63 }
 0xfb8   :  { %8342 = vmatpush3.msra.mxu1 %v11201_v61  ;;  %8375 = vmatpush3.msra.mxu0 %v5304_v55  ;;  %v5303_v61 = vld [vmem:[%s11680_s21 + $0x40] sm:$0xff] }
 0xfb9   :  { %8343 = vmatprep.subr.mxu1 %v11765_v63  ;;  %8376 = vmatprep.subr.mxu0 %v11765_v63 }
 0xfba   :  { %8344 = vmatpush3.msra.mxu1 %v11207_v53  ;;  %v5302_v53 = vld [vmem:[%s11680_s21 + $0x38] sm:$0xff]  ;;  %8377 = vmatpush3.msra.mxu0 %v5303_v61 }
 0xfbb   :  { %8345 = vmatprep.subr.mxu1 %v11765_v63  ;;  %8378 = vmatprep.subr.mxu0 %v11765_v63 }
 0xfbc   :  { %8346 = vmatpush3.msra.mxu1 %v11213_v60  ;;  %v5301_v60 = vld [vmem:[%s11680_s21 + $0x30] sm:$0xff]  ;;  %8379 = vmatpush3.msra.mxu0 %v5302_v53 }
 0xfbd   :  { %8347 = vmatprep.subr.mxu1 %v11765_v63  ;;  %8380 = vmatprep.subr.mxu0 %v11765_v63 }
 0xfbe   :  { %8348 = vmatpush3.msra.mxu1 %v11219_v1  ;;  %v5300_v1 = vld [vmem:[%s11680_s21 + $0x28] sm:$0xff]  ;;  %8381 = vmatpush3.msra.mxu0 %v5301_v60 }
 0xfbf   :  { %8349 = vmatprep.subr.mxu1 %v11765_v63  ;;  %8382 = vmatprep.subr.mxu0 %v11765_v63 }
 0xfc0   :  { %8350 = vmatpush3.msra.mxu1 %v11225_v54  ;;  %v5299_v54 = vld [vmem:[%s11680_s21 + $0x20] sm:$0xff]  ;;  %8383 = vmatpush3.msra.mxu0 %v5300_v1 }
 0xfc1   :  { %8351 = vmatprep.subr.mxu1 %v11765_v63  ;;  %8384 = vmatprep.subr.mxu0 %v11765_v63 }
 0xfc2   :  { %8352 = vmatpush3.msra.mxu1 %v11231_v43  ;;  %v5298_v43 = vld [vmem:[%s11680_s21 + $0x18] sm:$0xff]  ;;  %8385 = vmatpush3.msra.mxu0 %v5299_v54 }
 0xfc3   :  { %8353 = vmatprep.subr.mxu1 %v11765_v63  ;;  %8386 = vmatprep.subr.mxu0 %v11765_v63 }
 0xfc4   :  { %8354 = vmatpush3.msra.mxu1 %v11237_v48  ;;  %v5297_v48 = vld [vmem:[%s11680_s21 + $0x10] sm:$0xff]  ;;  %8387 = vmatpush3.msra.mxu0 %v5298_v43 }
 0xfc5   :  { %8355 = vmatprep.subr.mxu1 %v11765_v63  ;;  %8388 = vmatprep.subr.mxu0 %v11765_v63 }
 0xfc6   :  { %8356 = vmatpush3.msra.mxu1 %v11243_v33  ;;  %v5296_v33 = vld [vmem:[%s11680_s21 + $0x8] sm:$0xff]  ;;  %8389 = vmatpush3.msra.mxu0 %v5297_v48 }
 0xfc7   :  { %8357 = vmatprep.subr.mxu1 %v11765_v63  ;;  %8390 = vmatprep.subr.mxu0 %v11765_v63 }
 0xfc8   :  { %8358 = vmatpush3.msra.mxu1 %v11249_v42  ;;  %v5295_v42 = vld [vmem:[%s11680_s21] sm:$0xff]  ;;  %8391 = vmatpush3.msra.mxu0 %v5296_v33 }
 0xfc9   :  { %8360 = vmatmul.mubr.f32.vlgmr.msra.gmra.mxu1 %v11543_v62  ;;  %8392 = vmatprep.subr.mxu0 %v11765_v63 }
 0xfca   :  { %8393 = vmatpush3.msra.mxu0 %v5295_v42 }
0x1069   :  { %v5127_v9 = vpop.f32.mrf.mxu1  ;;  %v5197_v52 = vpop.f32.mrf.mxu0 }
0x106a   :  { %v5202_v2 = vadd.f32 %v5127_v9, %v3085_v41  ;;  %v5210_v8 = vadd.f32 %v5197_v52, %v3221_v21 }
0x106b   :  { %v8291_v35 = vpop.f32.mrf.mxu1  ;;  %v8326_v44 = vpop.f32.mrf.mxu0 }
0x106c   :  { %v5438_v23 = vmul.f32 -1.442695, %v5202_v2  ;;  %v5439_v29 = vmul.f32 -1.442695, %v5210_v8 }
0x106e   :  { %8563 = vpow2.f32 %v5438_v23 }
0x106f   :  { %8565 = vpow2.f32 %v5439_v29 }
0x107b   :  { %v8564_v51 = vpop.eup %8563 }
0x107c   :  { %v5206_v16 = vadd.f32 1.0, %v8564_v51  ;;  %v8566_v63 = vpop.eup %8565 }
0x107d   :  { %v5214_v37 = vadd.f32 1.0, %v8566_v63 }
0x107e   :  { %8567 = vrcp.f32 %v5206_v16 }
0x107f   :  { %8569 = vrcp.f32 %v5214_v37 }
0x1089   :  { %v5284_v36 = vpop.f32.mrf.mxu1 }
0x108a   :  { %v5285_v22 = vadd.f32 %v11310_v59, %v5284_v36 }
0x108b   :  { %v8568_v40 = vpop.eup %8567  ;;  %v8361_v30 = vpop.f32.mrf.mxu1 }
0x108c   :  { %v5288_v47 = vmul.f32 %v8568_v40, %v5285_v22  ;;  %v8570_v58 = vpop.eup %8569 }
0x108d   :  { %v5291_v7 = vsub.f32 1.0, %v8570_v58  ;;  %v5293_v20 = vmul.f32 %v8570_v58, %v11543_v62 }
0x108e   :  { %v5289_v5 = vadd.f32 %v5288_v47, %v11881_v49 }
0x1090   :  { %8571 = vtanh.f32 %v5289_v5 }
0x109d   :  { %v8572_v38 = vpop.eup %8571 }
0x109e   :  { %v5292_v14 = vmul.f32 %v8572_v38, %v5291_v7 }
0x10a0   :  { %v5294_v50 = vadd.f32 %v5293_v20, %v5292_v14 }
0x10a2   :  { %8395 = vmatmul.mubr.f32.vlgmr.msra.gmra.mxu0 %v5294_v50 }
0x1162   :  { %v5384_v59 = vpop.f32.mrf.mxu0 }
0x1163   :  { %v5385_v56 = vadd.f32 %v5440_v18, %v5384_v59 }
0x1164   :  { %v8396_v17 = vpop.f32.mrf.mxu0 }
0x1165   :  { %5388 = vst [vmem:[%s11682_s23] sm:$0xff] %v5385_v56 }
0x1166   :  { %5393 = vsyncpa [#allocation7], 1 }
0x1167   :  { %5394 = vsyncpa [#allocation9], 1 }
0x1168   :  { %5395 = vsyncpa [#allocation12], 1 }
0x1169   :  { %5396 = vsyncpa [#allocation15], 1 }
0x116a   :  { %5397 = vsyncpa [#allocation18], 1 }
0x116b   :  { %5398 = vsyncpa [#allocation21], 1 }
0x116c   :  { %5399 = vsyncpa [#allocation24], 1 }

</bundles_post_ra>
